<compile_context>
chip_gen: v7x
topology: tpu7x:2x2x1
jax: 0.10.0
libtpu: 0.0.40
codegen_flags: <defaults>
</compile_context>

<pallas_src>
import functools

import numpy as np
import jax
import jax.numpy as jnp
from jax.experimental import pallas as pl
from jax.experimental.pallas import tpu as pltpu

_BF16 = jnp.bfloat16
_F32 = jnp.float32
_LN_EPS = 1e-5                      # torch.nn.LayerNorm default
_MASK_BIAS = np.float32(-1e30)      # additive bias for masked key positions
_MAX_Q_TILE = 256                   # query rows per grid step
_MAX_KV_TILE = 256                  # K/V rows per online-softmax step


# --------------------------- feature / hardware probes -------------------------

@functools.lru_cache(maxsize=None)
def _vmem_limit_bytes():
    """Per-generation VMEM budget: generous on v5e/v6e (128 MiB physical),
    conservative on v7x-class parts (64 MiB per TensorCore)."""
    try:
        cap = pltpu.get_tpu_info().vmem_capacity_bytes
    except Exception:                                   # pragma: no cover
        cap = 64 * 1024 * 1024
    if cap <= 64 * 1024 * 1024:
        return 32 * 1024 * 1024
    return 100 * 1024 * 1024


@functools.lru_cache(maxsize=None)
def _weights_can_single_buffer():
    """Probe (once, eagerly) whether pl.Buffered(1) is accepted so the
    constant weight operands can be single-buffered; fall back to the default
    double-buffered specs on older Pallas/Mosaic versions."""
    def _copy(x_ref, o_ref):
        o_ref[...] = x_ref[...]
    try:
        with jax.ensure_compile_time_eval():
            x = jnp.arange(8 * 128, dtype=_F32).reshape(8, 128)
            y = pl.pallas_call(
                _copy,
                grid=(1,),
                out_shape=jax.ShapeDtypeStruct((8, 128), _F32),
                in_specs=[pl.BlockSpec((8, 128), lambda i: (0, 0),
                                       pipeline_mode=pl.Buffered(buffer_count=1))],
                out_specs=pl.BlockSpec((8, 128), lambda i: (0, 0)),
            )(x)
            jax.block_until_ready(y)
            return bool(jnp.array_equal(y, x))
    except Exception:                                   # pragma: no cover
        return False


# ----------------------------- in-kernel helpers ------------------------------

def _layernorm(x, g, b):
    mu = jnp.mean(x, axis=-1, keepdims=True)
    var = jnp.mean(jnp.square(x - mu), axis=-1, keepdims=True)
    return (x - mu) * jax.lax.rsqrt(var + _LN_EPS) * g + b


def _split_heads(x2d, n_heads, d):
    """(S, n_heads*d) -> (n_heads, S, d).

    Implemented as static lane slices + a leading-axis stack, which lowers
    robustly in Mosaic (no minor-dim reshape of the activations)."""
    return jnp.stack([x2d[:, i * d:(i + 1) * d] for i in range(n_heads)],
                     axis=0)


def _flash_mha(x_q, x_kv, wq, bq, wk, bk, wv, bv, *,
               n_heads, d_k, d_v, kv_tile, bias=None):
    """Multi-head attention core with WIDE fused QKV projections and a
    flash-style (K/V-tiled, online-softmax) score loop.

    x_q:  (Sq, D)    queries (any float dtype)
    x_kv: (Sk, D)    keys/values source
    wq/wk: (D, n_heads*d_k) bf16, wv: (D, n_heads*d_v) bf16   (1/sqrt(d_k) is
    already folded into wq/bq); bq/bk/bv: (1, n_heads*d) f32
    bias: (1, Sk) additive f32 mask bias (0 or -1e30) or None
    Returns the per-head context (n_heads, Sq, d_v) f32 (softmax normalized).
    NOTE: fully-masked rows give a uniform distribution (not NaN like torch).
    """
    sk = x_kv.shape[0]
    # Wide 2-D projections: N = n_heads*d saturates the MXU lanes.
    q = jnp.dot(x_q.astype(_BF16), wq, preferred_element_type=_F32) + bq
    k = jnp.dot(x_kv.astype(_BF16), wk, preferred_element_type=_F32) + bk
    v = jnp.dot(x_kv.astype(_BF16), wv, preferred_element_type=_F32) + bv
    qh = _split_heads(q, n_heads, d_k).astype(_BF16)      # (H, Sq, d_k)
    kh = _split_heads(k, n_heads, d_k).astype(_BF16)      # (H, Sk, d_k)
    vh = _split_heads(v, n_heads, d_v).astype(_BF16)      # (H, Sk, d_v)

    sq = qh.shape[1]
    m_i = jnp.full((n_heads, sq, 1), -jnp.inf, _F32)
    l_i = jnp.zeros((n_heads, sq, 1), _F32)
    acc = jnp.zeros((n_heads, sq, d_v), _F32)
    n_kv = sk // kv_tile
    # TODO(synk): switch this static unroll to lax.fori_loop + VMEM scratch
    # once n_kv gets large (long sequences).
    for t in range(n_kv):
        ks = kh[:, t * kv_tile:(t + 1) * kv_tile, :]
        vs = vh[:, t * kv_tile:(t + 1) * kv_tile, :]
        s = jnp.einsum("hqd,hkd->hqk", qh, ks, preferred_element_type=_F32)
        if bias is not None:
            s = s + bias[:, t * kv_tile:(t + 1) * kv_tile][None]
        m_new = jnp.maximum(m_i, jnp.max(s, axis=-1, keepdims=True))
        alpha = jnp.exp(m_i - m_new)
        p = jnp.exp(s - m_new)
        l_i = alpha * l_i + jnp.sum(p, axis=-1, keepdims=True)
        acc = alpha * acc + jnp.einsum("hqk,hkd->hqd", p.astype(_BF16), vs,
                                       preferred_element_type=_F32)
        m_i = m_new
    return acc * pl.reciprocal(l_i, approx=True)


# --------------------------------- kernels ------------------------------------

def _mask_bias_kernel(x_ref, o_ref, *, padding_idx):
    # additive mask bias: -1e30 where sum(input, -1) == padding_idx, else 0
    row_sum = jnp.sum(x_ref[...], axis=-1)                # (B, S)
    o_ref[...] = jnp.where(row_sum == jnp.float32(padding_idx),
                           _MASK_BIAS, jnp.float32(0.0))


def _encoder_layer_kernel(x_ref, bias_ref,
                          wq_ref, bq_ref, wk_ref, bk_ref, wv_ref, bv_ref,
                          wo_ref, bo_ref, mg_ref, mb_ref, lg_ref, lb_ref,
                          w1_ref, b1_ref, w2_ref, b2_ref, fg_ref, fb_ref,
                          o_ref, *, n_branch, h, d_k, d_v, q_tile, kv_tile):
    x_kv = x_ref[0]                                        # (S, D) bf16
    q0 = pl.multiple_of(pl.program_id(1) * q_tile, q_tile)
    x_q = x_ref[0, pl.ds(q0, q_tile), :]                   # (tq, D) bf16
    x_q_f32 = x_q.astype(_F32)
    bias = bias_ref[0]                                     # (1, S) additive f32

    # all M branches * h heads in one wide-QKV flash attention
    ctx = _flash_mha(x_q, x_kv,
                     wq_ref[...], bq_ref[...], wk_ref[...], bk_ref[...],
                     wv_ref[...], bv_ref[...],
                     n_heads=n_branch * h, d_k=d_k, d_v=d_v,
                     kv_tile=kv_tile, bias=bias)           # (M*h, tq, d_v)

    # (M*h, tq, d_v) -> (M, tq, h*d_v): merge heads per branch (lane concat)
    merged = jnp.stack(
        [jnp.concatenate([ctx[m * h + j] for j in range(h)], axis=-1)
         for m in range(n_branch)], axis=0)                # (M, tq, h*d_v)

    # per-branch output projection: one deep (tq, h*d_v) @ (h*d_v, D) matmul
    proj = jnp.einsum("mtv,mvd->mtd", merged.astype(_BF16), wo_ref[...],
                      preferred_element_type=_F32) + bo_ref[...]   # (M, tq, D)

    # all M branch LayerNorms batched, then the branch mean (eval: rho = 0)
    branches = _layernorm(x_q_f32[None] + proj, mg_ref[...], mb_ref[...])
    att = jnp.sum(branches, axis=0) * (1.0 / n_branch)
    att = _layernorm(x_q_f32 + att, lg_ref[...], lb_ref[...])

    # position-wise feed-forward + residual LayerNorm
    h1 = jnp.dot(att.astype(_BF16), w1_ref[...],
                 preferred_element_type=_F32) + b1_ref[...]
    h1 = jnp.maximum(h1, 0.0)
    h2 = jnp.dot(h1.astype(_BF16), w2_ref[...],
                 preferred_element_type=_F32) + b2_ref[...]
    o_ref[0] = _layernorm(att + h2, fg_ref[...], fb_ref[...]).astype(o_ref.dtype)


def _final_kernel(o1_ref, o2_ref, o3_ref,
                  wq_ref, bq_ref, wk_ref, bk_ref, wv_ref, bv_ref,
                  wo_ref, bo_ref,
                  w1a_ref, w1b_ref, w1c_ref, b1_ref, w2_ref, b2_ref,
                  o_ref, *, h, d_k, d_v, kv_tile):
    # Fused: cross-att(out2, out1) -> cross-att(out3, out2') -> 3-way MLP.
    o1 = o1_ref[0].astype(_F32)
    o2 = o2_ref[0].astype(_F32)
    o3 = o3_ref[0].astype(_F32)

    def _cross(q_in, kv_in):
        # out = 0.2 * ScaledDotProductAttention(q, kv, kv) + q  (no mask/LN)
        ctx = _flash_mha(q_in, kv_in, wq_ref[...], bq_ref[...], wk_ref[...],
                         bk_ref[...], wv_ref[...], bv_ref[...],
                         n_heads=h, d_k=d_k, d_v=d_v, kv_tile=kv_tile)
        merged = jnp.concatenate([ctx[j] for j in range(h)], axis=-1)
        att = jnp.dot(merged.astype(_BF16), wo_ref[...],
                      preferred_element_type=_F32) + bo_ref[...]
        return q_in + 0.2 * att

    o2u = _cross(o2, o1)
    r3 = _cross(o3, o2u)

    # mlp1(cat(out1, out2, out3)) on the ORIGINAL layer outputs, split into
    # three matmuls (no concat); residual uses the UPDATED out3 (r3).
    m1 = (jnp.dot(o1.astype(_BF16), w1a_ref[...], preferred_element_type=_F32)
          + jnp.dot(o2.astype(_BF16), w1b_ref[...], preferred_element_type=_F32)
          + jnp.dot(o3.astype(_BF16), w1c_ref[...], preferred_element_type=_F32)
          + b1_ref[...])
    m1 = jnp.where(m1 >= 0.0, m1, 0.01 * m1)               # nn.LeakyReLU default
    m2 = jnp.dot(m1.astype(_BF16), w2_ref[...],
                 preferred_element_type=_F32) + b2_ref[...]
    m2 = jnp.where(m2 >= 0.0, m2, 0.01 * m2)
    o_ref[0] = (r3 + 0.2 * m2).astype(o_ref.dtype)


# ------------------------------ pallas_call wrappers ---------------------------

_LAYER_WKEYS = ("wq", "bq", "wk", "bk", "wv", "bv", "wo", "bo",
                "mha_ln_g", "mha_ln_b", "ln_g", "ln_b",
                "w1", "b1", "w2", "b2", "ff_ln_g", "ff_ln_b")
_ATT_WKEYS = ("wq", "bq", "wk", "bk", "wv", "bv", "wo", "bo")
_MLP_WKEYS = ("w1a", "w1b", "w1c", "b1", "w2", "b2")


def _seq_tile(s, max_tile):
    if s <= max_tile:
        return s
    # TODO(synk): pad / mask the tail tile for ragged sequence lengths.
    assert s % max_tile == 0, "sequence length must divide the tile size"
    return max_tile


def _cparams(dim_sem):
    return pltpu.CompilerParams(dimension_semantics=dim_sem,
                                vmem_limit_bytes=_vmem_limit_bytes())


def _weight_spec(arr, grid_ndim):
    """Whole-array VMEM block, constant across the grid (weights).  Weights
    are single-buffered when the installed Pallas supports pl.Buffered."""
    nd = arr.ndim
    imap = {1: lambda b: (0,) * nd,
            2: lambda b, q: (0,) * nd}[grid_ndim]
    if _weights_can_single_buffer():
        return pl.BlockSpec(arr.shape, imap,
                            pipeline_mode=pl.Buffered(buffer_count=1))
    return pl.BlockSpec(arr.shape, imap)


def _encoder_layer(lp, x, mask_bias3, *, n_branch, h, d_k, d_v):
    B, S, D = x.shape
    tq = _seq_tile(S, _MAX_Q_TILE)
    tkv = _seq_tile(S, _MAX_KV_TILE)
    weights = [lp[k] for k in _LAYER_WKEYS]
    kernel = functools.partial(_encoder_layer_kernel, n_branch=n_branch, h=h,
                               d_k=d_k, d_v=d_v, q_tile=tq, kv_tile=tkv)
    return pl.pallas_call(
        kernel,
        grid=(B, S // tq),
        out_shape=jax.ShapeDtypeStruct((B, S, D), _BF16),
        in_specs=[pl.BlockSpec((1, S, D), lambda b, q: (b, 0, 0)),   # full seq
                  pl.BlockSpec((1, 1, S), lambda b, q: (b, 0, 0))]   # mask bias
                 + [_weight_spec(w, 2) for w in weights],
        out_specs=pl.BlockSpec((1, tq, D), lambda b, q: (b, q, 0)),
        compiler_params=_cparams(("parallel", "parallel")),
    )(x, mask_bias3, *weights)


def _final_block(att_p, mlp_p, o1, o2, o3, *, h, d_k, d_v):
    B, S, D = o1.shape
    tkv = _seq_tile(S, _MAX_KV_TILE)
    weights = [att_p[k] for k in _ATT_WKEYS] + [mlp_p[k] for k in _MLP_WKEYS]
    kernel = functools.partial(_final_kernel, h=h, d_k=d_k, d_v=d_v,
                               kv_tile=tkv)
    act_spec = pl.BlockSpec((1, S, D), lambda b: (b, 0, 0))
    return pl.pallas_call(
        kernel,
        grid=(B,),
        out_shape=jax.ShapeDtypeStruct((B, S, D), _F32),
        in_specs=[act_spec, act_spec, act_spec]
                 + [_weight_spec(w, 1) for w in weights],
        out_specs=pl.BlockSpec((1, S, D), lambda b: (b, 0, 0)),
        compiler_params=_cparams(("parallel",)),
    )(o1, o2, o3, *weights)


def multilevel_encoder_forward(params, x, *, padding_idx, n_branch, h, d_k, d_v):
    B, S, D = x.shape
    # additive padding-mask bias from the ORIGINAL f32 input (one tiny launch)
    mask_bias = pl.pallas_call(
        functools.partial(_mask_bias_kernel, padding_idx=padding_idx),
        out_shape=jax.ShapeDtypeStruct((B, S), _F32),
        in_specs=[pl.BlockSpec(memory_space=pltpu.MemorySpace.VMEM)],
        out_specs=pl.BlockSpec(memory_space=pltpu.MemorySpace.VMEM),
    )(x)
    attention_mask = (mask_bias < -1.0).reshape(B, 1, 1, S)
    mask_bias3 = mask_bias.reshape(B, 1, S)

    # inter-layer activations live in bf16 in HBM (halves activation traffic);
    # f32 math (LN / softmax / residual) happens inside the kernels.
    # NOTE: with d_model >= 128 (realistic configs) the layer outputs are
    # already lane-dense; no extra output-layout plumbing is needed there.
    out = x.astype(_BF16)
    outs = []
    for lp in params["layers"]:
        out = _encoder_layer(lp, out, mask_bias3,
                             n_branch=n_branch, h=h, d_k=d_k, d_v=d_v)
        outs.append(out)

    out1, out2, out3 = outs
    final = _final_block(params["self_att"], params["mlp"], out1, out2, out3,
                         h=h, d_k=d_k, d_v=d_v)
    return final, attention_mask


# --------------------------- raw parameter init (torch-like) -------------------

def _init_linear(key, d_in, d_out):
    kw, kb = jax.random.split(key)
    bound = 1.0 / np.sqrt(d_in)
    w = jax.random.uniform(kw, (d_in, d_out), _F32, -bound, bound)
    b = jax.random.uniform(kb, (1, d_out), _F32, -bound, bound)
    return w, b


def _init_sdpa(key, d_model, d_k, d_v, h):
    ks = jax.random.split(key, 4)
    wq, bq = _init_linear(ks[0], d_model, h * d_k)
    wk, bk = _init_linear(ks[1], d_model, h * d_k)
    wv, bv = _init_linear(ks[2], d_model, h * d_v)
    wo, bo = _init_linear(ks[3], h * d_v, d_model)
    return dict(wq=wq, bq=bq, wk=wk, bk=bk, wv=wv, bv=bv, wo=wo, bo=bo)


def _init_mha(key, d_model, d_k, d_v, h):
    return dict(att=_init_sdpa(key, d_model, d_k, d_v, h),
                ln_g=jnp.ones((1, d_model), _F32),
                ln_b=jnp.zeros((1, d_model), _F32))


def _init_pwff(key, d_model, d_ff):
    k1, k2 = jax.random.split(key)
    w1, b1 = _init_linear(k1, d_model, d_ff)
    w2, b2 = _init_linear(k2, d_ff, d_model)
    return dict(w1=w1, b1=b1, w2=w2, b2=b2,
                ln_g=jnp.ones((1, d_model), _F32),
                ln_b=jnp.zeros((1, d_model), _F32))


def _init_layer(key, d_model, d_k, d_v, h, d_ff, M):
    ks = jax.random.split(key, M + 1)
    return dict(
        mhatts=[_init_mha(ks[i], d_model, d_k, d_v, h) for i in range(M)],
        ln_g=jnp.ones((1, d_model), _F32),
        ln_b=jnp.zeros((1, d_model), _F32),
        pwff=_init_pwff(ks[M], d_model, d_ff),
    )


def init_multilevel_encoder_raw(key, N, d_model, d_k, d_v, h, d_ff, M):
    ks = jax.random.split(key, N + 3)
    layers = [_init_layer(ks[i], d_model, d_k, d_v, h, d_ff, M) for i in range(N)]
    self_att = _init_sdpa(ks[N], d_model, d_k, d_v, h)
    mlp1_w, mlp1_b = _init_linear(ks[N + 1], d_model * 3, d_model * 3)
    mlp2_w, mlp2_b = _init_linear(ks[N + 2], d_model * 3, d_model)
    return dict(layers=layers, self_att=self_att,
                mlp1_w=mlp1_w, mlp1_b=mlp1_b,
                mlp2_w=mlp2_w, mlp2_b=mlp2_b)


# ----------------- one-time parameter fusion / packing for the kernels ---------

def _fuse_sdpa(p, d_k):
    """Lane-dense wide packing: wq/wk/wv stay (D, h*d) bf16, wo (h*d_v, D)
    bf16; the 1/sqrt(d_k) scale is folded into the Q projection."""
    scale = 1.0 / np.sqrt(d_k)
    return dict(wq=(p["wq"] * scale).astype(_BF16), bq=p["bq"] * scale,
                wk=p["wk"].astype(_BF16), bk=p["bk"],
                wv=p["wv"].astype(_BF16), bv=p["bv"],
                wo=p["wo"].astype(_BF16), bo=p["bo"])


def _fuse_layer(lp, d_k):
    atts = [_fuse_sdpa(mp["att"], d_k) for mp in lp["mhatts"]]
    pw = lp["pwff"]
    return dict(
        wq=jnp.concatenate([a["wq"] for a in atts], axis=1),   # (D, M*h*d_k)
        bq=jnp.concatenate([a["bq"] for a in atts], axis=1),   # (1, M*h*d_k)
        wk=jnp.concatenate([a["wk"] for a in atts], axis=1),
        bk=jnp.concatenate([a["bk"] for a in atts], axis=1),
        wv=jnp.concatenate([a["wv"] for a in atts], axis=1),
        bv=jnp.concatenate([a["bv"] for a in atts], axis=1),
        wo=jnp.stack([a["wo"] for a in atts], axis=0),         # (M, h*d_v, D)
        bo=jnp.stack([a["bo"] for a in atts], axis=0),         # (M, 1, D)
        mha_ln_g=jnp.stack([mp["ln_g"] for mp in lp["mhatts"]], axis=0),
        mha_ln_b=jnp.stack([mp["ln_b"] for mp in lp["mhatts"]], axis=0),
        ln_g=lp["ln_g"], ln_b=lp["ln_b"],
        w1=pw["w1"].astype(_BF16), b1=pw["b1"],
        w2=pw["w2"].astype(_BF16), b2=pw["b2"],
        ff_ln_g=pw["ln_g"], ff_ln_b=pw["ln_b"],
    )


def fuse_params(raw, *, d_model, d_k):
    layers = [_fuse_layer(lp, d_k) for lp in raw["layers"]]
    mlp = dict(
        w1a=raw["mlp1_w"][:d_model].astype(_BF16),
        w1b=raw["mlp1_w"][d_model:2 * d_model].astype(_BF16),
        w1c=raw["mlp1_w"][2 * d_model:].astype(_BF16),
        b1=raw["mlp1_b"],
        w2=raw["mlp2_w"].astype(_BF16),
        b2=raw["mlp2_b"],
    )
    return dict(layers=layers, self_att=_fuse_sdpa(raw["self_att"], d_k),
                mlp=mlp)


# --------------------------- pure-JAX f32 reference ----------------------------

def _ref_ln(x, g, b):
    mu = x.mean(-1, keepdims=True)
    var = ((x - mu) ** 2).mean(-1, keepdims=True)
    return (x - mu) / jnp.sqrt(var + _LN_EPS) * g + b


def _ref_sdpa(p, q_in, k_in, v_in, mask, h, d_k, d_v):
    B, Sq, _ = q_in.shape
    Sk = k_in.shape[1]
    q = (q_in @ p["wq"] + p["bq"]).reshape(B, Sq, h, d_k).transpose(0, 2, 1, 3)
    k = (k_in @ p["wk"] + p["bk"]).reshape(B, Sk, h, d_k).transpose(0, 2, 1, 3)
    v = (v_in @ p["wv"] + p["bv"]).reshape(B, Sk, h, d_v).transpose(0, 2, 1, 3)
    s = jnp.einsum("bhqd,bhkd->bhqk", q, k) / np.sqrt(d_k)
    if mask is not None:
        s = jnp.where(mask, _MASK_BIAS, s)
    a = jax.nn.softmax(s, axis=-1)
    o = jnp.einsum("bhqk,bhkd->bhqd", a, v).transpose(0, 2, 1, 3)
    o = o.reshape(B, Sq, h * d_v)
    return o @ p["wo"] + p["bo"]


def _ref_layer(lp, x, mask, h, d_k, d_v):
    att = None
    for mp in lp["mhatts"]:
        o = _ref_sdpa(mp["att"], x, x, x, mask, h, d_k, d_v)
        o = _ref_ln(x + o, mp["ln_g"], mp["ln_b"])
        att = o if att is None else att + o
    att = att / len(lp["mhatts"])
    att = _ref_ln(x + att, lp["ln_g"], lp["ln_b"])
    pw = lp["pwff"]
    h1 = jnp.maximum(att @ pw["w1"] + pw["b1"], 0.0)
    h2 = h1 @ pw["w2"] + pw["b2"]
    return _ref_ln(att + h2, pw["ln_g"], pw["ln_b"])


def reference_forward(raw, x, *, padding_idx, h, d_k, d_v):
    B, S, _ = x.shape
    mask = (jnp.sum(x, -1) == padding_idx).reshape(B, 1, 1, S)
    outs = []
    out = x
    for lp in raw["layers"]:
        out = _ref_layer(lp, out, mask, h, d_k, d_v)
        outs.append(out)
    o1, o2, o3 = outs
    o2 = 0.2 * _ref_sdpa(raw["self_att"], o2, o1, o1, None, h, d_k, d_v) + o2
    o3 = 0.2 * _ref_sdpa(raw["self_att"], o3, o2, o2, None, h, d_k, d_v) + o3
    m = jnp.concatenate(outs, axis=-1) @ raw["mlp1_w"] + raw["mlp1_b"]
    m = jnp.where(m >= 0.0, m, 0.01 * m)
    m = m @ raw["mlp2_w"] + raw["mlp2_b"]
    m = jnp.where(m >= 0.0, m, 0.01 * m)
    return o3 + 0.2 * m, mask


# ---------------------------------- main ---------------------------------------

if __name__ == "__main__":
    N, M = 3, 3                    # forward unpacks exactly 3 layer outputs
    B, S = 2, 8
    d_model, d_k, d_v, h, d_ff = 32, 8, 8, 4, 64
    padding_idx = 0

    key = jax.random.PRNGKey(0)
    kp, kx = jax.random.split(key)
    raw = init_multilevel_encoder_raw(kp, N, d_model, d_k, d_v, h, d_ff, M)
    params = fuse_params(raw, d_model=d_model, d_k=d_k)
    x = jax.random.normal(kx, (B, S, d_model), _F32)

    # run the capability probes eagerly (outside jit) once
    _weights_can_single_buffer()
    _vmem_limit_bytes()

    fwd = jax.jit(functools.partial(multilevel_encoder_forward,
                                    padding_idx=padding_idx, n_branch=M,
                                    h=h, d_k=d_k, d_v=d_v))
    out, attn_mask = fwd(params, x)
    jax.block_until_ready(out)
    jax.block_until_ready(attn_mask)

    assert out.shape == (B, S, d_model)
    assert attn_mask.shape == (B, 1, 1, S)
    assert bool(jnp.all(jnp.isfinite(out)))

    # sanity check against a pure-JAX f32 reference (kernels use bf16 matmuls
    # and bf16 inter-layer activations)
    ref_out, ref_mask = reference_forward(raw, x, padding_idx=padding_idx,
                                          h=h, d_k=d_k, d_v=d_v)
    assert bool(jnp.array_equal(attn_mask, ref_mask))
    max_err = float(jnp.max(jnp.abs(out - ref_out)))
    assert max_err < 0.3, f"max abs error vs reference: {max_err}"

    print("KERNEL_OK")
</pallas_src>

<mosaic_0001>
module attributes {stable_mosaic.version = 11 : i64} {
  func.func @_copy(%arg0: i32, %arg1: memref<8x128xf32, #tpu.memory_space<vmem>>, %arg2: memref<8x128xf32, #tpu.memory_space<vmem>>) attributes {dimension_semantics = [#tpu.dimension_semantics<arbitrary>], iteration_bounds = array<i64: 1>, scalar_prefetch = 0 : i64, scratch_operands = 0 : i64, tpu.core_type = #tpu.core_type<tc>, window_params = [{pipeline_mode = #tpu.pipeline_mode<synchronous>, transform_indices = @transform_0, window_bounds = array<i64: 8, 128>}, {pipeline_mode = #tpu.pipeline_mode<synchronous>, transform_indices = @transform_1, window_bounds = array<i64: 8, 128>}]} {
    %c0 = arith.constant 0 : index
    %c0_0 = arith.constant 0 : index
    %0 = vector.load %arg1[%c0, %c0_0] : memref<8x128xf32, #tpu.memory_space<vmem>>, vector<8x128xf32>
    %c0_1 = arith.constant 0 : index
    %c0_2 = arith.constant 0 : index
    %1 = vector.load %arg2[%c0_1, %c0_2] : memref<8x128xf32, #tpu.memory_space<vmem>>, vector<8x128xf32>
    tpu.vector_store %arg2[%c0_1, %c0_2], %0 {strides = array<i32>} : memref<8x128xf32, #tpu.memory_space<vmem>>, vector<8x128xf32>,
    return
  }
  func.func @transform_0(%arg0: i32) -> (i32, i32) {
    %c0_i32 = arith.constant 0 : i32
    %c0_i32_0 = arith.constant 0 : i32
    %c0_i32_1 = arith.constant 0 : i32
    return %c0_i32, %c0_i32_0 : i32, i32
  }
  func.func @transform_1(%arg0: i32) -> (i32, i32) {
    %c0_i32 = arith.constant 0 : i32
    %c0_i32_0 = arith.constant 0 : i32
    %c0_i32_1 = arith.constant 0 : i32
    return %c0_i32, %c0_i32_0 : i32, i32
  }
}

module attributes {stable_mosaic.version = 11 : i64} {
  func.func @_encoder_layer_kernel(%arg0: i32, %arg1: i32, %arg2: memref<1x8x32xbf16, #tpu.memory_space<vmem>>, %arg3: memref<1x1x8xf32, #tpu.memory_space<vmem>>, %arg4: memref<32x96xbf16, #tpu.memory_space<vmem>>, %arg5: memref<1x96xf32, #tpu.memory_space<vmem>>, %arg6: memref<32x96xbf16, #tpu.memory_space<vmem>>, %arg7: memref<1x96xf32, #tpu.memory_space<vmem>>, %arg8: memref<32x96xbf16, #tpu.memory_space<vmem>>, %arg9: memref<1x96xf32, #tpu.memory_space<vmem>>, %arg10: memref<3x32x32xbf16, #tpu.memory_space<vmem>>, %arg11: memref<3x1x32xf32, #tpu.memory_space<vmem>>, %arg12: memref<3x1x32xf32, #tpu.memory_space<vmem>>, %arg13: memref<3x1x32xf32, #tpu.memory_space<vmem>>, %arg14: memref<1x32xf32, #tpu.memory_space<vmem>>, %arg15: memref<1x32xf32, #tpu.memory_space<vmem>>, %arg16: memref<32x64xbf16, #tpu.memory_space<vmem>>, %arg17: memref<1x64xf32, #tpu.memory_space<vmem>>, %arg18: memref<64x32xbf16, #tpu.memory_space<vmem>>, %arg19: memref<1x32xf32, #tpu.memory_space<vmem>>, %arg20: memref<1x32xf32, #tpu.memory_space<vmem>>, %arg21: memref<1x32xf32, #tpu.memory_space<vmem>>, %arg22: memref<1x8x32xbf16, #tpu.memory_space<vmem>>) attributes {dimension_semantics = [#tpu.dimension_semantics<parallel>, #tpu.dimension_semantics<parallel>], iteration_bounds = array<i64: 2, 1>, scalar_prefetch = 0 : i64, scratch_operands = 0 : i64, tpu.core_type = #tpu.core_type<tc>, window_params = [{transform_indices = @transform_0, window_bounds = array<i64: 1, 8, 32>}, {transform_indices = @transform_1, window_bounds = array<i64: 1, 1, 8>}, {pipeline_mode = #tpu.pipeline_mode<synchronous>, transform_indices = @transform_2, window_bounds = array<i64: 32, 96>}, {pipeline_mode = #tpu.pipeline_mode<synchronous>, transform_indices = @transform_3, window_bounds = array<i64: 1, 96>}, {pipeline_mode = #tpu.pipeline_mode<synchronous>, transform_indices = @transform_4, window_bounds = array<i64: 32, 96>}, {pipeline_mode = #tpu.pipeline_mode<synchronous>, transform_indices = @transform_5, window_bounds = array<i64: 1, 96>}, {pipeline_mode = #tpu.pipeline_mode<synchronous>, transform_indices = @transform_6, window_bounds = array<i64: 32, 96>}, {pipeline_mode = #tpu.pipeline_mode<synchronous>, transform_indices = @transform_7, window_bounds = array<i64: 1, 96>}, {pipeline_mode = #tpu.pipeline_mode<synchronous>, transform_indices = @transform_8, window_bounds = array<i64: 3, 32, 32>}, {pipeline_mode = #tpu.pipeline_mode<synchronous>, transform_indices = @transform_9, window_bounds = array<i64: 3, 1, 32>}, {pipeline_mode = #tpu.pipeline_mode<synchronous>, transform_indices = @transform_10, window_bounds = array<i64: 3, 1, 32>}, {pipeline_mode = #tpu.pipeline_mode<synchronous>, transform_indices = @transform_11, window_bounds = array<i64: 3, 1, 32>}, {pipeline_mode = #tpu.pipeline_mode<synchronous>, transform_indices = @transform_12, window_bounds = array<i64: 1, 32>}, {pipeline_mode = #tpu.pipeline_mode<synchronous>, transform_indices = @transform_13, window_bounds = array<i64: 1, 32>}, {pipeline_mode = #tpu.pipeline_mode<synchronous>, transform_indices = @transform_14, window_bounds = array<i64: 32, 64>}, {pipeline_mode = #tpu.pipeline_mode<synchronous>, transform_indices = @transform_15, window_bounds = array<i64: 1, 64>}, {pipeline_mode = #tpu.pipeline_mode<synchronous>, transform_indices = @transform_16, window_bounds = array<i64: 64, 32>}, {pipeline_mode = #tpu.pipeline_mode<synchronous>, transform_indices = @transform_17, window_bounds = array<i64: 1, 32>}, {pipeline_mode = #tpu.pipeline_mode<synchronous>, transform_indices = @transform_18, window_bounds = array<i64: 1, 32>}, {pipeline_mode = #tpu.pipeline_mode<synchronous>, transform_indices = @transform_19, window_bounds = array<i64: 1, 32>}, {transform_indices = @transform_20, window_bounds = array<i64: 1, 8, 32>}]} {
    %c0 = arith.constant 0 : index
    %c0_0 = arith.constant 0 : index
    %c0_1 = arith.constant 0 : index
    %0 = vector.load %arg2[%c0, %c0_0, %c0_1] : memref<1x8x32xbf16, #tpu.memory_space<vmem>>, vector<1x8x32xbf16>
    %1 = vector.shape_cast %0 : vector<1x8x32xbf16> to vector<8x32xbf16>
    %c8_i32 = arith.constant 8 : i32
    %2 = arith.muli %arg1, %c8_i32 : i32
    %3 = tpu.assume_multiple %2, 8 : i32
    %c0_2 = arith.constant 0 : index
    %4 = arith.index_cast %3 : i32 to index
    %c0_3 = arith.constant 0 : index
    %5 = vector.load %arg2[%c0_2, %4, %c0_3] : memref<1x8x32xbf16, #tpu.memory_space<vmem>>, vector<1x8x32xbf16>
    %6 = vector.shape_cast %5 : vector<1x8x32xbf16> to vector<8x32xbf16>
    %7 = arith.extf %6 : vector<8x32xbf16> to vector<8x32xf32>
    %c0_4 = arith.constant 0 : index
    %c0_5 = arith.constant 0 : index
    %c0_6 = arith.constant 0 : index
    %8 = vector.load %arg3[%c0_4, %c0_5, %c0_6] : memref<1x1x8xf32, #tpu.memory_space<vmem>>, vector<1x1x8xf32>
    %9 = vector.shape_cast %8 : vector<1x1x8xf32> to vector<1x8xf32>
    %c0_7 = arith.constant 0 : index
    %c0_8 = arith.constant 0 : index
    %10 = vector.load %arg4[%c0_7, %c0_8] : memref<32x96xbf16, #tpu.memory_space<vmem>>, vector<32x96xbf16>
    %c0_9 = arith.constant 0 : index
    %c0_10 = arith.constant 0 : index
    %11 = vector.load %arg5[%c0_9, %c0_10] : memref<1x96xf32, #tpu.memory_space<vmem>>, vector<1x96xf32>
    %c0_11 = arith.constant 0 : index
    %c0_12 = arith.constant 0 : index
    %12 = vector.load %arg6[%c0_11, %c0_12] : memref<32x96xbf16, #tpu.memory_space<vmem>>, vector<32x96xbf16>
    %c0_13 = arith.constant 0 : index
    %c0_14 = arith.constant 0 : index
    %13 = vector.load %arg7[%c0_13, %c0_14] : memref<1x96xf32, #tpu.memory_space<vmem>>, vector<1x96xf32>
    %c0_15 = arith.constant 0 : index
    %c0_16 = arith.constant 0 : index
    %14 = vector.load %arg8[%c0_15, %c0_16] : memref<32x96xbf16, #tpu.memory_space<vmem>>, vector<32x96xbf16>
    %c0_17 = arith.constant 0 : index
    %c0_18 = arith.constant 0 : index
    %15 = vector.load %arg9[%c0_17, %c0_18] : memref<1x96xf32, #tpu.memory_space<vmem>>, vector<1x96xf32>
    %cst = arith.constant dense<0.000000e+00> : vector<8x96xf32>
    %16 = tpu.matmul %6, %10, %cst {dimension_numbers = #tpu.dot_dimension_numbers<[1], [0], [0], [1], [0, 0, 1, 1], [], []>} : vector<8x32xbf16>, vector<32x96xbf16>, vector<8x96xf32> -> vector<8x96xf32>
    %17 = vector.broadcast %11 : vector<1x96xf32> to vector<8x96xf32>
    %18 = arith.addf %16, %17 : vector<8x96xf32>
    %cst_19 = arith.constant dense<0.000000e+00> : vector<8x96xf32>
    %19 = tpu.matmul %1, %12, %cst_19 {dimension_numbers = #tpu.dot_dimension_numbers<[1], [0], [0], [1], [0, 0, 1, 1], [], []>} : vector<8x32xbf16>, vector<32x96xbf16>, vector<8x96xf32> -> vector<8x96xf32>
    %20 = vector.broadcast %13 : vector<1x96xf32> to vector<8x96xf32>
    %21 = arith.addf %19, %20 : vector<8x96xf32>
    %cst_20 = arith.constant dense<0.000000e+00> : vector<8x96xf32>
    %22 = tpu.matmul %1, %14, %cst_20 {dimension_numbers = #tpu.dot_dimension_numbers<[1], [0], [0], [1], [0, 0, 1, 1], [], []>} : vector<8x32xbf16>, vector<32x96xbf16>, vector<8x96xf32> -> vector<8x96xf32>
    %23 = vector.broadcast %15 : vector<1x96xf32> to vector<8x96xf32>
    %24 = arith.addf %22, %23 : vector<8x96xf32>
    %25 = vector.extract_strided_slice %18 {offsets = [0, 0], sizes = [8, 8], strides = [1, 1]} : vector<8x96xf32> to vector<8x8xf32>
    %26 = vector.extract_strided_slice %18 {offsets = [0, 8], sizes = [8, 8], strides = [1, 1]} : vector<8x96xf32> to vector<8x8xf32>
    %27 = vector.extract_strided_slice %18 {offsets = [0, 16], sizes = [8, 8], strides = [1, 1]} : vector<8x96xf32> to vector<8x8xf32>
    %28 = vector.extract_strided_slice %18 {offsets = [0, 24], sizes = [8, 8], strides = [1, 1]} : vector<8x96xf32> to vector<8x8xf32>
    %29 = vector.extract_strided_slice %18 {offsets = [0, 32], sizes = [8, 8], strides = [1, 1]} : vector<8x96xf32> to vector<8x8xf32>
    %30 = vector.extract_strided_slice %18 {offsets = [0, 40], sizes = [8, 8], strides = [1, 1]} : vector<8x96xf32> to vector<8x8xf32>
    %31 = vector.extract_strided_slice %18 {offsets = [0, 48], sizes = [8, 8], strides = [1, 1]} : vector<8x96xf32> to vector<8x8xf32>
    %32 = vector.extract_strided_slice %18 {offsets = [0, 56], sizes = [8, 8], strides = [1, 1]} : vector<8x96xf32> to vector<8x8xf32>
    %33 = vector.extract_strided_slice %18 {offsets = [0, 64], sizes = [8, 8], strides = [1, 1]} : vector<8x96xf32> to vector<8x8xf32>
    %34 = vector.extract_strided_slice %18 {offsets = [0, 72], sizes = [8, 8], strides = [1, 1]} : vector<8x96xf32> to vector<8x8xf32>
    %35 = vector.extract_strided_slice %18 {offsets = [0, 80], sizes = [8, 8], strides = [1, 1]} : vector<8x96xf32> to vector<8x8xf32>
    %36 = vector.extract_strided_slice %18 {offsets = [0, 88], sizes = [8, 8], strides = [1, 1]} : vector<8x96xf32> to vector<8x8xf32>
    %37 = vector.shape_cast %25 : vector<8x8xf32> to vector<1x8x8xf32>
    %38 = vector.shape_cast %26 : vector<8x8xf32> to vector<1x8x8xf32>
    %39 = vector.shape_cast %27 : vector<8x8xf32> to vector<1x8x8xf32>
    %40 = vector.shape_cast %28 : vector<8x8xf32> to vector<1x8x8xf32>
    %41 = vector.shape_cast %29 : vector<8x8xf32> to vector<1x8x8xf32>
    %42 = vector.shape_cast %30 : vector<8x8xf32> to vector<1x8x8xf32>
    %43 = vector.shape_cast %31 : vector<8x8xf32> to vector<1x8x8xf32>
    %44 = vector.shape_cast %32 : vector<8x8xf32> to vector<1x8x8xf32>
    %45 = vector.shape_cast %33 : vector<8x8xf32> to vector<1x8x8xf32>
    %46 = vector.shape_cast %34 : vector<8x8xf32> to vector<1x8x8xf32>
    %47 = vector.shape_cast %35 : vector<8x8xf32> to vector<1x8x8xf32>
    %48 = vector.shape_cast %36 : vector<8x8xf32> to vector<1x8x8xf32>
    %49 = tpu.concatenate %37, %38, %39, %40, %41, %42, %43, %44, %45, %46, %47, %48 in 0 : vector<1x8x8xf32>, vector<1x8x8xf32>, vector<1x8x8xf32>, vector<1x8x8xf32>, vector<1x8x8xf32>, vector<1x8x8xf32>, vector<1x8x8xf32>, vector<1x8x8xf32>, vector<1x8x8xf32>, vector<1x8x8xf32>, vector<1x8x8xf32>, vector<1x8x8xf32> -> vector<12x8x8xf32>
    %50 = arith.truncf %49 : vector<12x8x8xf32> to vector<12x8x8xbf16>
    %51 = vector.extract_strided_slice %21 {offsets = [0, 0], sizes = [8, 8], strides = [1, 1]} : vector<8x96xf32> to vector<8x8xf32>
    %52 = vector.extract_strided_slice %21 {offsets = [0, 8], sizes = [8, 8], strides = [1, 1]} : vector<8x96xf32> to vector<8x8xf32>
    %53 = vector.extract_strided_slice %21 {offsets = [0, 16], sizes = [8, 8], strides = [1, 1]} : vector<8x96xf32> to vector<8x8xf32>
    %54 = vector.extract_strided_slice %21 {offsets = [0, 24], sizes = [8, 8], strides = [1, 1]} : vector<8x96xf32> to vector<8x8xf32>
    %55 = vector.extract_strided_slice %21 {offsets = [0, 32], sizes = [8, 8], strides = [1, 1]} : vector<8x96xf32> to vector<8x8xf32>
    %56 = vector.extract_strided_slice %21 {offsets = [0, 40], sizes = [8, 8], strides = [1, 1]} : vector<8x96xf32> to vector<8x8xf32>
    %57 = vector.extract_strided_slice %21 {offsets = [0, 48], sizes = [8, 8], strides = [1, 1]} : vector<8x96xf32> to vector<8x8xf32>
    %58 = vector.extract_strided_slice %21 {offsets = [0, 56], sizes = [8, 8], strides = [1, 1]} : vector<8x96xf32> to vector<8x8xf32>
    %59 = vector.extract_strided_slice %21 {offsets = [0, 64], sizes = [8, 8], strides = [1, 1]} : vector<8x96xf32> to vector<8x8xf32>
    %60 = vector.extract_strided_slice %21 {offsets = [0, 72], sizes = [8, 8], strides = [1, 1]} : vector<8x96xf32> to vector<8x8xf32>
    %61 = vector.extract_strided_slice %21 {offsets = [0, 80], sizes = [8, 8], strides = [1, 1]} : vector<8x96xf32> to vector<8x8xf32>
    %62 = vector.extract_strided_slice %21 {offsets = [0, 88], sizes = [8, 8], strides = [1, 1]} : vector<8x96xf32> to vector<8x8xf32>
    %63 = vector.shape_cast %51 : vector<8x8xf32> to vector<1x8x8xf32>
    %64 = vector.shape_cast %52 : vector<8x8xf32> to vector<1x8x8xf32>
    %65 = vector.shape_cast %53 : vector<8x8xf32> to vector<1x8x8xf32>
    %66 = vector.shape_cast %54 : vector<8x8xf32> to vector<1x8x8xf32>
    %67 = vector.shape_cast %55 : vector<8x8xf32> to vector<1x8x8xf32>
    %68 = vector.shape_cast %56 : vector<8x8xf32> to vector<1x8x8xf32>
    %69 = vector.shape_cast %57 : vector<8x8xf32> to vector<1x8x8xf32>
    %70 = vector.shape_cast %58 : vector<8x8xf32> to vector<1x8x8xf32>
    %71 = vector.shape_cast %59 : vector<8x8xf32> to vector<1x8x8xf32>
    %72 = vector.shape_cast %60 : vector<8x8xf32> to vector<1x8x8xf32>
    %73 = vector.shape_cast %61 : vector<8x8xf32> to vector<1x8x8xf32>
    %74 = vector.shape_cast %62 : vector<8x8xf32> to vector<1x8x8xf32>
    %75 = tpu.concatenate %63, %64, %65, %66, %67, %68, %69, %70, %71, %72, %73, %74 in 0 : vector<1x8x8xf32>, vector<1x8x8xf32>, vector<1x8x8xf32>, vector<1x8x8xf32>, vector<1x8x8xf32>, vector<1x8x8xf32>, vector<1x8x8xf32>, vector<1x8x8xf32>, vector<1x8x8xf32>, vector<1x8x8xf32>, vector<1x8x8xf32>, vector<1x8x8xf32> -> vector<12x8x8xf32>
    %76 = arith.truncf %75 : vector<12x8x8xf32> to vector<12x8x8xbf16>
    %77 = vector.extract_strided_slice %24 {offsets = [0, 0], sizes = [8, 8], strides = [1, 1]} : vector<8x96xf32> to vector<8x8xf32>
    %78 = vector.extract_strided_slice %24 {offsets = [0, 8], sizes = [8, 8], strides = [1, 1]} : vector<8x96xf32> to vector<8x8xf32>
    %79 = vector.extract_strided_slice %24 {offsets = [0, 16], sizes = [8, 8], strides = [1, 1]} : vector<8x96xf32> to vector<8x8xf32>
    %80 = vector.extract_strided_slice %24 {offsets = [0, 24], sizes = [8, 8], strides = [1, 1]} : vector<8x96xf32> to vector<8x8xf32>
    %81 = vector.extract_strided_slice %24 {offsets = [0, 32], sizes = [8, 8], strides = [1, 1]} : vector<8x96xf32> to vector<8x8xf32>
    %82 = vector.extract_strided_slice %24 {offsets = [0, 40], sizes = [8, 8], strides = [1, 1]} : vector<8x96xf32> to vector<8x8xf32>
    %83 = vector.extract_strided_slice %24 {offsets = [0, 48], sizes = [8, 8], strides = [1, 1]} : vector<8x96xf32> to vector<8x8xf32>
    %84 = vector.extract_strided_slice %24 {offsets = [0, 56], sizes = [8, 8], strides = [1, 1]} : vector<8x96xf32> to vector<8x8xf32>
    %85 = vector.extract_strided_slice %24 {offsets = [0, 64], sizes = [8, 8], strides = [1, 1]} : vector<8x96xf32> to vector<8x8xf32>
    %86 = vector.extract_strided_slice %24 {offsets = [0, 72], sizes = [8, 8], strides = [1, 1]} : vector<8x96xf32> to vector<8x8xf32>
    %87 = vector.extract_strided_slice %24 {offsets = [0, 80], sizes = [8, 8], strides = [1, 1]} : vector<8x96xf32> to vector<8x8xf32>
    %88 = vector.extract_strided_slice %24 {offsets = [0, 88], sizes = [8, 8], strides = [1, 1]} : vector<8x96xf32> to vector<8x8xf32>
    %89 = vector.shape_cast %77 : vector<8x8xf32> to vector<1x8x8xf32>
    %90 = vector.shape_cast %78 : vector<8x8xf32> to vector<1x8x8xf32>
    %91 = vector.shape_cast %79 : vector<8x8xf32> to vector<1x8x8xf32>
    %92 = vector.shape_cast %80 : vector<8x8xf32> to vector<1x8x8xf32>
    %93 = vector.shape_cast %81 : vector<8x8xf32> to vector<1x8x8xf32>
    %94 = vector.shape_cast %82 : vector<8x8xf32> to vector<1x8x8xf32>
    %95 = vector.shape_cast %83 : vector<8x8xf32> to vector<1x8x8xf32>
    %96 = vector.shape_cast %84 : vector<8x8xf32> to vector<1x8x8xf32>
    %97 = vector.shape_cast %85 : vector<8x8xf32> to vector<1x8x8xf32>
    %98 = vector.shape_cast %86 : vector<8x8xf32> to vector<1x8x8xf32>
    %99 = vector.shape_cast %87 : vector<8x8xf32> to vector<1x8x8xf32>
    %100 = vector.shape_cast %88 : vector<8x8xf32> to vector<1x8x8xf32>
    %101 = tpu.concatenate %89, %90, %91, %92, %93, %94, %95, %96, %97, %98, %99, %100 in 0 : vector<1x8x8xf32>, vector<1x8x8xf32>, vector<1x8x8xf32>, vector<1x8x8xf32>, vector<1x8x8xf32>, vector<1x8x8xf32>, vector<1x8x8xf32>, vector<1x8x8xf32>, vector<1x8x8xf32>, vector<1x8x8xf32>, vector<1x8x8xf32>, vector<1x8x8xf32> -> vector<12x8x8xf32>
    %102 = arith.truncf %101 : vector<12x8x8xf32> to vector<12x8x8xbf16>
    %cst_21 = arith.constant 0xFF800000 : f32
    %103 = vector.broadcast %cst_21 : f32 to vector<12x8x1xf32>
    %cst_22 = arith.constant 0.000000e+00 : f32
    %104 = vector.broadcast %cst_22 : f32 to vector<12x8x1xf32>
    %cst_23 = arith.constant 0.000000e+00 : f32
    %105 = vector.broadcast %cst_23 : f32 to vector<12x8x8xf32>
    "tpu.trace_start"() <{level = 10 : i32, message = "hqd,hkd->hqk"}> : () -> ()
    %cst_24 = arith.constant dense<0.000000e+00> : vector<12x8x8xf32>
    %106 = tpu.matmul %50, %76, %cst_24 {dimension_numbers = #tpu.dot_dimension_numbers<[2], [2], [1], [1], [0, 0, 0, 1, 1, 1], [0], [0]>} : vector<12x8x8xbf16>, vector<12x8x8xbf16>, vector<12x8x8xf32> -> vector<12x8x8xf32>
    "tpu.trace_stop"() : () -> ()
    %107 = vector.shape_cast %9 : vector<1x8xf32> to vector<1x1x8xf32>
    %108 = vector.broadcast %107 : vector<1x1x8xf32> to vector<12x8x8xf32>
    %109 = arith.addf %106, %108 : vector<12x8x8xf32>
    %cst_25 = arith.constant dense<0xFF800000> : vector<12x8xf32>
    %110 = vector.multi_reduction <maximumf>, %109, %cst_25 [2] : vector<12x8x8xf32> to vector<12x8xf32>
    %111 = vector.shape_cast %110 : vector<12x8xf32> to vector<12x8x1xf32>
    %112 = arith.maximumf %103, %111 : vector<12x8x1xf32>
    %113 = arith.subf %103, %112 : vector<12x8x1xf32>
    %114 = math.exp %113 : vector<12x8x1xf32>
    %115 = vector.broadcast %112 : vector<12x8x1xf32> to vector<12x8x8xf32>
    %116 = arith.subf %109, %115 : vector<12x8x8xf32>
    %117 = math.exp %116 : vector<12x8x8xf32>
    %118 = arith.mulf %114, %104 : vector<12x8x1xf32>
    %cst_26 = arith.constant dense<0.000000e+00> : vector<12x8xf32>
    %119 = vector.multi_reduction <add>, %117, %cst_26 [2] : vector<12x8x8xf32> to vector<12x8xf32>
    %120 = vector.shape_cast %119 : vector<12x8xf32> to vector<12x8x1xf32>
    %121 = arith.addf %118, %120 : vector<12x8x1xf32>
    %122 = vector.broadcast %114 : vector<12x8x1xf32> to vector<12x8x8xf32>
    %123 = arith.mulf %122, %105 : vector<12x8x8xf32>
    %124 = arith.truncf %117 : vector<12x8x8xf32> to vector<12x8x8xbf16>
    "tpu.trace_start"() <{level = 10 : i32, message = "hqk,hkd->hqd"}> : () -> ()
    %cst_27 = arith.constant dense<0.000000e+00> : vector<12x8x8xf32>
    %125 = tpu.matmul %124, %102, %cst_27 {dimension_numbers = #tpu.dot_dimension_numbers<[2], [1], [1], [2], [0, 0, 0, 1, 1, 2], [0], [0]>} : vector<12x8x8xbf16>, vector<12x8x8xbf16>, vector<12x8x8xf32> -> vector<12x8x8xf32>
    "tpu.trace_stop"() : () -> ()
    %126 = arith.addf %123, %125 : vector<12x8x8xf32>
    %127 = tpu.reciprocal %121 {approx = true} : vector<12x8x1xf32> -> vector<12x8x1xf32>
    %128 = vector.broadcast %127 : vector<12x8x1xf32> to vector<12x8x8xf32>
    %129 = arith.mulf %126, %128 : vector<12x8x8xf32>
    %130 = vector.extract_strided_slice %129 {offsets = [0, 0, 0], sizes = [1, 8, 8], strides = [1, 1, 1]} : vector<12x8x8xf32> to vector<1x8x8xf32>
    %131 = vector.shape_cast %130 : vector<1x8x8xf32> to vector<8x8xf32>
    %132 = vector.extract_strided_slice %129 {offsets = [1, 0, 0], sizes = [1, 8, 8], strides = [1, 1, 1]} : vector<12x8x8xf32> to vector<1x8x8xf32>
    %133 = vector.shape_cast %132 : vector<1x8x8xf32> to vector<8x8xf32>
    %134 = vector.extract_strided_slice %129 {offsets = [2, 0, 0], sizes = [1, 8, 8], strides = [1, 1, 1]} : vector<12x8x8xf32> to vector<1x8x8xf32>
    %135 = vector.shape_cast %134 : vector<1x8x8xf32> to vector<8x8xf32>
    %136 = vector.extract_strided_slice %129 {offsets = [3, 0, 0], sizes = [1, 8, 8], strides = [1, 1, 1]} : vector<12x8x8xf32> to vector<1x8x8xf32>
    %137 = vector.shape_cast %136 : vector<1x8x8xf32> to vector<8x8xf32>
    %138 = tpu.concatenate %131, %133, %135, %137 in 1 : vector<8x8xf32>, vector<8x8xf32>, vector<8x8xf32>, vector<8x8xf32> -> vector<8x32xf32>
    %139 = vector.extract_strided_slice %129 {offsets = [4, 0, 0], sizes = [1, 8, 8], strides = [1, 1, 1]} : vector<12x8x8xf32> to vector<1x8x8xf32>
    %140 = vector.shape_cast %139 : vector<1x8x8xf32> to vector<8x8xf32>
    %141 = vector.extract_strided_slice %129 {offsets = [5, 0, 0], sizes = [1, 8, 8], strides = [1, 1, 1]} : vector<12x8x8xf32> to vector<1x8x8xf32>
    %142 = vector.shape_cast %141 : vector<1x8x8xf32> to vector<8x8xf32>
    %143 = vector.extract_strided_slice %129 {offsets = [6, 0, 0], sizes = [1, 8, 8], strides = [1, 1, 1]} : vector<12x8x8xf32> to vector<1x8x8xf32>
    %144 = vector.shape_cast %143 : vector<1x8x8xf32> to vector<8x8xf32>
    %145 = vector.extract_strided_slice %129 {offsets = [7, 0, 0], sizes = [1, 8, 8], strides = [1, 1, 1]} : vector<12x8x8xf32> to vector<1x8x8xf32>
    %146 = vector.shape_cast %145 : vector<1x8x8xf32> to vector<8x8xf32>
    %147 = tpu.concatenate %140, %142, %144, %146 in 1 : vector<8x8xf32>, vector<8x8xf32>, vector<8x8xf32>, vector<8x8xf32> -> vector<8x32xf32>
    %148 = vector.extract_strided_slice %129 {offsets = [8, 0, 0], sizes = [1, 8, 8], strides = [1, 1, 1]} : vector<12x8x8xf32> to vector<1x8x8xf32>
    %149 = vector.shape_cast %148 : vector<1x8x8xf32> to vector<8x8xf32>
    %150 = vector.extract_strided_slice %129 {offsets = [9, 0, 0], sizes = [1, 8, 8], strides = [1, 1, 1]} : vector<12x8x8xf32> to vector<1x8x8xf32>
    %151 = vector.shape_cast %150 : vector<1x8x8xf32> to vector<8x8xf32>
    %152 = vector.extract_strided_slice %129 {offsets = [10, 0, 0], sizes = [1, 8, 8], strides = [1, 1, 1]} : vector<12x8x8xf32> to vector<1x8x8xf32>
    %153 = vector.shape_cast %152 : vector<1x8x8xf32> to vector<8x8xf32>
    %154 = vector.extract_strided_slice %129 {offsets = [11, 0, 0], sizes = [1, 8, 8], strides = [1, 1, 1]} : vector<12x8x8xf32> to vector<1x8x8xf32>
    %155 = vector.shape_cast %154 : vector<1x8x8xf32> to vector<8x8xf32>
    %156 = tpu.concatenate %149, %151, %153, %155 in 1 : vector<8x8xf32>, vector<8x8xf32>, vector<8x8xf32>, vector<8x8xf32> -> vector<8x32xf32>
    %157 = vector.shape_cast %138 : vector<8x32xf32> to vector<1x8x32xf32>
    %158 = vector.shape_cast %147 : vector<8x32xf32> to vector<1x8x32xf32>
    %159 = vector.shape_cast %156 : vector<8x32xf32> to vector<1x8x32xf32>
    %160 = tpu.concatenate %157, %158, %159 in 0 : vector<1x8x32xf32>, vector<1x8x32xf32>, vector<1x8x32xf32> -> vector<3x8x32xf32>
    %161 = arith.truncf %160 : vector<3x8x32xf32> to vector<3x8x32xbf16>
    %c0_28 = arith.constant 0 : index
    %c0_29 = arith.constant 0 : index
    %c0_30 = arith.constant 0 : index
    %162 = vector.load %arg10[%c0_28, %c0_29, %c0_30] : memref<3x32x32xbf16, #tpu.memory_space<vmem>>, vector<3x32x32xbf16>
    "tpu.trace_start"() <{level = 10 : i32, message = "mtv,mvd->mtd"}> : () -> ()
    %cst_31 = arith.constant dense<0.000000e+00> : vector<3x8x32xf32>
    %163 = tpu.matmul %161, %162, %cst_31 {dimension_numbers = #tpu.dot_dimension_numbers<[2], [1], [1], [2], [0, 0, 0, 1, 1, 2], [0], [0]>} : vector<3x8x32xbf16>, vector<3x32x32xbf16>, vector<3x8x32xf32> -> vector<3x8x32xf32>
    "tpu.trace_stop"() : () -> ()
    %c0_32 = arith.constant 0 : index
    %c0_33 = arith.constant 0 : index
    %c0_34 = arith.constant 0 : index
    %164 = vector.load %arg11[%c0_32, %c0_33, %c0_34] : memref<3x1x32xf32, #tpu.memory_space<vmem>>, vector<3x1x32xf32>
    %165 = vector.broadcast %164 : vector<3x1x32xf32> to vector<3x8x32xf32>
    %166 = arith.addf %163, %165 : vector<3x8x32xf32>
    %167 = vector.shape_cast %7 : vector<8x32xf32> to vector<1x8x32xf32>
    %168 = vector.broadcast %167 : vector<1x8x32xf32> to vector<3x8x32xf32>
    %169 = arith.addf %168, %166 : vector<3x8x32xf32>
    %c0_35 = arith.constant 0 : index
    %c0_36 = arith.constant 0 : index
    %c0_37 = arith.constant 0 : index
    %170 = vector.load %arg12[%c0_35, %c0_36, %c0_37] : memref<3x1x32xf32, #tpu.memory_space<vmem>>, vector<3x1x32xf32>
    %c0_38 = arith.constant 0 : index
    %c0_39 = arith.constant 0 : index
    %c0_40 = arith.constant 0 : index
    %171 = vector.load %arg13[%c0_38, %c0_39, %c0_40] : memref<3x1x32xf32, #tpu.memory_space<vmem>>, vector<3x1x32xf32>
    %cst_41 = arith.constant dense<0.000000e+00> : vector<3x8xf32>
    %172 = vector.multi_reduction <add>, %169, %cst_41 [2] : vector<3x8x32xf32> to vector<3x8xf32>
    %173 = vector.shape_cast %172 : vector<3x8xf32> to vector<3x8x1xf32>
    %cst_42 = arith.constant 3.200000e+01 : f32
    %174 = vector.broadcast %cst_42 : f32 to vector<3x8x1xf32>
    %175 = arith.divf %173, %174 : vector<3x8x1xf32>
    %176 = vector.broadcast %175 : vector<3x8x1xf32> to vector<3x8x32xf32>
    %177 = arith.subf %169, %176 : vector<3x8x32xf32>
    %178 = arith.mulf %177, %177 : vector<3x8x32xf32>
    %cst_43 = arith.constant dense<0.000000e+00> : vector<3x8xf32>
    %179 = vector.multi_reduction <add>, %178, %cst_43 [2] : vector<3x8x32xf32> to vector<3x8xf32>
    %180 = vector.shape_cast %179 : vector<3x8xf32> to vector<3x8x1xf32>
    %cst_44 = arith.constant 3.200000e+01 : f32
    %181 = vector.broadcast %cst_44 : f32 to vector<3x8x1xf32>
    %182 = arith.divf %180, %181 : vector<3x8x1xf32>
    %183 = vector.broadcast %175 : vector<3x8x1xf32> to vector<3x8x32xf32>
    %184 = arith.subf %169, %183 : vector<3x8x32xf32>
    %cst_45 = arith.constant 9.99999974E-6 : f32
    %185 = vector.broadcast %cst_45 : f32 to vector<3x8x1xf32>
    %186 = arith.addf %182, %185 : vector<3x8x1xf32>
    %187 = math.rsqrt %186 : vector<3x8x1xf32>
    %188 = vector.broadcast %187 : vector<3x8x1xf32> to vector<3x8x32xf32>
    %189 = arith.mulf %184, %188 : vector<3x8x32xf32>
    %190 = vector.broadcast %170 : vector<3x1x32xf32> to vector<3x8x32xf32>
    %191 = arith.mulf %189, %190 : vector<3x8x32xf32>
    %192 = vector.broadcast %171 : vector<3x1x32xf32> to vector<3x8x32xf32>
    %193 = arith.addf %191, %192 : vector<3x8x32xf32>
    %cst_46 = arith.constant dense<0.000000e+00> : vector<8x32xf32>
    %194 = vector.multi_reduction <add>, %193, %cst_46 [0] : vector<3x8x32xf32> to vector<8x32xf32>
    %cst_47 = arith.constant 0.333333343 : f32
    %195 = vector.broadcast %cst_47 : f32 to vector<8x32xf32>
    %196 = arith.mulf %194, %195 : vector<8x32xf32>
    %197 = arith.addf %7, %196 : vector<8x32xf32>
    %c0_48 = arith.constant 0 : index
    %c0_49 = arith.constant 0 : index
    %198 = vector.load %arg14[%c0_48, %c0_49] : memref<1x32xf32, #tpu.memory_space<vmem>>, vector<1x32xf32>
    %c0_50 = arith.constant 0 : index
    %c0_51 = arith.constant 0 : index
    %199 = vector.load %arg15[%c0_50, %c0_51] : memref<1x32xf32, #tpu.memory_space<vmem>>, vector<1x32xf32>
    %cst_52 = arith.constant dense<0.000000e+00> : vector<8xf32>
    %200 = vector.multi_reduction <add>, %197, %cst_52 [1] : vector<8x32xf32> to vector<8xf32>
    %201 = vector.shape_cast %200 : vector<8xf32> to vector<8x1xf32>
    %cst_53 = arith.constant 3.200000e+01 : f32
    %202 = vector.broadcast %cst_53 : f32 to vector<8x1xf32>
    %203 = arith.divf %201, %202 : vector<8x1xf32>
    %204 = vector.broadcast %203 : vector<8x1xf32> to vector<8x32xf32>
    %205 = arith.subf %197, %204 : vector<8x32xf32>
    %206 = arith.mulf %205, %205 : vector<8x32xf32>
    %cst_54 = arith.constant dense<0.000000e+00> : vector<8xf32>
    %207 = vector.multi_reduction <add>, %206, %cst_54 [1] : vector<8x32xf32> to vector<8xf32>
    %208 = vector.shape_cast %207 : vector<8xf32> to vector<8x1xf32>
    %cst_55 = arith.constant 3.200000e+01 : f32
    %209 = vector.broadcast %cst_55 : f32 to vector<8x1xf32>
    %210 = arith.divf %208, %209 : vector<8x1xf32>
    %211 = vector.broadcast %203 : vector<8x1xf32> to vector<8x32xf32>
    %212 = arith.subf %197, %211 : vector<8x32xf32>
    %cst_56 = arith.constant 9.99999974E-6 : f32
    %213 = vector.broadcast %cst_56 : f32 to vector<8x1xf32>
    %214 = arith.addf %210, %213 : vector<8x1xf32>
    %215 = math.rsqrt %214 : vector<8x1xf32>
    %216 = vector.broadcast %215 : vector<8x1xf32> to vector<8x32xf32>
    %217 = arith.mulf %212, %216 : vector<8x32xf32>
    %218 = vector.broadcast %198 : vector<1x32xf32> to vector<8x32xf32>
    %219 = arith.mulf %217, %218 : vector<8x32xf32>
    %220 = vector.broadcast %199 : vector<1x32xf32> to vector<8x32xf32>
    %221 = arith.addf %219, %220 : vector<8x32xf32>
    %222 = arith.truncf %221 : vector<8x32xf32> to vector<8x32xbf16>
    %c0_57 = arith.constant 0 : index
    %c0_58 = arith.constant 0 : index
    %223 = vector.load %arg16[%c0_57, %c0_58] : memref<32x64xbf16, #tpu.memory_space<vmem>>, vector<32x64xbf16>
    %cst_59 = arith.constant dense<0.000000e+00> : vector<8x64xf32>
    %224 = tpu.matmul %222, %223, %cst_59 {dimension_numbers = #tpu.dot_dimension_numbers<[1], [0], [0], [1], [0, 0, 1, 1], [], []>} : vector<8x32xbf16>, vector<32x64xbf16>, vector<8x64xf32> -> vector<8x64xf32>
    %c0_60 = arith.constant 0 : index
    %c0_61 = arith.constant 0 : index
    %225 = vector.load %arg17[%c0_60, %c0_61] : memref<1x64xf32, #tpu.memory_space<vmem>>, vector<1x64xf32>
    %226 = vector.broadcast %225 : vector<1x64xf32> to vector<8x64xf32>
    %227 = arith.addf %224, %226 : vector<8x64xf32>
    %cst_62 = arith.constant 0.000000e+00 : f32
    %228 = vector.broadcast %cst_62 : f32 to vector<8x64xf32>
    %229 = arith.maximumf %227, %228 : vector<8x64xf32>
    %230 = arith.truncf %229 : vector<8x64xf32> to vector<8x64xbf16>
    %c0_63 = arith.constant 0 : index
    %c0_64 = arith.constant 0 : index
    %231 = vector.load %arg18[%c0_63, %c0_64] : memref<64x32xbf16, #tpu.memory_space<vmem>>, vector<64x32xbf16>
    %cst_65 = arith.constant dense<0.000000e+00> : vector<8x32xf32>
    %232 = tpu.matmul %230, %231, %cst_65 {dimension_numbers = #tpu.dot_dimension_numbers<[1], [0], [0], [1], [0, 0, 1, 1], [], []>} : vector<8x64xbf16>, vector<64x32xbf16>, vector<8x32xf32> -> vector<8x32xf32>
    %c0_66 = arith.constant 0 : index
    %c0_67 = arith.constant 0 : index
    %233 = vector.load %arg19[%c0_66, %c0_67] : memref<1x32xf32, #tpu.memory_space<vmem>>, vector<1x32xf32>
    %234 = vector.broadcast %233 : vector<1x32xf32> to vector<8x32xf32>
    %235 = arith.addf %232, %234 : vector<8x32xf32>
    %236 = arith.addf %221, %235 : vector<8x32xf32>
    %c0_68 = arith.constant 0 : index
    %c0_69 = arith.constant 0 : index
    %237 = vector.load %arg20[%c0_68, %c0_69] : memref<1x32xf32, #tpu.memory_space<vmem>>, vector<1x32xf32>
    %c0_70 = arith.constant 0 : index
    %c0_71 = arith.constant 0 : index
    %238 = vector.load %arg21[%c0_70, %c0_71] : memref<1x32xf32, #tpu.memory_space<vmem>>, vector<1x32xf32>
    %cst_72 = arith.constant dense<0.000000e+00> : vector<8xf32>
    %239 = vector.multi_reduction <add>, %236, %cst_72 [1] : vector<8x32xf32> to vector<8xf32>
    %240 = vector.shape_cast %239 : vector<8xf32> to vector<8x1xf32>
    %cst_73 = arith.constant 3.200000e+01 : f32
    %241 = vector.broadcast %cst_73 : f32 to vector<8x1xf32>
    %242 = arith.divf %240, %241 : vector<8x1xf32>
    %243 = vector.broadcast %242 : vector<8x1xf32> to vector<8x32xf32>
    %244 = arith.subf %236, %243 : vector<8x32xf32>
    %245 = arith.mulf %244, %244 : vector<8x32xf32>
    %cst_74 = arith.constant dense<0.000000e+00> : vector<8xf32>
    %246 = vector.multi_reduction <add>, %245, %cst_74 [1] : vector<8x32xf32> to vector<8xf32>
    %247 = vector.shape_cast %246 : vector<8xf32> to vector<8x1xf32>
    %cst_75 = arith.constant 3.200000e+01 : f32
    %248 = vector.broadcast %cst_75 : f32 to vector<8x1xf32>
    %249 = arith.divf %247, %248 : vector<8x1xf32>
    %250 = vector.broadcast %242 : vector<8x1xf32> to vector<8x32xf32>
    %251 = arith.subf %236, %250 : vector<8x32xf32>
    %cst_76 = arith.constant 9.99999974E-6 : f32
    %252 = vector.broadcast %cst_76 : f32 to vector<8x1xf32>
    %253 = arith.addf %249, %252 : vector<8x1xf32>
    %254 = math.rsqrt %253 : vector<8x1xf32>
    %255 = vector.broadcast %254 : vector<8x1xf32> to vector<8x32xf32>
    %256 = arith.mulf %251, %255 : vector<8x32xf32>
    %257 = vector.broadcast %237 : vector<1x32xf32> to vector<8x32xf32>
    %258 = arith.mulf %256, %257 : vector<8x32xf32>
    %259 = vector.broadcast %238 : vector<1x32xf32> to vector<8x32xf32>
    %260 = arith.addf %258, %259 : vector<8x32xf32>
    %261 = arith.truncf %260 : vector<8x32xf32> to vector<8x32xbf16>
    %c0_77 = arith.constant 0 : index
    %c0_78 = arith.constant 0 : index
    %c0_79 = arith.constant 0 : index
    %262 = vector.load %arg22[%c0_77, %c0_78, %c0_79] : memref<1x8x32xbf16, #tpu.memory_space<vmem>>, vector<1x8x32xbf16>
    %263 = vector.shape_cast %262 : vector<1x8x32xbf16> to vector<8x32xbf16>
    %264 = vector.shape_cast %261 : vector<8x32xbf16> to vector<1x8x32xbf16>
    tpu.vector_store %arg22[%c0_77, %c0_78, %c0_79], %264 {strides = array<i32>} : memref<1x8x32xbf16, #tpu.memory_space<vmem>>, vector<1x8x32xbf16>,
    return
  }
  func.func @transform_0(%arg0: i32, %arg1: i32) -> (i32, i32, i32) {
    %c0_i32 = arith.constant 0 : i32
    %c0_i32_0 = arith.constant 0 : i32
    %c0_i32_1 = arith.constant 0 : i32
    return %arg0, %c0_i32, %c0_i32_0 : i32, i32, i32
  }
  func.func @transform_1(%arg0: i32, %arg1: i32) -> (i32, i32, i32) {
    %c0_i32 = arith.constant 0 : i32
    %c0_i32_0 = arith.constant 0 : i32
    %c0_i32_1 = arith.constant 0 : i32
    return %arg0, %c0_i32, %c0_i32_0 : i32, i32, i32
  }
  func.func @transform_2(%arg0: i32, %arg1: i32) -> (i32, i32) {
    %c0_i32 = arith.constant 0 : i32
    %c0_i32_0 = arith.constant 0 : i32
    %c0_i32_1 = arith.constant 0 : i32
    return %c0_i32, %c0_i32_0 : i32, i32
  }
  func.func @transform_3(%arg0: i32, %arg1: i32) -> (i32, i32) {
    %c0_i32 = arith.constant 0 : i32
    %c0_i32_0 = arith.constant 0 : i32
    %c0_i32_1 = arith.constant 0 : i32
    return %c0_i32, %c0_i32_0 : i32, i32
  }
  func.func @transform_4(%arg0: i32, %arg1: i32) -> (i32, i32) {
    %c0_i32 = arith.constant 0 : i32
    %c0_i32_0 = arith.constant 0 : i32
    %c0_i32_1 = arith.constant 0 : i32
    return %c0_i32, %c0_i32_0 : i32, i32
  }
  func.func @transform_5(%arg0: i32, %arg1: i32) -> (i32, i32) {
    %c0_i32 = arith.constant 0 : i32
    %c0_i32_0 = arith.constant 0 : i32
    %c0_i32_1 = arith.constant 0 : i32
    return %c0_i32, %c0_i32_0 : i32, i32
  }
  func.func @transform_6(%arg0: i32, %arg1: i32) -> (i32, i32) {
    %c0_i32 = arith.constant 0 : i32
    %c0_i32_0 = arith.constant 0 : i32
    %c0_i32_1 = arith.constant 0 : i32
    return %c0_i32, %c0_i32_0 : i32, i32
  }
  func.func @transform_7(%arg0: i32, %arg1: i32) -> (i32, i32) {
    %c0_i32 = arith.constant 0 : i32
    %c0_i32_0 = arith.constant 0 : i32
    %c0_i32_1 = arith.constant 0 : i32
    return %c0_i32, %c0_i32_0 : i32, i32
  }
  func.func @transform_8(%arg0: i32, %arg1: i32) -> (i32, i32, i32) {
    %c0_i32 = arith.constant 0 : i32
    %c0_i32_0 = arith.constant 0 : i32
    %c0_i32_1 = arith.constant 0 : i32
    %c0_i32_2 = arith.constant 0 : i32
    return %c0_i32, %c0_i32_0, %c0_i32_1 : i32, i32, i32
  }
  func.func @transform_9(%arg0: i32, %arg1: i32) -> (i32, i32, i32) {
    %c0_i32 = arith.constant 0 : i32
    %c0_i32_0 = arith.constant 0 : i32
    %c0_i32_1 = arith.constant 0 : i32
    %c0_i32_2 = arith.constant 0 : i32
    return %c0_i32, %c0_i32_0, %c0_i32_1 : i32, i32, i32
  }
  func.func @transform_10(%arg0: i32, %arg1: i32) -> (i32, i32, i32) {
    %c0_i32 = arith.constant 0 : i32
    %c0_i32_0 = arith.constant 0 : i32
    %c0_i32_1 = arith.constant 0 : i32
    %c0_i32_2 = arith.constant 0 : i32
    return %c0_i32, %c0_i32_0, %c0_i32_1 : i32, i32, i32
  }
  func.func @transform_11(%arg0: i32, %arg1: i32) -> (i32, i32, i32) {
    %c0_i32 = arith.constant 0 : i32
    %c0_i32_0 = arith.constant 0 : i32
    %c0_i32_1 = arith.constant 0 : i32
    %c0_i32_2 = arith.constant 0 : i32
    return %c0_i32, %c0_i32_0, %c0_i32_1 : i32, i32, i32
  }
  func.func @transform_12(%arg0: i32, %arg1: i32) -> (i32, i32) {
    %c0_i32 = arith.constant 0 : i32
    %c0_i32_0 = arith.constant 0 : i32
    %c0_i32_1 = arith.constant 0 : i32
    return %c0_i32, %c0_i32_0 : i32, i32
  }
  func.func @transform_13(%arg0: i32, %arg1: i32) -> (i32, i32) {
    %c0_i32 = arith.constant 0 : i32
    %c0_i32_0 = arith.constant 0 : i32
    %c0_i32_1 = arith.constant 0 : i32
    return %c0_i32, %c0_i32_0 : i32, i32
  }
  func.func @transform_14(%arg0: i32, %arg1: i32) -> (i32, i32) {
    %c0_i32 = arith.constant 0 : i32
    %c0_i32_0 = arith.constant 0 : i32
    %c0_i32_1 = arith.constant 0 : i32
    return %c0_i32, %c0_i32_0 : i32, i32
  }
  func.func @transform_15(%arg0: i32, %arg1: i32) -> (i32, i32) {
    %c0_i32 = arith.constant 0 : i32
    %c0_i32_0 = arith.constant 0 : i32
    %c0_i32_1 = arith.constant 0 : i32
    return %c0_i32, %c0_i32_0 : i32, i32
  }
  func.func @transform_16(%arg0: i32, %arg1: i32) -> (i32, i32) {
    %c0_i32 = arith.constant 0 : i32
    %c0_i32_0 = arith.constant 0 : i32
    %c0_i32_1 = arith.constant 0 : i32
    return %c0_i32, %c0_i32_0 : i32, i32
  }
  func.func @transform_17(%arg0: i32, %arg1: i32) -> (i32, i32) {
    %c0_i32 = arith.constant 0 : i32
    %c0_i32_0 = arith.constant 0 : i32
    %c0_i32_1 = arith.constant 0 : i32
    return %c0_i32, %c0_i32_0 : i32, i32
  }
  func.func @transform_18(%arg0: i32, %arg1: i32) -> (i32, i32) {
    %c0_i32 = arith.constant 0 : i32
    %c0_i32_0 = arith.constant 0 : i32
    %c0_i32_1 = arith.constant 0 : i32
    return %c0_i32, %c0_i32_0 : i32, i32
  }
  func.func @transform_19(%arg0: i32, %arg1: i32) -> (i32, i32) {
    %c0_i32 = arith.constant 0 : i32
    %c0_i32_0 = arith.constant 0 : i32
    %c0_i32_1 = arith.constant 0 : i32
    return %c0_i32, %c0_i32_0 : i32, i32
  }
  func.func @transform_20(%arg0: i32, %arg1: i32) -> (i32, i32, i32) {
    %c0_i32 = arith.constant 0 : i32
    %c0_i32_0 = arith.constant 0 : i32
    return %arg0, %arg1, %c0_i32 : i32, i32, i32
  }
}

module attributes {stable_mosaic.version = 11 : i64} {
  func.func @_mask_bias_kernel(%arg0: memref<2x8x32xf32, #tpu.memory_space<vmem>>, %arg1: memref<2x8xf32, #tpu.memory_space<vmem>>) attributes {dimension_semantics = [], scalar_prefetch = 0 : i64, scratch_operands = 0 : i64, tpu.core_type = #tpu.core_type<tc>} {
    %c0 = arith.constant 0 : index
    %c0_0 = arith.constant 0 : index
    %c0_1 = arith.constant 0 : index
    %0 = vector.load %arg0[%c0, %c0_0, %c0_1] : memref<2x8x32xf32, #tpu.memory_space<vmem>>, vector<2x8x32xf32>
    %cst = arith.constant dense<0.000000e+00> : vector<2x8xf32>
    %1 = vector.multi_reduction <add>, %0, %cst [2] : vector<2x8x32xf32> to vector<2x8xf32>
    %cst_2 = arith.constant 0.000000e+00 : f32
    %2 = vector.broadcast %cst_2 : f32 to vector<2x8xf32>
    %3 = arith.cmpf oeq, %1, %2 : vector<2x8xf32>
    %cst_3 = arith.constant -1.000000e+30 : f32
    %cst_4 = arith.constant 0.000000e+00 : f32
    %4 = vector.broadcast %cst_3 : f32 to vector<2x8xf32>
    %5 = vector.broadcast %cst_4 : f32 to vector<2x8xf32>
    %6 = arith.select %3, %4, %5 : vector<2x8xi1>, vector<2x8xf32>
    %c0_5 = arith.constant 0 : index
    %c0_6 = arith.constant 0 : index
    %7 = vector.load %arg1[%c0_5, %c0_6] : memref<2x8xf32, #tpu.memory_space<vmem>>, vector<2x8xf32>
    tpu.vector_store %arg1[%c0_5, %c0_6], %6 {strides = array<i32>} : memref<2x8xf32, #tpu.memory_space<vmem>>, vector<2x8xf32>,
    return
  }
}

module attributes {stable_mosaic.version = 11 : i64} {
  func.func @_encoder_layer_kernel(%arg0: i32, %arg1: i32, %arg2: memref<1x8x32xbf16, #tpu.memory_space<vmem>>, %arg3: memref<1x1x8xf32, #tpu.memory_space<vmem>>, %arg4: memref<32x96xbf16, #tpu.memory_space<vmem>>, %arg5: memref<1x96xf32, #tpu.memory_space<vmem>>, %arg6: memref<32x96xbf16, #tpu.memory_space<vmem>>, %arg7: memref<1x96xf32, #tpu.memory_space<vmem>>, %arg8: memref<32x96xbf16, #tpu.memory_space<vmem>>, %arg9: memref<1x96xf32, #tpu.memory_space<vmem>>, %arg10: memref<3x32x32xbf16, #tpu.memory_space<vmem>>, %arg11: memref<3x1x32xf32, #tpu.memory_space<vmem>>, %arg12: memref<3x1x32xf32, #tpu.memory_space<vmem>>, %arg13: memref<3x1x32xf32, #tpu.memory_space<vmem>>, %arg14: memref<1x32xf32, #tpu.memory_space<vmem>>, %arg15: memref<1x32xf32, #tpu.memory_space<vmem>>, %arg16: memref<32x64xbf16, #tpu.memory_space<vmem>>, %arg17: memref<1x64xf32, #tpu.memory_space<vmem>>, %arg18: memref<64x32xbf16, #tpu.memory_space<vmem>>, %arg19: memref<1x32xf32, #tpu.memory_space<vmem>>, %arg20: memref<1x32xf32, #tpu.memory_space<vmem>>, %arg21: memref<1x32xf32, #tpu.memory_space<vmem>>, %arg22: memref<1x8x32xbf16, #tpu.memory_space<vmem>>) attributes {dimension_semantics = [#tpu.dimension_semantics<parallel>, #tpu.dimension_semantics<parallel>], iteration_bounds = array<i64: 2, 1>, scalar_prefetch = 0 : i64, scratch_operands = 0 : i64, tpu.core_type = #tpu.core_type<tc>, window_params = [{transform_indices = @transform_0, window_bounds = array<i64: 1, 8, 32>}, {transform_indices = @transform_1, window_bounds = array<i64: 1, 1, 8>}, {pipeline_mode = #tpu.pipeline_mode<synchronous>, transform_indices = @transform_2, window_bounds = array<i64: 32, 96>}, {pipeline_mode = #tpu.pipeline_mode<synchronous>, transform_indices = @transform_3, window_bounds = array<i64: 1, 96>}, {pipeline_mode = #tpu.pipeline_mode<synchronous>, transform_indices = @transform_4, window_bounds = array<i64: 32, 96>}, {pipeline_mode = #tpu.pipeline_mode<synchronous>, transform_indices = @transform_5, window_bounds = array<i64: 1, 96>}, {pipeline_mode = #tpu.pipeline_mode<synchronous>, transform_indices = @transform_6, window_bounds = array<i64: 32, 96>}, {pipeline_mode = #tpu.pipeline_mode<synchronous>, transform_indices = @transform_7, window_bounds = array<i64: 1, 96>}, {pipeline_mode = #tpu.pipeline_mode<synchronous>, transform_indices = @transform_8, window_bounds = array<i64: 3, 32, 32>}, {pipeline_mode = #tpu.pipeline_mode<synchronous>, transform_indices = @transform_9, window_bounds = array<i64: 3, 1, 32>}, {pipeline_mode = #tpu.pipeline_mode<synchronous>, transform_indices = @transform_10, window_bounds = array<i64: 3, 1, 32>}, {pipeline_mode = #tpu.pipeline_mode<synchronous>, transform_indices = @transform_11, window_bounds = array<i64: 3, 1, 32>}, {pipeline_mode = #tpu.pipeline_mode<synchronous>, transform_indices = @transform_12, window_bounds = array<i64: 1, 32>}, {pipeline_mode = #tpu.pipeline_mode<synchronous>, transform_indices = @transform_13, window_bounds = array<i64: 1, 32>}, {pipeline_mode = #tpu.pipeline_mode<synchronous>, transform_indices = @transform_14, window_bounds = array<i64: 32, 64>}, {pipeline_mode = #tpu.pipeline_mode<synchronous>, transform_indices = @transform_15, window_bounds = array<i64: 1, 64>}, {pipeline_mode = #tpu.pipeline_mode<synchronous>, transform_indices = @transform_16, window_bounds = array<i64: 64, 32>}, {pipeline_mode = #tpu.pipeline_mode<synchronous>, transform_indices = @transform_17, window_bounds = array<i64: 1, 32>}, {pipeline_mode = #tpu.pipeline_mode<synchronous>, transform_indices = @transform_18, window_bounds = array<i64: 1, 32>}, {pipeline_mode = #tpu.pipeline_mode<synchronous>, transform_indices = @transform_19, window_bounds = array<i64: 1, 32>}, {transform_indices = @transform_20, window_bounds = array<i64: 1, 8, 32>}]} {
    %c0 = arith.constant 0 : index
    %c0_0 = arith.constant 0 : index
    %c0_1 = arith.constant 0 : index
    %0 = vector.load %arg2[%c0, %c0_0, %c0_1] : memref<1x8x32xbf16, #tpu.memory_space<vmem>>, vector<1x8x32xbf16>
    %1 = vector.shape_cast %0 : vector<1x8x32xbf16> to vector<8x32xbf16>
    %c8_i32 = arith.constant 8 : i32
    %2 = arith.muli %arg1, %c8_i32 : i32
    %3 = tpu.assume_multiple %2, 8 : i32
    %c0_2 = arith.constant 0 : index
    %4 = arith.index_cast %3 : i32 to index
    %c0_3 = arith.constant 0 : index
    %5 = vector.load %arg2[%c0_2, %4, %c0_3] : memref<1x8x32xbf16, #tpu.memory_space<vmem>>, vector<1x8x32xbf16>
    %6 = vector.shape_cast %5 : vector<1x8x32xbf16> to vector<8x32xbf16>
    %7 = arith.extf %6 : vector<8x32xbf16> to vector<8x32xf32>
    %c0_4 = arith.constant 0 : index
    %c0_5 = arith.constant 0 : index
    %c0_6 = arith.constant 0 : index
    %8 = vector.load %arg3[%c0_4, %c0_5, %c0_6] : memref<1x1x8xf32, #tpu.memory_space<vmem>>, vector<1x1x8xf32>
    %9 = vector.shape_cast %8 : vector<1x1x8xf32> to vector<1x8xf32>
    %c0_7 = arith.constant 0 : index
    %c0_8 = arith.constant 0 : index
    %10 = vector.load %arg4[%c0_7, %c0_8] : memref<32x96xbf16, #tpu.memory_space<vmem>>, vector<32x96xbf16>
    %c0_9 = arith.constant 0 : index
    %c0_10 = arith.constant 0 : index
    %11 = vector.load %arg5[%c0_9, %c0_10] : memref<1x96xf32, #tpu.memory_space<vmem>>, vector<1x96xf32>
    %c0_11 = arith.constant 0 : index
    %c0_12 = arith.constant 0 : index
    %12 = vector.load %arg6[%c0_11, %c0_12] : memref<32x96xbf16, #tpu.memory_space<vmem>>, vector<32x96xbf16>
    %c0_13 = arith.constant 0 : index
    %c0_14 = arith.constant 0 : index
    %13 = vector.load %arg7[%c0_13, %c0_14] : memref<1x96xf32, #tpu.memory_space<vmem>>, vector<1x96xf32>
    %c0_15 = arith.constant 0 : index
    %c0_16 = arith.constant 0 : index
    %14 = vector.load %arg8[%c0_15, %c0_16] : memref<32x96xbf16, #tpu.memory_space<vmem>>, vector<32x96xbf16>
    %c0_17 = arith.constant 0 : index
    %c0_18 = arith.constant 0 : index
    %15 = vector.load %arg9[%c0_17, %c0_18] : memref<1x96xf32, #tpu.memory_space<vmem>>, vector<1x96xf32>
    %cst = arith.constant dense<0.000000e+00> : vector<8x96xf32>
    %16 = tpu.matmul %6, %10, %cst {dimension_numbers = #tpu.dot_dimension_numbers<[1], [0], [0], [1], [0, 0, 1, 1], [], []>} : vector<8x32xbf16>, vector<32x96xbf16>, vector<8x96xf32> -> vector<8x96xf32>
    %17 = vector.broadcast %11 : vector<1x96xf32> to vector<8x96xf32>
    %18 = arith.addf %16, %17 : vector<8x96xf32>
    %cst_19 = arith.constant dense<0.000000e+00> : vector<8x96xf32>
    %19 = tpu.matmul %1, %12, %cst_19 {dimension_numbers = #tpu.dot_dimension_numbers<[1], [0], [0], [1], [0, 0, 1, 1], [], []>} : vector<8x32xbf16>, vector<32x96xbf16>, vector<8x96xf32> -> vector<8x96xf32>
    %20 = vector.broadcast %13 : vector<1x96xf32> to vector<8x96xf32>
    %21 = arith.addf %19, %20 : vector<8x96xf32>
    %cst_20 = arith.constant dense<0.000000e+00> : vector<8x96xf32>
    %22 = tpu.matmul %1, %14, %cst_20 {dimension_numbers = #tpu.dot_dimension_numbers<[1], [0], [0], [1], [0, 0, 1, 1], [], []>} : vector<8x32xbf16>, vector<32x96xbf16>, vector<8x96xf32> -> vector<8x96xf32>
    %23 = vector.broadcast %15 : vector<1x96xf32> to vector<8x96xf32>
    %24 = arith.addf %22, %23 : vector<8x96xf32>
    %25 = vector.extract_strided_slice %18 {offsets = [0, 0], sizes = [8, 8], strides = [1, 1]} : vector<8x96xf32> to vector<8x8xf32>
    %26 = vector.extract_strided_slice %18 {offsets = [0, 8], sizes = [8, 8], strides = [1, 1]} : vector<8x96xf32> to vector<8x8xf32>
    %27 = vector.extract_strided_slice %18 {offsets = [0, 16], sizes = [8, 8], strides = [1, 1]} : vector<8x96xf32> to vector<8x8xf32>
    %28 = vector.extract_strided_slice %18 {offsets = [0, 24], sizes = [8, 8], strides = [1, 1]} : vector<8x96xf32> to vector<8x8xf32>
    %29 = vector.extract_strided_slice %18 {offsets = [0, 32], sizes = [8, 8], strides = [1, 1]} : vector<8x96xf32> to vector<8x8xf32>
    %30 = vector.extract_strided_slice %18 {offsets = [0, 40], sizes = [8, 8], strides = [1, 1]} : vector<8x96xf32> to vector<8x8xf32>
    %31 = vector.extract_strided_slice %18 {offsets = [0, 48], sizes = [8, 8], strides = [1, 1]} : vector<8x96xf32> to vector<8x8xf32>
    %32 = vector.extract_strided_slice %18 {offsets = [0, 56], sizes = [8, 8], strides = [1, 1]} : vector<8x96xf32> to vector<8x8xf32>
    %33 = vector.extract_strided_slice %18 {offsets = [0, 64], sizes = [8, 8], strides = [1, 1]} : vector<8x96xf32> to vector<8x8xf32>
    %34 = vector.extract_strided_slice %18 {offsets = [0, 72], sizes = [8, 8], strides = [1, 1]} : vector<8x96xf32> to vector<8x8xf32>
    %35 = vector.extract_strided_slice %18 {offsets = [0, 80], sizes = [8, 8], strides = [1, 1]} : vector<8x96xf32> to vector<8x8xf32>
    %36 = vector.extract_strided_slice %18 {offsets = [0, 88], sizes = [8, 8], strides = [1, 1]} : vector<8x96xf32> to vector<8x8xf32>
    %37 = vector.shape_cast %25 : vector<8x8xf32> to vector<1x8x8xf32>
    %38 = vector.shape_cast %26 : vector<8x8xf32> to vector<1x8x8xf32>
    %39 = vector.shape_cast %27 : vector<8x8xf32> to vector<1x8x8xf32>
    %40 = vector.shape_cast %28 : vector<8x8xf32> to vector<1x8x8xf32>
    %41 = vector.shape_cast %29 : vector<8x8xf32> to vector<1x8x8xf32>
    %42 = vector.shape_cast %30 : vector<8x8xf32> to vector<1x8x8xf32>
    %43 = vector.shape_cast %31 : vector<8x8xf32> to vector<1x8x8xf32>
    %44 = vector.shape_cast %32 : vector<8x8xf32> to vector<1x8x8xf32>
    %45 = vector.shape_cast %33 : vector<8x8xf32> to vector<1x8x8xf32>
    %46 = vector.shape_cast %34 : vector<8x8xf32> to vector<1x8x8xf32>
    %47 = vector.shape_cast %35 : vector<8x8xf32> to vector<1x8x8xf32>
    %48 = vector.shape_cast %36 : vector<8x8xf32> to vector<1x8x8xf32>
    %49 = tpu.concatenate %37, %38, %39, %40, %41, %42, %43, %44, %45, %46, %47, %48 in 0 : vector<1x8x8xf32>, vector<1x8x8xf32>, vector<1x8x8xf32>, vector<1x8x8xf32>, vector<1x8x8xf32>, vector<1x8x8xf32>, vector<1x8x8xf32>, vector<1x8x8xf32>, vector<1x8x8xf32>, vector<1x8x8xf32>, vector<1x8x8xf32>, vector<1x8x8xf32> -> vector<12x8x8xf32>
    %50 = arith.truncf %49 : vector<12x8x8xf32> to vector<12x8x8xbf16>
    %51 = vector.extract_strided_slice %21 {offsets = [0, 0], sizes = [8, 8], strides = [1, 1]} : vector<8x96xf32> to vector<8x8xf32>
    %52 = vector.extract_strided_slice %21 {offsets = [0, 8], sizes = [8, 8], strides = [1, 1]} : vector<8x96xf32> to vector<8x8xf32>
    %53 = vector.extract_strided_slice %21 {offsets = [0, 16], sizes = [8, 8], strides = [1, 1]} : vector<8x96xf32> to vector<8x8xf32>
    %54 = vector.extract_strided_slice %21 {offsets = [0, 24], sizes = [8, 8], strides = [1, 1]} : vector<8x96xf32> to vector<8x8xf32>
    %55 = vector.extract_strided_slice %21 {offsets = [0, 32], sizes = [8, 8], strides = [1, 1]} : vector<8x96xf32> to vector<8x8xf32>
    %56 = vector.extract_strided_slice %21 {offsets = [0, 40], sizes = [8, 8], strides = [1, 1]} : vector<8x96xf32> to vector<8x8xf32>
    %57 = vector.extract_strided_slice %21 {offsets = [0, 48], sizes = [8, 8], strides = [1, 1]} : vector<8x96xf32> to vector<8x8xf32>
    %58 = vector.extract_strided_slice %21 {offsets = [0, 56], sizes = [8, 8], strides = [1, 1]} : vector<8x96xf32> to vector<8x8xf32>
    %59 = vector.extract_strided_slice %21 {offsets = [0, 64], sizes = [8, 8], strides = [1, 1]} : vector<8x96xf32> to vector<8x8xf32>
    %60 = vector.extract_strided_slice %21 {offsets = [0, 72], sizes = [8, 8], strides = [1, 1]} : vector<8x96xf32> to vector<8x8xf32>
    %61 = vector.extract_strided_slice %21 {offsets = [0, 80], sizes = [8, 8], strides = [1, 1]} : vector<8x96xf32> to vector<8x8xf32>
    %62 = vector.extract_strided_slice %21 {offsets = [0, 88], sizes = [8, 8], strides = [1, 1]} : vector<8x96xf32> to vector<8x8xf32>
    %63 = vector.shape_cast %51 : vector<8x8xf32> to vector<1x8x8xf32>
    %64 = vector.shape_cast %52 : vector<8x8xf32> to vector<1x8x8xf32>
    %65 = vector.shape_cast %53 : vector<8x8xf32> to vector<1x8x8xf32>
    %66 = vector.shape_cast %54 : vector<8x8xf32> to vector<1x8x8xf32>
    %67 = vector.shape_cast %55 : vector<8x8xf32> to vector<1x8x8xf32>
    %68 = vector.shape_cast %56 : vector<8x8xf32> to vector<1x8x8xf32>
    %69 = vector.shape_cast %57 : vector<8x8xf32> to vector<1x8x8xf32>
    %70 = vector.shape_cast %58 : vector<8x8xf32> to vector<1x8x8xf32>
    %71 = vector.shape_cast %59 : vector<8x8xf32> to vector<1x8x8xf32>
    %72 = vector.shape_cast %60 : vector<8x8xf32> to vector<1x8x8xf32>
    %73 = vector.shape_cast %61 : vector<8x8xf32> to vector<1x8x8xf32>
    %74 = vector.shape_cast %62 : vector<8x8xf32> to vector<1x8x8xf32>
    %75 = tpu.concatenate %63, %64, %65, %66, %67, %68, %69, %70, %71, %72, %73, %74 in 0 : vector<1x8x8xf32>, vector<1x8x8xf32>, vector<1x8x8xf32>, vector<1x8x8xf32>, vector<1x8x8xf32>, vector<1x8x8xf32>, vector<1x8x8xf32>, vector<1x8x8xf32>, vector<1x8x8xf32>, vector<1x8x8xf32>, vector<1x8x8xf32>, vector<1x8x8xf32> -> vector<12x8x8xf32>
    %76 = arith.truncf %75 : vector<12x8x8xf32> to vector<12x8x8xbf16>
    %77 = vector.extract_strided_slice %24 {offsets = [0, 0], sizes = [8, 8], strides = [1, 1]} : vector<8x96xf32> to vector<8x8xf32>
    %78 = vector.extract_strided_slice %24 {offsets = [0, 8], sizes = [8, 8], strides = [1, 1]} : vector<8x96xf32> to vector<8x8xf32>
    %79 = vector.extract_strided_slice %24 {offsets = [0, 16], sizes = [8, 8], strides = [1, 1]} : vector<8x96xf32> to vector<8x8xf32>
    %80 = vector.extract_strided_slice %24 {offsets = [0, 24], sizes = [8, 8], strides = [1, 1]} : vector<8x96xf32> to vector<8x8xf32>
    %81 = vector.extract_strided_slice %24 {offsets = [0, 32], sizes = [8, 8], strides = [1, 1]} : vector<8x96xf32> to vector<8x8xf32>
    %82 = vector.extract_strided_slice %24 {offsets = [0, 40], sizes = [8, 8], strides = [1, 1]} : vector<8x96xf32> to vector<8x8xf32>
    %83 = vector.extract_strided_slice %24 {offsets = [0, 48], sizes = [8, 8], strides = [1, 1]} : vector<8x96xf32> to vector<8x8xf32>
    %84 = vector.extract_strided_slice %24 {offsets = [0, 56], sizes = [8, 8], strides = [1, 1]} : vector<8x96xf32> to vector<8x8xf32>
    %85 = vector.extract_strided_slice %24 {offsets = [0, 64], sizes = [8, 8], strides = [1, 1]} : vector<8x96xf32> to vector<8x8xf32>
    %86 = vector.extract_strided_slice %24 {offsets = [0, 72], sizes = [8, 8], strides = [1, 1]} : vector<8x96xf32> to vector<8x8xf32>
    %87 = vector.extract_strided_slice %24 {offsets = [0, 80], sizes = [8, 8], strides = [1, 1]} : vector<8x96xf32> to vector<8x8xf32>
    %88 = vector.extract_strided_slice %24 {offsets = [0, 88], sizes = [8, 8], strides = [1, 1]} : vector<8x96xf32> to vector<8x8xf32>
    %89 = vector.shape_cast %77 : vector<8x8xf32> to vector<1x8x8xf32>
    %90 = vector.shape_cast %78 : vector<8x8xf32> to vector<1x8x8xf32>
    %91 = vector.shape_cast %79 : vector<8x8xf32> to vector<1x8x8xf32>
    %92 = vector.shape_cast %80 : vector<8x8xf32> to vector<1x8x8xf32>
    %93 = vector.shape_cast %81 : vector<8x8xf32> to vector<1x8x8xf32>
    %94 = vector.shape_cast %82 : vector<8x8xf32> to vector<1x8x8xf32>
    %95 = vector.shape_cast %83 : vector<8x8xf32> to vector<1x8x8xf32>
    %96 = vector.shape_cast %84 : vector<8x8xf32> to vector<1x8x8xf32>
    %97 = vector.shape_cast %85 : vector<8x8xf32> to vector<1x8x8xf32>
    %98 = vector.shape_cast %86 : vector<8x8xf32> to vector<1x8x8xf32>
    %99 = vector.shape_cast %87 : vector<8x8xf32> to vector<1x8x8xf32>
    %100 = vector.shape_cast %88 : vector<8x8xf32> to vector<1x8x8xf32>
    %101 = tpu.concatenate %89, %90, %91, %92, %93, %94, %95, %96, %97, %98, %99, %100 in 0 : vector<1x8x8xf32>, vector<1x8x8xf32>, vector<1x8x8xf32>, vector<1x8x8xf32>, vector<1x8x8xf32>, vector<1x8x8xf32>, vector<1x8x8xf32>, vector<1x8x8xf32>, vector<1x8x8xf32>, vector<1x8x8xf32>, vector<1x8x8xf32>, vector<1x8x8xf32> -> vector<12x8x8xf32>
    %102 = arith.truncf %101 : vector<12x8x8xf32> to vector<12x8x8xbf16>
    %cst_21 = arith.constant 0xFF800000 : f32
    %103 = vector.broadcast %cst_21 : f32 to vector<12x8x1xf32>
    %cst_22 = arith.constant 0.000000e+00 : f32
    %104 = vector.broadcast %cst_22 : f32 to vector<12x8x1xf32>
    %cst_23 = arith.constant 0.000000e+00 : f32
    %105 = vector.broadcast %cst_23 : f32 to vector<12x8x8xf32>
    "tpu.trace_start"() <{level = 10 : i32, message = "hqd,hkd->hqk"}> : () -> ()
    %cst_24 = arith.constant dense<0.000000e+00> : vector<12x8x8xf32>
    %106 = tpu.matmul %50, %76, %cst_24 {dimension_numbers = #tpu.dot_dimension_numbers<[2], [2], [1], [1], [0, 0, 0, 1, 1, 1], [0], [0]>} : vector<12x8x8xbf16>, vector<12x8x8xbf16>, vector<12x8x8xf32> -> vector<12x8x8xf32>
    "tpu.trace_stop"() : () -> ()
    %107 = vector.shape_cast %9 : vector<1x8xf32> to vector<1x1x8xf32>
    %108 = vector.broadcast %107 : vector<1x1x8xf32> to vector<12x8x8xf32>
    %109 = arith.addf %106, %108 : vector<12x8x8xf32>
    %cst_25 = arith.constant dense<0xFF800000> : vector<12x8xf32>
    %110 = vector.multi_reduction <maximumf>, %109, %cst_25 [2] : vector<12x8x8xf32> to vector<12x8xf32>
    %111 = vector.shape_cast %110 : vector<12x8xf32> to vector<12x8x1xf32>
    %112 = arith.maximumf %103, %111 : vector<12x8x1xf32>
    %113 = arith.subf %103, %112 : vector<12x8x1xf32>
    %114 = math.exp %113 : vector<12x8x1xf32>
    %115 = vector.broadcast %112 : vector<12x8x1xf32> to vector<12x8x8xf32>
    %116 = arith.subf %109, %115 : vector<12x8x8xf32>
    %117 = math.exp %116 : vector<12x8x8xf32>
    %118 = arith.mulf %114, %104 : vector<12x8x1xf32>
    %cst_26 = arith.constant dense<0.000000e+00> : vector<12x8xf32>
    %119 = vector.multi_reduction <add>, %117, %cst_26 [2] : vector<12x8x8xf32> to vector<12x8xf32>
    %120 = vector.shape_cast %119 : vector<12x8xf32> to vector<12x8x1xf32>
    %121 = arith.addf %118, %120 : vector<12x8x1xf32>
    %122 = vector.broadcast %114 : vector<12x8x1xf32> to vector<12x8x8xf32>
    %123 = arith.mulf %122, %105 : vector<12x8x8xf32>
    %124 = arith.truncf %117 : vector<12x8x8xf32> to vector<12x8x8xbf16>
    "tpu.trace_start"() <{level = 10 : i32, message = "hqk,hkd->hqd"}> : () -> ()
    %cst_27 = arith.constant dense<0.000000e+00> : vector<12x8x8xf32>
    %125 = tpu.matmul %124, %102, %cst_27 {dimension_numbers = #tpu.dot_dimension_numbers<[2], [1], [1], [2], [0, 0, 0, 1, 1, 2], [0], [0]>} : vector<12x8x8xbf16>, vector<12x8x8xbf16>, vector<12x8x8xf32> -> vector<12x8x8xf32>
    "tpu.trace_stop"() : () -> ()
    %126 = arith.addf %123, %125 : vector<12x8x8xf32>
    %127 = tpu.reciprocal %121 {approx = true} : vector<12x8x1xf32> -> vector<12x8x1xf32>
    %128 = vector.broadcast %127 : vector<12x8x1xf32> to vector<12x8x8xf32>
    %129 = arith.mulf %126, %128 : vector<12x8x8xf32>
    %130 = vector.extract_strided_slice %129 {offsets = [0, 0, 0], sizes = [1, 8, 8], strides = [1, 1, 1]} : vector<12x8x8xf32> to vector<1x8x8xf32>
    %131 = vector.shape_cast %130 : vector<1x8x8xf32> to vector<8x8xf32>
    %132 = vector.extract_strided_slice %129 {offsets = [1, 0, 0], sizes = [1, 8, 8], strides = [1, 1, 1]} : vector<12x8x8xf32> to vector<1x8x8xf32>
    %133 = vector.shape_cast %132 : vector<1x8x8xf32> to vector<8x8xf32>
    %134 = vector.extract_strided_slice %129 {offsets = [2, 0, 0], sizes = [1, 8, 8], strides = [1, 1, 1]} : vector<12x8x8xf32> to vector<1x8x8xf32>
    %135 = vector.shape_cast %134 : vector<1x8x8xf32> to vector<8x8xf32>
    %136 = vector.extract_strided_slice %129 {offsets = [3, 0, 0], sizes = [1, 8, 8], strides = [1, 1, 1]} : vector<12x8x8xf32> to vector<1x8x8xf32>
    %137 = vector.shape_cast %136 : vector<1x8x8xf32> to vector<8x8xf32>
    %138 = tpu.concatenate %131, %133, %135, %137 in 1 : vector<8x8xf32>, vector<8x8xf32>, vector<8x8xf32>, vector<8x8xf32> -> vector<8x32xf32>
    %139 = vector.extract_strided_slice %129 {offsets = [4, 0, 0], sizes = [1, 8, 8], strides = [1, 1, 1]} : vector<12x8x8xf32> to vector<1x8x8xf32>
    %140 = vector.shape_cast %139 : vector<1x8x8xf32> to vector<8x8xf32>
    %141 = vector.extract_strided_slice %129 {offsets = [5, 0, 0], sizes = [1, 8, 8], strides = [1, 1, 1]} : vector<12x8x8xf32> to vector<1x8x8xf32>
    %142 = vector.shape_cast %141 : vector<1x8x8xf32> to vector<8x8xf32>
    %143 = vector.extract_strided_slice %129 {offsets = [6, 0, 0], sizes = [1, 8, 8], strides = [1, 1, 1]} : vector<12x8x8xf32> to vector<1x8x8xf32>
    %144 = vector.shape_cast %143 : vector<1x8x8xf32> to vector<8x8xf32>
    %145 = vector.extract_strided_slice %129 {offsets = [7, 0, 0], sizes = [1, 8, 8], strides = [1, 1, 1]} : vector<12x8x8xf32> to vector<1x8x8xf32>
    %146 = vector.shape_cast %145 : vector<1x8x8xf32> to vector<8x8xf32>
    %147 = tpu.concatenate %140, %142, %144, %146 in 1 : vector<8x8xf32>, vector<8x8xf32>, vector<8x8xf32>, vector<8x8xf32> -> vector<8x32xf32>
    %148 = vector.extract_strided_slice %129 {offsets = [8, 0, 0], sizes = [1, 8, 8], strides = [1, 1, 1]} : vector<12x8x8xf32> to vector<1x8x8xf32>
    %149 = vector.shape_cast %148 : vector<1x8x8xf32> to vector<8x8xf32>
    %150 = vector.extract_strided_slice %129 {offsets = [9, 0, 0], sizes = [1, 8, 8], strides = [1, 1, 1]} : vector<12x8x8xf32> to vector<1x8x8xf32>
    %151 = vector.shape_cast %150 : vector<1x8x8xf32> to vector<8x8xf32>
    %152 = vector.extract_strided_slice %129 {offsets = [10, 0, 0], sizes = [1, 8, 8], strides = [1, 1, 1]} : vector<12x8x8xf32> to vector<1x8x8xf32>
    %153 = vector.shape_cast %152 : vector<1x8x8xf32> to vector<8x8xf32>
    %154 = vector.extract_strided_slice %129 {offsets = [11, 0, 0], sizes = [1, 8, 8], strides = [1, 1, 1]} : vector<12x8x8xf32> to vector<1x8x8xf32>
    %155 = vector.shape_cast %154 : vector<1x8x8xf32> to vector<8x8xf32>
    %156 = tpu.concatenate %149, %151, %153, %155 in 1 : vector<8x8xf32>, vector<8x8xf32>, vector<8x8xf32>, vector<8x8xf32> -> vector<8x32xf32>
    %157 = vector.shape_cast %138 : vector<8x32xf32> to vector<1x8x32xf32>
    %158 = vector.shape_cast %147 : vector<8x32xf32> to vector<1x8x32xf32>
    %159 = vector.shape_cast %156 : vector<8x32xf32> to vector<1x8x32xf32>
    %160 = tpu.concatenate %157, %158, %159 in 0 : vector<1x8x32xf32>, vector<1x8x32xf32>, vector<1x8x32xf32> -> vector<3x8x32xf32>
    %161 = arith.truncf %160 : vector<3x8x32xf32> to vector<3x8x32xbf16>
    %c0_28 = arith.constant 0 : index
    %c0_29 = arith.constant 0 : index
    %c0_30 = arith.constant 0 : index
    %162 = vector.load %arg10[%c0_28, %c0_29, %c0_30] : memref<3x32x32xbf16, #tpu.memory_space<vmem>>, vector<3x32x32xbf16>
    "tpu.trace_start"() <{level = 10 : i32, message = "mtv,mvd->mtd"}> : () -> ()
    %cst_31 = arith.constant dense<0.000000e+00> : vector<3x8x32xf32>
    %163 = tpu.matmul %161, %162, %cst_31 {dimension_numbers = #tpu.dot_dimension_numbers<[2], [1], [1], [2], [0, 0, 0, 1, 1, 2], [0], [0]>} : vector<3x8x32xbf16>, vector<3x32x32xbf16>, vector<3x8x32xf32> -> vector<3x8x32xf32>
    "tpu.trace_stop"() : () -> ()
    %c0_32 = arith.constant 0 : index
    %c0_33 = arith.constant 0 : index
    %c0_34 = arith.constant 0 : index
    %164 = vector.load %arg11[%c0_32, %c0_33, %c0_34] : memref<3x1x32xf32, #tpu.memory_space<vmem>>, vector<3x1x32xf32>
    %165 = vector.broadcast %164 : vector<3x1x32xf32> to vector<3x8x32xf32>
    %166 = arith.addf %163, %165 : vector<3x8x32xf32>
    %167 = vector.shape_cast %7 : vector<8x32xf32> to vector<1x8x32xf32>
    %168 = vector.broadcast %167 : vector<1x8x32xf32> to vector<3x8x32xf32>
    %169 = arith.addf %168, %166 : vector<3x8x32xf32>
    %c0_35 = arith.constant 0 : index
    %c0_36 = arith.constant 0 : index
    %c0_37 = arith.constant 0 : index
    %170 = vector.load %arg12[%c0_35, %c0_36, %c0_37] : memref<3x1x32xf32, #tpu.memory_space<vmem>>, vector<3x1x32xf32>
    %c0_38 = arith.constant 0 : index
    %c0_39 = arith.constant 0 : index
    %c0_40 = arith.constant 0 : index
    %171 = vector.load %arg13[%c0_38, %c0_39, %c0_40] : memref<3x1x32xf32, #tpu.memory_space<vmem>>, vector<3x1x32xf32>
    %cst_41 = arith.constant dense<0.000000e+00> : vector<3x8xf32>
    %172 = vector.multi_reduction <add>, %169, %cst_41 [2] : vector<3x8x32xf32> to vector<3x8xf32>
    %173 = vector.shape_cast %172 : vector<3x8xf32> to vector<3x8x1xf32>
    %cst_42 = arith.constant 3.200000e+01 : f32
    %174 = vector.broadcast %cst_42 : f32 to vector<3x8x1xf32>
    %175 = arith.divf %173, %174 : vector<3x8x1xf32>
    %176 = vector.broadcast %175 : vector<3x8x1xf32> to vector<3x8x32xf32>
    %177 = arith.subf %169, %176 : vector<3x8x32xf32>
    %178 = arith.mulf %177, %177 : vector<3x8x32xf32>
    %cst_43 = arith.constant dense<0.000000e+00> : vector<3x8xf32>
    %179 = vector.multi_reduction <add>, %178, %cst_43 [2] : vector<3x8x32xf32> to vector<3x8xf32>
    %180 = vector.shape_cast %179 : vector<3x8xf32> to vector<3x8x1xf32>
    %cst_44 = arith.constant 3.200000e+01 : f32
    %181 = vector.broadcast %cst_44 : f32 to vector<3x8x1xf32>
    %182 = arith.divf %180, %181 : vector<3x8x1xf32>
    %183 = vector.broadcast %175 : vector<3x8x1xf32> to vector<3x8x32xf32>
    %184 = arith.subf %169, %183 : vector<3x8x32xf32>
    %cst_45 = arith.constant 9.99999974E-6 : f32
    %185 = vector.broadcast %cst_45 : f32 to vector<3x8x1xf32>
    %186 = arith.addf %182, %185 : vector<3x8x1xf32>
    %187 = math.rsqrt %186 : vector<3x8x1xf32>
    %188 = vector.broadcast %187 : vector<3x8x1xf32> to vector<3x8x32xf32>
    %189 = arith.mulf %184, %188 : vector<3x8x32xf32>
    %190 = vector.broadcast %170 : vector<3x1x32xf32> to vector<3x8x32xf32>
    %191 = arith.mulf %189, %190 : vector<3x8x32xf32>
    %192 = vector.broadcast %171 : vector<3x1x32xf32> to vector<3x8x32xf32>
    %193 = arith.addf %191, %192 : vector<3x8x32xf32>
    %cst_46 = arith.constant dense<0.000000e+00> : vector<8x32xf32>
    %194 = vector.multi_reduction <add>, %193, %cst_46 [0] : vector<3x8x32xf32> to vector<8x32xf32>
    %cst_47 = arith.constant 0.333333343 : f32
    %195 = vector.broadcast %cst_47 : f32 to vector<8x32xf32>
    %196 = arith.mulf %194, %195 : vector<8x32xf32>
    %197 = arith.addf %7, %196 : vector<8x32xf32>
    %c0_48 = arith.constant 0 : index
    %c0_49 = arith.constant 0 : index
    %198 = vector.load %arg14[%c0_48, %c0_49] : memref<1x32xf32, #tpu.memory_space<vmem>>, vector<1x32xf32>
    %c0_50 = arith.constant 0 : index
    %c0_51 = arith.constant 0 : index
    %199 = vector.load %arg15[%c0_50, %c0_51] : memref<1x32xf32, #tpu.memory_space<vmem>>, vector<1x32xf32>
    %cst_52 = arith.constant dense<0.000000e+00> : vector<8xf32>
    %200 = vector.multi_reduction <add>, %197, %cst_52 [1] : vector<8x32xf32> to vector<8xf32>
    %201 = vector.shape_cast %200 : vector<8xf32> to vector<8x1xf32>
    %cst_53 = arith.constant 3.200000e+01 : f32
    %202 = vector.broadcast %cst_53 : f32 to vector<8x1xf32>
    %203 = arith.divf %201, %202 : vector<8x1xf32>
    %204 = vector.broadcast %203 : vector<8x1xf32> to vector<8x32xf32>
    %205 = arith.subf %197, %204 : vector<8x32xf32>
    %206 = arith.mulf %205, %205 : vector<8x32xf32>
    %cst_54 = arith.constant dense<0.000000e+00> : vector<8xf32>
    %207 = vector.multi_reduction <add>, %206, %cst_54 [1] : vector<8x32xf32> to vector<8xf32>
    %208 = vector.shape_cast %207 : vector<8xf32> to vector<8x1xf32>
    %cst_55 = arith.constant 3.200000e+01 : f32
    %209 = vector.broadcast %cst_55 : f32 to vector<8x1xf32>
    %210 = arith.divf %208, %209 : vector<8x1xf32>
    %211 = vector.broadcast %203 : vector<8x1xf32> to vector<8x32xf32>
    %212 = arith.subf %197, %211 : vector<8x32xf32>
    %cst_56 = arith.constant 9.99999974E-6 : f32
    %213 = vector.broadcast %cst_56 : f32 to vector<8x1xf32>
    %214 = arith.addf %210, %213 : vector<8x1xf32>
    %215 = math.rsqrt %214 : vector<8x1xf32>
    %216 = vector.broadcast %215 : vector<8x1xf32> to vector<8x32xf32>
    %217 = arith.mulf %212, %216 : vector<8x32xf32>
    %218 = vector.broadcast %198 : vector<1x32xf32> to vector<8x32xf32>
    %219 = arith.mulf %217, %218 : vector<8x32xf32>
    %220 = vector.broadcast %199 : vector<1x32xf32> to vector<8x32xf32>
    %221 = arith.addf %219, %220 : vector<8x32xf32>
    %222 = arith.truncf %221 : vector<8x32xf32> to vector<8x32xbf16>
    %c0_57 = arith.constant 0 : index
    %c0_58 = arith.constant 0 : index
    %223 = vector.load %arg16[%c0_57, %c0_58] : memref<32x64xbf16, #tpu.memory_space<vmem>>, vector<32x64xbf16>
    %cst_59 = arith.constant dense<0.000000e+00> : vector<8x64xf32>
    %224 = tpu.matmul %222, %223, %cst_59 {dimension_numbers = #tpu.dot_dimension_numbers<[1], [0], [0], [1], [0, 0, 1, 1], [], []>} : vector<8x32xbf16>, vector<32x64xbf16>, vector<8x64xf32> -> vector<8x64xf32>
    %c0_60 = arith.constant 0 : index
    %c0_61 = arith.constant 0 : index
    %225 = vector.load %arg17[%c0_60, %c0_61] : memref<1x64xf32, #tpu.memory_space<vmem>>, vector<1x64xf32>
    %226 = vector.broadcast %225 : vector<1x64xf32> to vector<8x64xf32>
    %227 = arith.addf %224, %226 : vector<8x64xf32>
    %cst_62 = arith.constant 0.000000e+00 : f32
    %228 = vector.broadcast %cst_62 : f32 to vector<8x64xf32>
    %229 = arith.maximumf %227, %228 : vector<8x64xf32>
    %230 = arith.truncf %229 : vector<8x64xf32> to vector<8x64xbf16>
    %c0_63 = arith.constant 0 : index
    %c0_64 = arith.constant 0 : index
    %231 = vector.load %arg18[%c0_63, %c0_64] : memref<64x32xbf16, #tpu.memory_space<vmem>>, vector<64x32xbf16>
    %cst_65 = arith.constant dense<0.000000e+00> : vector<8x32xf32>
    %232 = tpu.matmul %230, %231, %cst_65 {dimension_numbers = #tpu.dot_dimension_numbers<[1], [0], [0], [1], [0, 0, 1, 1], [], []>} : vector<8x64xbf16>, vector<64x32xbf16>, vector<8x32xf32> -> vector<8x32xf32>
    %c0_66 = arith.constant 0 : index
    %c0_67 = arith.constant 0 : index
    %233 = vector.load %arg19[%c0_66, %c0_67] : memref<1x32xf32, #tpu.memory_space<vmem>>, vector<1x32xf32>
    %234 = vector.broadcast %233 : vector<1x32xf32> to vector<8x32xf32>
    %235 = arith.addf %232, %234 : vector<8x32xf32>
    %236 = arith.addf %221, %235 : vector<8x32xf32>
    %c0_68 = arith.constant 0 : index
    %c0_69 = arith.constant 0 : index
    %237 = vector.load %arg20[%c0_68, %c0_69] : memref<1x32xf32, #tpu.memory_space<vmem>>, vector<1x32xf32>
    %c0_70 = arith.constant 0 : index
    %c0_71 = arith.constant 0 : index
    %238 = vector.load %arg21[%c0_70, %c0_71] : memref<1x32xf32, #tpu.memory_space<vmem>>, vector<1x32xf32>
    %cst_72 = arith.constant dense<0.000000e+00> : vector<8xf32>
    %239 = vector.multi_reduction <add>, %236, %cst_72 [1] : vector<8x32xf32> to vector<8xf32>
    %240 = vector.shape_cast %239 : vector<8xf32> to vector<8x1xf32>
    %cst_73 = arith.constant 3.200000e+01 : f32
    %241 = vector.broadcast %cst_73 : f32 to vector<8x1xf32>
    %242 = arith.divf %240, %241 : vector<8x1xf32>
    %243 = vector.broadcast %242 : vector<8x1xf32> to vector<8x32xf32>
    %244 = arith.subf %236, %243 : vector<8x32xf32>
    %245 = arith.mulf %244, %244 : vector<8x32xf32>
    %cst_74 = arith.constant dense<0.000000e+00> : vector<8xf32>
    %246 = vector.multi_reduction <add>, %245, %cst_74 [1] : vector<8x32xf32> to vector<8xf32>
    %247 = vector.shape_cast %246 : vector<8xf32> to vector<8x1xf32>
    %cst_75 = arith.constant 3.200000e+01 : f32
    %248 = vector.broadcast %cst_75 : f32 to vector<8x1xf32>
    %249 = arith.divf %247, %248 : vector<8x1xf32>
    %250 = vector.broadcast %242 : vector<8x1xf32> to vector<8x32xf32>
    %251 = arith.subf %236, %250 : vector<8x32xf32>
    %cst_76 = arith.constant 9.99999974E-6 : f32
    %252 = vector.broadcast %cst_76 : f32 to vector<8x1xf32>
    %253 = arith.addf %249, %252 : vector<8x1xf32>
    %254 = math.rsqrt %253 : vector<8x1xf32>
    %255 = vector.broadcast %254 : vector<8x1xf32> to vector<8x32xf32>
    %256 = arith.mulf %251, %255 : vector<8x32xf32>
    %257 = vector.broadcast %237 : vector<1x32xf32> to vector<8x32xf32>
    %258 = arith.mulf %256, %257 : vector<8x32xf32>
    %259 = vector.broadcast %238 : vector<1x32xf32> to vector<8x32xf32>
    %260 = arith.addf %258, %259 : vector<8x32xf32>
    %261 = arith.truncf %260 : vector<8x32xf32> to vector<8x32xbf16>
    %c0_77 = arith.constant 0 : index
    %c0_78 = arith.constant 0 : index
    %c0_79 = arith.constant 0 : index
    %262 = vector.load %arg22[%c0_77, %c0_78, %c0_79] : memref<1x8x32xbf16, #tpu.memory_space<vmem>>, vector<1x8x32xbf16>
    %263 = vector.shape_cast %262 : vector<1x8x32xbf16> to vector<8x32xbf16>
    %264 = vector.shape_cast %261 : vector<8x32xbf16> to vector<1x8x32xbf16>
    tpu.vector_store %arg22[%c0_77, %c0_78, %c0_79], %264 {strides = array<i32>} : memref<1x8x32xbf16, #tpu.memory_space<vmem>>, vector<1x8x32xbf16>,
    return
  }
  func.func @transform_0(%arg0: i32, %arg1: i32) -> (i32, i32, i32) {
    %c0_i32 = arith.constant 0 : i32
    %c0_i32_0 = arith.constant 0 : i32
    %c0_i32_1 = arith.constant 0 : i32
    return %arg0, %c0_i32, %c0_i32_0 : i32, i32, i32
  }
  func.func @transform_1(%arg0: i32, %arg1: i32) -> (i32, i32, i32) {
    %c0_i32 = arith.constant 0 : i32
    %c0_i32_0 = arith.constant 0 : i32
    %c0_i32_1 = arith.constant 0 : i32
    return %arg0, %c0_i32, %c0_i32_0 : i32, i32, i32
  }
  func.func @transform_2(%arg0: i32, %arg1: i32) -> (i32, i32) {
    %c0_i32 = arith.constant 0 : i32
    %c0_i32_0 = arith.constant 0 : i32
    %c0_i32_1 = arith.constant 0 : i32
    return %c0_i32, %c0_i32_0 : i32, i32
  }
  func.func @transform_3(%arg0: i32, %arg1: i32) -> (i32, i32) {
    %c0_i32 = arith.constant 0 : i32
    %c0_i32_0 = arith.constant 0 : i32
    %c0_i32_1 = arith.constant 0 : i32
    return %c0_i32, %c0_i32_0 : i32, i32
  }
  func.func @transform_4(%arg0: i32, %arg1: i32) -> (i32, i32) {
    %c0_i32 = arith.constant 0 : i32
    %c0_i32_0 = arith.constant 0 : i32
    %c0_i32_1 = arith.constant 0 : i32
    return %c0_i32, %c0_i32_0 : i32, i32
  }
  func.func @transform_5(%arg0: i32, %arg1: i32) -> (i32, i32) {
    %c0_i32 = arith.constant 0 : i32
    %c0_i32_0 = arith.constant 0 : i32
    %c0_i32_1 = arith.constant 0 : i32
    return %c0_i32, %c0_i32_0 : i32, i32
  }
  func.func @transform_6(%arg0: i32, %arg1: i32) -> (i32, i32) {
    %c0_i32 = arith.constant 0 : i32
    %c0_i32_0 = arith.constant 0 : i32
    %c0_i32_1 = arith.constant 0 : i32
    return %c0_i32, %c0_i32_0 : i32, i32
  }
  func.func @transform_7(%arg0: i32, %arg1: i32) -> (i32, i32) {
    %c0_i32 = arith.constant 0 : i32
    %c0_i32_0 = arith.constant 0 : i32
    %c0_i32_1 = arith.constant 0 : i32
    return %c0_i32, %c0_i32_0 : i32, i32
  }
  func.func @transform_8(%arg0: i32, %arg1: i32) -> (i32, i32, i32) {
    %c0_i32 = arith.constant 0 : i32
    %c0_i32_0 = arith.constant 0 : i32
    %c0_i32_1 = arith.constant 0 : i32
    %c0_i32_2 = arith.constant 0 : i32
    return %c0_i32, %c0_i32_0, %c0_i32_1 : i32, i32, i32
  }
  func.func @transform_9(%arg0: i32, %arg1: i32) -> (i32, i32, i32) {
    %c0_i32 = arith.constant 0 : i32
    %c0_i32_0 = arith.constant 0 : i32
    %c0_i32_1 = arith.constant 0 : i32
    %c0_i32_2 = arith.constant 0 : i32
    return %c0_i32, %c0_i32_0, %c0_i32_1 : i32, i32, i32
  }
  func.func @transform_10(%arg0: i32, %arg1: i32) -> (i32, i32, i32) {
    %c0_i32 = arith.constant 0 : i32
    %c0_i32_0 = arith.constant 0 : i32
    %c0_i32_1 = arith.constant 0 : i32
    %c0_i32_2 = arith.constant 0 : i32
    return %c0_i32, %c0_i32_0, %c0_i32_1 : i32, i32, i32
  }
  func.func @transform_11(%arg0: i32, %arg1: i32) -> (i32, i32, i32) {
    %c0_i32 = arith.constant 0 : i32
    %c0_i32_0 = arith.constant 0 : i32
    %c0_i32_1 = arith.constant 0 : i32
    %c0_i32_2 = arith.constant 0 : i32
    return %c0_i32, %c0_i32_0, %c0_i32_1 : i32, i32, i32
  }
  func.func @transform_12(%arg0: i32, %arg1: i32) -> (i32, i32) {
    %c0_i32 = arith.constant 0 : i32
    %c0_i32_0 = arith.constant 0 : i32
    %c0_i32_1 = arith.constant 0 : i32
    return %c0_i32, %c0_i32_0 : i32, i32
  }
  func.func @transform_13(%arg0: i32, %arg1: i32) -> (i32, i32) {
    %c0_i32 = arith.constant 0 : i32
    %c0_i32_0 = arith.constant 0 : i32
    %c0_i32_1 = arith.constant 0 : i32
    return %c0_i32, %c0_i32_0 : i32, i32
  }
  func.func @transform_14(%arg0: i32, %arg1: i32) -> (i32, i32) {
    %c0_i32 = arith.constant 0 : i32
    %c0_i32_0 = arith.constant 0 : i32
    %c0_i32_1 = arith.constant 0 : i32
    return %c0_i32, %c0_i32_0 : i32, i32
  }
  func.func @transform_15(%arg0: i32, %arg1: i32) -> (i32, i32) {
    %c0_i32 = arith.constant 0 : i32
    %c0_i32_0 = arith.constant 0 : i32
    %c0_i32_1 = arith.constant 0 : i32
    return %c0_i32, %c0_i32_0 : i32, i32
  }
  func.func @transform_16(%arg0: i32, %arg1: i32) -> (i32, i32) {
    %c0_i32 = arith.constant 0 : i32
    %c0_i32_0 = arith.constant 0 : i32
    %c0_i32_1 = arith.constant 0 : i32
    return %c0_i32, %c0_i32_0 : i32, i32
  }
  func.func @transform_17(%arg0: i32, %arg1: i32) -> (i32, i32) {
    %c0_i32 = arith.constant 0 : i32
    %c0_i32_0 = arith.constant 0 : i32
    %c0_i32_1 = arith.constant 0 : i32
    return %c0_i32, %c0_i32_0 : i32, i32
  }
  func.func @transform_18(%arg0: i32, %arg1: i32) -> (i32, i32) {
    %c0_i32 = arith.constant 0 : i32
    %c0_i32_0 = arith.constant 0 : i32
    %c0_i32_1 = arith.constant 0 : i32
    return %c0_i32, %c0_i32_0 : i32, i32
  }
  func.func @transform_19(%arg0: i32, %arg1: i32) -> (i32, i32) {
    %c0_i32 = arith.constant 0 : i32
    %c0_i32_0 = arith.constant 0 : i32
    %c0_i32_1 = arith.constant 0 : i32
    return %c0_i32, %c0_i32_0 : i32, i32
  }
  func.func @transform_20(%arg0: i32, %arg1: i32) -> (i32, i32, i32) {
    %c0_i32 = arith.constant 0 : i32
    %c0_i32_0 = arith.constant 0 : i32
    return %arg0, %arg1, %c0_i32 : i32, i32, i32
  }
}

module attributes {stable_mosaic.version = 11 : i64} {
  func.func @_final_kernel(%arg0: i32, %arg1: memref<1x8x32xbf16, #tpu.memory_space<vmem>>, %arg2: memref<1x8x32xbf16, #tpu.memory_space<vmem>>, %arg3: memref<1x8x32xbf16, #tpu.memory_space<vmem>>, %arg4: memref<32x32xbf16, #tpu.memory_space<vmem>>, %arg5: memref<1x32xf32, #tpu.memory_space<vmem>>, %arg6: memref<32x32xbf16, #tpu.memory_space<vmem>>, %arg7: memref<1x32xf32, #tpu.memory_space<vmem>>, %arg8: memref<32x32xbf16, #tpu.memory_space<vmem>>, %arg9: memref<1x32xf32, #tpu.memory_space<vmem>>, %arg10: memref<32x32xbf16, #tpu.memory_space<vmem>>, %arg11: memref<1x32xf32, #tpu.memory_space<vmem>>, %arg12: memref<32x96xbf16, #tpu.memory_space<vmem>>, %arg13: memref<32x96xbf16, #tpu.memory_space<vmem>>, %arg14: memref<32x96xbf16, #tpu.memory_space<vmem>>, %arg15: memref<1x96xf32, #tpu.memory_space<vmem>>, %arg16: memref<96x32xbf16, #tpu.memory_space<vmem>>, %arg17: memref<1x32xf32, #tpu.memory_space<vmem>>, %arg18: memref<1x8x32xf32, #tpu.memory_space<vmem>>) attributes {dimension_semantics = [#tpu.dimension_semantics<parallel>], iteration_bounds = array<i64: 2>, scalar_prefetch = 0 : i64, scratch_operands = 0 : i64, tpu.core_type = #tpu.core_type<tc>, window_params = [{transform_indices = @transform_0, window_bounds = array<i64: 1, 8, 32>}, {transform_indices = @transform_1, window_bounds = array<i64: 1, 8, 32>}, {transform_indices = @transform_2, window_bounds = array<i64: 1, 8, 32>}, {pipeline_mode = #tpu.pipeline_mode<synchronous>, transform_indices = @transform_3, window_bounds = array<i64: 32, 32>}, {pipeline_mode = #tpu.pipeline_mode<synchronous>, transform_indices = @transform_4, window_bounds = array<i64: 1, 32>}, {pipeline_mode = #tpu.pipeline_mode<synchronous>, transform_indices = @transform_5, window_bounds = array<i64: 32, 32>}, {pipeline_mode = #tpu.pipeline_mode<synchronous>, transform_indices = @transform_6, window_bounds = array<i64: 1, 32>}, {pipeline_mode = #tpu.pipeline_mode<synchronous>, transform_indices = @transform_7, window_bounds = array<i64: 32, 32>}, {pipeline_mode = #tpu.pipeline_mode<synchronous>, transform_indices = @transform_8, window_bounds = array<i64: 1, 32>}, {pipeline_mode = #tpu.pipeline_mode<synchronous>, transform_indices = @transform_9, window_bounds = array<i64: 32, 32>}, {pipeline_mode = #tpu.pipeline_mode<synchronous>, transform_indices = @transform_10, window_bounds = array<i64: 1, 32>}, {pipeline_mode = #tpu.pipeline_mode<synchronous>, transform_indices = @transform_11, window_bounds = array<i64: 32, 96>}, {pipeline_mode = #tpu.pipeline_mode<synchronous>, transform_indices = @transform_12, window_bounds = array<i64: 32, 96>}, {pipeline_mode = #tpu.pipeline_mode<synchronous>, transform_indices = @transform_13, window_bounds = array<i64: 32, 96>}, {pipeline_mode = #tpu.pipeline_mode<synchronous>, transform_indices = @transform_14, window_bounds = array<i64: 1, 96>}, {pipeline_mode = #tpu.pipeline_mode<synchronous>, transform_indices = @transform_15, window_bounds = array<i64: 96, 32>}, {pipeline_mode = #tpu.pipeline_mode<synchronous>, transform_indices = @transform_16, window_bounds = array<i64: 1, 32>}, {transform_indices = @transform_17, window_bounds = array<i64: 1, 8, 32>}]} {
    %c0 = arith.constant 0 : index
    %c0_0 = arith.constant 0 : index
    %c0_1 = arith.constant 0 : index
    %0 = vector.load %arg1[%c0, %c0_0, %c0_1] : memref<1x8x32xbf16, #tpu.memory_space<vmem>>, vector<1x8x32xbf16>
    %1 = vector.shape_cast %0 : vector<1x8x32xbf16> to vector<8x32xbf16>
    %2 = arith.extf %1 : vector<8x32xbf16> to vector<8x32xf32>
    %c0_2 = arith.constant 0 : index
    %c0_3 = arith.constant 0 : index
    %c0_4 = arith.constant 0 : index
    %3 = vector.load %arg2[%c0_2, %c0_3, %c0_4] : memref<1x8x32xbf16, #tpu.memory_space<vmem>>, vector<1x8x32xbf16>
    %4 = vector.shape_cast %3 : vector<1x8x32xbf16> to vector<8x32xbf16>
    %5 = arith.extf %4 : vector<8x32xbf16> to vector<8x32xf32>
    %c0_5 = arith.constant 0 : index
    %c0_6 = arith.constant 0 : index
    %c0_7 = arith.constant 0 : index
    %6 = vector.load %arg3[%c0_5, %c0_6, %c0_7] : memref<1x8x32xbf16, #tpu.memory_space<vmem>>, vector<1x8x32xbf16>
    %7 = vector.shape_cast %6 : vector<1x8x32xbf16> to vector<8x32xbf16>
    %8 = arith.extf %7 : vector<8x32xbf16> to vector<8x32xf32>
    %c0_8 = arith.constant 0 : index
    %c0_9 = arith.constant 0 : index
    %9 = vector.load %arg4[%c0_8, %c0_9] : memref<32x32xbf16, #tpu.memory_space<vmem>>, vector<32x32xbf16>
    %c0_10 = arith.constant 0 : index
    %c0_11 = arith.constant 0 : index
    %10 = vector.load %arg5[%c0_10, %c0_11] : memref<1x32xf32, #tpu.memory_space<vmem>>, vector<1x32xf32>
    %c0_12 = arith.constant 0 : index
    %c0_13 = arith.constant 0 : index
    %11 = vector.load %arg6[%c0_12, %c0_13] : memref<32x32xbf16, #tpu.memory_space<vmem>>, vector<32x32xbf16>
    %c0_14 = arith.constant 0 : index
    %c0_15 = arith.constant 0 : index
    %12 = vector.load %arg7[%c0_14, %c0_15] : memref<1x32xf32, #tpu.memory_space<vmem>>, vector<1x32xf32>
    %c0_16 = arith.constant 0 : index
    %c0_17 = arith.constant 0 : index
    %13 = vector.load %arg8[%c0_16, %c0_17] : memref<32x32xbf16, #tpu.memory_space<vmem>>, vector<32x32xbf16>
    %c0_18 = arith.constant 0 : index
    %c0_19 = arith.constant 0 : index
    %14 = vector.load %arg9[%c0_18, %c0_19] : memref<1x32xf32, #tpu.memory_space<vmem>>, vector<1x32xf32>
    %15 = arith.truncf %5 : vector<8x32xf32> to vector<8x32xbf16>
    %cst = arith.constant dense<0.000000e+00> : vector<8x32xf32>
    %16 = tpu.matmul %15, %9, %cst {dimension_numbers = #tpu.dot_dimension_numbers<[1], [0], [0], [1], [0, 0, 1, 1], [], []>} : vector<8x32xbf16>, vector<32x32xbf16>, vector<8x32xf32> -> vector<8x32xf32>
    %17 = vector.broadcast %10 : vector<1x32xf32> to vector<8x32xf32>
    %18 = arith.addf %16, %17 : vector<8x32xf32>
    %19 = arith.truncf %2 : vector<8x32xf32> to vector<8x32xbf16>
    %cst_20 = arith.constant dense<0.000000e+00> : vector<8x32xf32>
    %20 = tpu.matmul %19, %11, %cst_20 {dimension_numbers = #tpu.dot_dimension_numbers<[1], [0], [0], [1], [0, 0, 1, 1], [], []>} : vector<8x32xbf16>, vector<32x32xbf16>, vector<8x32xf32> -> vector<8x32xf32>
    %21 = vector.broadcast %12 : vector<1x32xf32> to vector<8x32xf32>
    %22 = arith.addf %20, %21 : vector<8x32xf32>
    %23 = arith.truncf %2 : vector<8x32xf32> to vector<8x32xbf16>
    %cst_21 = arith.constant dense<0.000000e+00> : vector<8x32xf32>
    %24 = tpu.matmul %23, %13, %cst_21 {dimension_numbers = #tpu.dot_dimension_numbers<[1], [0], [0], [1], [0, 0, 1, 1], [], []>} : vector<8x32xbf16>, vector<32x32xbf16>, vector<8x32xf32> -> vector<8x32xf32>
    %25 = vector.broadcast %14 : vector<1x32xf32> to vector<8x32xf32>
    %26 = arith.addf %24, %25 : vector<8x32xf32>
    %27 = vector.extract_strided_slice %18 {offsets = [0, 0], sizes = [8, 8], strides = [1, 1]} : vector<8x32xf32> to vector<8x8xf32>
    %28 = vector.extract_strided_slice %18 {offsets = [0, 8], sizes = [8, 8], strides = [1, 1]} : vector<8x32xf32> to vector<8x8xf32>
    %29 = vector.extract_strided_slice %18 {offsets = [0, 16], sizes = [8, 8], strides = [1, 1]} : vector<8x32xf32> to vector<8x8xf32>
    %30 = vector.extract_strided_slice %18 {offsets = [0, 24], sizes = [8, 8], strides = [1, 1]} : vector<8x32xf32> to vector<8x8xf32>
    %31 = vector.shape_cast %27 : vector<8x8xf32> to vector<1x8x8xf32>
    %32 = vector.shape_cast %28 : vector<8x8xf32> to vector<1x8x8xf32>
    %33 = vector.shape_cast %29 : vector<8x8xf32> to vector<1x8x8xf32>
    %34 = vector.shape_cast %30 : vector<8x8xf32> to vector<1x8x8xf32>
    %35 = tpu.concatenate %31, %32, %33, %34 in 0 : vector<1x8x8xf32>, vector<1x8x8xf32>, vector<1x8x8xf32>, vector<1x8x8xf32> -> vector<4x8x8xf32>
    %36 = arith.truncf %35 : vector<4x8x8xf32> to vector<4x8x8xbf16>
    %37 = vector.extract_strided_slice %22 {offsets = [0, 0], sizes = [8, 8], strides = [1, 1]} : vector<8x32xf32> to vector<8x8xf32>
    %38 = vector.extract_strided_slice %22 {offsets = [0, 8], sizes = [8, 8], strides = [1, 1]} : vector<8x32xf32> to vector<8x8xf32>
    %39 = vector.extract_strided_slice %22 {offsets = [0, 16], sizes = [8, 8], strides = [1, 1]} : vector<8x32xf32> to vector<8x8xf32>
    %40 = vector.extract_strided_slice %22 {offsets = [0, 24], sizes = [8, 8], strides = [1, 1]} : vector<8x32xf32> to vector<8x8xf32>
    %41 = vector.shape_cast %37 : vector<8x8xf32> to vector<1x8x8xf32>
    %42 = vector.shape_cast %38 : vector<8x8xf32> to vector<1x8x8xf32>
    %43 = vector.shape_cast %39 : vector<8x8xf32> to vector<1x8x8xf32>
    %44 = vector.shape_cast %40 : vector<8x8xf32> to vector<1x8x8xf32>
    %45 = tpu.concatenate %41, %42, %43, %44 in 0 : vector<1x8x8xf32>, vector<1x8x8xf32>, vector<1x8x8xf32>, vector<1x8x8xf32> -> vector<4x8x8xf32>
    %46 = arith.truncf %45 : vector<4x8x8xf32> to vector<4x8x8xbf16>
    %47 = vector.extract_strided_slice %26 {offsets = [0, 0], sizes = [8, 8], strides = [1, 1]} : vector<8x32xf32> to vector<8x8xf32>
    %48 = vector.extract_strided_slice %26 {offsets = [0, 8], sizes = [8, 8], strides = [1, 1]} : vector<8x32xf32> to vector<8x8xf32>
    %49 = vector.extract_strided_slice %26 {offsets = [0, 16], sizes = [8, 8], strides = [1, 1]} : vector<8x32xf32> to vector<8x8xf32>
    %50 = vector.extract_strided_slice %26 {offsets = [0, 24], sizes = [8, 8], strides = [1, 1]} : vector<8x32xf32> to vector<8x8xf32>
    %51 = vector.shape_cast %47 : vector<8x8xf32> to vector<1x8x8xf32>
    %52 = vector.shape_cast %48 : vector<8x8xf32> to vector<1x8x8xf32>
    %53 = vector.shape_cast %49 : vector<8x8xf32> to vector<1x8x8xf32>
    %54 = vector.shape_cast %50 : vector<8x8xf32> to vector<1x8x8xf32>
    %55 = tpu.concatenate %51, %52, %53, %54 in 0 : vector<1x8x8xf32>, vector<1x8x8xf32>, vector<1x8x8xf32>, vector<1x8x8xf32> -> vector<4x8x8xf32>
    %56 = arith.truncf %55 : vector<4x8x8xf32> to vector<4x8x8xbf16>
    %cst_22 = arith.constant 0xFF800000 : f32
    %57 = vector.broadcast %cst_22 : f32 to vector<4x8x1xf32>
    %cst_23 = arith.constant 0.000000e+00 : f32
    %58 = vector.broadcast %cst_23 : f32 to vector<4x8x1xf32>
    %cst_24 = arith.constant 0.000000e+00 : f32
    %59 = vector.broadcast %cst_24 : f32 to vector<4x8x8xf32>
    "tpu.trace_start"() <{level = 10 : i32, message = "hqd,hkd->hqk"}> : () -> ()
    %cst_25 = arith.constant dense<0.000000e+00> : vector<4x8x8xf32>
    %60 = tpu.matmul %36, %46, %cst_25 {dimension_numbers = #tpu.dot_dimension_numbers<[2], [2], [1], [1], [0, 0, 0, 1, 1, 1], [0], [0]>} : vector<4x8x8xbf16>, vector<4x8x8xbf16>, vector<4x8x8xf32> -> vector<4x8x8xf32>
    "tpu.trace_stop"() : () -> ()
    %cst_26 = arith.constant dense<0xFF800000> : vector<4x8xf32>
    %61 = vector.multi_reduction <maximumf>, %60, %cst_26 [2] : vector<4x8x8xf32> to vector<4x8xf32>
    %62 = vector.shape_cast %61 : vector<4x8xf32> to vector<4x8x1xf32>
    %63 = arith.maximumf %57, %62 : vector<4x8x1xf32>
    %64 = arith.subf %57, %63 : vector<4x8x1xf32>
    %65 = math.exp %64 : vector<4x8x1xf32>
    %66 = vector.broadcast %63 : vector<4x8x1xf32> to vector<4x8x8xf32>
    %67 = arith.subf %60, %66 : vector<4x8x8xf32>
    %68 = math.exp %67 : vector<4x8x8xf32>
    %69 = arith.mulf %65, %58 : vector<4x8x1xf32>
    %cst_27 = arith.constant dense<0.000000e+00> : vector<4x8xf32>
    %70 = vector.multi_reduction <add>, %68, %cst_27 [2] : vector<4x8x8xf32> to vector<4x8xf32>
    %71 = vector.shape_cast %70 : vector<4x8xf32> to vector<4x8x1xf32>
    %72 = arith.addf %69, %71 : vector<4x8x1xf32>
    %73 = vector.broadcast %65 : vector<4x8x1xf32> to vector<4x8x8xf32>
    %74 = arith.mulf %73, %59 : vector<4x8x8xf32>
    %75 = arith.truncf %68 : vector<4x8x8xf32> to vector<4x8x8xbf16>
    "tpu.trace_start"() <{level = 10 : i32, message = "hqk,hkd->hqd"}> : () -> ()
    %cst_28 = arith.constant dense<0.000000e+00> : vector<4x8x8xf32>
    %76 = tpu.matmul %75, %56, %cst_28 {dimension_numbers = #tpu.dot_dimension_numbers<[2], [1], [1], [2], [0, 0, 0, 1, 1, 2], [0], [0]>} : vector<4x8x8xbf16>, vector<4x8x8xbf16>, vector<4x8x8xf32> -> vector<4x8x8xf32>
    "tpu.trace_stop"() : () -> ()
    %77 = arith.addf %74, %76 : vector<4x8x8xf32>
    %78 = tpu.reciprocal %72 {approx = true} : vector<4x8x1xf32> -> vector<4x8x1xf32>
    %79 = vector.broadcast %78 : vector<4x8x1xf32> to vector<4x8x8xf32>
    %80 = arith.mulf %77, %79 : vector<4x8x8xf32>
    %81 = vector.extract_strided_slice %80 {offsets = [0, 0, 0], sizes = [1, 8, 8], strides = [1, 1, 1]} : vector<4x8x8xf32> to vector<1x8x8xf32>
    %82 = vector.shape_cast %81 : vector<1x8x8xf32> to vector<8x8xf32>
    %83 = vector.extract_strided_slice %80 {offsets = [1, 0, 0], sizes = [1, 8, 8], strides = [1, 1, 1]} : vector<4x8x8xf32> to vector<1x8x8xf32>
    %84 = vector.shape_cast %83 : vector<1x8x8xf32> to vector<8x8xf32>
    %85 = vector.extract_strided_slice %80 {offsets = [2, 0, 0], sizes = [1, 8, 8], strides = [1, 1, 1]} : vector<4x8x8xf32> to vector<1x8x8xf32>
    %86 = vector.shape_cast %85 : vector<1x8x8xf32> to vector<8x8xf32>
    %87 = vector.extract_strided_slice %80 {offsets = [3, 0, 0], sizes = [1, 8, 8], strides = [1, 1, 1]} : vector<4x8x8xf32> to vector<1x8x8xf32>
    %88 = vector.shape_cast %87 : vector<1x8x8xf32> to vector<8x8xf32>
    %89 = tpu.concatenate %82, %84, %86, %88 in 1 : vector<8x8xf32>, vector<8x8xf32>, vector<8x8xf32>, vector<8x8xf32> -> vector<8x32xf32>
    %90 = arith.truncf %89 : vector<8x32xf32> to vector<8x32xbf16>
    %c0_29 = arith.constant 0 : index
    %c0_30 = arith.constant 0 : index
    %91 = vector.load %arg10[%c0_29, %c0_30] : memref<32x32xbf16, #tpu.memory_space<vmem>>, vector<32x32xbf16>
    %cst_31 = arith.constant dense<0.000000e+00> : vector<8x32xf32>
    %92 = tpu.matmul %90, %91, %cst_31 {dimension_numbers = #tpu.dot_dimension_numbers<[1], [0], [0], [1], [0, 0, 1, 1], [], []>} : vector<8x32xbf16>, vector<32x32xbf16>, vector<8x32xf32> -> vector<8x32xf32>
    %c0_32 = arith.constant 0 : index
    %c0_33 = arith.constant 0 : index
    %93 = vector.load %arg11[%c0_32, %c0_33] : memref<1x32xf32, #tpu.memory_space<vmem>>, vector<1x32xf32>
    %94 = vector.broadcast %93 : vector<1x32xf32> to vector<8x32xf32>
    %95 = arith.addf %92, %94 : vector<8x32xf32>
    %cst_34 = arith.constant 2.000000e-01 : f32
    %96 = vector.broadcast %cst_34 : f32 to vector<8x32xf32>
    %97 = arith.mulf %96, %95 : vector<8x32xf32>
    %98 = arith.addf %5, %97 : vector<8x32xf32>
    %c0_35 = arith.constant 0 : index
    %c0_36 = arith.constant 0 : index
    %99 = vector.load %arg4[%c0_35, %c0_36] : memref<32x32xbf16, #tpu.memory_space<vmem>>, vector<32x32xbf16>
    %c0_37 = arith.constant 0 : index
    %c0_38 = arith.constant 0 : index
    %100 = vector.load %arg5[%c0_37, %c0_38] : memref<1x32xf32, #tpu.memory_space<vmem>>, vector<1x32xf32>
    %c0_39 = arith.constant 0 : index
    %c0_40 = arith.constant 0 : index
    %101 = vector.load %arg6[%c0_39, %c0_40] : memref<32x32xbf16, #tpu.memory_space<vmem>>, vector<32x32xbf16>
    %c0_41 = arith.constant 0 : index
    %c0_42 = arith.constant 0 : index
    %102 = vector.load %arg7[%c0_41, %c0_42] : memref<1x32xf32, #tpu.memory_space<vmem>>, vector<1x32xf32>
    %c0_43 = arith.constant 0 : index
    %c0_44 = arith.constant 0 : index
    %103 = vector.load %arg8[%c0_43, %c0_44] : memref<32x32xbf16, #tpu.memory_space<vmem>>, vector<32x32xbf16>
    %c0_45 = arith.constant 0 : index
    %c0_46 = arith.constant 0 : index
    %104 = vector.load %arg9[%c0_45, %c0_46] : memref<1x32xf32, #tpu.memory_space<vmem>>, vector<1x32xf32>
    %105 = arith.truncf %8 : vector<8x32xf32> to vector<8x32xbf16>
    %cst_47 = arith.constant dense<0.000000e+00> : vector<8x32xf32>
    %106 = tpu.matmul %105, %99, %cst_47 {dimension_numbers = #tpu.dot_dimension_numbers<[1], [0], [0], [1], [0, 0, 1, 1], [], []>} : vector<8x32xbf16>, vector<32x32xbf16>, vector<8x32xf32> -> vector<8x32xf32>
    %107 = vector.broadcast %100 : vector<1x32xf32> to vector<8x32xf32>
    %108 = arith.addf %106, %107 : vector<8x32xf32>
    %109 = arith.truncf %98 : vector<8x32xf32> to vector<8x32xbf16>
    %cst_48 = arith.constant dense<0.000000e+00> : vector<8x32xf32>
    %110 = tpu.matmul %109, %101, %cst_48 {dimension_numbers = #tpu.dot_dimension_numbers<[1], [0], [0], [1], [0, 0, 1, 1], [], []>} : vector<8x32xbf16>, vector<32x32xbf16>, vector<8x32xf32> -> vector<8x32xf32>
    %111 = vector.broadcast %102 : vector<1x32xf32> to vector<8x32xf32>
    %112 = arith.addf %110, %111 : vector<8x32xf32>
    %113 = arith.truncf %98 : vector<8x32xf32> to vector<8x32xbf16>
    %cst_49 = arith.constant dense<0.000000e+00> : vector<8x32xf32>
    %114 = tpu.matmul %113, %103, %cst_49 {dimension_numbers = #tpu.dot_dimension_numbers<[1], [0], [0], [1], [0, 0, 1, 1], [], []>} : vector<8x32xbf16>, vector<32x32xbf16>, vector<8x32xf32> -> vector<8x32xf32>
    %115 = vector.broadcast %104 : vector<1x32xf32> to vector<8x32xf32>
    %116 = arith.addf %114, %115 : vector<8x32xf32>
    %117 = vector.extract_strided_slice %108 {offsets = [0, 0], sizes = [8, 8], strides = [1, 1]} : vector<8x32xf32> to vector<8x8xf32>
    %118 = vector.extract_strided_slice %108 {offsets = [0, 8], sizes = [8, 8], strides = [1, 1]} : vector<8x32xf32> to vector<8x8xf32>
    %119 = vector.extract_strided_slice %108 {offsets = [0, 16], sizes = [8, 8], strides = [1, 1]} : vector<8x32xf32> to vector<8x8xf32>
    %120 = vector.extract_strided_slice %108 {offsets = [0, 24], sizes = [8, 8], strides = [1, 1]} : vector<8x32xf32> to vector<8x8xf32>
    %121 = vector.shape_cast %117 : vector<8x8xf32> to vector<1x8x8xf32>
    %122 = vector.shape_cast %118 : vector<8x8xf32> to vector<1x8x8xf32>
    %123 = vector.shape_cast %119 : vector<8x8xf32> to vector<1x8x8xf32>
    %124 = vector.shape_cast %120 : vector<8x8xf32> to vector<1x8x8xf32>
    %125 = tpu.concatenate %121, %122, %123, %124 in 0 : vector<1x8x8xf32>, vector<1x8x8xf32>, vector<1x8x8xf32>, vector<1x8x8xf32> -> vector<4x8x8xf32>
    %126 = arith.truncf %125 : vector<4x8x8xf32> to vector<4x8x8xbf16>
    %127 = vector.extract_strided_slice %112 {offsets = [0, 0], sizes = [8, 8], strides = [1, 1]} : vector<8x32xf32> to vector<8x8xf32>
    %128 = vector.extract_strided_slice %112 {offsets = [0, 8], sizes = [8, 8], strides = [1, 1]} : vector<8x32xf32> to vector<8x8xf32>
    %129 = vector.extract_strided_slice %112 {offsets = [0, 16], sizes = [8, 8], strides = [1, 1]} : vector<8x32xf32> to vector<8x8xf32>
    %130 = vector.extract_strided_slice %112 {offsets = [0, 24], sizes = [8, 8], strides = [1, 1]} : vector<8x32xf32> to vector<8x8xf32>
    %131 = vector.shape_cast %127 : vector<8x8xf32> to vector<1x8x8xf32>
    %132 = vector.shape_cast %128 : vector<8x8xf32> to vector<1x8x8xf32>
    %133 = vector.shape_cast %129 : vector<8x8xf32> to vector<1x8x8xf32>
    %134 = vector.shape_cast %130 : vector<8x8xf32> to vector<1x8x8xf32>
    %135 = tpu.concatenate %131, %132, %133, %134 in 0 : vector<1x8x8xf32>, vector<1x8x8xf32>, vector<1x8x8xf32>, vector<1x8x8xf32> -> vector<4x8x8xf32>
    %136 = arith.truncf %135 : vector<4x8x8xf32> to vector<4x8x8xbf16>
    %137 = vector.extract_strided_slice %116 {offsets = [0, 0], sizes = [8, 8], strides = [1, 1]} : vector<8x32xf32> to vector<8x8xf32>
    %138 = vector.extract_strided_slice %116 {offsets = [0, 8], sizes = [8, 8], strides = [1, 1]} : vector<8x32xf32> to vector<8x8xf32>
    %139 = vector.extract_strided_slice %116 {offsets = [0, 16], sizes = [8, 8], strides = [1, 1]} : vector<8x32xf32> to vector<8x8xf32>
    %140 = vector.extract_strided_slice %116 {offsets = [0, 24], sizes = [8, 8], strides = [1, 1]} : vector<8x32xf32> to vector<8x8xf32>
    %141 = vector.shape_cast %137 : vector<8x8xf32> to vector<1x8x8xf32>
    %142 = vector.shape_cast %138 : vector<8x8xf32> to vector<1x8x8xf32>
    %143 = vector.shape_cast %139 : vector<8x8xf32> to vector<1x8x8xf32>
    %144 = vector.shape_cast %140 : vector<8x8xf32> to vector<1x8x8xf32>
    %145 = tpu.concatenate %141, %142, %143, %144 in 0 : vector<1x8x8xf32>, vector<1x8x8xf32>, vector<1x8x8xf32>, vector<1x8x8xf32> -> vector<4x8x8xf32>
    %146 = arith.truncf %145 : vector<4x8x8xf32> to vector<4x8x8xbf16>
    %cst_50 = arith.constant 0xFF800000 : f32
    %147 = vector.broadcast %cst_50 : f32 to vector<4x8x1xf32>
    %cst_51 = arith.constant 0.000000e+00 : f32
    %148 = vector.broadcast %cst_51 : f32 to vector<4x8x1xf32>
    %cst_52 = arith.constant 0.000000e+00 : f32
    %149 = vector.broadcast %cst_52 : f32 to vector<4x8x8xf32>
    "tpu.trace_start"() <{level = 10 : i32, message = "hqd,hkd->hqk"}> : () -> ()
    %cst_53 = arith.constant dense<0.000000e+00> : vector<4x8x8xf32>
    %150 = tpu.matmul %126, %136, %cst_53 {dimension_numbers = #tpu.dot_dimension_numbers<[2], [2], [1], [1], [0, 0, 0, 1, 1, 1], [0], [0]>} : vector<4x8x8xbf16>, vector<4x8x8xbf16>, vector<4x8x8xf32> -> vector<4x8x8xf32>
    "tpu.trace_stop"() : () -> ()
    %cst_54 = arith.constant dense<0xFF800000> : vector<4x8xf32>
    %151 = vector.multi_reduction <maximumf>, %150, %cst_54 [2] : vector<4x8x8xf32> to vector<4x8xf32>
    %152 = vector.shape_cast %151 : vector<4x8xf32> to vector<4x8x1xf32>
    %153 = arith.maximumf %147, %152 : vector<4x8x1xf32>
    %154 = arith.subf %147, %153 : vector<4x8x1xf32>
    %155 = math.exp %154 : vector<4x8x1xf32>
    %156 = vector.broadcast %153 : vector<4x8x1xf32> to vector<4x8x8xf32>
    %157 = arith.subf %150, %156 : vector<4x8x8xf32>
    %158 = math.exp %157 : vector<4x8x8xf32>
    %159 = arith.mulf %155, %148 : vector<4x8x1xf32>
    %cst_55 = arith.constant dense<0.000000e+00> : vector<4x8xf32>
    %160 = vector.multi_reduction <add>, %158, %cst_55 [2] : vector<4x8x8xf32> to vector<4x8xf32>
    %161 = vector.shape_cast %160 : vector<4x8xf32> to vector<4x8x1xf32>
    %162 = arith.addf %159, %161 : vector<4x8x1xf32>
    %163 = vector.broadcast %155 : vector<4x8x1xf32> to vector<4x8x8xf32>
    %164 = arith.mulf %163, %149 : vector<4x8x8xf32>
    %165 = arith.truncf %158 : vector<4x8x8xf32> to vector<4x8x8xbf16>
    "tpu.trace_start"() <{level = 10 : i32, message = "hqk,hkd->hqd"}> : () -> ()
    %cst_56 = arith.constant dense<0.000000e+00> : vector<4x8x8xf32>
    %166 = tpu.matmul %165, %146, %cst_56 {dimension_numbers = #tpu.dot_dimension_numbers<[2], [1], [1], [2], [0, 0, 0, 1, 1, 2], [0], [0]>} : vector<4x8x8xbf16>, vector<4x8x8xbf16>, vector<4x8x8xf32> -> vector<4x8x8xf32>
    "tpu.trace_stop"() : () -> ()
    %167 = arith.addf %164, %166 : vector<4x8x8xf32>
    %168 = tpu.reciprocal %162 {approx = true} : vector<4x8x1xf32> -> vector<4x8x1xf32>
    %169 = vector.broadcast %168 : vector<4x8x1xf32> to vector<4x8x8xf32>
    %170 = arith.mulf %167, %169 : vector<4x8x8xf32>
    %171 = vector.extract_strided_slice %170 {offsets = [0, 0, 0], sizes = [1, 8, 8], strides = [1, 1, 1]} : vector<4x8x8xf32> to vector<1x8x8xf32>
    %172 = vector.shape_cast %171 : vector<1x8x8xf32> to vector<8x8xf32>
    %173 = vector.extract_strided_slice %170 {offsets = [1, 0, 0], sizes = [1, 8, 8], strides = [1, 1, 1]} : vector<4x8x8xf32> to vector<1x8x8xf32>
    %174 = vector.shape_cast %173 : vector<1x8x8xf32> to vector<8x8xf32>
    %175 = vector.extract_strided_slice %170 {offsets = [2, 0, 0], sizes = [1, 8, 8], strides = [1, 1, 1]} : vector<4x8x8xf32> to vector<1x8x8xf32>
    %176 = vector.shape_cast %175 : vector<1x8x8xf32> to vector<8x8xf32>
    %177 = vector.extract_strided_slice %170 {offsets = [3, 0, 0], sizes = [1, 8, 8], strides = [1, 1, 1]} : vector<4x8x8xf32> to vector<1x8x8xf32>
    %178 = vector.shape_cast %177 : vector<1x8x8xf32> to vector<8x8xf32>
    %179 = tpu.concatenate %172, %174, %176, %178 in 1 : vector<8x8xf32>, vector<8x8xf32>, vector<8x8xf32>, vector<8x8xf32> -> vector<8x32xf32>
    %180 = arith.truncf %179 : vector<8x32xf32> to vector<8x32xbf16>
    %c0_57 = arith.constant 0 : index
    %c0_58 = arith.constant 0 : index
    %181 = vector.load %arg10[%c0_57, %c0_58] : memref<32x32xbf16, #tpu.memory_space<vmem>>, vector<32x32xbf16>
    %cst_59 = arith.constant dense<0.000000e+00> : vector<8x32xf32>
    %182 = tpu.matmul %180, %181, %cst_59 {dimension_numbers = #tpu.dot_dimension_numbers<[1], [0], [0], [1], [0, 0, 1, 1], [], []>} : vector<8x32xbf16>, vector<32x32xbf16>, vector<8x32xf32> -> vector<8x32xf32>
    %c0_60 = arith.constant 0 : index
    %c0_61 = arith.constant 0 : index
    %183 = vector.load %arg11[%c0_60, %c0_61] : memref<1x32xf32, #tpu.memory_space<vmem>>, vector<1x32xf32>
    %184 = vector.broadcast %183 : vector<1x32xf32> to vector<8x32xf32>
    %185 = arith.addf %182, %184 : vector<8x32xf32>
    %cst_62 = arith.constant 2.000000e-01 : f32
    %186 = vector.broadcast %cst_62 : f32 to vector<8x32xf32>
    %187 = arith.mulf %186, %185 : vector<8x32xf32>
    %188 = arith.addf %8, %187 : vector<8x32xf32>
    %189 = arith.truncf %2 : vector<8x32xf32> to vector<8x32xbf16>
    %c0_63 = arith.constant 0 : index
    %c0_64 = arith.constant 0 : index
    %190 = vector.load %arg12[%c0_63, %c0_64] : memref<32x96xbf16, #tpu.memory_space<vmem>>, vector<32x96xbf16>
    %cst_65 = arith.constant dense<0.000000e+00> : vector<8x96xf32>
    %191 = tpu.matmul %189, %190, %cst_65 {dimension_numbers = #tpu.dot_dimension_numbers<[1], [0], [0], [1], [0, 0, 1, 1], [], []>} : vector<8x32xbf16>, vector<32x96xbf16>, vector<8x96xf32> -> vector<8x96xf32>
    %192 = arith.truncf %5 : vector<8x32xf32> to vector<8x32xbf16>
    %c0_66 = arith.constant 0 : index
    %c0_67 = arith.constant 0 : index
    %193 = vector.load %arg13[%c0_66, %c0_67] : memref<32x96xbf16, #tpu.memory_space<vmem>>, vector<32x96xbf16>
    %cst_68 = arith.constant dense<0.000000e+00> : vector<8x96xf32>
    %194 = tpu.matmul %192, %193, %cst_68 {dimension_numbers = #tpu.dot_dimension_numbers<[1], [0], [0], [1], [0, 0, 1, 1], [], []>} : vector<8x32xbf16>, vector<32x96xbf16>, vector<8x96xf32> -> vector<8x96xf32>
    %195 = arith.addf %191, %194 : vector<8x96xf32>
    %196 = arith.truncf %8 : vector<8x32xf32> to vector<8x32xbf16>
    %c0_69 = arith.constant 0 : index
    %c0_70 = arith.constant 0 : index
    %197 = vector.load %arg14[%c0_69, %c0_70] : memref<32x96xbf16, #tpu.memory_space<vmem>>, vector<32x96xbf16>
    %cst_71 = arith.constant dense<0.000000e+00> : vector<8x96xf32>
    %198 = tpu.matmul %196, %197, %cst_71 {dimension_numbers = #tpu.dot_dimension_numbers<[1], [0], [0], [1], [0, 0, 1, 1], [], []>} : vector<8x32xbf16>, vector<32x96xbf16>, vector<8x96xf32> -> vector<8x96xf32>
    %199 = arith.addf %195, %198 : vector<8x96xf32>
    %c0_72 = arith.constant 0 : index
    %c0_73 = arith.constant 0 : index
    %200 = vector.load %arg15[%c0_72, %c0_73] : memref<1x96xf32, #tpu.memory_space<vmem>>, vector<1x96xf32>
    %201 = vector.broadcast %200 : vector<1x96xf32> to vector<8x96xf32>
    %202 = arith.addf %199, %201 : vector<8x96xf32>
    %cst_74 = arith.constant 0.000000e+00 : f32
    %203 = vector.broadcast %cst_74 : f32 to vector<8x96xf32>
    %204 = arith.cmpf oge, %202, %203 : vector<8x96xf32>
    %cst_75 = arith.constant 0.00999999977 : f32
    %205 = vector.broadcast %cst_75 : f32 to vector<8x96xf32>
    %206 = arith.mulf %205, %202 : vector<8x96xf32>
    %207 = arith.select %204, %202, %206 : vector<8x96xi1>, vector<8x96xf32>
    %208 = arith.truncf %207 : vector<8x96xf32> to vector<8x96xbf16>
    %c0_76 = arith.constant 0 : index
    %c0_77 = arith.constant 0 : index
    %209 = vector.load %arg16[%c0_76, %c0_77] : memref<96x32xbf16, #tpu.memory_space<vmem>>, vector<96x32xbf16>
    %cst_78 = arith.constant dense<0.000000e+00> : vector<8x32xf32>
    %210 = tpu.matmul %208, %209, %cst_78 {dimension_numbers = #tpu.dot_dimension_numbers<[1], [0], [0], [1], [0, 0, 1, 1], [], []>} : vector<8x96xbf16>, vector<96x32xbf16>, vector<8x32xf32> -> vector<8x32xf32>
    %c0_79 = arith.constant 0 : index
    %c0_80 = arith.constant 0 : index
    %211 = vector.load %arg17[%c0_79, %c0_80] : memref<1x32xf32, #tpu.memory_space<vmem>>, vector<1x32xf32>
    %212 = vector.broadcast %211 : vector<1x32xf32> to vector<8x32xf32>
    %213 = arith.addf %210, %212 : vector<8x32xf32>
    %cst_81 = arith.constant 0.000000e+00 : f32
    %214 = vector.broadcast %cst_81 : f32 to vector<8x32xf32>
    %215 = arith.cmpf oge, %213, %214 : vector<8x32xf32>
    %cst_82 = arith.constant 0.00999999977 : f32
    %216 = vector.broadcast %cst_82 : f32 to vector<8x32xf32>
    %217 = arith.mulf %216, %213 : vector<8x32xf32>
    %218 = arith.select %215, %213, %217 : vector<8x32xi1>, vector<8x32xf32>
    %cst_83 = arith.constant 2.000000e-01 : f32
    %219 = vector.broadcast %cst_83 : f32 to vector<8x32xf32>
    %220 = arith.mulf %219, %218 : vector<8x32xf32>
    %221 = arith.addf %188, %220 : vector<8x32xf32>
    %c0_84 = arith.constant 0 : index
    %c0_85 = arith.constant 0 : index
    %c0_86 = arith.constant 0 : index
    %222 = vector.load %arg18[%c0_84, %c0_85, %c0_86] : memref<1x8x32xf32, #tpu.memory_space<vmem>>, vector<1x8x32xf32>
    %223 = vector.shape_cast %222 : vector<1x8x32xf32> to vector<8x32xf32>
    %224 = vector.shape_cast %221 : vector<8x32xf32> to vector<1x8x32xf32>
    tpu.vector_store %arg18[%c0_84, %c0_85, %c0_86], %224 {strides = array<i32>} : memref<1x8x32xf32, #tpu.memory_space<vmem>>, vector<1x8x32xf32>,
    return
  }
  func.func @transform_0(%arg0: i32) -> (i32, i32, i32) {
    %c0_i32 = arith.constant 0 : i32
    %c0_i32_0 = arith.constant 0 : i32
    %c0_i32_1 = arith.constant 0 : i32
    return %arg0, %c0_i32, %c0_i32_0 : i32, i32, i32
  }
  func.func @transform_1(%arg0: i32) -> (i32, i32, i32) {
    %c0_i32 = arith.constant 0 : i32
    %c0_i32_0 = arith.constant 0 : i32
    %c0_i32_1 = arith.constant 0 : i32
    return %arg0, %c0_i32, %c0_i32_0 : i32, i32, i32
  }
  func.func @transform_2(%arg0: i32) -> (i32, i32, i32) {
    %c0_i32 = arith.constant 0 : i32
    %c0_i32_0 = arith.constant 0 : i32
    %c0_i32_1 = arith.constant 0 : i32
    return %arg0, %c0_i32, %c0_i32_0 : i32, i32, i32
  }
  func.func @transform_3(%arg0: i32) -> (i32, i32) {
    %c0_i32 = arith.constant 0 : i32
    %c0_i32_0 = arith.constant 0 : i32
    %c0_i32_1 = arith.constant 0 : i32
    return %c0_i32, %c0_i32_0 : i32, i32
  }
  func.func @transform_4(%arg0: i32) -> (i32, i32) {
    %c0_i32 = arith.constant 0 : i32
    %c0_i32_0 = arith.constant 0 : i32
    %c0_i32_1 = arith.constant 0 : i32
    return %c0_i32, %c0_i32_0 : i32, i32
  }
  func.func @transform_5(%arg0: i32) -> (i32, i32) {
    %c0_i32 = arith.constant 0 : i32
    %c0_i32_0 = arith.constant 0 : i32
    %c0_i32_1 = arith.constant 0 : i32
    return %c0_i32, %c0_i32_0 : i32, i32
  }
  func.func @transform_6(%arg0: i32) -> (i32, i32) {
    %c0_i32 = arith.constant 0 : i32
    %c0_i32_0 = arith.constant 0 : i32
    %c0_i32_1 = arith.constant 0 : i32
    return %c0_i32, %c0_i32_0 : i32, i32
  }
  func.func @transform_7(%arg0: i32) -> (i32, i32) {
    %c0_i32 = arith.constant 0 : i32
    %c0_i32_0 = arith.constant 0 : i32
    %c0_i32_1 = arith.constant 0 : i32
    return %c0_i32, %c0_i32_0 : i32, i32
  }
  func.func @transform_8(%arg0: i32) -> (i32, i32) {
    %c0_i32 = arith.constant 0 : i32
    %c0_i32_0 = arith.constant 0 : i32
    %c0_i32_1 = arith.constant 0 : i32
    return %c0_i32, %c0_i32_0 : i32, i32
  }
  func.func @transform_9(%arg0: i32) -> (i32, i32) {
    %c0_i32 = arith.constant 0 : i32
    %c0_i32_0 = arith.constant 0 : i32
    %c0_i32_1 = arith.constant 0 : i32
    return %c0_i32, %c0_i32_0 : i32, i32
  }
  func.func @transform_10(%arg0: i32) -> (i32, i32) {
    %c0_i32 = arith.constant 0 : i32
    %c0_i32_0 = arith.constant 0 : i32
    %c0_i32_1 = arith.constant 0 : i32
    return %c0_i32, %c0_i32_0 : i32, i32
  }
  func.func @transform_11(%arg0: i32) -> (i32, i32) {
    %c0_i32 = arith.constant 0 : i32
    %c0_i32_0 = arith.constant 0 : i32
    %c0_i32_1 = arith.constant 0 : i32
    return %c0_i32, %c0_i32_0 : i32, i32
  }
  func.func @transform_12(%arg0: i32) -> (i32, i32) {
    %c0_i32 = arith.constant 0 : i32
    %c0_i32_0 = arith.constant 0 : i32
    %c0_i32_1 = arith.constant 0 : i32
    return %c0_i32, %c0_i32_0 : i32, i32
  }
  func.func @transform_13(%arg0: i32) -> (i32, i32) {
    %c0_i32 = arith.constant 0 : i32
    %c0_i32_0 = arith.constant 0 : i32
    %c0_i32_1 = arith.constant 0 : i32
    return %c0_i32, %c0_i32_0 : i32, i32
  }
  func.func @transform_14(%arg0: i32) -> (i32, i32) {
    %c0_i32 = arith.constant 0 : i32
    %c0_i32_0 = arith.constant 0 : i32
    %c0_i32_1 = arith.constant 0 : i32
    return %c0_i32, %c0_i32_0 : i32, i32
  }
  func.func @transform_15(%arg0: i32) -> (i32, i32) {
    %c0_i32 = arith.constant 0 : i32
    %c0_i32_0 = arith.constant 0 : i32
    %c0_i32_1 = arith.constant 0 : i32
    return %c0_i32, %c0_i32_0 : i32, i32
  }
  func.func @transform_16(%arg0: i32) -> (i32, i32) {
    %c0_i32 = arith.constant 0 : i32
    %c0_i32_0 = arith.constant 0 : i32
    %c0_i32_1 = arith.constant 0 : i32
    return %c0_i32, %c0_i32_0 : i32, i32
  }
  func.func @transform_17(%arg0: i32) -> (i32, i32, i32) {
    %c0_i32 = arith.constant 0 : i32
    %c0_i32_0 = arith.constant 0 : i32
    %c0_i32_1 = arith.constant 0 : i32
    return %arg0, %c0_i32, %c0_i32_0 : i32, i32, i32
  }
}

</mosaic_0001>

<bundles_post_ra>
// kernel: tpu_custom_call.1
= control target key start
LH: loop header
LB: loop body
LE: loop exit
PB: predicated region body
PF: predicated region fallthrough
CT: control target
= control target key end

     0   :  { %6 = vsyncpa [#allocation3], 0  ;;  %s124_s0 = inlined_call_operand.hbm [shape: f32[8,128], index: 0, kind: input, shape index: {}]   ;;  %s125_s1 = inlined_call_operand.hbm [shape: f32[8,128], index: 1, kind: output, shape index: {}]  }
   0x1   :  { %7 = vsyncpa [#allocation4], 0  ;;  %s88_s6 = smov [#allocation2]   ;;  %s40_s10 = scalar_lea.hbm %s124_s0, 128 }
   0x2   :  { %s14_s7 = sshll.u32 %s88_s6, 4  ;;  %p41_p0 = scmp.ne.s32.totalorder %s124_s0, %s40_s10  ;;  %s15_s7 = int_to_ptr.vmem [resolvable:$true] %s14_s7 }
   0x3   :  { %p44_p1 = scmp.lt.u32.totalorder %s40_s10, %s124_s0 }
   0x5   :  { %p46_p2 = pnand %p44_p1, %p41_p0 }
   0x7   :  { %49 = shalt.err (!%p46_p2)
}
   0x8   :  { %s50_s15 = scalar_lea.vmem %s15_s7, 128  ;;  %p55_p4 = scmp.lt.s32.totalorder %s15_s7, %s15_s7 }
   0x9   :  { %p51_p3 = scmp.ne.s32.totalorder %s15_s7, %s50_s15  ;;  %p56_p5 = scmp.lt.s32.totalorder %s50_s15, %s50_s15 }
   0xb   :  { %p57_p6 = por %p56_p5, %p55_p4 }
   0xd   :  { %p58_p7 = pnand %p57_p6, %p51_p3 }
   0xf   :  { %61 = shalt.err (!%p58_p7)
}
  0x10   :  { %17 = dma.hbm_to_vmem [thread:$0]  %s124_s0, 128, %s15_s7, [#allocation3]  }
  0x11   :  { %84 = dma.done.wait [#allocation3], 128  }
  0x12   :  { %85 = vsyncadd [#allocation3], 4294967168  ;;  %s89_s18 = smov [#allocation5]   ;;  %v21_v0 = vld [vmem:[#allocation2] sm:$0xff] }
  0x13   :  { %s29_s19 = sshll.u32 %s89_s18, 4  ;;  %22 = vst [vmem:[#allocation5] sm:$0xff] %v21_v0  ;;  %s30_s19 = int_to_ptr.vmem [resolvable:$true] %s29_s19 }
  0x14   :  { %s62_s20 = scalar_lea.vmem %s30_s19, 128  ;;  %p67_p9 = scmp.lt.s32.totalorder %s30_s19, %s30_s19 }
  0x15   :  { %p63_p8 = scmp.ne.s32.totalorder %s30_s19, %s62_s20  ;;  %p68_p10 = scmp.lt.s32.totalorder %s62_s20, %s62_s20 }
  0x17   :  { %p69_p11 = por %p68_p10, %p67_p9 }
  0x19   :  { %p70_p12 = pnand %p69_p11, %p63_p8 }
  0x1b   :  { %73 = shalt.err (!%p70_p12)
}
  0x1c   :  { %s74_s23 = scalar_lea.hbm %s125_s1, 128 }
  0x1d   :  { %p75_p13 = scmp.ne.s32.totalorder %s125_s1, %s74_s23  ;;  %p78_p0 = scmp.lt.u32.totalorder %s74_s23, %s125_s1 }
  0x1f   :  { %p80_p1 = pnand %p78_p0, %p75_p13 }
  0x21   :  { %83 = shalt.err (!%p80_p1)
}
  0x22   :  { %32 = dma.vmem_to_hbm [thread:$0]  %s30_s19, 128, %s125_s1, [#allocation4]  }
  0x23   :  { %86 = dma.done.wait [#allocation4], 128  }
  0x24   :  { %87 = vsyncadd [#allocation4], 4294967168 }
  0x25   :  { %36 = vsyncpa [#allocation3], 1 }
  0x26   :  { %37 = vsyncpa [#allocation4], 1 }

// kernel: multilevel_encoder_forward.5
= control target key start
LH: loop header
LB: loop body
LE: loop exit
PB: predicated region body
PF: predicated region fallthrough
CT: control target
= control target key end

     0   :  { %vm10_vm0 = vcmask 261120   ;;  %v23_v4 = vlaneseq  ;;  %v43_v9 = vmov 0.0   ;;  %vm33_vm3 = vcmask 1041409   ;;  %s63_s0 = inlined_call_operand.vmem [shape: f32[2,8,32], index: 0, kind: input, shape index: {}]   ;;  %s64_s1 = inlined_call_operand.vmem [shape: f32[2,8], index: 1, kind: output, shape index: {}]  }
   0x1   :  { %v8_v0 = vld [vmem:[%s63_s0] sm:$0xff]  ;;  %v9_v1 = vld [vmem:[%s63_s0 + $0x8] sm:$0xff]  ;;  %vm36_vm4 = vcmask 58368  }
   0x2   :  { %v11_v2 = vsel %vm10_vm0, %v8_v0, 0.0  ;;  %v14_v3 = vsel %vm10_vm0, %v9_v1, 0.0  ;;  %v24_v5 = vand.u32 127, %v23_v4  ;;  %v26_v6 = vshrl.u32 %v23_v4, 7 }
   0x3   :  { %12 = vadd.xlane.f32.xlu0 %v11_v2 }
   0x4   :  { %v27_v8 = vsub.s32 %v24_v5, %v26_v6 }
   0x7   :  { %15 = vadd.xlane.f32.xlu0 %v14_v3 }
  0x90   :  { %v13_v7 = vpop.xlane.xlu0 %12 }
  0x91   :  { %vm17_vm1 = vcmp.eq.f32.partialorder %v13_v7, 0.0 }
  0x92   :  { %v19_v10 = vsel %vm17_vm1, -1e+30, %v43_v9 }
  0x93   :  { %v28_v13 = vrot.slane %v19_v10, %v27_v8 }
  0x94   :  { %v16_v11 = vpop.xlane.xlu0 %15 }
  0x95   :  { %vm18_vm2 = vcmp.eq.f32.partialorder %v16_v11, 0.0 }
  0x96   :  { %v20_v12 = vsel %vm18_vm2, -1e+30, %v43_v9 }
  0x97   :  { %v32_v14 = vrot.slane %v20_v12, %v27_v8 }
  0x99   :  { %v34_v15 = vsel %vm33_vm3, %v32_v14, %v28_v13 }
  0x9a   :  { %37 = vst.msk [vmem:[%s64_s1] sm:$0x3] %vm36_vm4, %v34_v15 }

// kernel: multilevel_encoder_forward.6
= control target key start
LH: loop header
LB: loop body
LE: loop exit
PB: predicated region body
PF: predicated region fallthrough
CT: control target
= control target key end

     0   :  { %s5190_s0 = inlined_call_operand.vmem [shape: bf16[2,8,32], index: 0, kind: input, shape index: {}]   ;;  %s5191_s1 = inlined_call_operand.vmem [shape: f32[2,1,8], index: 1, kind: input, shape index: {}]   ;;  %s5192_s2 = inlined_call_operand.vmem [shape: bf16[32,96], index: 2, kind: input, shape index: {}]   ;;  %s5193_s3 = inlined_call_operand.hbm [shape: f32[1,96], index: 3, kind: input, shape index: {}]   ;;  %s5194_s4 = inlined_call_operand.vmem [shape: bf16[32,96], index: 4, kind: input, shape index: {}]   ;;  %s5195_s5 = inlined_call_operand.hbm [shape: f32[1,96], index: 5, kind: input, shape index: {}]   ;;  %s5196_s6 = inlined_call_operand.vmem [shape: bf16[32,96], index: 6, kind: input, shape index: {}]   ;;  %s5197_s7 = inlined_call_operand.hbm [shape: f32[1,96], index: 7, kind: input, shape index: {}]   ;;  %s5198_s8 = inlined_call_operand.vmem [shape: bf16[3,32,32], index: 8, kind: input, shape index: {}]   ;;  %s5199_s9 = inlined_call_operand.vmem [shape: f32[3,1,32], index: 9, kind: input, shape index: {}]   ;;  %s5200_s10 = inlined_call_operand.vmem [shape: f32[3,1,32], index: 10, kind: input, shape index: {}]   ;;  %s5201_s11 = inlined_call_operand.hbm [shape: f32[3,1,32], index: 11, kind: input, shape index: {}]   ;;  %s5202_s12 = inlined_call_operand.hbm [shape: f32[1,32], index: 12, kind: input, shape index: {}]   ;;  %s5203_s13 = inlined_call_operand.hbm [shape: f32[1,32], index: 13, kind: input, shape index: {}]   ;;  %s5204_s14 = inlined_call_operand.hbm [shape: bf16[32,64], index: 14, kind: input, shape index: {}]   ;;  %s5205_s15 = inlined_call_operand.hbm [shape: f32[1,64], index: 15, kind: input, shape index: {}]   ;;  %s5206_s16 = inlined_call_operand.vmem [shape: bf16[64,32], index: 16, kind: input, shape index: {}]   ;;  %s5207_s17 = inlined_call_operand.hbm [shape: f32[1,32], index: 17, kind: input, shape index: {}]   ;;  %s5208_s18 = inlined_call_operand.hbm [shape: f32[1,32], index: 18, kind: input, shape index: {}]   ;;  %s5209_s19 = inlined_call_operand.hbm [shape: f32[1,32], index: 19, kind: input, shape index: {}]   ;;  %s5210_s20 = inlined_call_operand.vmem [shape: bf16[2,8,32], index: 20, kind: output, shape index: {}]  }
   0x1   :  { %5222 = sst [smem:[#allocation26_spill]] %s5190_s0 }
   0x2   :  { %5223 = sst [smem:[#allocation27_spill]] %s5191_s1 }
   0x3   :  { %5224 = sst [smem:[#allocation28_spill]] %s5192_s2 }
   0x4   :  { %5225 = sst [smem:[#allocation29_spill]] %s5193_s3 }
   0x5   :  { %5226 = sst [smem:[#allocation30_spill]] %s5194_s4 }
   0x6   :  { %5227 = sst [smem:[#allocation31_spill]] %s5195_s5 }
   0x7   :  { %5228 = sst [smem:[#allocation32_spill]] %s5199_s9 }
   0x8   :  { %5229 = sst [smem:[#allocation33_spill]] %s5200_s10 }
   0x9   :  { %5230 = sst [smem:[#allocation34_spill]] %s5201_s11 }
   0xa   :  { %5231 = sst [smem:[#allocation35_spill]] %s5206_s16 }
   0xb   :  { %5232 = sst [smem:[#allocation36_spill]] %s5210_s20 }
   0xc   :  { %25 = vsyncpa [#allocation3], 0 }
   0xd   :  { %26 = vsyncpa [#allocation5], 0 }
   0xe   :  { %27 = vsyncpa [#allocation8], 0 }
   0xf   :  { %28 = vsyncpa [#allocation11], 0 }
  0x10   :  { %29 = vsyncpa [#allocation14], 0 }
  0x11   :  { %30 = vsyncpa [#allocation17], 0  ;;  %s4367_s1 = smov 0   ;;  %s4369_s22 = smov 0  }
  0x12   :  { %s4371_s23 = smov 0  }
  0x13 LB: > { %5233 = sst [smem:[#allocation25_spill]] %s4229_s23  ;;  %s4231_s24 = smov [#allocation4]   ;;  %s4229_s23 = sphi %s4371_s23, %s36_s23   ;;  %s4225_s22 = sphi %s4369_s22, %s5253_s22   ;;  %s4221_s1 = sphi %s4367_s1, %s5252_s1  }
  0x14   : > { %s541_s2 = sshll.u32 %s4231_s24, 4  ;;  %s3223_s25 = sadd.s32 4294967295, %s4229_s23   ;;  %s4389_s2 = int_to_ptr.vmem [resolvable:$true] %s541_s2 }
  0x15   : > { %p3225_p0 = scmp.ge.s32.totalorder %s4229_s23, 1  ;;  %p511_p1 = scmp.lt.s32.totalorder %s4229_s23, 3 }
  0x16   : > { %p4385_p2 = scmp.eq.s32.totalorder %s3223_s25, 0  ;;  %s4232_s27 = smov [#allocation7]  }
  0x17   : > { %p4391_p3 = pnand %p3225_p0, %p511_p1  ;;  %s574_s28 = sshll.u32 %s4232_s27, 4  ;;  %s4397_s28 = int_to_ptr.vmem [resolvable:$true] %s574_s28 }
  0x18   : > { %s5234_s3 = scalar_select %p4385_p2, 1, 0 }
  0x19   : > { %s5235_s26 = scalar_select %p4391_p3, 1, 0 }
  0x1a   : > { %p3653_p4 = pneg %p4391_p3  ;;  %s4233_s29 = smov [#allocation10]  }
  0x1b   : > { %s599_s30 = sshll.u32 %s4233_s29, 4  ;;  %s4234_s0 = smov [#allocation13]   ;;  %s4405_s30 = int_to_ptr.vmem [resolvable:$true] %s599_s30 }
  0x1c   : > { %p4401_p5 = pnand %p4385_p2, %p3653_p4  ;;  %s4407_s21 = sshll.u32 %s4234_s0, 4  ;;  %s624_s21 = int_to_ptr.vmem [resolvable:$true] %s4407_s21 }
  0x1d   : > { %s5237_s5 = sld [smem:[#allocation31_spill]] }
  0x1e   : > { %p4417_p7 = pneg %p4401_p5 }
  0x23   : > { %s3875_s27 = scalar_lea.hbm %s5237_s5, 16 }
  0x24   : > { %p3876_p6 = scmp.ne.s32.totalorder %s5237_s5, %s3875_s27  ;;  %p3882_p10 = scmp.lt.u32.totalorder %s3875_s27, %s5237_s5 }
  0x26   : > { %p3878_p8 = pnand %p4417_p7, %p3876_p6 }
  0x28   : > { %p3879_p9 = pneg %p3878_p8 }
  0x2a   : > { %p3884_p11 = pnand %p3882_p10, %p3879_p9 }
  0x2c   : > { %3887 = shalt.err (!%p3884_p11)
}
  0x2d   : > { %s3888_s20 = scalar_lea.vmem %s4389_s2, 16  ;;  %s3895_s23 = scalar_lea.vmem %s4389_s2, 32 }
  0x2e   : > { %p3889_p12 = scmp.ne.s32.totalorder %s4389_s2, %s3888_s20  ;;  %p3896_p1 = scmp.lt.s32.totalorder %s4389_s2, %s4389_s2 }
  0x2f   : > { %p3897_p4 = scmp.lt.s32.totalorder %s3895_s23, %s3888_s20 }
  0x30   : > { %p3891_p13 = pnand %p3889_p12, %p4417_p7 }
  0x31   : > { %p3898_p6 = por %p3897_p4, %p3896_p1 }
  0x32   : > { %p3892_p0 = pneg %p3891_p13 }
  0x34   : > { %p3899_p8 = pnand %p3898_p6, %p3892_p0 }
  0x36   : > { %3902 = shalt.err (!%p3899_p8)
}
  0x37   : > { %3659 = dma.hbm_to_vmem [thread:$0]  (!%p4401_p5), %s5237_s5, 16, %s4389_s2, [#allocation5]  }
  0x38   : > { %s5239_s11 = sld [smem:[#allocation34_spill]] }
  0x3e   : > { %s3903_s0 = scalar_lea.hbm %s5239_s11, 48 }
  0x3f   : > { %p3904_p9 = scmp.ne.s32.totalorder %s5239_s11, %s3903_s0  ;;  %p3910_p12 = scmp.lt.u32.totalorder %s3903_s0, %s5239_s11 }
  0x41   : > { %p3906_p10 = pnand %p3904_p9, %p4417_p7 }
  0x43   : > { %p3907_p11 = pneg %p3906_p10 }
  0x45   : > { %p3912_p13 = pnand %p3910_p12, %p3907_p11 }
  0x47   : > { %3915 = shalt.err (!%p3912_p13)
}
  0x48   : > { %s3916_s2 = scalar_lea.vmem %s4397_s28, 48  ;;  %s3923_s9 = scalar_lea.vmem %s4397_s28, 64 }
  0x49   : > { %p3917_p0 = scmp.ne.s32.totalorder %s4397_s28, %s3916_s2  ;;  %p3924_p6 = scmp.lt.s32.totalorder %s4397_s28, %s4397_s28 }
  0x4a   : > { %p3925_p8 = scmp.lt.s32.totalorder %s3923_s9, %s3916_s2 }
  0x4b   : > { %p3919_p1 = pnand %p3917_p0, %p4417_p7 }
  0x4c   : > { %p3926_p9 = por %p3925_p8, %p3924_p6 }
  0x4d   : > { %p3920_p4 = pneg %p3919_p1 }
  0x4f   : > { %p3927_p10 = pnand %p3926_p9, %p3920_p4 }
  0x51   : > { %3930 = shalt.err (!%p3927_p10)
}
  0x52   : > { %s4235_s10 = smov 16   ;;  %s4236_s24 = smov 1  }
  0x53   : > { %3665 = dma.hbm_to_vmem [thread:$0]  (!%p4401_p5), %s5239_s11, 48, %s4397_s28, [#allocation8], %s4235_s10, %s4235_s10, %s4236_s24  }
  0x54   : > { %s3931_s20 = scalar_lea.hbm %s5203_s13, 16 }
  0x55   : > { %p3932_p11 = scmp.ne.s32.totalorder %s5203_s13, %s3931_s20  ;;  %p3938_p0 = scmp.lt.u32.totalorder %s3931_s20, %s5203_s13 }
  0x57   : > { %p3934_p12 = pnand %p3932_p11, %p4417_p7 }
  0x59   : > { %p3935_p13 = pneg %p3934_p12 }
  0x5b   : > { %p3940_p1 = pnand %p3938_p0, %p3935_p13 }
  0x5d   : > { %3943 = shalt.err (!%p3940_p1)
}
  0x5e   : > { %s3944_s28 = scalar_lea.vmem %s4405_s30, 16  ;;  %s3951_s5 = scalar_lea.vmem %s4405_s30, 32 }
  0x5f   : > { %p3945_p4 = scmp.ne.s32.totalorder %s4405_s30, %s3944_s28  ;;  %p3952_p9 = scmp.lt.s32.totalorder %s4405_s30, %s4405_s30 }
  0x60   : > { %p3953_p10 = scmp.lt.s32.totalorder %s3951_s5, %s3944_s28 }
  0x61   : > { %p3947_p6 = pnand %p3945_p4, %p4417_p7 }
  0x62   : > { %p3954_p11 = por %p3953_p10, %p3952_p9 }
  0x63   : > { %p3948_p8 = pneg %p3947_p6 }
  0x65   : > { %p3955_p12 = pnand %p3954_p11, %p3948_p8 }
  0x67   : > { %3958 = shalt.err (!%p3955_p12)
}
  0x68   : > { %3671 = dma.hbm_to_vmem [thread:$0]  (!%p4401_p5), %s5203_s13, 16, %s4405_s30, [#allocation11]  }
  0x69   : > { %s3959_s29 = scalar_lea.hbm %s5205_s15, 16 }
  0x6a   : > { %p3960_p13 = scmp.ne.s32.totalorder %s5205_s15, %s3959_s29  ;;  %p3966_p4 = scmp.lt.u32.totalorder %s3959_s29, %s5205_s15 }
  0x6c   : > { %p3962_p0 = pnand %p3960_p13, %p4417_p7 }
  0x6e   : > { %p3963_p1 = pneg %p3962_p0 }
  0x70   : > { %p3968_p6 = pnand %p3966_p4, %p3963_p1 }
  0x72   : > { %3971 = shalt.err (!%p3968_p6)
}
  0x73   : > { %s3972_s9 = scalar_lea.vmem %s624_s21, 16  ;;  %s3979_s30 = scalar_lea.vmem %s624_s21, 32 }
  0x74   : > { %p3973_p8 = scmp.ne.s32.totalorder %s624_s21, %s3972_s9  ;;  %p3980_p11 = scmp.lt.s32.totalorder %s624_s21, %s624_s21 }
  0x75   : > { %p3981_p12 = scmp.lt.s32.totalorder %s3979_s30, %s3972_s9 }
  0x76   : > { %p3975_p9 = pnand %p3973_p8, %p4417_p7 }
  0x77   : > { %p3982_p2 = por %p3981_p12, %p3980_p11 }
  0x78   : > { %p3976_p10 = pneg %p3975_p9 }
  0x7a   : > { %p3983_p3 = pnand %p3982_p2, %p3976_p10 }
  0x7c   : > { %3986 = shalt.err (!%p3983_p3)
}
  0x7d   : > { %3677 = dma.hbm_to_vmem [thread:$0]  (!%p4401_p5), %s5205_s15, 16, %s624_s21, [#allocation14]  }
  0x7e   : > { %s4237_s10 = smov [#allocation16]   ;;  %s3987_s29 = scalar_lea.hbm %s5208_s18, 16 }
  0x7f   : > { %s648_s24 = sshll.u32 %s4237_s10, 4  ;;  %p3988_p13 = scmp.ne.s32.totalorder %s5208_s18, %s3987_s29  ;;  %s649_s24 = int_to_ptr.vmem [resolvable:$true] %s648_s24 }
  0x80   : > { %p3994_p0 = scmp.lt.u32.totalorder %s3987_s29, %s5208_s18 }
  0x81   : > { %p3990_p2 = pnand %p3988_p13, %p4417_p7 }
  0x83   : > { %p3991_p3 = pneg %p3990_p2 }
  0x85   : > { %p3996_p1 = pnand %p3994_p0, %p3991_p3 }
  0x87   : > { %3999 = shalt.err (!%p3996_p1)
}
  0x88   : > { %s4000_s21 = scalar_lea.vmem %s649_s24, 16  ;;  %s4007_s9 = scalar_lea.vmem %s649_s24, 32 }
  0x89   : > { %p4001_p4 = scmp.ne.s32.totalorder %s649_s24, %s4000_s21  ;;  %p4008_p9 = scmp.lt.s32.totalorder %s649_s24, %s649_s24 }
  0x8a   : > { %p4009_p10 = scmp.lt.s32.totalorder %s4007_s9, %s4000_s21 }
  0x8b   : > { %p4003_p6 = pnand %p4001_p4, %p4417_p7 }
  0x8c   : > { %p4010_p11 = por %p4009_p10, %p4008_p9 }
  0x8d   : > { %p4004_p8 = pneg %p4003_p6 }
  0x8f   : > { %p4011_p12 = pnand %p4010_p11, %p4004_p8 }
  0x91   : > { %4014 = shalt.err (!%p4011_p12)
}
  0x92   : > { %3683 = dma.hbm_to_vmem [thread:$0]  (!%p4401_p5), %s5208_s18, 16, %s649_s24, [#allocation17]  }
  0x93   : > { %s48_s5 = sadd.s32 1, %s4225_s22  ;;  %s4238_s10 = smov [#allocation2]  }
  0x94   : > { %p50_p13 = scmp.ge.s32.totalorder %s48_s5, 2  ;;  %s527_s25 = sshll.u32 %s4238_s10, 4  ;;  %s528_s25 = int_to_ptr.vmem [resolvable:$true] %s527_s25 }
  0x95   : > { %s5240_s0 = sld [smem:[#allocation29_spill]] }
  0x96   : > { %s5255_s5 = smov (%p50_p13, %s48_s5), 0 }
  0x9b   : > { %s4015_s20 = scalar_lea.hbm %s5240_s0, 16 }
  0x9c   : > { %p4016_p2 = scmp.ne.s32.totalorder %s5240_s0, %s4015_s20  ;;  %p4022_p1 = scmp.lt.u32.totalorder %s4015_s20, %s5240_s0 }
  0x9e   : > { %p4018_p3 = pnand %p4016_p2, %p4417_p7 }
  0xa0   : > { %p4019_p0 = pneg %p4018_p3 }
  0xa2   : > { %p4024_p4 = pnand %p4022_p1, %p4019_p0 }
  0xa4   : > { %4027 = shalt.err (!%p4024_p4)
}
  0xa5   : > { %s4028_s9 = scalar_lea.vmem %s528_s25, 16  ;;  %s4035_s30 = scalar_lea.vmem %s528_s25, 32 }
  0xa6   : > { %p4029_p6 = scmp.ne.s32.totalorder %s528_s25, %s4028_s9  ;;  %p4036_p10 = scmp.lt.s32.totalorder %s528_s25, %s528_s25 }
  0xa7   : > { %p4037_p11 = scmp.lt.s32.totalorder %s4035_s30, %s4028_s9 }
  0xa8   : > { %p4031_p8 = pnand %p4029_p6, %p4417_p7 }
  0xa9   : > { %p4038_p12 = por %p4037_p11, %p4036_p10 }
  0xaa   : > { %p4032_p9 = pneg %p4031_p8 }
  0xac   : > { %p4039_p13 = pnand %p4038_p12, %p4032_p9 }
  0xae   : > { %4042 = shalt.err (!%p4039_p13)
}
  0xaf   : > { %3656 = dma.hbm_to_vmem [thread:$0]  (!%p4401_p5), %s5240_s0, 16, %s528_s25, [#allocation3]  }
  0xb0   : > { %s4239_s27 = smov [#allocation6]   ;;  %s4240_s20 = smov [#allocation9]  }
  0xb1   : > { %s555_s29 = sshll.u32 %s4239_s27, 4  ;;  %s588_s23 = sshll.u32 %s4240_s20, 4  ;;  %s556_s29 = int_to_ptr.vmem [resolvable:$true] %s555_s29  ;;  %s589_s23 = int_to_ptr.vmem [resolvable:$true] %s588_s23 }
  0xb2   : > { %s4043_s24 = scalar_lea.hbm %s5197_s7, 16 }
  0xb3   : > { %p4044_p2 = scmp.ne.s32.totalorder %s5197_s7, %s4043_s24  ;;  %p4050_p1 = scmp.lt.u32.totalorder %s4043_s24, %s5197_s7 }
  0xb5   : > { %p4046_p3 = pnand %p4044_p2, %p4417_p7 }
  0xb7   : > { %p4047_p0 = pneg %p4046_p3 }
  0xb9   : > { %p4052_p4 = pnand %p4050_p1, %p4047_p0 }
  0xbb   : > { %4055 = shalt.err (!%p4052_p4)
}
  0xbc   : > { %s4056_s25 = scalar_lea.vmem %s556_s29, 16  ;;  %s4063_s10 = scalar_lea.vmem %s556_s29, 32 }
  0xbd   : > { %p4057_p6 = scmp.ne.s32.totalorder %s556_s29, %s4056_s25  ;;  %p4064_p10 = scmp.lt.s32.totalorder %s556_s29, %s556_s29 }
  0xbe   : > { %p4065_p11 = scmp.lt.s32.totalorder %s4063_s10, %s4056_s25 }
  0xbf   : > { %p4059_p8 = pnand %p4057_p6, %p4417_p7 }
  0xc0   : > { %p4066_p12 = por %p4065_p11, %p4064_p10 }
  0xc1   : > { %p4060_p9 = pneg %p4059_p8 }
  0xc3   : > { %p4067_p13 = pnand %p4066_p12, %p4060_p9 }
  0xc5   : > { %4070 = shalt.err (!%p4067_p13)
}
  0xc6   : > { %3662 = dma.hbm_to_vmem [thread:$0]  (!%p4401_p5), %s5197_s7, 16, %s556_s29, [#allocation5]  }
  0xc7   : > { %s4071_s21 = scalar_lea.hbm %s5202_s12, 16 }
  0xc8   : > { %p4072_p2 = scmp.ne.s32.totalorder %s5202_s12, %s4071_s21  ;;  %p4078_p1 = scmp.lt.u32.totalorder %s4071_s21, %s5202_s12 }
  0xca   : > { %p4074_p3 = pnand %p4072_p2, %p4417_p7 }
  0xcc   : > { %p4075_p0 = pneg %p4074_p3 }
  0xce   : > { %p4080_p4 = pnand %p4078_p1, %p4075_p0 }
  0xd0   : > { %4083 = shalt.err (!%p4080_p4)
}
  0xd1   : > { %s4084_s25 = scalar_lea.vmem %s589_s23, 16  ;;  %s4091_s29 = scalar_lea.vmem %s589_s23, 32 }
  0xd2   : > { %p4085_p6 = scmp.ne.s32.totalorder %s589_s23, %s4084_s25  ;;  %p4092_p10 = scmp.lt.s32.totalorder %s589_s23, %s589_s23 }
  0xd3   : > { %p4093_p11 = scmp.lt.s32.totalorder %s4091_s29, %s4084_s25 }
  0xd4   : > { %p4087_p8 = pnand %p4085_p6, %p4417_p7 }
  0xd5   : > { %p4094_p12 = por %p4093_p11, %p4092_p10 }
  0xd6   : > { %p4088_p9 = pneg %p4087_p8 }
  0xd8   : > { %p4095_p13 = pnand %p4094_p12, %p4088_p9 }
  0xda   : > { %4098 = shalt.err (!%p4095_p13)
}
  0xdb   : > { %3668 = dma.hbm_to_vmem [thread:$0]  (!%p4401_p5), %s5202_s12, 16, %s589_s23, [#allocation8]  }
  0xdc   : > { %s4241_s20 = smov [#allocation12]   ;;  %s4099_s24 = scalar_lea.hbm %s5204_s14, 256 }
  0xdd   : > { %s609_s11 = sshll.u32 %s4241_s20, 4  ;;  %p4100_p2 = scmp.ne.s32.totalorder %s5204_s14, %s4099_s24  ;;  %s610_s11 = int_to_ptr.vmem [resolvable:$true] %s609_s11 }
  0xde   : > { %p4106_p1 = scmp.lt.u32.totalorder %s4099_s24, %s5204_s14 }
  0xdf   : > { %p4102_p3 = pnand %p4100_p2, %p4417_p7 }
  0xe1   : > { %p4103_p0 = pneg %p4102_p3 }
  0xe3   : > { %p4108_p4 = pnand %p4106_p1, %p4103_p0 }
  0xe5   : > { %4111 = shalt.err (!%p4108_p4)
}
  0xe6   : > { %s4112_s23 = scalar_lea.vmem %s610_s11, 256  ;;  %p4120_p10 = scmp.lt.s32.totalorder %s610_s11, %s610_s11 }
  0xe7   : > { %p4113_p6 = scmp.ne.s32.totalorder %s610_s11, %s4112_s23  ;;  %p4121_p11 = scmp.lt.s32.totalorder %s4112_s23, %s4112_s23 }
  0xe9   : > { %p4115_p8 = pnand %p4113_p6, %p4417_p7  ;;  %p4122_p12 = por %p4121_p11, %p4120_p10 }
  0xeb   : > { %p4116_p9 = pneg %p4115_p8 }
  0xed   : > { %p4123_p13 = pnand %p4122_p12, %p4116_p9 }
  0xef   : > { %4126 = shalt.err (!%p4123_p13)
}
  0xf0   : > { %s4242_s29 = smov 64   ;;  %s4243_s10 = smov 4  }
  0xf1   : > { %3674 = dma.hbm_to_vmem [thread:$0]  (!%p4401_p5), %s5204_s14, 256, %s610_s11, [#allocation11], %s4242_s29, %s4242_s29, %s4243_s10  }
  0xf2   : > { %s4244_s2 = smov [#allocation15]   ;;  %s4245_s24 = smov [#allocation18]  }
  0xf3   : > { %s637_s21 = sshll.u32 %s4244_s2, 4  ;;  %s659_s9 = sshll.u32 %s4245_s24, 4  ;;  %s638_s21 = int_to_ptr.vmem [resolvable:$true] %s637_s21  ;;  %s4599_s9 = int_to_ptr.vmem [resolvable:$true] %s659_s9 }
  0xf4   : > { %s4127_s25 = scalar_lea.hbm %s5207_s17, 16 }
  0xf5   : > { %p4128_p2 = scmp.ne.s32.totalorder %s5207_s17, %s4127_s25  ;;  %p4134_p1 = scmp.lt.u32.totalorder %s4127_s25, %s5207_s17 }
  0xf7   : > { %p4130_p3 = pnand %p4128_p2, %p4417_p7 }
  0xf9   : > { %p4131_p0 = pneg %p4130_p3 }
  0xfb   : > { %p4136_p4 = pnand %p4134_p1, %p4131_p0 }
  0xfd   : > { %4139 = shalt.err (!%p4136_p4)
}
  0xfe   : > { %s4140_s29 = scalar_lea.vmem %s638_s21, 16  ;;  %s4147_s10 = scalar_lea.vmem %s638_s21, 32 }
  0xff   : > { %p4141_p6 = scmp.ne.s32.totalorder %s638_s21, %s4140_s29  ;;  %p4148_p10 = scmp.lt.s32.totalorder %s638_s21, %s638_s21 }
 0x100   : > { %p4149_p11 = scmp.lt.s32.totalorder %s4147_s10, %s4140_s29 }
 0x101   : > { %p4143_p8 = pnand %p4141_p6, %p4417_p7 }
 0x102   : > { %p4150_p12 = por %p4149_p11, %p4148_p10 }
 0x103   : > { %p4144_p9 = pneg %p4143_p8 }
 0x105   : > { %p4151_p13 = pnand %p4150_p12, %p4144_p9 }
 0x107   : > { %4154 = shalt.err (!%p4151_p13)
}
 0x108   : > { %3680 = dma.hbm_to_vmem [thread:$0]  (!%p4401_p5), %s5207_s17, 16, %s638_s21, [#allocation14]  }
 0x109   : > { %s4155_s30 = scalar_lea.hbm %s5209_s19, 16 }
 0x10a   : > { %p4156_p2 = scmp.ne.s32.totalorder %s5209_s19, %s4155_s30  ;;  %p4162_p1 = scmp.lt.u32.totalorder %s4155_s30, %s5209_s19 }
 0x10c   : > { %p4158_p3 = pnand %p4156_p2, %p4417_p7 }
 0x10e   : > { %p4159_p0 = pneg %p4158_p3 }
 0x110   : > { %p4164_p4 = pnand %p4162_p1, %p4159_p0 }
 0x112   : > { %4167 = shalt.err (!%p4164_p4)
}
 0x113   : > { %s4168_s21 = scalar_lea.vmem %s4599_s9, 16  ;;  %s4175_s11 = scalar_lea.vmem %s4599_s9, 32 }
 0x114   : > { %p4169_p6 = scmp.ne.s32.totalorder %s4599_s9, %s4168_s21  ;;  %p4176_p10 = scmp.lt.s32.totalorder %s4599_s9, %s4599_s9 }
 0x115   : > { %p4177_p11 = scmp.lt.s32.totalorder %s4175_s11, %s4168_s21 }
 0x116   : > { %p4171_p8 = pnand %p4169_p6, %p4417_p7 }
 0x117   : > { %p4178_p12 = por %p4177_p11, %p4176_p10 }
 0x118   : > { %p4172_p9 = pneg %p4171_p8 }
 0x11a   : > { %p4179_p13 = pnand %p4178_p12, %p4172_p9 }
 0x11c   : > { %4182 = shalt.err (!%p4179_p13)
}
 0x11d   : > { %3686 = dma.hbm_to_vmem [thread:$0]  (!%p4401_p5), %s5209_s19, 16, %s4599_s9, [#allocation17]  }
 0x11e   : > { %p5241_p2 = scmp.ne.s32.totalorder %s5235_s26, 0 }
 0x11f   : > { %p5242_p7 = scmp.ne.s32.totalorder (!%p5241_p2), %s5234_s3, 0 }
 0x120   : > { %685 = sbr.rel (%p5241_p2) target bundleno = 3103 (0xc1f), region = 100 }
 0x127   : > { %4196 = dma.done.wait (%p5242_p7), [#allocation3], 16  }
 0x128   : > { %4198 = vsyncadd (%p5242_p7), [#allocation3], 4294967280 }
 0x129   : > { %4200 = dma.done.wait (%p5242_p7), [#allocation5], 32  }
 0x12a   : > { %4202 = vsyncadd (%p5242_p7), [#allocation5], 4294967264 }
 0x12b   : > { %4204 = dma.done.wait (%p5242_p7), [#allocation8], 64  }
 0x12c   : > { %4206 = vsyncadd (%p5242_p7), [#allocation8], 4294967232 }
 0x12d   : > { %4208 = dma.done.wait (%p5242_p7), [#allocation11], 272  }
 0x12e   : > { %4210 = vsyncadd (%p5242_p7), [#allocation11], 4294967024 }
 0x12f   : > { %4212 = dma.done.wait (%p5242_p7), [#allocation14], 32  }
 0x130   : > { %4214 = vsyncadd (%p5242_p7), [#allocation14], 4294967264 }
 0x131   : > { %4216 = dma.done.wait (%p5242_p7), [#allocation17], 32  }
 0x132   : > { %4218 = vsyncadd (%p5242_p7), [#allocation17], 4294967264  ;;  %p787_p5 = scmp.lt.s32.totalorder %s4221_s1, 1  ;;  %v4246_v0 = vmov 0.0   ;;  %vm4247_vm0 = vmmov 0   ;;  %s5243_s4 = sld [smem:[#allocation28_spill]] }
 0x133   : > { %3397 = vmatprep.subr.bf16.mxu0 %v4246_v0  ;;  %3405 = vmatprep.subr.bf16.mxu1 %v4246_v0  ;;  %s5244_s20 = sld [smem:[#allocation30_spill]]  ;;  %s5245_s25 = sld [smem:[#allocation26_spill]]  ;;  %vm844_vm1 = vcmask 261120   ;;  %v3778_v6 = vld [vmem:[%s5196_s6] sm:$0xff]   ;;  %v3779_v8 = vld [vmem:[%s5196_s6 + $0x8] sm:$0xff]   ;;  %vm1151_vm2 = vcmask 64512  }
 0x134   : > { %3401 = vmatprep.mubr.msk.bf16.mxu0 %vm4247_vm0, %v4246_v0  ;;  %3409 = vmatprep.mubr.msk.bf16.mxu1 %vm4247_vm0, %v4246_v0  ;;  %s5257_s1 = smov (!%p787_p5, %s4221_s1), 1  ;;  %v3252_v9 = vld [vmem:[#allocation2] ss:$0 sm:$0xff]  ;;  %v3256_v10 = vld [vmem:[#allocation4] ss:$0 sm:$0xff]  ;;  %s4248_s26 = smov 120  }
 0x135   : > { %s3250_s16 = sshll.u32 %s5257_s1, 2  ;;  %s4249_s9 = smov 104   ;;  %v3260_v24 = vld [vmem:[#allocation6] ss:$0 sm:$0xff]  ;;  %vm1887_vm3 = vcmask 1043456   ;;  %vm2486_vm4 = vcmask 130048  }
 0x136   : > { %s4250_s0 = smov 112   ;;  %s4251_s2 = smov 96   ;;  %vm2488_vm5 = vcmask 195584   ;;  %vm2956_vm6 = vcmask 523264   ;;  %vm3031_vm7 = vcmask 257024  }
 0x137   : > { %s4252_s24 = smov 88   ;;  %s4253_s30 = smov 80  }
 0x138   : > { %v3774_v1 = vld [vmem:[%s5243_s4] sm:$0xff]   ;;  %v3776_v3 = vld [vmem:[%s5243_s4 + $0x8] sm:$0xff]   ;;  %s4254_s28 = smov 72   ;;  %s4256_s27 = smov 56  }
 0x139   : > { %v3775_v2 = vld [vmem:[%s5244_s20] sm:$0xff]   ;;  %3398 = vmatpush3.bf16.msra.mxu0 %v3774_v1  ;;  %s4694_s23 = scalar_lea.vmem %s5245_s25, %s3250_s16  ;;  %v3777_v4 = vld [vmem:[%s5244_s20 + $0x8] sm:$0xff]   ;;  %s4255_s25 = smov 64  }
 0x13a   : > { %3406 = vmatpush3.bf16.msra.mxu1 %v3775_v2  ;;  %3399 = vmatprep.subr.bf16.mxu0 %v4246_v0  ;;  %v808_v5 = vld [vmem:[%s4694_s23] sm:$0xf]  ;;  %s4257_s21 = smov 48   ;;  %s4258_s11 = smov 40  }
 0x13b   : > { %3407 = vmatprep.subr.bf16.mxu1 %v4246_v0  ;;  %v802_v7 = vld [vmem:[%s4694_s23] sm:$0xf]  ;;  %s5246_s3 = sld [smem:[#allocation27_spill]]  ;;  %s4261_s29 = smov 16  }
 0x13d   : > { %3400 = vmatpush3.bf16.msra.mxu0 %v3776_v3 }
 0x13e   : > { %3408 = vmatpush3.bf16.msra.mxu1 %v3777_v4  ;;  %3413 = vmatprep.subr.bf16.mxu0 %v4246_v0 }
 0x13f   : > { %3421 = vmatprep.subr.bf16.mxu1 %v4246_v0 }
 0x140   : > { %3402 = vmatmul.mubr.msk.bf16.vlgmr.msra.gmra.mrb[0].mxu0 %vm844_vm1, %v808_v5 }
 0x141   : > { %3410 = vmatmul.mubr.msk.bf16.vlgmr.msra.gmra.mrb[0].mxu1 %vm844_vm1, %v802_v7  ;;  %3414 = vmatpush3.bf16.msra.mxu0 %v3778_v6 }
 0x142   : > { %3415 = vmatprep.subr.bf16.mxu0 %v4246_v0  ;;  %3417 = vmatprep.mubr.msk.bf16.mxu0 %vm4247_vm0, %v4246_v0 }
 0x143   : > { %3423 = vmatprep.mubr.msk.bf16.mxu1 %vm4247_vm0, %v4246_v0 }
 0x145   : > { %3416 = vmatpush3.bf16.msra.mxu0 %v3779_v8 }
 0x146   : > { %3427 = vmatprep.subr.bf16.mxu0 %v4246_v0 }
 0x148   : > { %3418 = vmatmul.mubr.msk.bf16.vlgmr.msra.gmra.mrb[4].mxu0 %vm844_vm1, %v802_v7 }
 0x149   : > { %3429 = vmatprep.mubr.msk.bf16.mxu0 %vm4247_vm0, %v4246_v0 }
 0x213   : > { %v882_v11 = vpop.f32.mrb[0].mxu0 }
 0x214   : > { %v883_v12 = vadd.f32 %v3252_v9, %v882_v11  ;;  %v943_v13 = vpop.f32.mrb[0].mxu1  ;;  %v3403_v14 = vpop.f32.mrb[1].mxu0 }
 0x215   : > { %v944_v15 = vadd.f32 %v3256_v10, %v943_v13  ;;  %v3411_v16 = vpop.f32.mrb[1].mxu1  ;;  %v885_v17 = vpop.f32.mrb[2].mxu0 }
 0x216   : > { %v946_v18 = vpop.f32.mrb[2].mxu1  ;;  %1008 = vrot.lane.b32.xlu1 %v883_v12, %s4248_s26  ;;  %v3404_v19 = vpop.f32.mrb[3].mxu0  ;;  %v1041_v23 = vpack.c.bf16 %v883_v12, %v883_v12 }
 0x217   : > { %1054 = vrot.lane.b32.xlu0 %v944_v15, %s4248_s26  ;;  %v3412_v20 = vpop.f32.mrb[3].mxu1  ;;  %v1087_v21 = vpack.c.bf16 %v944_v15, %v944_v15 }
 0x219   : > { %v1156_v22 = vsel %vm1151_vm2, %v1087_v21, 0 }
 0x21a   : > { %3422 = vmatpush3.bf16.xpose.msra.mxu1 %v1156_v22  ;;  %1060 = vrot.lane.b32.xlu1 %v944_v15, %s4249_s9 }
 0x21b   : > { %1057 = vrot.lane.b32.xlu0 %v944_v15, %s4250_s0  ;;  %3433 = vmatprep.subr.bf16.mxu1 %v4246_v0  ;;  %v1001_v25 = vpop.f32.mrb[4].mxu0 }
 0x21c   : > { %v3419_v26 = vpop.f32.mrb[5].mxu0  ;;  %v4749_v28 = vadd.f32 %v3260_v24, %v1001_v25 }
 0x21d   : > { %v1004_v27 = vpop.f32.mrb[6].mxu0 }
 0x21e   : > { %1063 = vrot.lane.b32.xlu1 %v944_v15, %s4251_s2  ;;  %v3420_v29 = vpop.f32.mrb[7].mxu0  ;;  %v1133_v17 = vpack.c.bf16 %v4749_v28, %v4749_v28 }
 0x21f   : > { %1011 = vrot.lane.b32.xlu0 %v883_v12, %s4250_s0 }
 0x220   : > { %v1889_v21 = vsel %vm1887_vm3, %v1133_v17, 0 }
 0x221   : > { %3424 = vmatmul.mubr.msk.bf16.vlgmr.msra.gmra.mrb[4].mxu1 %vm1151_vm2, %v1041_v23 }
 0x222   : > { %1066 = vrot.lane.b32.xlu1 %v944_v15, %s4252_s24  ;;  %3435 = vmatprep.mubr.msk.bf16.mxu1 %vm4247_vm0, %v4246_v0 }
 0x223   : > { %1014 = vrot.lane.b32.xlu0 %v883_v12, %s4249_s9 }
 0x226   : > { %1069 = vrot.lane.b32.xlu1 %v944_v15, %s4253_s30 }
 0x227   : > { %1017 = vrot.lane.b32.xlu0 %v883_v12, %s4251_s2 }
 0x22a   : > { %1072 = vrot.lane.b32.xlu1 %v944_v15, %s4254_s28 }
 0x22b   : > { %1020 = vrot.lane.b32.xlu0 %v883_v12, %s4252_s24 }
 0x22e   : > { %1075 = vrot.lane.b32.xlu1 %v944_v15, %s4255_s25 }
 0x22f   : > { %1023 = vrot.lane.b32.xlu0 %v883_v12, %s4253_s30 }
 0x232   : > { %1078 = vrot.lane.b32.xlu1 %v944_v15, %s4256_s27 }
 0x233   : > { %1026 = vrot.lane.b32.xlu0 %v883_v12, %s4254_s28 }
 0x236   : > { %1081 = vrot.lane.b32.xlu1 %v944_v15, %s4257_s21 }
 0x237   : > { %1029 = vrot.lane.b32.xlu0 %v883_v12, %s4255_s25 }
 0x23a   : > { %1084 = vrot.lane.b32.xlu1 %v944_v15, %s4258_s11 }
 0x23b   : > { %1032 = vrot.lane.b32.xlu0 %v883_v12, %s4256_s27 }
 0x23e   : > { %1038 = vrot.lane.b32.xlu1 %v883_v12, %s4258_s11 }
 0x23f   : > { %1035 = vrot.lane.b32.xlu0 %v883_v12, %s4257_s21 }
 0x242   : > { %1100 = vrot.lane.b32.xlu1 %v4749_v28, %s4248_s26  ;;  %s793_s26 = scalar_lea.vmem %s5246_s3, %s5257_s1  ;;  %s5250_s3 = sld [smem:[#allocation36_spill]] }
 0x243   : > { %1103 = vrot.lane.b32.xlu0 %v4749_v28, %s4250_s0  ;;  %v4822_v24 = vld [vmem:[%s793_s26] ss:$0 sm:$0xff] }
 0x246   : > { %1109 = vrot.lane.b32.xlu1 %v4749_v28, %s4251_s2  ;;  %s5249_s2 = sld [smem:[#allocation35_spill]] }
 0x247   : > { %1106 = vrot.lane.b32.xlu0 %v4749_v28, %s4249_s9  ;;  %s4259_s9 = smov 8  }
 0x248   : > { %s800_s26 = scalar_lea.vmem %s5250_s3, %s3250_s16 }
 0x288   : > { %v1009_v30 = vpop.permute.xlu1 %1008 }
 0x289   : > { %v1055_v31 = vpop.permute.xlu0 %1054  ;;  %v1042_v41 = vpack.c.bf16 %v1009_v30, %v1009_v30 }
 0x28a   : > { %v1088_v32 = vpack.c.bf16 %v1055_v31, %v1055_v31 }
 0x28c   : > { %v1202_v33 = vsel %vm1151_vm2, %v1088_v32, 0  ;;  %v1061_v34 = vpop.permute.xlu1 %1060 }
 0x28d   : > { %3428 = vmatpush3.bf16.xpose.msra.mxu0 %v1202_v33  ;;  %v1058_v35 = vpop.permute.xlu0 %1057  ;;  %v1090_v37 = vpack.c.bf16 %v1061_v34, %v1061_v34 }
 0x28e   : > { %v1089_v36 = vpack.c.bf16 %v1058_v35, %v1058_v35  ;;  %3439 = vmatprep.subr.bf16.mxu0 %v4246_v0 }
 0x28f   : > { %v1294_v42 = vsel %vm1151_vm2, %v1090_v37, 0 }
 0x290   : > { %v1248_v38 = vsel %vm1151_vm2, %v1089_v36, 0  ;;  %v1064_v39 = vpop.permute.xlu1 %1063 }
 0x291   : > { %v1012_v40 = vpop.permute.xlu0 %1011  ;;  %3434 = vmatpush3.bf16.xpose.msra.mxu1 %v1248_v38  ;;  %v1091_v43 = vpack.c.bf16 %v1064_v39, %v1064_v39 }
 0x292   : > { %3445 = vmatprep.subr.bf16.mxu1 %v4246_v0  ;;  %v1043_v46 = vpack.c.bf16 %v1012_v40, %v1012_v40 }
 0x293   : > { %v1340_v47 = vsel %vm1151_vm2, %v1091_v43, 0 }
 0x294   : > { %3430 = vmatmul.mubr.msk.bf16.vlgmr.msra.gmra.mrb[8].mxu0 %vm1151_vm2, %v1042_v41  ;;  %v1067_v44 = vpop.permute.xlu1 %1066 }
 0x295   : > { %3440 = vmatpush3.bf16.xpose.msra.mxu0 %v1294_v42  ;;  %v1015_v45 = vpop.permute.xlu0 %1014  ;;  %3441 = vmatprep.mubr.msk.bf16.mxu0 %vm4247_vm0, %v4246_v0  ;;  %v1092_v48 = vpack.c.bf16 %v1067_v44, %v1067_v44 }
 0x296   : > { %3451 = vmatprep.subr.bf16.mxu0 %v4246_v0  ;;  %v1044_v51 = vpack.c.bf16 %v1015_v45, %v1015_v45 }
 0x297   : > { %v1386_v52 = vsel %vm1151_vm2, %v1092_v48, 0 }
 0x298   : > { %3436 = vmatmul.mubr.msk.bf16.vlgmr.msra.gmra.mrb[8].mxu1 %vm1151_vm2, %v1043_v46  ;;  %v1070_v49 = vpop.permute.xlu1 %1069 }
 0x299   : > { %v1018_v50 = vpop.permute.xlu0 %1017  ;;  %3446 = vmatpush3.bf16.xpose.msra.mxu1 %v1340_v47  ;;  %3447 = vmatprep.mubr.msk.bf16.mxu1 %vm4247_vm0, %v4246_v0  ;;  %v1093_v53 = vpack.c.bf16 %v1070_v49, %v1070_v49 }
 0x29a   : > { %3457 = vmatprep.subr.bf16.mxu1 %v4246_v0  ;;  %v1045_v56 = vpack.c.bf16 %v1018_v50, %v1018_v50 }
 0x29b   : > { %v1432_v57 = vsel %vm1151_vm2, %v1093_v53, 0 }
 0x29c   : > { %3442 = vmatmul.mubr.msk.bf16.vlgmr.msra.gmra.mrb[12].mxu0 %vm1151_vm2, %v1044_v51  ;;  %v1073_v54 = vpop.permute.xlu1 %1072 }
 0x29d   : > { %3452 = vmatpush3.bf16.xpose.msra.mxu0 %v1386_v52  ;;  %v1021_v55 = vpop.permute.xlu0 %1020  ;;  %3453 = vmatprep.mubr.msk.bf16.mxu0 %vm4247_vm0, %v4246_v0  ;;  %v1094_v58 = vpack.c.bf16 %v1073_v54, %v1073_v54 }
 0x29e   : > { %3463 = vmatprep.subr.bf16.mxu0 %v4246_v0  ;;  %v1046_v61 = vpack.c.bf16 %v1021_v55, %v1021_v55 }
 0x29f   : > { %v1478_v62 = vsel %vm1151_vm2, %v1094_v58, 0 }
 0x2a0   : > { %3448 = vmatmul.mubr.msk.bf16.vlgmr.msra.gmra.mrb[12].mxu1 %vm1151_vm2, %v1045_v56  ;;  %v1076_v59 = vpop.permute.xlu1 %1075 }
 0x2a1   : > { %v1024_v60 = vpop.permute.xlu0 %1023  ;;  %3458 = vmatpush3.bf16.xpose.msra.mxu1 %v1432_v57  ;;  %3459 = vmatprep.mubr.msk.bf16.mxu1 %vm4247_vm0, %v4246_v0  ;;  %v1095_v63 = vpack.c.bf16 %v1076_v59, %v1076_v59 }
 0x2a2   : > { %3469 = vmatprep.subr.bf16.mxu1 %v4246_v0  ;;  %v1047_v3 = vpack.c.bf16 %v1024_v60, %v1024_v60 }
 0x2a3   : > { %v1524_v4 = vsel %vm1151_vm2, %v1095_v63, 0 }
 0x2a4   : > { %3454 = vmatmul.mubr.msk.bf16.vlgmr.msra.gmra.mrb[16].mxu0 %vm1151_vm2, %v1046_v61  ;;  %v1079_v1 = vpop.permute.xlu1 %1078 }
 0x2a5   : > { %3464 = vmatpush3.bf16.xpose.msra.mxu0 %v1478_v62  ;;  %v1027_v2 = vpop.permute.xlu0 %1026  ;;  %3465 = vmatprep.mubr.msk.bf16.mxu0 %vm4247_vm0, %v4246_v0  ;;  %v1096_v5 = vpack.c.bf16 %v1079_v1, %v1079_v1 }
 0x2a6   : > { %3475 = vmatprep.subr.bf16.mxu0 %v4246_v0  ;;  %v1048_v8 = vpack.c.bf16 %v1027_v2, %v1027_v2 }
 0x2a7   : > { %v1570_v9 = vsel %vm1151_vm2, %v1096_v5, 0 }
 0x2a8   : > { %3460 = vmatmul.mubr.msk.bf16.vlgmr.msra.gmra.mrb[16].mxu1 %vm1151_vm2, %v1047_v3  ;;  %v1082_v6 = vpop.permute.xlu1 %1081 }
 0x2a9   : > { %v1030_v7 = vpop.permute.xlu0 %1029  ;;  %3470 = vmatpush3.bf16.xpose.msra.mxu1 %v1524_v4  ;;  %3471 = vmatprep.mubr.msk.bf16.mxu1 %vm4247_vm0, %v4246_v0  ;;  %v1097_v10 = vpack.c.bf16 %v1082_v6, %v1082_v6 }
 0x2aa   : > { %3481 = vmatprep.subr.bf16.mxu1 %v4246_v0  ;;  %v1049_v13 = vpack.c.bf16 %v1030_v7, %v1030_v7 }
 0x2ab   : > { %v1616_v14 = vsel %vm1151_vm2, %v1097_v10, 0 }
 0x2ac   : > { %3466 = vmatmul.mubr.msk.bf16.vlgmr.msra.gmra.mrb[20].mxu0 %vm1151_vm2, %v1048_v8  ;;  %v1085_v11 = vpop.permute.xlu1 %1084 }
 0x2ad   : > { %3476 = vmatpush3.bf16.xpose.msra.mxu0 %v1570_v9  ;;  %v1033_v12 = vpop.permute.xlu0 %1032  ;;  %3477 = vmatprep.mubr.msk.bf16.mxu0 %vm4247_vm0, %v4246_v0  ;;  %v1098_v15 = vpack.c.bf16 %v1085_v11, %v1085_v11 }
 0x2ae   : > { %3487 = vmatprep.subr.bf16.mxu0 %v4246_v0  ;;  %v1050_v16 = vpack.c.bf16 %v1033_v12, %v1033_v12 }
 0x2af   : > { %v1662_v19 = vsel %vm1151_vm2, %v1098_v15, 0 }
 0x2b0   : > { %3472 = vmatmul.mubr.msk.bf16.vlgmr.msra.gmra.mrb[20].mxu1 %vm1151_vm2, %v1049_v13  ;;  %v1039_v22 = vpop.permute.xlu1 %1038 }
 0x2b1   : > { %3482 = vmatpush3.bf16.xpose.msra.mxu1 %v1616_v14  ;;  %3483 = vmatprep.mubr.msk.bf16.mxu1 %vm4247_vm0, %v4246_v0  ;;  %v1036_v18 = vpop.permute.xlu0 %1035  ;;  %v1052_v23 = vpack.c.bf16 %v1039_v22, %v1039_v22 }
 0x2b2   : > { %3493 = vmatprep.subr.bf16.mxu1 %v4246_v0  ;;  %v1051_v20 = vpack.c.bf16 %v1036_v18, %v1036_v18 }
 0x2b4   : > { %3478 = vmatmul.mubr.msk.bf16.vlgmr.msra.gmra.mrb[24].mxu0 %vm1151_vm2, %v1050_v16  ;;  %v1101_v32 = vpop.permute.xlu1 %1100 }
 0x2b5   : > { %3488 = vmatpush3.bf16.xpose.msra.mxu0 %v1662_v19  ;;  %3489 = vmatprep.mubr.msk.bf16.mxu0 %vm4247_vm0, %v4246_v0  ;;  %v1134_v33 = vpack.c.bf16 %v1101_v32, %v1101_v32  ;;  %v1104_v63 = vpop.permute.xlu0 %1103 }
 0x2b6   : > { %3499 = vmatprep.subr.bf16.mxu0 %v4246_v0  ;;  %v1135_v32 = vpack.c.bf16 %v1104_v63, %v1104_v63 }
 0x2b7   : > { %v1935_v34 = vsel %vm1887_vm3, %v1134_v33, 0 }
 0x2b8   : > { %3484 = vmatmul.mubr.msk.bf16.vlgmr.msra.gmra.mrb[24].mxu1 %vm1151_vm2, %v1051_v20 }
 0x2b9   : > { %3494 = vmatpush3.bf16.msra.mxu1 %v1889_v21  ;;  %3495 = vmatprep.mubr.msk.bf16.mxu1 %vm4247_vm0, %v4246_v0  ;;  %v4856_v8 = vpop.permute.xlu0 %1106 }
 0x2ba   : > { %3505 = vmatprep.subr.bf16.mxu1 %v4246_v0 }
 0x2bc   : > { %3490 = vmatmul.mubr.msk.bf16.vlgmr.msra.gmra.mrb[28].mxu0 %vm1151_vm2, %v1052_v23 }
 0x2bd   : > { %3501 = vmatprep.mubr.msk.bf16.mxu0 %vm4247_vm0, %v4246_v0  ;;  %3500 = vmatpush3.bf16.msra.mxu0 %v1935_v34 }
 0x2be   : > { %3511 = vmatprep.subr.bf16.mxu0 %v4246_v0 }
 0x2f4   : > { %v1192_v25 = vpop.f32.mrb[4].mxu1 }
 0x2f5   : > { %v4825_v26 = vadd.f32 %v4822_v24, %v1192_v25  ;;  %v3425_v27 = vpop.f32.mrb[5].mxu1 }
 0x2f6   : > { %v1195_v29 = vpop.f32.mrb[6].mxu1 }
 0x2f7   : > { %v3426_v30 = vpop.f32.mrb[7].mxu1  ;;  %v1704_v31 = vsel %vm1151_vm2, %v4825_v26, -inf }
 0x2f8   : > { %1705 = vmax.xlane.f32.xlu0 %v1704_v31 }
 0x367   : > { %v1238_v35 = vpop.f32.mrb[8].mxu0 }
 0x368   : > { %v4832_v36 = vadd.f32 %v4822_v24, %v1238_v35  ;;  %v3431_v37 = vpop.f32.mrb[9].mxu0  ;;  %v1981_v35 = vsel %vm1887_vm3, %v1135_v32, 0 }
 0x369   : > { %v1241_v38 = vpop.f32.mrb[10].mxu0 }
 0x36a   : > { %v3432_v39 = vpop.f32.mrb[11].mxu0  ;;  %v1707_v40 = vsel %vm1151_vm2, %v4832_v36, -inf }
 0x36b   : > { %1708 = vmax.xlane.f32.xlu1 %v1707_v40  ;;  %v1284_v41 = vpop.f32.mrb[8].mxu1 }
 0x36c   : > { %v4837_v42 = vadd.f32 %v4822_v24, %v1284_v41  ;;  %v3437_v43 = vpop.f32.mrb[9].mxu1 }
 0x36d   : > { %v1287_v44 = vpop.f32.mrb[10].mxu1 }
 0x36e   : > { %v3438_v45 = vpop.f32.mrb[11].mxu1  ;;  %v1710_v46 = vsel %vm1151_vm2, %v4837_v42, -inf }
 0x36f   : > { %v1330_v47 = vpop.f32.mrb[12].mxu0  ;;  %1711 = vmax.xlane.f32.xlu0 %v1710_v46 }
 0x370   : > { %v4842_v48 = vadd.f32 %v4822_v24, %v1330_v47  ;;  %v3443_v49 = vpop.f32.mrb[13].mxu0 }
 0x371   : > { %v1333_v50 = vpop.f32.mrb[14].mxu0 }
 0x372   : > { %v3444_v51 = vpop.f32.mrb[15].mxu0  ;;  %v1713_v52 = vsel %vm1151_vm2, %v4842_v48, -inf }
 0x373   : > { %1714 = vmax.xlane.f32.xlu0 %v1713_v52  ;;  %v1376_v53 = vpop.f32.mrb[12].mxu1  ;;  %v1110_v52 = vpop.permute.xlu1 %1109 }
 0x374   : > { %v4847_v54 = vadd.f32 %v4822_v24, %v1376_v53  ;;  %v3449_v55 = vpop.f32.mrb[13].mxu1 }
 0x375   : > { %v1379_v56 = vpop.f32.mrb[14].mxu1 }
 0x376   : > { %v3450_v57 = vpop.f32.mrb[15].mxu1  ;;  %v1716_v58 = vsel %vm1151_vm2, %v4847_v54, -inf }
 0x377   : > { %v1422_v59 = vpop.f32.mrb[16].mxu0  ;;  %1717 = vmax.xlane.f32.xlu1 %v1716_v58 }
 0x378   : > { %v4852_v60 = vadd.f32 %v4822_v24, %v1422_v59  ;;  %v3455_v61 = vpop.f32.mrb[17].mxu0 }
 0x379   : > { %v1425_v62 = vpop.f32.mrb[18].mxu0 }
 0x37a   : > { %v3456_v1 = vpop.f32.mrb[19].mxu0  ;;  %v1719_v2 = vsel %vm1151_vm2, %v4852_v60, -inf }
 0x37b   : > { %1720 = vmax.xlane.f32.xlu0 %v1719_v2  ;;  %v1468_v3 = vpop.f32.mrb[16].mxu1 }
 0x37c   : > { %v3461_v4 = vpop.f32.mrb[17].mxu1  ;;  %v4883_v39 = vadd.f32 %v4822_v24, %v1468_v3 }
 0x37d   : > { %v1471_v5 = vpop.f32.mrb[18].mxu1 }
 0x37e   : > { %v3462_v6 = vpop.f32.mrb[19].mxu1  ;;  %v1722_v44 = vsel %vm1151_vm2, %v4883_v39, -inf }
 0x37f   : > { %v1514_v7 = vpop.f32.mrb[20].mxu0 }
 0x380   : > { %v3467_v9 = vpop.f32.mrb[21].mxu0  ;;  %v4880_v38 = vadd.f32 %v4822_v24, %v1514_v7  ;;  %v1137_v7 = vpack.c.bf16 %v1110_v52, %v1110_v52 }
 0x381   : > { %v1517_v10 = vpop.f32.mrb[22].mxu0 }
 0x382   : > { %v3468_v11 = vpop.f32.mrb[23].mxu0  ;;  %v1725_v41 = vsel %vm1151_vm2, %v4880_v38, -inf }
 0x383   : > { %v1560_v12 = vpop.f32.mrb[20].mxu1  ;;  %v2073_v11 = vsel %vm1887_vm3, %v1137_v7, 0 }
 0x384   : > { %v3473_v13 = vpop.f32.mrb[21].mxu1  ;;  %v4886_v40 = vadd.f32 %v4822_v24, %v1560_v12 }
 0x385   : > { %v4858_v14 = vpop.xlane.xlu0 %1705  ;;  %v1563_v15 = vpop.f32.mrb[22].mxu1 }
 0x386   : > { %v1776_v16 = vsub.f32 %v4825_v26, %v4858_v14  ;;  %v3474_v17 = vpop.f32.mrb[23].mxu1  ;;  %v1728_v45 = vsel %vm1151_vm2, %v4886_v40, -inf }
 0x387   : > { %v1606_v18 = vpop.f32.mrb[24].mxu0 }
 0x388   : > { %v1788_v19 = vmul.f32 1.442695, %v1776_v16  ;;  %v3479_v20 = vpop.f32.mrb[25].mxu0  ;;  %1115 = vrot.lane.b32.xlu1 %v4749_v28, %s4253_s30  ;;  %v4909_v50 = vadd.f32 %v4822_v24, %v1606_v18 }
 0x389   : > { %v1609_v21 = vpop.f32.mrb[26].mxu0 }
 0x38a   : > { %v3480_v22 = vpop.f32.mrb[27].mxu0  ;;  %3792 = vpow2.f32 %v1788_v19  ;;  %v1731_v51 = vsel %vm1151_vm2, %v4909_v50, -inf }
 0x38b   : > { %v1652_v23 = vpop.f32.mrb[24].mxu1 }
 0x38c   : > { %1118 = vrot.lane.b32.xlu1 %v4749_v28, %s4254_s28  ;;  %v3485_v25 = vpop.f32.mrb[25].mxu1  ;;  %v4891_v43 = vadd.f32 %v4822_v24, %v1652_v23 }
 0x38d   : > { %v1655_v27 = vpop.f32.mrb[26].mxu1 }
 0x38e   : > { %v3486_v29 = vpop.f32.mrb[27].mxu1  ;;  %v1734_v47 = vsel %vm1151_vm2, %v4891_v43, -inf }
 0x38f   : > { %v1698_v30 = vpop.f32.mrb[28].mxu0 }
 0x390   : > { %v3491_v31 = vpop.f32.mrb[29].mxu0  ;;  %1121 = vrot.lane.b32.xlu1 %v4749_v28, %s4255_s25  ;;  %v4898_v46 = vadd.f32 %v4822_v24, %v1698_v30 }
 0x391   : > { %v1701_v26 = vpop.f32.mrb[30].mxu0  ;;  %1112 = vrot.lane.b32.xlu0 %v4749_v28, %s4252_s24  ;;  %s5247_s24 = sld [smem:[#allocation32_spill]] }
 0x392   : > { %v3492_v33 = vpop.f32.mrb[31].mxu0  ;;  %v1737_v49 = vsel %vm1151_vm2, %v4898_v46, -inf }
 0x394   : > { %v4870_v34 = vpop.eup %3792 }
 0x395   : > { %v1872_v37 = vpack.c.bf16 %v4870_v34, %v4870_v34 }
 0x397   : > { %3496 = vmatmul.mubr.msk.bf16.vlgmr.msra.gmra.mrb[28].mxu1 %vm1151_vm2, %v1872_v37 }
 0x398   : > { %3506 = vmatpush3.bf16.msra.mxu1 %v1981_v35  ;;  %3507 = vmatprep.mubr.msk.bf16.mxu1 %vm4247_vm0, %v4246_v0 }
 0x399   : > { %3517 = vmatprep.subr.bf16.mxu1 %v4246_v0 }
 0x3b0   : > { %1726 = vmax.xlane.f32.xlu0 %v1725_v41 }
 0x3b4   : > { %1723 = vmax.xlane.f32.xlu1 %v1722_v44  ;;  %1729 = vmax.xlane.f32.xlu0 %v1728_v45 }
 0x3b8   : > { %1735 = vmax.xlane.f32.xlu0 %v1734_v47 }
 0x3bc   : > { %1738 = vmax.xlane.f32.xlu0 %v1737_v49 }
 0x3c5   : > { %1124 = vrot.lane.b32.xlu1 %v4749_v28, %s4256_s27 }
 0x3d2   : > { %1130 = vrot.lane.b32.xlu0 %v4749_v28, %s4258_s11  ;;  %s4260_s11 = smov 24  }
 0x3e9   : > { %1732 = vmax.xlane.f32.xlu1 %v1731_v51 }
 0x3f8   : > { %v4913_v53 = vpop.xlane.xlu1 %1708 }
 0x3f9   : > { %v1777_v55 = vsub.f32 %v4832_v36, %v4913_v53 }
 0x3fa   : > { %1127 = vrot.lane.b32.xlu1 %v4749_v28, %s4257_s21 }
 0x3fb   : > { %v1790_v56 = vmul.f32 1.442695, %v1777_v55 }
 0x3fc   : > { %v4919_v57 = vpop.xlane.xlu0 %1711 }
 0x3fd   : > { %v1778_v24 = vsub.f32 %v4837_v42, %v4919_v57  ;;  %3794 = vpow2.f32 %v1790_v56  ;;  %v1136_v42 = vpack.c.bf16 %v4856_v8, %v4856_v8 }
 0x3ff   : > { %v1792_v58 = vmul.f32 1.442695, %v1778_v24  ;;  %v2027_v6 = vsel %vm1887_vm3, %v1136_v42, 0 }
 0x400   : > { %v4923_v59 = vpop.xlane.xlu0 %1714 }
 0x401   : > { %v1779_v61 = vsub.f32 %v4842_v48, %v4923_v59  ;;  %3796 = vpow2.f32 %v1792_v58 }
 0x403   : > { %v1794_v62 = vmul.f32 1.442695, %v1779_v61 }
 0x404   : > { %v4927_v63 = vpop.xlane.xlu1 %1717 }
 0x405   : > { %v1780_v28 = vsub.f32 %v4847_v54, %v4927_v63  ;;  %3798 = vpow2.f32 %v1794_v62 }
 0x407   : > { %v1796_v36 = vmul.f32 1.442695, %v1780_v28  ;;  %v3795_v1 = vpop.eup %3794 }
 0x408   : > { %v4933_v2 = vpop.xlane.xlu0 %1720  ;;  %v1873_v48 = vpack.c.bf16 %v3795_v1, %v3795_v1  ;;  %v1827_v29 = vsel %vm1151_vm2, %v3795_v1, 0.0 }
 0x409   : > { %v1781_v3 = vsub.f32 %v4852_v60, %v4933_v2  ;;  %3800 = vpow2.f32 %v1796_v36  ;;  %v1116_v60 = vpop.permute.xlu1 %1115 }
 0x40a   : > { %3502 = vmatmul.mubr.msk.bf16.vlgmr.msra.gmra.mrb[32].mxu0 %vm1151_vm2, %v1873_v48  ;;  %v1139_v17 = vpack.c.bf16 %v1116_v60, %v1116_v60 }
 0x40b   : > { %v1798_v4 = vmul.f32 1.442695, %v1781_v3  ;;  %v3797_v5 = vpop.eup %3796  ;;  %3512 = vmatpush3.bf16.msra.mxu0 %v2027_v6  ;;  %3513 = vmatprep.mubr.msk.bf16.mxu0 %vm4247_vm0, %v4246_v0  ;;  %v1824_v3 = vsel %vm1151_vm2, %v4870_v34, 0.0 }
 0x40c   : > { %v1113_v54 = vpop.permute.xlu0 %1112  ;;  %v1830_v9 = vsel %vm1151_vm2, %v3797_v5, 0.0  ;;  %v1874_v8 = vpack.c.bf16 %v3797_v5, %v3797_v5  ;;  %3523 = vmatprep.subr.bf16.mxu0 %v4246_v0  ;;  %v2165_v22 = vsel %vm1887_vm3, %v1139_v17, 0 }
 0x40d   : > { %3802 = vpow2.f32 %v1798_v4  ;;  %1831 = vadd.xlane.f32.xlu0 %v1830_v9  ;;  %v1138_v12 = vpack.c.bf16 %v1113_v54, %v1113_v54  ;;  %v1119_v19 = vpop.permute.xlu1 %1118 }
 0x40e   : > { %3508 = vmatmul.mubr.msk.bf16.vlgmr.msra.gmra.mrb[32].mxu1 %vm1151_vm2, %v1874_v8  ;;  %v1140_v23 = vpack.c.bf16 %v1119_v19, %v1119_v19 }
 0x40f   : > { %v3799_v10 = vpop.eup %3798  ;;  %3518 = vmatpush3.bf16.msra.mxu1 %v2073_v11  ;;  %3519 = vmatprep.mubr.msk.bf16.mxu1 %vm4247_vm0, %v4246_v0  ;;  %v2119_v18 = vsel %vm1887_vm3, %v1138_v12, 0 }
 0x410   : > { %v1833_v13 = vsel %vm1151_vm2, %v3799_v10, 0.0  ;;  %v1875_v15 = vpack.c.bf16 %v3799_v10, %v3799_v10  ;;  %3529 = vmatprep.subr.bf16.mxu1 %v4246_v0  ;;  %v2211_v27 = vsel %vm1887_vm3, %v1140_v23, 0 }
 0x411   : > { %1834 = vadd.xlane.f32.xlu0 %v1833_v13  ;;  %v1122_v31 = vpop.permute.xlu1 %1121 }
 0x412   : > { %3514 = vmatmul.mubr.msk.bf16.vlgmr.msra.gmra.mrb[36].mxu0 %vm1151_vm2, %v1875_v15  ;;  %v1141_v58 = vpack.c.bf16 %v1122_v31, %v1122_v31  ;;  %v1742_v31 = vsub.f32 -inf, %v4919_v57 }
 0x413   : > { %v4949_v16 = vpop.eup %3800  ;;  %3524 = vmatpush3.bf16.msra.mxu0 %v2119_v18  ;;  %3525 = vmatprep.mubr.msk.bf16.mxu0 %vm4247_vm0, %v4246_v0 }
 0x414   : > { %v1876_v20 = vpack.c.bf16 %v4949_v16, %v4949_v16  ;;  %3535 = vmatprep.subr.bf16.mxu0 %v4246_v0  ;;  %v2257_v28 = vsel %vm1887_vm3, %v1141_v58, 0 }
 0x416   : > { %3520 = vmatmul.mubr.msk.bf16.vlgmr.msra.gmra.mrb[36].mxu1 %vm1151_vm2, %v1876_v20 }
 0x417   : > { %v3803_v21 = vpop.eup %3802  ;;  %3530 = vmatpush3.bf16.msra.mxu1 %v2165_v22  ;;  %3531 = vmatprep.mubr.msk.bf16.mxu1 %vm4247_vm0, %v4246_v0 }
 0x418   : > { %v1877_v25 = vpack.c.bf16 %v3803_v21, %v3803_v21  ;;  %3541 = vmatprep.subr.bf16.mxu1 %v4246_v0  ;;  %v1839_v30 = vsel %vm1151_vm2, %v3803_v21, 0.0 }
 0x41a   : > { %3526 = vmatmul.mubr.msk.bf16.vlgmr.msra.gmra.mrb[40].mxu0 %vm1151_vm2, %v1877_v25  ;;  %v1836_v25 = vsel %vm1151_vm2, %v4949_v16, 0.0  ;;  %v1745_v16 = vsub.f32 -inf, %v4933_v2 }
 0x41b   : > { %3536 = vmatpush3.bf16.msra.mxu0 %v2211_v27  ;;  %3537 = vmatprep.mubr.msk.bf16.mxu0 %vm4247_vm0, %v4246_v0 }
 0x41c   : > { %3547 = vmatprep.subr.bf16.mxu0 %v4246_v0 }
 0x41e   : > { %1828 = vadd.xlane.f32.xlu1 %v1827_v29  ;;  %v1741_v29 = vsub.f32 -inf, %v4913_v53  ;;  %v1744_v53 = vsub.f32 -inf, %v4927_v63 }
 0x422   : > { %1840 = vadd.xlane.f32.xlu1 %v1839_v30  ;;  %v1754_v30 = vmul.f32 1.442695, %v1741_v29 }
 0x43d   : > { %v4970_v26 = vpop.xlane.xlu0 %1726 }
 0x43e   : > { %v1783_v32 = vsub.f32 %v4880_v38, %v4970_v26 }
 0x440   : > { %v1802_v33 = vmul.f32 1.442695, %v1783_v32  ;;  %v1756_v32 = vmul.f32 1.442695, %v1742_v31 }
 0x441   : > { %v4974_v35 = vpop.xlane.xlu1 %1723  ;;  %v4976_v37 = vpop.xlane.xlu0 %1729 }
 0x442   : > { %v1782_v41 = vsub.f32 %v4883_v39, %v4974_v35  ;;  %3804 = vpow2.f32 %v1802_v33  ;;  %v1784_v45 = vsub.f32 %v4886_v40, %v4976_v37  ;;  %v1743_v33 = vsub.f32 -inf, %v4923_v59 }
 0x444   : > { %v1800_v44 = vmul.f32 1.442695, %v1782_v41  ;;  %v1804_v51 = vmul.f32 1.442695, %v1784_v45  ;;  %v1758_v41 = vmul.f32 1.442695, %v1743_v33 }
 0x445   : > { %v4982_v47 = vpop.xlane.xlu0 %1735  ;;  %v1125_v52 = vpop.permute.xlu1 %1124  ;;  %v1762_v45 = vmul.f32 1.442695, %v1745_v16 }
 0x446   : > { %v1786_v49 = vsub.f32 %v4891_v43, %v4982_v47  ;;  %3806 = vpow2.f32 %v1800_v44  ;;  %v1142_v55 = vpack.c.bf16 %v1125_v52, %v1125_v52 }
 0x448   : > { %v1808_v38 = vmul.f32 1.442695, %v1786_v49  ;;  %v2303_v40 = vsel %vm1887_vm3, %v1142_v55, 0 }
 0x449   : > { %v5007_v9 = vpop.xlane.xlu0 %1738 }
 0x44a   : > { %3808 = vpow2.f32 %v1808_v38  ;;  %v1787_v34 = vsub.f32 %v4898_v46, %v5007_v9 }
 0x44b   : > { %3810 = vpow2.f32 %v1804_v51 }
 0x44c   : > { %v3805_v56 = vpop.eup %3804  ;;  %v1810_v11 = vmul.f32 1.442695, %v1787_v34 }
 0x44d   : > { %v1845_v39 = vsel %vm1151_vm2, %v3805_v56, 0.0  ;;  %v1879_v24 = vpack.c.bf16 %v3805_v56, %v3805_v56  ;;  %v1131_v46 = vpop.permute.xlu0 %1130 }
 0x44e   : > { %1846 = vadd.xlane.f32.xlu1 %v1845_v39  ;;  %v1144_v18 = vpack.c.bf16 %v1131_v46, %v1131_v46 }
 0x44f   : > { %3538 = vmatmul.mubr.msk.bf16.vlgmr.msra.gmra.mrb[44].mxu0 %vm1151_vm2, %v1879_v24  ;;  %v1760_v24 = vmul.f32 1.442695, %v1744_v53 }
 0x450   : > { %v3807_v61 = vpop.eup %3806  ;;  %3548 = vmatpush3.bf16.msra.mxu0 %v2303_v40  ;;  %3549 = vmatprep.mubr.msk.bf16.mxu0 %vm4247_vm0, %v4246_v0  ;;  %v2395_v22 = vsel %vm1887_vm3, %v1144_v18, 0 }
 0x451   : > { %v1842_v43 = vsel %vm1151_vm2, %v3807_v61, 0.0  ;;  %v1878_v62 = vpack.c.bf16 %v3807_v61, %v3807_v61  ;;  %3559 = vmatprep.subr.bf16.mxu0 %v4246_v0 }
 0x452   : > { %1843 = vadd.xlane.f32.xlu0 %v1842_v43 }
 0x453   : > { %3532 = vmatmul.mubr.msk.bf16.vlgmr.msra.gmra.mrb[40].mxu1 %vm1151_vm2, %v1878_v62 }
 0x454   : > { %v3809_v36 = vpop.eup %3808  ;;  %3542 = vmatpush3.bf16.msra.mxu1 %v2257_v28  ;;  %3543 = vmatprep.mubr.msk.bf16.mxu1 %vm4247_vm0, %v4246_v0 }
 0x455   : > { %v1854_v1 = vsel %vm1151_vm2, %v3809_v36, 0.0  ;;  %3553 = vmatprep.subr.bf16.mxu1 %v4246_v0  ;;  %v3811_v42 = vpop.eup %3810  ;;  %v1882_v17 = vpack.c.bf16 %v3809_v36, %v3809_v36 }
 0x456   : > { %1855 = vadd.xlane.f32.xlu1 %v1854_v1  ;;  %v1880_v48 = vpack.c.bf16 %v3811_v42, %v3811_v42  ;;  %v1848_v4 = vsel %vm1151_vm2, %v3811_v42, 0.0 }
 0x45a   : > { %1825 = vadd.xlane.f32.xlu1 %v1824_v3 }
 0x45b   : > { %3544 = vmatmul.mubr.msk.bf16.vlgmr.msra.gmra.mrb[44].mxu1 %vm1151_vm2, %v1880_v48 }
 0x45c   : > { %3555 = vmatprep.mubr.msk.bf16.mxu1 %vm4247_vm0, %v4246_v0 }
 0x45e   : > { %1849 = vadd.xlane.f32.xlu1 %v1848_v4 }
 0x46a   : > { %v5005_v5 = vpop.f32.mrb[28].mxu1 }
 0x46b   : > { %v3497_v6 = vpop.f32.mrb[29].mxu1 }
 0x46c   : > { %v1928_v7 = vpop.f32.mrb[30].mxu1 }
 0x46d   : > { %v3498_v54 = vpop.f32.mrb[31].mxu1 }
 0x476   : > { %v5011_v8 = vpop.xlane.xlu1 %1732 }
 0x477   : > { %v1785_v60 = vsub.f32 %v4909_v50, %v5011_v8 }
 0x479   : > { %v1806_v10 = vmul.f32 1.442695, %v1785_v60 }
 0x47a   : > { %v1128_v12 = vpop.permute.xlu1 %1127 }
 0x47b   : > { %v1143_v13 = vpack.c.bf16 %v1128_v12, %v1128_v12  ;;  %3812 = vpow2.f32 %v1806_v10 }
 0x47c   : > { %3814 = vpow2.f32 %v1810_v11 }
 0x47d   : > { %v2349_v15 = vsel %vm1887_vm3, %v1143_v13, 0  ;;  %3816 = vpow2.f32 %v1754_v30 }
 0x47e   : > { %3554 = vmatpush3.bf16.msra.mxu1 %v2349_v15  ;;  %3818 = vpow2.f32 %v1756_v32 }
 0x47f   : > { %3565 = vmatprep.subr.bf16.mxu1 %v4246_v0  ;;  %3820 = vpow2.f32 %v1758_v41 }
 0x480   : > { %3822 = vpow2.f32 %v1762_v45 }
 0x481   : > { %3556 = vmatmul.mubr.msk.bf16.vlgmr.msra.gmra.mrb[48].mxu1 %vm1151_vm2, %v1882_v17 }
 0x482   : > { %3569 = vmatprep.mubr.msk.bf16.mxu1 %vm4247_vm0, %v4246_v0 }
 0x485   : > { %v3813_v50 = vpop.eup %3812 }
 0x486   : > { %v1851_v19 = vsel %vm1151_vm2, %v3813_v50, 0.0  ;;  %v1881_v20 = vpack.c.bf16 %v3813_v50, %v3813_v50  ;;  %v3815_v21 = vpop.eup %3814 }
 0x487   : > { %1852 = vadd.xlane.f32.xlu0 %v1851_v19  ;;  %v1857_v23 = vsel %vm1151_vm2, %v3815_v21, 0.0  ;;  %v1883_v27 = vpack.c.bf16 %v3815_v21, %v3815_v21  ;;  %v3817_v44 = vpop.eup %3816 }
 0x488   : > { %3550 = vmatmul.mubr.msk.bf16.vlgmr.msra.gmra.mrb[48].mxu0 %vm1151_vm2, %v1881_v20  ;;  %v1813_v38 = vmul.f32 0.0, %v3817_v44  ;;  %v3819_v51 = vpop.eup %3818  ;;  %v1747_v44 = vsub.f32 -inf, %v4970_v26 }
 0x489   : > { %3560 = vmatpush3.bf16.msra.mxu0 %v2395_v22  ;;  %3561 = vmatprep.mubr.msk.bf16.mxu0 %vm4247_vm0, %v4246_v0  ;;  %v1814_v57 = vmul.f32 0.0, %v3819_v51  ;;  %v3821_v56 = vpop.eup %3820  ;;  %v1748_v51 = vsub.f32 -inf, %v4976_v37  ;;  %v3780_v37 = vld [vmem:[%s5198_s8 + $0x10] sm:$0xff]  }
 0x48a   : > { %3573 = vmatprep.subr.bf16.mxu0 %v4246_v0  ;;  %v1815_v58 = vmul.f32 0.0, %v3821_v56  ;;  %v3823_v2 = vpop.eup %3822  ;;  %v1766_v45 = vmul.f32 1.442695, %v1747_v44 }
 0x48b   : > { %1858 = vadd.xlane.f32.xlu0 %v1857_v23  ;;  %v1817_v1 = vmul.f32 0.0, %v3823_v2 }
 0x48f   : > { %1837 = vadd.xlane.f32.xlu0 %v1836_v25 }
 0x490   : > { %3562 = vmatmul.mubr.msk.bf16.vlgmr.msra.gmra.mrb[52].mxu0 %vm1151_vm2, %v1883_v27 }
 0x491   : > { %3577 = vmatprep.mubr.msk.bf16.mxu0 %vm4247_vm0, %v4246_v0  ;;  %3574 = vmatpush3.bf16.msra.mxu0 %v3780_v37 }
 0x492   : > { %3575 = vmatprep.subr.bf16.mxu0 %v4246_v0 }
 0x49a   : > { %v1832_v52 = vpop.xlane.xlu0 %1831 }
 0x49b   : > { %v1862_v39 = vadd.f32 %v1832_v52, %v1814_v57  ;;  %v1768_v52 = vmul.f32 1.442695, %v1748_v51 }
 0x49e   : > { %v1835_v59 = vpop.xlane.xlu0 %1834 }
 0x49f   : > { %v1863_v40 = vadd.f32 %v1835_v59, %v1815_v58 }
 0x4ab   : > { %v1829_v49 = vpop.xlane.xlu1 %1828 }
 0x4ac   : > { %v1861_v55 = vadd.f32 %v1829_v49, %v1813_v38  ;;  %v1746_v49 = vsub.f32 -inf, %v4974_v35 }
 0x4ae   : > { %3824 = vrcp.f32 %v1861_v55 }
 0x4af   : > { %3826 = vrcp.f32 %v1862_v39  ;;  %v1841_v43 = vpop.xlane.xlu1 %1840 }
 0x4b0   : > { %3828 = vpow2.f32 %v1760_v24  ;;  %v1865_v48 = vadd.f32 %v1841_v43, %v1817_v1 }
 0x4b1   : > { %3830 = vrcp.f32 %v1863_v40 }
 0x4b2   : > { %3832 = vrcp.f32 %v1865_v48 }
 0x4b3   : > { %3834 = vpow2.f32 %v1766_v45 }
 0x4b8   : > { %v3825_v36 = vpop.eup %3824 }
 0x4b9   : > { %v3827_v54 = vpop.eup %3826 }
 0x4ba   : > { %v3829_v11 = vpop.eup %3828 }
 0x4bb   : > { %v3831_v17 = vpop.eup %3830  ;;  %v1816_v19 = vmul.f32 0.0, %v3829_v11 }
 0x4bc   : > { %v3833_v31 = vpop.eup %3832 }
 0x4db   : > { %v1847_v55 = vpop.xlane.xlu1 %1846 }
 0x4dd   : > { %v1971_v61 = vpop.f32.mrb[32].mxu0 }
 0x4de   : > { %v2438_v62 = vadd.f32 %v1971_v61, %v1813_v38  ;;  %v3503_v28 = vpop.f32.mrb[33].mxu0  ;;  %v1764_v38 = vmul.f32 1.442695, %v1746_v49 }
 0x4df   : > { %v1974_v42 = vpop.f32.mrb[34].mxu0  ;;  %v1844_v53 = vpop.xlane.xlu0 %1843 }
 0x4e0   : > { %v2462_v63 = vmul.f32 %v3825_v36, %v2438_v62  ;;  %v3504_v3 = vpop.f32.mrb[35].mxu0  ;;  %3836 = vpow2.f32 %v1764_v38 }
 0x4e1   : > { %v2017_v4 = vpop.f32.mrb[32].mxu1  ;;  %3838 = vpow2.f32 %v1768_v52  ;;  %v3782_v3 = vld [vmem:[%s5198_s8 + $0x18] sm:$0xff]  }
 0x4e2   : > { %v2439_v6 = vadd.f32 %v2017_v4, %v1814_v57  ;;  %v3509_v7 = vpop.f32.mrb[33].mxu1  ;;  %v3835_v57 = vpop.eup %3834  ;;  %3576 = vmatpush3.bf16.msra.mxu0 %v3782_v3 }
 0x4e3   : > { %v2020_v34 = vpop.f32.mrb[34].mxu1  ;;  %v5047_v56 = vpop.xlane.xlu1 %1855  ;;  %v1819_v39 = vmul.f32 0.0, %v3835_v57  ;;  %3589 = vmatprep.subr.bf16.mxu0 %v4246_v0 }
 0x4e4   : > { %v5037_v60 = vmul.f32 %v3827_v54, %v2439_v6  ;;  %v3510_v10 = vpop.f32.mrb[35].mxu1  ;;  %v3783_v54 = vld [vmem:[%s5198_s8 + $0x8] sm:$0xff]  }
 0x4e5   : > { %v2063_v12 = vpop.f32.mrb[36].mxu0  ;;  %v1867_v26 = vadd.f32 %v1847_v55, %v1819_v39 }
 0x4e6   : > { %v2440_v13 = vadd.f32 %v2063_v12, %v1815_v58  ;;  %v3515_v15 = vpop.f32.mrb[37].mxu0 }
 0x4e7   : > { %v2066_v46 = vpop.f32.mrb[38].mxu0  ;;  %v5053_v35 = vpop.xlane.xlu1 %1825  ;;  %3840 = vrcp.f32 %v1867_v26 }
 0x4e8   : > { %v5039_v18 = vmul.f32 %v3831_v17, %v2440_v13  ;;  %v3516_v50 = vpop.f32.mrb[39].mxu0 }
 0x4e9   : > { %v2109_v20 = vpop.f32.mrb[36].mxu1 }
 0x4ea   : > { %v5041_v21 = vadd.f32 %v2109_v20, %v1816_v19  ;;  %v3521_v22 = vpop.f32.mrb[37].mxu1  ;;  %v3837_v24 = vpop.eup %3836 }
 0x4eb   : > { %v2112_v23 = vpop.f32.mrb[38].mxu1  ;;  %v1818_v58 = vmul.f32 0.0, %v3837_v24  ;;  %v3839_v43 = vpop.eup %3838 }
 0x4ec   : > { %v3522_v25 = vpop.f32.mrb[39].mxu1  ;;  %v1850_v28 = vpop.xlane.xlu1 %1849  ;;  %v1820_v36 = vmul.f32 0.0, %v3839_v43 }
 0x4ed   : > { %v2155_v27 = vpop.f32.mrb[40].mxu0  ;;  %v1866_v2 = vadd.f32 %v1844_v53, %v1818_v58 }
 0x4ee   : > { %v2442_v29 = vadd.f32 %v2155_v27, %v1817_v1  ;;  %v3527_v30 = vpop.f32.mrb[41].mxu0  ;;  %v3781_v1 = vld [vmem:[%s5198_s8] sm:$0xff]   ;;  %v1868_v42 = vadd.f32 %v1850_v28, %v1820_v36 }
 0x4ef   : > { %v2158_v32 = vpop.f32.mrb[42].mxu0  ;;  %3842 = vrcp.f32 %v1866_v2  ;;  %3566 = vmatpush3.bf16.msra.mxu1 %v3781_v1  ;;  %v1750_v30 = vsub.f32 -inf, %v4982_v47 }
 0x4f0   : > { %v2466_v33 = vmul.f32 %v3833_v31, %v2442_v29  ;;  %v3528_v41 = vpop.f32.mrb[43].mxu0  ;;  %3567 = vmatprep.subr.bf16.mxu1 %v4246_v0 }
 0x4f1   : > { %v3841_v6 = vpop.eup %3840 }
 0x4f2   : > { %v3764_v16 = vpack.i.bf16 %v2466_v33, %v2462_v63 }
 0x4f3   : > { %3568 = vmatpush3.bf16.msra.mxu1 %v3783_v54 }
 0x4f4   : > { %3765 = vrot.lane.b32.xlu0 %v3764_v16, %s4259_s9  ;;  %3581 = vmatprep.subr.bf16.mxu1 %v4246_v0  ;;  %v1751_v16 = vsub.f32 -inf, %v5007_v9 }
 0x4f6   : > { %v1774_v45 = vmul.f32 1.442695, %v1751_v16 }
 0x4f9   : > { %v3843_v15 = vpop.eup %3842 }
 0x514   : > { %v5049_v59 = vpop.xlane.xlu0 %1852 }
 0x518   : > { %v5051_v40 = vpop.xlane.xlu0 %1858 }
 0x51c   : > { %v1838_v61 = vpop.xlane.xlu0 %1837 }
 0x51d   : > { %v1864_v62 = vadd.f32 %v1838_v61, %v1816_v19 }
 0x51f   : > { %3844 = vrcp.f32 %v1864_v62 }
 0x520   : > { %3846 = vrcp.f32 %v1868_v42 }
 0x522   : > { %v2247_v63 = vpop.f32.mrb[44].mxu0 }
 0x523   : > { %v2444_v48 = vadd.f32 %v2247_v63, %v1819_v39  ;;  %v3539_v4 = vpop.f32.mrb[45].mxu0 }
 0x524   : > { %v2250_v7 = vpop.f32.mrb[46].mxu0 }
 0x525   : > { %v2468_v34 = vmul.f32 %v3841_v6, %v2444_v48  ;;  %v3540_v10 = vpop.f32.mrb[47].mxu0 }
 0x526   : > { %v2201_v11 = vpop.f32.mrb[40].mxu1 }
 0x527   : > { %v2443_v12 = vadd.f32 %v2201_v11, %v1818_v58  ;;  %2499 = vrot.lane.b32.xlu0 %v2468_v34, %s4260_s11  ;;  %v3533_v13 = vpop.f32.mrb[41].mxu1 }
 0x528   : > { %v2204_v17 = vpop.f32.mrb[42].mxu1 }
 0x529   : > { %v3845_v46 = vpop.eup %3844  ;;  %v2467_v50 = vmul.f32 %v3843_v15, %v2443_v12  ;;  %v3534_v19 = vpop.f32.mrb[43].mxu1 }
 0x52a   : > { %v5073_v20 = vmul.f32 %v3845_v46, %v5041_v21  ;;  %v3847_v29 = vpop.eup %3846  ;;  %v1772_v21 = vmul.f32 1.442695, %v1750_v30  ;;  %v3784_v30 = vld [vmem:[%s5198_s8 + $0x20] sm:$0xff]  }
 0x52b   : > { %v3769_v22 = vpack.i.bf16 %v2467_v50, %v5037_v60  ;;  %v1749_v60 = vsub.f32 -inf, %v5011_v8 }
 0x52c   : > { %3848 = vpow2.f32 %v1772_v21 }
 0x52d   : > { %3770 = vrot.lane.b32.xlu1 %v3769_v22, %s4261_s29  ;;  %v1770_v41 = vmul.f32 1.442695, %v1749_v60 }
 0x52e   : > { %v2293_v23 = vpop.f32.mrb[44].mxu1 }
 0x52f   : > { %v2445_v25 = vadd.f32 %v2293_v23, %v1820_v36  ;;  %v3545_v27 = vpop.f32.mrb[45].mxu1  ;;  %3850 = vpow2.f32 %v1770_v41 }
 0x530   : > { %v2296_v31 = vpop.f32.mrb[46].mxu1  ;;  %3852 = vpow2.f32 %v1774_v45 }
 0x531   : > { %v5078_v32 = vmul.f32 %v3847_v29, %v2445_v25  ;;  %2482 = vrot.lane.b32.xlu1 %v5039_v18, %s4260_s11  ;;  %v3546_v33 = vpop.f32.mrb[47].mxu1 }
 0x536   : > { %v3849_v44 = vpop.eup %3848 }
 0x537   : > { %v1822_v49 = vmul.f32 0.0, %v3849_v44 }
 0x539   : > { %v1870_v47 = vadd.f32 %v5047_v56, %v1822_v49  ;;  %v3851_v38 = vpop.eup %3850 }
 0x53a   : > { %v1821_v51 = vmul.f32 0.0, %v3851_v38  ;;  %v3853_v52 = vpop.eup %3852 }
 0x53b   : > { %3854 = vrcp.f32 %v1870_v47  ;;  %v1823_v39 = vmul.f32 0.0, %v3853_v52  ;;  %v3874_v47 = vld [vmem:[%s4694_s23] sm:$0xf] }
 0x53c   : > { %v1869_v18 = vadd.f32 %v5049_v59, %v1821_v51  ;;  %v5125_v38 = vunpack.c.l.bf16 %v3874_v47 }
 0x53d   : > { %v1871_v58 = vadd.f32 %v5051_v40, %v1823_v39  ;;  %v1740_v40 = vsub.f32 -inf, %v4858_v14 }
 0x53e   : > { %3856 = vrcp.f32 %v1869_v18 }
 0x53f   : > { %3858 = vrcp.f32 %v1871_v58  ;;  %v1752_v4 = vmul.f32 1.442695, %v1740_v40 }
 0x541   : > { %3860 = vpow2.f32 %v1752_v4 }
 0x545   : > { %v3855_v57 = vpop.eup %3854 }
 0x548   : > { %v3857_v61 = vpop.eup %3856 }
 0x549   : > { %v3859_v42 = vpop.eup %3858 }
 0x54b   : > { %v3861_v6 = vpop.eup %3860 }
 0x54c   : > { %v1812_v7 = vmul.f32 0.0, %v3861_v6 }
 0x54e   : > { %v1860_v54 = vadd.f32 %v5053_v35, %v1812_v7  ;;  %v2437_v11 = vadd.f32 %v5005_v5, %v1812_v7 }
 0x550   : > { %3862 = vrcp.f32 %v1860_v54 }
 0x554   : > { %v2385_v55 = vpop.f32.mrb[48].mxu1 }
 0x555   : > { %v2447_v53 = vadd.f32 %v2385_v55, %v1822_v49  ;;  %v3557_v8 = vpop.f32.mrb[49].mxu1  ;;  %v3290_v49 = vld [vmem:[%s5247_s24 + $0x1] ss:$0 sm:$0xff] }
 0x556   : > { %v2388_v9 = vpop.f32.mrb[50].mxu1 }
 0x557   : > { %v2471_v24 = vmul.f32 %v3855_v57, %v2447_v53  ;;  %v3558_v26 = vpop.f32.mrb[51].mxu1 }
 0x559   : > { %2510 = vrot.lane.b32.xlu0 %v2471_v24, %s4261_s29 }
 0x55a   : > { %v3863_v10 = vpop.eup %3862 }
 0x55b   : > { %v2339_v56 = vpop.f32.mrb[48].mxu0  ;;  %v2461_v17 = vmul.f32 %v3863_v10, %v2437_v11 }
 0x55c   : > { %v2446_v37 = vadd.f32 %v2339_v56, %v1821_v51  ;;  %v3551_v2 = vpop.f32.mrb[49].mxu0 }
 0x55d   : > { %v2342_v59 = vpop.f32.mrb[50].mxu0  ;;  %v3291_v2 = vld [vmem:[%s5247_s24 + $0x2] ss:$0 sm:$0xff] }
 0x55e   : > { %v2470_v43 = vmul.f32 %v3857_v61, %v2446_v37  ;;  %v3552_v62 = vpop.f32.mrb[51].mxu0 }
 0x560   : > { %2506 = vrot.lane.b32.xlu1 %v2470_v43, %s4259_s9 }
 0x563   : > { %v2431_v28 = vpop.f32.mrb[52].mxu0 }
 0x564   : > { %v2448_v36 = vadd.f32 %v2431_v28, %v1823_v39  ;;  %v3563_v1 = vpop.f32.mrb[53].mxu0 }
 0x565   : > { %v2434_v63 = vpop.f32.mrb[54].mxu0 }
 0x566   : > { %v2472_v3 = vmul.f32 %v3859_v42, %v2448_v36  ;;  %v3564_v48 = vpop.f32.mrb[55].mxu0  ;;  %v3766_v34 = vpop.permute.xlu0 %3765 }
 0x567   : > { %v3768_v12 = vunpack.i.h.bf16 %v3766_v34  ;;  %v3767_v13 = vunpack.i.l.bf16 %v3766_v34 }
 0x568   : > { %2514 = vrot.lane.b32.xlu1 %v2472_v3, %s4260_s11  ;;  %s5248_s11 = sld [smem:[#allocation33_spill]] }
 0x569   : > { %v2502_v14 = vsel %vm1151_vm2, %v5073_v20, %v3768_v12  ;;  %v2485_v19 = vsel %vm1151_vm2, %v2461_v17, %v3767_v13  ;;  %v3785_v20 = vld [vmem:[%s5198_s8 + $0x28] sm:$0xff]  }
 0x599   : > { %v2500_v22 = vpop.permute.xlu0 %2499 }
 0x59f   : > { %v3771_v15 = vpop.permute.xlu1 %3770 }
 0x5a0   : > { %v3773_v46 = vunpack.i.h.bf16 %v3771_v15  ;;  %v3772_v50 = vunpack.i.l.bf16 %v3771_v15 }
 0x5a2   : > { %v2503_v35 = vsel %vm2486_vm4, %v2502_v14, %v3773_v46  ;;  %v2487_v23 = vsel %vm2486_vm4, %v2485_v19, %v3772_v50 }
 0x5a3   : > { %v2483_v25 = vpop.permute.xlu1 %2482  ;;  %v2504_v5 = vsel %vm2488_vm5, %v2503_v35, %v2500_v22 }
 0x5a4   : > { %v2489_v27 = vsel %vm2488_vm5, %v2487_v23, %v2483_v25  ;;  %v2521_v29 = vpack.c.bf16 %v2504_v5, %v2504_v5 }
 0x5a5   : > { %v2520_v31 = vpack.c.bf16 %v2489_v27, %v2489_v27 }
 0x5a6   : > { %3578 = vmatmul.mubr.msk.bf16.vlgmr.msra.gmra.mrb[56].mxu0 %vm844_vm1, %v2521_v29 }
 0x5a7   : > { %3570 = vmatmul.mubr.msk.bf16.vlgmr.msra.gmra.mrb[52].mxu1 %vm844_vm1, %v2520_v31  ;;  %3593 = vmatprep.mubr.msk.bf16.mxu0 %vm4247_vm0, %v4246_v0  ;;  %v3301_v31 = vld [vmem:[%s5248_s11] ss:$0 sm:$0xff] }
 0x5a8   : > { %3582 = vmatpush3.bf16.msra.mxu1 %v3784_v30  ;;  %3585 = vmatprep.mubr.msk.bf16.mxu1 %vm4247_vm0, %v4246_v0 }
 0x5a9   : > { %3583 = vmatprep.subr.bf16.mxu1 %v4246_v0 }
 0x5ac   : > { %3584 = vmatpush3.bf16.msra.mxu1 %v3785_v20  ;;  %v3302_v20 = vld [vmem:[%s5248_s11 + $0x1] ss:$0 sm:$0xff] }
 0x5ad   : > { %3597 = vmatprep.subr.bf16.mxu1 %v4246_v0 }
 0x5cb   : > { %v2511_v60 = vpop.permute.xlu0 %2510 }
 0x5d2   : > { %v2507_v33 = vpop.permute.xlu1 %2506 }
 0x5d3   : > { %v2517_v21 = vsel %vm1151_vm2, %v5078_v32, %v2507_v33  ;;  %v3289_v32 = vld [vmem:[%s5247_s24] ss:$0 sm:$0xff] }
 0x5d4   : > { %v2518_v16 = vsel %vm2486_vm4, %v2517_v21, %v2511_v60  ;;  %v3304_v60 = vld [vmem:[#allocation7] ss:$0 sm:$0xff] }
 0x5da   : > { %v2515_v41 = vpop.permute.xlu1 %2514 }
 0x5db   : > { %v2519_v44 = vsel %vm2488_vm5, %v2518_v16, %v2515_v41  ;;  %v3305_v41 = vld [vmem:[#allocation7 + $0x1] ss:$0 sm:$0xff] }
 0x5dc   : > { %v2522_v45 = vpack.c.bf16 %v2519_v44, %v2519_v44 }
 0x5de   : > { %3586 = vmatmul.mubr.msk.bf16.vlgmr.msra.gmra.mrb[56].mxu1 %vm844_vm1, %v2522_v45 }
 0x5df   : > { %3605 = vmatprep.mubr.msk.bf16.mxu1 %vm4247_vm0, %v4246_v0 }
 0x679   : > { %v2660_v51 = vpop.f32.mrb[56].mxu0 }
 0x67a   : > { %v2661_v18 = vadd.f32 %v3290_v49, %v2660_v51  ;;  %v2605_v52 = vpop.f32.mrb[52].mxu1  ;;  %v3579_v55 = vpop.f32.mrb[57].mxu0  ;;  %v3303_v49 = vld [vmem:[%s5248_s11 + $0x2] ss:$0 sm:$0xff] }
 0x67b   : > { %v2606_v53 = vadd.f32 %v3289_v32, %v2605_v52  ;;  %v3571_v8 = vpop.f32.mrb[53].mxu1  ;;  %v2663_v57 = vpop.f32.mrb[58].mxu0  ;;  %v3306_v32 = vld [vmem:[#allocation7 + $0x2] ss:$0 sm:$0xff] }
 0x67c   : > { %v2608_v39 = vpop.f32.mrb[54].mxu1  ;;  %v3580_v9 = vpop.f32.mrb[59].mxu0  ;;  %v2722_v24 = vadd.f32 %v2661_v18, %v5125_v38 }
 0x67d   : > { %v3572_v26 = vpop.f32.mrb[55].mxu1  ;;  %v2721_v58 = vadd.f32 %v2606_v53, %v5125_v38 }
 0x67e   : > { %v2733_v56 = vsel %vm844_vm1, %v2722_v24, 0.0 }
 0x67f   : > { %2734 = vadd.xlane.f32.xlu1 %v2733_v56  ;;  %v2730_v37 = vsel %vm844_vm1, %v2721_v58, 0.0 }
 0x680   : > { %2731 = vadd.xlane.f32.xlu0 %v2730_v37 }
 0x6b1   : > { %v2715_v61 = vpop.f32.mrb[56].mxu1 }
 0x6b2   : > { %v2716_v59 = vadd.f32 %v3291_v2, %v2715_v61  ;;  %v3587_v43 = vpop.f32.mrb[57].mxu1  ;;  %v3786_v61 = vld [vmem:[#allocation12] sm:$0xff]  }
 0x6b3   : > { %v2718_v62 = vpop.f32.mrb[58].mxu1  ;;  %3590 = vmatpush3.bf16.msra.mxu0 %v3786_v61  ;;  %v3789_v43 = vld [vmem:[%s5249_s2 + $0x8] sm:$0xff]  }
 0x6b4   : > { %v3588_v28 = vpop.f32.mrb[59].mxu1  ;;  %v2723_v36 = vadd.f32 %v2716_v59, %v5125_v38  ;;  %v3787_v59 = vld [vmem:[#allocation12 + $0x8] sm:$0xff]   ;;  %3591 = vmatprep.subr.bf16.mxu0 %v4246_v0 }
 0x6b6   : > { %v2736_v1 = vsel %vm844_vm1, %v2723_v36, 0.0 }
 0x6b7   : > { %2737 = vadd.xlane.f32.xlu0 %v2736_v1  ;;  %3592 = vmatpush3.bf16.msra.mxu0 %v3787_v59 }
 0x70c   : > { %v2735_v42 = vpop.xlane.xlu1 %2734 }
 0x70d   : > { %v2741_v63 = vmul.f32 0.03125, %v2735_v42  ;;  %v2732_v3 = vpop.xlane.xlu0 %2731  ;;  %v3307_v42 = vld [vmem:[#allocation9] ss:$0 sm:$0xff] }
 0x70e   : > { %v2740_v48 = vmul.f32 0.03125, %v2732_v3  ;;  %v3308_v3 = vld [vmem:[#allocation10] ss:$0 sm:$0xff] }
 0x70f   : > { %v2744_v40 = vsub.f32 %v2722_v24, %v2741_v63 }
 0x710   : > { %v2743_v4 = vsub.f32 %v2721_v58, %v2740_v48 }
 0x711   : > { %v2747_v6 = vmul.f32 %v2744_v40, %v2744_v40 }
 0x712   : > { %v2746_v7 = vmul.f32 %v2743_v4, %v2743_v4 }
 0x713   : > { %v2752_v54 = vsel %vm844_vm1, %v2747_v6, 0.0  ;;  %v3790_v6 = vld [vmem:[%s5249_s2 + $0x10] sm:$0xff]  }
 0x714   : > { %2753 = vadd.xlane.f32.xlu1 %v2752_v54  ;;  %v2749_v34 = vsel %vm844_vm1, %v2746_v7, 0.0  ;;  %v3791_v7 = vld [vmem:[%s5249_s2 + $0x18] sm:$0xff]  }
 0x715   : > { %2750 = vadd.xlane.f32.xlu0 %v2749_v34  ;;  %v3309_v54 = vld [vmem:[#allocation13] ss:$0 sm:$0xff] }
 0x744   : > { %v2738_v10 = vpop.xlane.xlu0 %2737 }
 0x745   : > { %v2742_v11 = vmul.f32 0.03125, %v2738_v10 }
 0x747   : > { %v2745_v12 = vsub.f32 %v2723_v36, %v2742_v11 }
 0x749   : > { %v2748_v13 = vmul.f32 %v2745_v12, %v2745_v12 }
 0x74b   : > { %v2755_v15 = vsel %vm844_vm1, %v2748_v13, 0.0 }
 0x74c   : > { %2756 = vadd.xlane.f32.xlu0 %v2755_v15 }
 0x7a1   : > { %v2754_v17 = vpop.xlane.xlu1 %2753 }
 0x7a2   : > { %v2751_v46 = vpop.xlane.xlu0 %2750  ;;  %v2759_v50 = vmul.f32 0.03125, %v2754_v17 }
 0x7a3   : > { %v2758_v14 = vmul.f32 0.03125, %v2751_v46  ;;  %v3313_v46 = vld [vmem:[#allocation15] ss:$0 sm:$0xff] }
 0x7a4   : > { %v2762_v19 = vadd.f32 1e-05, %v2759_v50 }
 0x7a5   : > { %v2761_v22 = vadd.f32 1e-05, %v2758_v14 }
 0x7a6   : > { %3864 = vrsqrt.f32 %v2762_v19 }
 0x7a7   : > { %3866 = vrsqrt.f32 %v2761_v22 }
 0x7b0   : > { %v3865_v25 = vpop.eup %3864 }
 0x7b1   : > { %v3867_v5 = vpop.eup %3866  ;;  %v2768_v29 = vmul.f32 %v3865_v25, %v2744_v40 }
 0x7b2   : > { %v2767_v30 = vmul.f32 %v3867_v5, %v2743_v4 }
 0x7b3   : > { %v2789_v21 = vmul.f32 %v3302_v20, %v2768_v29 }
 0x7b4   : > { %v2788_v33 = vmul.f32 %v3301_v31, %v2767_v30 }
 0x7b5   : > { %v2810_v44 = vadd.f32 %v3305_v41, %v2789_v21 }
 0x7b6   : > { %v2809_v16 = vadd.f32 %v3304_v60, %v2788_v33  ;;  %v3319_v60 = vld [vmem:[#allocation16] ss:$0 sm:$0xff] }
 0x7b7   : > { %v2813_v52 = vsel %vm844_vm1, %v2810_v44, 0.0 }
 0x7b8   : > { %v2812_v18 = vsel %vm844_vm1, %v2809_v16, 0.0  ;;  %v3320_v16 = vld [vmem:[#allocation18] ss:$0 sm:$0xff] }
 0x7b9   : > { %v2814_v53 = vadd.f32 %v2813_v52, %v2812_v18 }
 0x7d9   : > { %v2757_v35 = vpop.xlane.xlu0 %2756 }
 0x7da   : > { %v2760_v23 = vmul.f32 0.03125, %v2757_v35 }
 0x7dc   : > { %v2763_v27 = vadd.f32 1e-05, %v2760_v23 }
 0x7de   : > { %3868 = vrsqrt.f32 %v2763_v27 }
 0x7e8   : > { %v3869_v45 = vpop.eup %3868 }
 0x7e9   : > { %v2769_v47 = vmul.f32 %v3869_v45, %v2745_v12 }
 0x7eb   : > { %v2790_v51 = vmul.f32 %v3303_v49, %v2769_v47 }
 0x7ed   : > { %v2811_v55 = vadd.f32 %v3306_v32, %v2790_v51 }
 0x7ef   : > { %v2815_v8 = vsel %vm844_vm1, %v2811_v55, 0.0 }
 0x7f0   : > { %v2816_v57 = vadd.f32 %v2815_v8, %v2814_v53 }
 0x7f2   : > { %v2817_v39 = vmul.f32 0.33333334, %v2816_v57 }
 0x7f4   : > { %v2818_v9 = vadd.f32 %v2817_v39, %v5125_v38  ;;  %v3788_v38 = vld [vmem:[%s5249_s2] sm:$0xff]  }
 0x7f5   : > { %3598 = vmatpush3.bf16.msra.mxu1 %v3788_v38 }
 0x7f6   : > { %v2821_v24 = vsel %vm844_vm1, %v2818_v9, 0.0  ;;  %3599 = vmatprep.subr.bf16.mxu1 %v4246_v0 }
 0x7f7   : > { %2822 = vadd.xlane.f32.xlu1 %v2821_v24 }
 0x7f9   : > { %3600 = vmatpush3.bf16.msra.mxu1 %v3789_v43 }
 0x7fa   : > { %3601 = vmatprep.subr.bf16.mxu1 %v4246_v0 }
 0x7fd   : > { %3602 = vmatpush3.bf16.msra.mxu1 %v3790_v6 }
 0x7fe   : > { %3603 = vmatprep.subr.bf16.mxu1 %v4246_v0 }
 0x801   : > { %3604 = vmatpush3.bf16.msra.mxu1 %v3791_v7 }
 0x884   : > { %v2823_v26 = vpop.xlane.xlu1 %2822 }
 0x885   : > { %v2824_v58 = vmul.f32 0.03125, %v2823_v26 }
 0x887   : > { %v2825_v56 = vsub.f32 %v2818_v9, %v2824_v58 }
 0x889   : > { %v2826_v37 = vmul.f32 %v2825_v56, %v2825_v56 }
 0x88b   : > { %v2827_v2 = vsel %vm844_vm1, %v2826_v37, 0.0 }
 0x88c   : > { %2828 = vadd.xlane.f32.xlu0 %v2827_v2 }
 0x919   : > { %v2829_v62 = vpop.xlane.xlu0 %2828 }
 0x91a   : > { %v2830_v28 = vmul.f32 0.03125, %v2829_v62 }
 0x91c   : > { %v2831_v36 = vadd.f32 1e-05, %v2830_v28 }
 0x91e   : > { %3870 = vrsqrt.f32 %v2831_v36 }
 0x928   : > { %v3871_v1 = vpop.eup %3870 }
 0x929   : > { %v2833_v63 = vmul.f32 %v3871_v1, %v2825_v56 }
 0x92b   : > { %v2840_v48 = vmul.f32 %v3307_v42, %v2833_v63 }
 0x92d   : > { %v2847_v40 = vadd.f32 %v3308_v3, %v2840_v48 }
 0x92f   : > { %v2848_v4 = vpack.c.bf16 %v2847_v40, %v2847_v40 }
 0x931   : > { %3594 = vmatmul.mubr.msk.bf16.vlgmr.msra.gmra.mrb[60].mxu0 %vm844_vm1, %v2848_v4 }
 0xa04   : > { %v2909_v34 = vpop.f32.mrb[60].mxu0 }
 0xa05   : > { %v2910_v10 = vadd.f32 %v3309_v54, %v2909_v34  ;;  %v3595_v11 = vpop.f32.mrb[61].mxu0 }
 0xa06   : > { %v2912_v12 = vpop.f32.mrb[62].mxu0 }
 0xa07   : > { %v2915_v13 = vmax.f32 %v2910_v10, 0.0  ;;  %v3596_v15 = vpop.f32.mrb[63].mxu0 }
 0xa09   : > { %v2916_v17 = vpack.c.bf16 %v2915_v13, %v2915_v13 }
 0xa0b   : > { %3606 = vmatmul.mubr.msk.bf16.vlgmr.msra.gmra.mrb[60].mxu1 %vm2956_vm6, %v2916_v17 }
 0xade   : > { %v2994_v50 = vpop.f32.mrb[60].mxu1 }
 0xadf   : > { %v2995_v14 = vadd.f32 %v3313_v46, %v2994_v50  ;;  %v3607_v19 = vpop.f32.mrb[61].mxu1 }
 0xae0   : > { %v2997_v0 = vpop.f32.mrb[62].mxu1 }
 0xae1   : > { %v3608_v22 = vpop.f32.mrb[63].mxu1  ;;  %v3000_v35 = vadd.f32 %v2995_v14, %v2847_v40 }
 0xae3   : > { %v3003_v23 = vsel %vm844_vm1, %v3000_v35, 0.0 }
 0xae4   : > { %3004 = vadd.xlane.f32.xlu1 %v3003_v23 }
 0xb71   : > { %v3005_v25 = vpop.xlane.xlu1 %3004 }
 0xb72   : > { %v3006_v5 = vmul.f32 0.03125, %v3005_v25 }
 0xb74   : > { %v3007_v27 = vsub.f32 %v3000_v35, %v3006_v5 }
 0xb76   : > { %v3008_v29 = vmul.f32 %v3007_v27, %v3007_v27 }
 0xb78   : > { %v3009_v30 = vsel %vm844_vm1, %v3008_v29, 0.0 }
 0xb79   : > { %3010 = vadd.xlane.f32.xlu0 %v3009_v30 }
 0xc06   : > { %v3011_v31 = vpop.xlane.xlu0 %3010 }
 0xc07   : > { %v3012_v20 = vmul.f32 0.03125, %v3011_v31 }
 0xc09   : > { %v3013_v33 = vadd.f32 1e-05, %v3012_v20 }
 0xc0b   : > { %3872 = vrsqrt.f32 %v3013_v33 }
 0xc15   : > { %v3873_v21 = vpop.eup %3872 }
 0xc16   : > { %v3015_v41 = vmul.f32 %v3873_v21, %v3007_v27 }
 0xc18   : > { %v3022_v44 = vmul.f32 %v3319_v60, %v3015_v41 }
 0xc1a   : > { %v3029_v45 = vadd.f32 %v3320_v16, %v3022_v44 }
 0xc1c   : > { %v3030_v49 = vpack.c.bf16 %v3029_v45, %v3029_v45 }
 0xc1e   : > { %3032 = vst.msk [vmem:[%s800_s26] sm:$0xf] %vm3031_vm7, %v3030_v49 }
 0xc1f PF: > { %s5251_s9 = sld [smem:[#allocation25_spill]]  ;;  %s5252_s1 = smov %s4225_s22 }
 0xc20   : > { %s5253_s22 = smov %s5255_s5 }
 0xc25   : > { %s36_s23 = sadd.s32 1, %s5251_s9  }
 0xc26   : > { %p33_p3 = scmp.ge.s32.totalorder %s36_s23, 4  }
 0xc28   :  { %35 = sbr.rel (!%p33_p3) target bundleno = 19 (0x13), region = 179 }
 0xc2f   :  { %3058 = vsyncpa [#allocation3], 1 }
 0xc30   :  { %3060 = vsyncpa [#allocation3 + $0x1], 1 }
 0xc31   :  { %3061 = vsyncpa [#allocation5], 1 }
 0xc32   :  { %3062 = vsyncpa [#allocation8], 1 }
 0xc33   :  { %3063 = vsyncpa [#allocation11], 1 }
 0xc34   :  { %3064 = vsyncpa [#allocation14], 1 }
 0xc35   :  { %3065 = vsyncpa [#allocation17], 1 }

// kernel: multilevel_encoder_forward.7
= control target key start
LH: loop header
LB: loop body
LE: loop exit
PB: predicated region body
PF: predicated region fallthrough
CT: control target
= control target key end

     0   :  { %s3635_s22 = smov 0   ;;  %s3637_s23 = smov 0   ;;  %s4212_s0 = inlined_call_operand.vmem [shape: bf16[2,8,32], index: 0, kind: input, shape index: {}]   ;;  %s4213_s1 = inlined_call_operand.vmem [shape: f32[2,1,8], index: 1, kind: input, shape index: {}]   ;;  %s4214_s2 = inlined_call_operand.vmem [shape: bf16[32,96], index: 2, kind: input, shape index: {}]   ;;  %s4215_s3 = inlined_call_operand.vmem [shape: f32[1,96], index: 3, kind: input, shape index: {}]   ;;  %s4216_s4 = inlined_call_operand.vmem [shape: bf16[32,96], index: 4, kind: input, shape index: {}]   ;;  %s4217_s5 = inlined_call_operand.vmem [shape: f32[1,96], index: 5, kind: input, shape index: {}]   ;;  %s4218_s6 = inlined_call_operand.vmem [shape: bf16[32,96], index: 6, kind: input, shape index: {}]   ;;  %s4219_s7 = inlined_call_operand.vmem [shape: f32[1,96], index: 7, kind: input, shape index: {}]   ;;  %s4220_s8 = inlined_call_operand.vmem [shape: bf16[3,32,32], index: 8, kind: input, shape index: {}]   ;;  %s4221_s9 = inlined_call_operand.vmem [shape: f32[3,1,32], index: 9, kind: input, shape index: {}]   ;;  %s4222_s10 = inlined_call_operand.vmem [shape: f32[3,1,32], index: 10, kind: input, shape index: {}]   ;;  %s4223_s11 = inlined_call_operand.vmem [shape: f32[3,1,32], index: 11, kind: input, shape index: {}]   ;;  %s4224_s12 = inlined_call_operand.vmem [shape: f32[1,32], index: 12, kind: input, shape index: {}]   ;;  %s4225_s13 = inlined_call_operand.vmem [shape: f32[1,32], index: 13, kind: input, shape index: {}]   ;;  %s4226_s14 = inlined_call_operand.vmem [shape: bf16[32,64], index: 14, kind: input, shape index: {}]   ;;  %s4227_s15 = inlined_call_operand.vmem [shape: f32[1,64], index: 15, kind: input, shape index: {}]   ;;  %s4228_s16 = inlined_call_operand.vmem [shape: bf16[64,32], index: 16, kind: input, shape index: {}]   ;;  %s4229_s17 = inlined_call_operand.vmem [shape: f32[1,32], index: 17, kind: input, shape index: {}]   ;;  %s4230_s18 = inlined_call_operand.vmem [shape: f32[1,32], index: 18, kind: input, shape index: {}]   ;;  %s4231_s19 = inlined_call_operand.vmem [shape: f32[1,32], index: 19, kind: input, shape index: {}]   ;;  %s4232_s20 = inlined_call_operand.vmem [shape: bf16[2,8,32], index: 20, kind: output, shape index: {}]  }
   0x1   :  { %4244 = sst [smem:[#allocation2_spill]] %s4212_s0 }
   0x2   :  { %4245 = sst [smem:[#allocation3_spill]] %s4213_s1  ;;  %s3633_s1 = smov 0  }
   0x3   :  { %4246 = sst [smem:[#allocation4_spill]] %s4214_s2 }
   0x4   :  { %4247 = sst [smem:[#allocation5_spill]] %s4215_s3 }
   0x5   :  { %4248 = sst [smem:[#allocation6_spill]] %s4216_s4 }
   0x6 LB: > { %s42_s24 = sadd.s32 1, %s3506_s22  ;;  %p2977_p0 = scmp.ge.s32.totalorder %s3510_s23, 1  ;;  %s3510_s23 = sphi %s3637_s23, %s30_s23   ;;  %s3506_s22 = sphi %s3635_s22, %s4264_s22   ;;  %s3502_s1 = sphi %s3633_s1, %s4263_s1  }
   0x7   : > { %p44_p1 = scmp.ge.s32.totalorder %s42_s24, 2  ;;  %p583_p2 = scmp.lt.s32.totalorder %s3510_s23, 3 }
   0x9   : > { %s4266_s24 = smov (%p44_p1, %s42_s24), 0  ;;  %p584_p3 = pnand %p2977_p0, %p583_p2 }
   0xa   : > { %s4249_s3 = sld [smem:[#allocation4_spill]] (!%p584_p3)  ;;  %v3512_v1 = vmov (!%p584_p3), 0.0   ;;  %s4250_s28 = sld [smem:[#allocation6_spill]] (!%p584_p3)  ;;  %vm3513_vm0 = vmmov (!%p584_p3), 0   ;;  %vm702_vm1 = vcmask (!%p584_p3), 261120   ;;  %v3391_v5 = vld [vmem:[%s4218_s6] sm:$0xff] (!%p584_p3)  }
   0xb   : > { %587 = sbr.rel (%p584_p3) target bundleno = 2807 (0xaf7), region = 100  ;;  %3125 = vmatprep.subr.bf16.mxu0 (!%p584_p3), %v3512_v1  ;;  %3133 = vmatprep.subr.bf16.mxu1 (!%p584_p3), %v3512_v1  ;;  %p645_p4 = scmp.lt.s32.totalorder (!%p584_p3), %s3502_s1, 1  ;;  %v3392_v8 = vld [vmem:[%s4218_s6 + $0x8] sm:$0xff] (!%p584_p3)   ;;  %v2984_v10 = vld [vmem:[%s4217_s5] ss:$0 sm:$0xff] (!%p584_p3)  ;;  %vm1009_vm2 = vcmask (!%p584_p3), 64512  }
   0xc   : > { %3129 = vmatprep.mubr.msk.bf16.mxu0 (!%p584_p3), %vm3513_vm0, %v3512_v1  ;;  %3137 = vmatprep.mubr.msk.bf16.mxu1 (!%p584_p3), %vm3513_vm0, %v3512_v1  ;;  %s4251_s4 = sld [smem:[#allocation2_spill]] (!%p584_p3)  ;;  %s4252_s26 = sld [smem:[#allocation5_spill]] (!%p584_p3)  ;;  %v2988_v24 = vld [vmem:[%s4219_s7] ss:$0 sm:$0xff] (!%p584_p3)  ;;  %vm1745_vm3 = vcmask (!%p584_p3), 1043456   ;;  %vm2344_vm4 = vcmask (!%p584_p3), 130048  }
   0xd   : > { %s4240_s30 = smov (!%p584_p3), 120   ;;  %s4237_s0 = smov (!%p584_p3), 104   ;;  %vm2346_vm5 = vcmask (!%p584_p3), 195584   ;;  %vm2814_vm6 = vcmask (!%p584_p3), 523264   ;;  %vm2889_vm7 = vcmask (!%p584_p3), 257024  }
   0xe   : > { %s4236_s2 = smov (!%p584_p3), 112   ;;  %s4238_s25 = smov (!%p584_p3), 96  }
   0xf   : > { %s3519_s27 = smov (!%p584_p3), 80  }
  0x10   : > { %v3387_v0 = vld [vmem:[%s4249_s3] sm:$0xff] (!%p584_p3)   ;;  %v3389_v3 = vld [vmem:[%s4249_s3 + $0x8] sm:$0xff] (!%p584_p3)  }
  0x11   : > { %v3388_v2 = vld [vmem:[%s4250_s28] sm:$0xff] (!%p584_p3)   ;;  %3126 = vmatpush3.bf16.msra.mxu0 (!%p584_p3), %v3387_v0  ;;  %v3390_v4 = vld [vmem:[%s4250_s28 + $0x8] sm:$0xff] (!%p584_p3)  }
  0x12   : > { %3134 = vmatpush3.bf16.msra.mxu1 %v3388_v2  ;;  %3127 = vmatprep.subr.bf16.mxu0 %v3512_v1  ;;  %s4268_s1 = smov (!%p645_p4, %s3502_s1), 1  ;;  %v2980_v9 = vld [vmem:[%s4252_s26] ss:$0 sm:$0xff]  ;;  %s4239_s26 = smov 88  }
  0x13   : > { %3135 = vmatprep.subr.bf16.mxu1 %v3512_v1  ;;  %s4235_s21 = sshll.u32 %s4268_s1, 2 }
  0x14   : > { %s3682_s29 = scalar_lea.vmem %s4251_s4, %s4235_s21  ;;  %s4242_s4 = smov 72  }
  0x15   : > { %3128 = vmatpush3.bf16.msra.mxu0 %v3389_v3  ;;  %v666_v6 = vld [vmem:[%s3682_s29] sm:$0xf]  ;;  %s4241_s21 = smov 64  }
  0x16   : > { %3136 = vmatpush3.bf16.msra.mxu1 %v3390_v4  ;;  %3141 = vmatprep.subr.bf16.mxu0 %v3512_v1  ;;  %v660_v7 = vld [vmem:[%s3682_s29] sm:$0xf] }
  0x17   : > { %3149 = vmatprep.subr.bf16.mxu1 %v3512_v1 }
  0x18   : > { %3130 = vmatmul.mubr.msk.bf16.vlgmr.msra.gmra.mrb[0].mxu0 %vm702_vm1, %v666_v6 }
  0x19   : > { %3138 = vmatmul.mubr.msk.bf16.vlgmr.msra.gmra.mrb[0].mxu1 %vm702_vm1, %v660_v7  ;;  %3142 = vmatpush3.bf16.msra.mxu0 %v3391_v5 }
  0x1a   : > { %3143 = vmatprep.subr.bf16.mxu0 %v3512_v1  ;;  %3145 = vmatprep.mubr.msk.bf16.mxu0 %vm3513_vm0, %v3512_v1 }
  0x1b   : > { %3151 = vmatprep.mubr.msk.bf16.mxu1 %vm3513_vm0, %v3512_v1 }
  0x1d   : > { %3144 = vmatpush3.bf16.msra.mxu0 %v3392_v8 }
  0x1e   : > { %3155 = vmatprep.subr.bf16.mxu0 %v3512_v1 }
  0x20   : > { %3146 = vmatmul.mubr.msk.bf16.vlgmr.msra.gmra.mrb[4].mxu0 %vm702_vm1, %v660_v7 }
  0x21   : > { %3157 = vmatprep.mubr.msk.bf16.mxu0 %vm3513_vm0, %v3512_v1 }
  0xeb   : > { %v740_v11 = vpop.f32.mrb[0].mxu0 }
  0xec   : > { %v741_v12 = vadd.f32 %v2980_v9, %v740_v11  ;;  %v801_v13 = vpop.f32.mrb[0].mxu1  ;;  %v3131_v14 = vpop.f32.mrb[1].mxu0 }
  0xed   : > { %v802_v15 = vadd.f32 %v2984_v10, %v801_v13  ;;  %v3139_v16 = vpop.f32.mrb[1].mxu1  ;;  %v743_v17 = vpop.f32.mrb[2].mxu0 }
  0xee   : > { %v804_v18 = vpop.f32.mrb[2].mxu1  ;;  %866 = vrot.lane.b32.xlu1 %v741_v12, %s4240_s30  ;;  %v3132_v19 = vpop.f32.mrb[3].mxu0  ;;  %v899_v23 = vpack.c.bf16 %v741_v12, %v741_v12 }
  0xef   : > { %912 = vrot.lane.b32.xlu0 %v802_v15, %s4240_s30  ;;  %v3140_v20 = vpop.f32.mrb[3].mxu1  ;;  %v945_v21 = vpack.c.bf16 %v802_v15, %v802_v15  ;;  %s4256_s30 = smov 104  }
  0xf1   : > { %v1014_v22 = vsel %vm1009_vm2, %v945_v21, 0 }
  0xf2   : > { %3150 = vmatpush3.bf16.xpose.msra.mxu1 %v1014_v22  ;;  %918 = vrot.lane.b32.xlu1 %v802_v15, %s4237_s0 }
  0xf3   : > { %915 = vrot.lane.b32.xlu0 %v802_v15, %s4236_s2  ;;  %3161 = vmatprep.subr.bf16.mxu1 %v3512_v1  ;;  %v859_v25 = vpop.f32.mrb[4].mxu0 }
  0xf4   : > { %v3147_v26 = vpop.f32.mrb[5].mxu0  ;;  %v3738_v28 = vadd.f32 %v2988_v24, %v859_v25 }
  0xf5   : > { %v862_v27 = vpop.f32.mrb[6].mxu0 }
  0xf6   : > { %921 = vrot.lane.b32.xlu1 %v802_v15, %s4238_s25  ;;  %v3148_v29 = vpop.f32.mrb[7].mxu0  ;;  %v991_v17 = vpack.c.bf16 %v3738_v28, %v3738_v28 }
  0xf7   : > { %869 = vrot.lane.b32.xlu0 %v741_v12, %s4236_s2  ;;  %s4243_s2 = smov 56  }
  0xf8   : > { %v1747_v21 = vsel %vm1745_vm3, %v991_v17, 0 }
  0xf9   : > { %3152 = vmatmul.mubr.msk.bf16.vlgmr.msra.gmra.mrb[4].mxu1 %vm1009_vm2, %v899_v23 }
  0xfa   : > { %924 = vrot.lane.b32.xlu1 %v802_v15, %s4239_s26  ;;  %3163 = vmatprep.mubr.msk.bf16.mxu1 %vm3513_vm0, %v3512_v1 }
  0xfb   : > { %872 = vrot.lane.b32.xlu0 %v741_v12, %s4237_s0  ;;  %s3523_s0 = smov 48  }
  0xfe   : > { %927 = vrot.lane.b32.xlu1 %v802_v15, %s3519_s27 }
  0xff   : > { %875 = vrot.lane.b32.xlu0 %v741_v12, %s4238_s25  ;;  %s3524_s25 = smov 40  }
 0x102   : > { %930 = vrot.lane.b32.xlu1 %v802_v15, %s4242_s4 }
 0x103   : > { %878 = vrot.lane.b32.xlu0 %v741_v12, %s4239_s26  ;;  %s4257_s26 = sld [smem:[#allocation3_spill]] }
 0x106   : > { %933 = vrot.lane.b32.xlu1 %v802_v15, %s4241_s21 }
 0x107   : > { %881 = vrot.lane.b32.xlu0 %v741_v12, %s3519_s27 }
 0x10a   : > { %936 = vrot.lane.b32.xlu1 %v802_v15, %s4243_s2 }
 0x10b   : > { %884 = vrot.lane.b32.xlu0 %v741_v12, %s4242_s4  ;;  %s4254_s4 = smov 112  }
 0x10e   : > { %939 = vrot.lane.b32.xlu1 %v802_v15, %s3523_s0 }
 0x10f   : > { %887 = vrot.lane.b32.xlu0 %v741_v12, %s4241_s21  ;;  %s4253_s21 = smov 120  }
 0x112   : > { %942 = vrot.lane.b32.xlu1 %v802_v15, %s3524_s25 }
 0x113   : > { %890 = vrot.lane.b32.xlu0 %v741_v12, %s4243_s2  ;;  %s4255_s2 = smov 96  }
 0x116   : > { %896 = vrot.lane.b32.xlu1 %v741_v12, %s3524_s25 }
 0x117   : > { %893 = vrot.lane.b32.xlu0 %v741_v12, %s3523_s0 }
 0x11a   : > { %958 = vrot.lane.b32.xlu1 %v3738_v28, %s4253_s21  ;;  %s4259_s21 = smov 64  }
 0x11b   : > { %961 = vrot.lane.b32.xlu0 %v3738_v28, %s4254_s4  ;;  %s651_s4 = scalar_lea.vmem %s4257_s26, %s4268_s1  ;;  %s3526_s26 = smov 24  }
 0x11c   : > { %v3811_v24 = vld [vmem:[%s651_s4] ss:$0 sm:$0xff]  ;;  %s3527_s4 = smov 16  }
 0x11e   : > { %967 = vrot.lane.b32.xlu1 %v3738_v28, %s4255_s2  ;;  %s4260_s2 = smov 88  }
 0x11f   : > { %964 = vrot.lane.b32.xlu0 %v3738_v28, %s4256_s30  ;;  %s4258_s30 = smov 72  }
 0x160   : > { %v867_v30 = vpop.permute.xlu1 %866 }
 0x161   : > { %v913_v31 = vpop.permute.xlu0 %912  ;;  %v900_v41 = vpack.c.bf16 %v867_v30, %v867_v30 }
 0x162   : > { %v946_v32 = vpack.c.bf16 %v913_v31, %v913_v31 }
 0x164   : > { %v1060_v33 = vsel %vm1009_vm2, %v946_v32, 0  ;;  %v919_v34 = vpop.permute.xlu1 %918 }
 0x165   : > { %3156 = vmatpush3.bf16.xpose.msra.mxu0 %v1060_v33  ;;  %v916_v35 = vpop.permute.xlu0 %915  ;;  %v948_v37 = vpack.c.bf16 %v919_v34, %v919_v34 }
 0x166   : > { %v947_v36 = vpack.c.bf16 %v916_v35, %v916_v35  ;;  %3167 = vmatprep.subr.bf16.mxu0 %v3512_v1 }
 0x167   : > { %v1152_v42 = vsel %vm1009_vm2, %v948_v37, 0 }
 0x168   : > { %v1106_v38 = vsel %vm1009_vm2, %v947_v36, 0  ;;  %v922_v39 = vpop.permute.xlu1 %921 }
 0x169   : > { %v870_v40 = vpop.permute.xlu0 %869  ;;  %3162 = vmatpush3.bf16.xpose.msra.mxu1 %v1106_v38  ;;  %v949_v43 = vpack.c.bf16 %v922_v39, %v922_v39 }
 0x16a   : > { %3173 = vmatprep.subr.bf16.mxu1 %v3512_v1  ;;  %v901_v46 = vpack.c.bf16 %v870_v40, %v870_v40 }
 0x16b   : > { %v1198_v47 = vsel %vm1009_vm2, %v949_v43, 0 }
 0x16c   : > { %3158 = vmatmul.mubr.msk.bf16.vlgmr.msra.gmra.mrb[8].mxu0 %vm1009_vm2, %v900_v41  ;;  %v925_v44 = vpop.permute.xlu1 %924 }
 0x16d   : > { %3168 = vmatpush3.bf16.xpose.msra.mxu0 %v1152_v42  ;;  %v873_v45 = vpop.permute.xlu0 %872  ;;  %3169 = vmatprep.mubr.msk.bf16.mxu0 %vm3513_vm0, %v3512_v1  ;;  %v950_v48 = vpack.c.bf16 %v925_v44, %v925_v44 }
 0x16e   : > { %3179 = vmatprep.subr.bf16.mxu0 %v3512_v1  ;;  %v902_v51 = vpack.c.bf16 %v873_v45, %v873_v45 }
 0x16f   : > { %v1244_v52 = vsel %vm1009_vm2, %v950_v48, 0 }
 0x170   : > { %3164 = vmatmul.mubr.msk.bf16.vlgmr.msra.gmra.mrb[8].mxu1 %vm1009_vm2, %v901_v46  ;;  %v928_v49 = vpop.permute.xlu1 %927 }
 0x171   : > { %v876_v50 = vpop.permute.xlu0 %875  ;;  %3174 = vmatpush3.bf16.xpose.msra.mxu1 %v1198_v47  ;;  %3175 = vmatprep.mubr.msk.bf16.mxu1 %vm3513_vm0, %v3512_v1  ;;  %v951_v53 = vpack.c.bf16 %v928_v49, %v928_v49 }
 0x172   : > { %3185 = vmatprep.subr.bf16.mxu1 %v3512_v1  ;;  %v903_v56 = vpack.c.bf16 %v876_v50, %v876_v50 }
 0x173   : > { %v1290_v57 = vsel %vm1009_vm2, %v951_v53, 0 }
 0x174   : > { %3170 = vmatmul.mubr.msk.bf16.vlgmr.msra.gmra.mrb[12].mxu0 %vm1009_vm2, %v902_v51  ;;  %v931_v54 = vpop.permute.xlu1 %930 }
 0x175   : > { %3180 = vmatpush3.bf16.xpose.msra.mxu0 %v1244_v52  ;;  %v879_v55 = vpop.permute.xlu0 %878  ;;  %3181 = vmatprep.mubr.msk.bf16.mxu0 %vm3513_vm0, %v3512_v1  ;;  %v952_v58 = vpack.c.bf16 %v931_v54, %v931_v54 }
 0x176   : > { %3191 = vmatprep.subr.bf16.mxu0 %v3512_v1  ;;  %v904_v61 = vpack.c.bf16 %v879_v55, %v879_v55 }
 0x177   : > { %v1336_v62 = vsel %vm1009_vm2, %v952_v58, 0 }
 0x178   : > { %3176 = vmatmul.mubr.msk.bf16.vlgmr.msra.gmra.mrb[12].mxu1 %vm1009_vm2, %v903_v56  ;;  %v934_v59 = vpop.permute.xlu1 %933 }
 0x179   : > { %v882_v60 = vpop.permute.xlu0 %881  ;;  %3186 = vmatpush3.bf16.xpose.msra.mxu1 %v1290_v57  ;;  %3187 = vmatprep.mubr.msk.bf16.mxu1 %vm3513_vm0, %v3512_v1  ;;  %v953_v63 = vpack.c.bf16 %v934_v59, %v934_v59 }
 0x17a   : > { %3197 = vmatprep.subr.bf16.mxu1 %v3512_v1  ;;  %v905_v3 = vpack.c.bf16 %v882_v60, %v882_v60 }
 0x17b   : > { %v1382_v4 = vsel %vm1009_vm2, %v953_v63, 0 }
 0x17c   : > { %3182 = vmatmul.mubr.msk.bf16.vlgmr.msra.gmra.mrb[16].mxu0 %vm1009_vm2, %v904_v61  ;;  %v937_v0 = vpop.permute.xlu1 %936 }
 0x17d   : > { %3192 = vmatpush3.bf16.xpose.msra.mxu0 %v1336_v62  ;;  %v885_v2 = vpop.permute.xlu0 %884  ;;  %3193 = vmatprep.mubr.msk.bf16.mxu0 %vm3513_vm0, %v3512_v1  ;;  %v954_v5 = vpack.c.bf16 %v937_v0, %v937_v0 }
 0x17e   : > { %3203 = vmatprep.subr.bf16.mxu0 %v3512_v1  ;;  %v906_v8 = vpack.c.bf16 %v885_v2, %v885_v2 }
 0x17f   : > { %v1428_v9 = vsel %vm1009_vm2, %v954_v5, 0 }
 0x180   : > { %3188 = vmatmul.mubr.msk.bf16.vlgmr.msra.gmra.mrb[16].mxu1 %vm1009_vm2, %v905_v3  ;;  %v940_v6 = vpop.permute.xlu1 %939 }
 0x181   : > { %v888_v7 = vpop.permute.xlu0 %887  ;;  %3198 = vmatpush3.bf16.xpose.msra.mxu1 %v1382_v4  ;;  %3199 = vmatprep.mubr.msk.bf16.mxu1 %vm3513_vm0, %v3512_v1  ;;  %v955_v10 = vpack.c.bf16 %v940_v6, %v940_v6 }
 0x182   : > { %3209 = vmatprep.subr.bf16.mxu1 %v3512_v1  ;;  %v907_v13 = vpack.c.bf16 %v888_v7, %v888_v7 }
 0x183   : > { %v1474_v14 = vsel %vm1009_vm2, %v955_v10, 0 }
 0x184   : > { %3194 = vmatmul.mubr.msk.bf16.vlgmr.msra.gmra.mrb[20].mxu0 %vm1009_vm2, %v906_v8  ;;  %v943_v11 = vpop.permute.xlu1 %942 }
 0x185   : > { %3204 = vmatpush3.bf16.xpose.msra.mxu0 %v1428_v9  ;;  %v891_v12 = vpop.permute.xlu0 %890  ;;  %3205 = vmatprep.mubr.msk.bf16.mxu0 %vm3513_vm0, %v3512_v1  ;;  %v956_v15 = vpack.c.bf16 %v943_v11, %v943_v11 }
 0x186   : > { %3215 = vmatprep.subr.bf16.mxu0 %v3512_v1  ;;  %v908_v16 = vpack.c.bf16 %v891_v12, %v891_v12 }
 0x187   : > { %v1520_v19 = vsel %vm1009_vm2, %v956_v15, 0 }
 0x188   : > { %3200 = vmatmul.mubr.msk.bf16.vlgmr.msra.gmra.mrb[20].mxu1 %vm1009_vm2, %v907_v13  ;;  %v897_v22 = vpop.permute.xlu1 %896 }
 0x189   : > { %3210 = vmatpush3.bf16.xpose.msra.mxu1 %v1474_v14  ;;  %3211 = vmatprep.mubr.msk.bf16.mxu1 %vm3513_vm0, %v3512_v1  ;;  %v894_v18 = vpop.permute.xlu0 %893  ;;  %v910_v23 = vpack.c.bf16 %v897_v22, %v897_v22 }
 0x18a   : > { %3221 = vmatprep.subr.bf16.mxu1 %v3512_v1  ;;  %v909_v20 = vpack.c.bf16 %v894_v18, %v894_v18 }
 0x18c   : > { %3206 = vmatmul.mubr.msk.bf16.vlgmr.msra.gmra.mrb[24].mxu0 %vm1009_vm2, %v908_v16  ;;  %v959_v32 = vpop.permute.xlu1 %958 }
 0x18d   : > { %3216 = vmatpush3.bf16.xpose.msra.mxu0 %v1520_v19  ;;  %3217 = vmatprep.mubr.msk.bf16.mxu0 %vm3513_vm0, %v3512_v1  ;;  %v992_v33 = vpack.c.bf16 %v959_v32, %v959_v32  ;;  %v962_v63 = vpop.permute.xlu0 %961 }
 0x18e   : > { %3227 = vmatprep.subr.bf16.mxu0 %v3512_v1  ;;  %v993_v32 = vpack.c.bf16 %v962_v63, %v962_v63 }
 0x18f   : > { %v1793_v34 = vsel %vm1745_vm3, %v992_v33, 0 }
 0x190   : > { %3212 = vmatmul.mubr.msk.bf16.vlgmr.msra.gmra.mrb[24].mxu1 %vm1009_vm2, %v909_v20 }
 0x191   : > { %3222 = vmatpush3.bf16.msra.mxu1 %v1747_v21  ;;  %3223 = vmatprep.mubr.msk.bf16.mxu1 %vm3513_vm0, %v3512_v1  ;;  %v3845_v8 = vpop.permute.xlu0 %964 }
 0x192   : > { %3233 = vmatprep.subr.bf16.mxu1 %v3512_v1 }
 0x194   : > { %3218 = vmatmul.mubr.msk.bf16.vlgmr.msra.gmra.mrb[28].mxu0 %vm1009_vm2, %v910_v23 }
 0x195   : > { %3229 = vmatprep.mubr.msk.bf16.mxu0 %vm3513_vm0, %v3512_v1  ;;  %3228 = vmatpush3.bf16.msra.mxu0 %v1793_v34 }
 0x196   : > { %3239 = vmatprep.subr.bf16.mxu0 %v3512_v1 }
 0x1cc   : > { %v1050_v25 = vpop.f32.mrb[4].mxu1 }
 0x1cd   : > { %v3814_v26 = vadd.f32 %v3811_v24, %v1050_v25  ;;  %v3153_v27 = vpop.f32.mrb[5].mxu1 }
 0x1ce   : > { %v1053_v29 = vpop.f32.mrb[6].mxu1 }
 0x1cf   : > { %v3154_v30 = vpop.f32.mrb[7].mxu1  ;;  %v1562_v31 = vsel %vm1009_vm2, %v3814_v26, -inf }
 0x1d0   : > { %1563 = vmax.xlane.f32.xlu0 %v1562_v31 }
 0x23f   : > { %v1096_v35 = vpop.f32.mrb[8].mxu0 }
 0x240   : > { %v3821_v36 = vadd.f32 %v3811_v24, %v1096_v35  ;;  %v3159_v37 = vpop.f32.mrb[9].mxu0  ;;  %v1839_v35 = vsel %vm1745_vm3, %v993_v32, 0 }
 0x241   : > { %v1099_v38 = vpop.f32.mrb[10].mxu0 }
 0x242   : > { %v3160_v39 = vpop.f32.mrb[11].mxu0  ;;  %v1565_v40 = vsel %vm1009_vm2, %v3821_v36, -inf }
 0x243   : > { %1566 = vmax.xlane.f32.xlu1 %v1565_v40  ;;  %v1142_v41 = vpop.f32.mrb[8].mxu1 }
 0x244   : > { %v3826_v42 = vadd.f32 %v3811_v24, %v1142_v41  ;;  %v3165_v43 = vpop.f32.mrb[9].mxu1 }
 0x245   : > { %v1145_v44 = vpop.f32.mrb[10].mxu1 }
 0x246   : > { %v3166_v45 = vpop.f32.mrb[11].mxu1  ;;  %v1568_v46 = vsel %vm1009_vm2, %v3826_v42, -inf }
 0x247   : > { %v1188_v47 = vpop.f32.mrb[12].mxu0  ;;  %1569 = vmax.xlane.f32.xlu0 %v1568_v46 }
 0x248   : > { %v3831_v48 = vadd.f32 %v3811_v24, %v1188_v47  ;;  %v3171_v49 = vpop.f32.mrb[13].mxu0 }
 0x249   : > { %v1191_v50 = vpop.f32.mrb[14].mxu0 }
 0x24a   : > { %v3172_v51 = vpop.f32.mrb[15].mxu0  ;;  %v1571_v52 = vsel %vm1009_vm2, %v3831_v48, -inf }
 0x24b   : > { %1572 = vmax.xlane.f32.xlu0 %v1571_v52  ;;  %v1234_v53 = vpop.f32.mrb[12].mxu1  ;;  %v968_v52 = vpop.permute.xlu1 %967 }
 0x24c   : > { %v3836_v54 = vadd.f32 %v3811_v24, %v1234_v53  ;;  %v3177_v55 = vpop.f32.mrb[13].mxu1 }
 0x24d   : > { %v1237_v56 = vpop.f32.mrb[14].mxu1 }
 0x24e   : > { %v3178_v57 = vpop.f32.mrb[15].mxu1  ;;  %v1574_v58 = vsel %vm1009_vm2, %v3836_v54, -inf }
 0x24f   : > { %v1280_v59 = vpop.f32.mrb[16].mxu0  ;;  %1575 = vmax.xlane.f32.xlu1 %v1574_v58 }
 0x250   : > { %v3841_v60 = vadd.f32 %v3811_v24, %v1280_v59  ;;  %v3183_v61 = vpop.f32.mrb[17].mxu0 }
 0x251   : > { %v1283_v62 = vpop.f32.mrb[18].mxu0 }
 0x252   : > { %v3184_v0 = vpop.f32.mrb[19].mxu0  ;;  %v1577_v2 = vsel %vm1009_vm2, %v3841_v60, -inf }
 0x253   : > { %1578 = vmax.xlane.f32.xlu0 %v1577_v2  ;;  %v1326_v3 = vpop.f32.mrb[16].mxu1 }
 0x254   : > { %v3189_v4 = vpop.f32.mrb[17].mxu1  ;;  %v3872_v39 = vadd.f32 %v3811_v24, %v1326_v3 }
 0x255   : > { %v1329_v5 = vpop.f32.mrb[18].mxu1 }
 0x256   : > { %v3190_v6 = vpop.f32.mrb[19].mxu1  ;;  %v1580_v44 = vsel %vm1009_vm2, %v3872_v39, -inf }
 0x257   : > { %v1372_v7 = vpop.f32.mrb[20].mxu0 }
 0x258   : > { %v3195_v9 = vpop.f32.mrb[21].mxu0  ;;  %v3869_v38 = vadd.f32 %v3811_v24, %v1372_v7  ;;  %v995_v7 = vpack.c.bf16 %v968_v52, %v968_v52 }
 0x259   : > { %v1375_v10 = vpop.f32.mrb[22].mxu0 }
 0x25a   : > { %v3196_v11 = vpop.f32.mrb[23].mxu0  ;;  %v1583_v41 = vsel %vm1009_vm2, %v3869_v38, -inf }
 0x25b   : > { %v1418_v12 = vpop.f32.mrb[20].mxu1  ;;  %v1931_v11 = vsel %vm1745_vm3, %v995_v7, 0 }
 0x25c   : > { %v3201_v13 = vpop.f32.mrb[21].mxu1  ;;  %v3875_v40 = vadd.f32 %v3811_v24, %v1418_v12 }
 0x25d   : > { %v3847_v14 = vpop.xlane.xlu0 %1563  ;;  %v1421_v15 = vpop.f32.mrb[22].mxu1 }
 0x25e   : > { %v1634_v16 = vsub.f32 %v3814_v26, %v3847_v14  ;;  %v3202_v17 = vpop.f32.mrb[23].mxu1  ;;  %v1586_v45 = vsel %vm1009_vm2, %v3875_v40, -inf }
 0x25f   : > { %v1464_v18 = vpop.f32.mrb[24].mxu0 }
 0x260   : > { %v1646_v19 = vmul.f32 1.442695, %v1634_v16  ;;  %v3207_v20 = vpop.f32.mrb[25].mxu0  ;;  %973 = vrot.lane.b32.xlu1 %v3738_v28, %s3519_s27  ;;  %s4261_s27 = smov 56   ;;  %v3898_v50 = vadd.f32 %v3811_v24, %v1464_v18 }
 0x261   : > { %v1467_v21 = vpop.f32.mrb[26].mxu0 }
 0x262   : > { %v3208_v22 = vpop.f32.mrb[27].mxu0  ;;  %3405 = vpow2.f32 %v1646_v19  ;;  %v1589_v51 = vsel %vm1009_vm2, %v3898_v50, -inf }
 0x263   : > { %v1510_v23 = vpop.f32.mrb[24].mxu1 }
 0x264   : > { %976 = vrot.lane.b32.xlu1 %v3738_v28, %s4258_s30  ;;  %v3213_v25 = vpop.f32.mrb[25].mxu1  ;;  %v3880_v43 = vadd.f32 %v3811_v24, %v1510_v23  ;;  %s4262_s30 = sshll.u32 %s4268_s1, 2 }
 0x265   : > { %v1513_v27 = vpop.f32.mrb[26].mxu1 }
 0x266   : > { %v3214_v29 = vpop.f32.mrb[27].mxu1  ;;  %v1592_v47 = vsel %vm1009_vm2, %v3880_v43, -inf }
 0x267   : > { %v1556_v30 = vpop.f32.mrb[28].mxu0 }
 0x268   : > { %v3219_v31 = vpop.f32.mrb[29].mxu0  ;;  %979 = vrot.lane.b32.xlu1 %v3738_v28, %s4259_s21  ;;  %v3887_v46 = vadd.f32 %v3811_v24, %v1556_v30 }
 0x269   : > { %v1559_v26 = vpop.f32.mrb[30].mxu0  ;;  %970 = vrot.lane.b32.xlu0 %v3738_v28, %s4260_s2 }
 0x26a   : > { %v3220_v33 = vpop.f32.mrb[31].mxu0  ;;  %v1595_v49 = vsel %vm1009_vm2, %v3887_v46, -inf }
 0x26c   : > { %v3859_v34 = vpop.eup %3405 }
 0x26d   : > { %v1730_v37 = vpack.c.bf16 %v3859_v34, %v3859_v34 }
 0x26f   : > { %3224 = vmatmul.mubr.msk.bf16.vlgmr.msra.gmra.mrb[28].mxu1 %vm1009_vm2, %v1730_v37 }
 0x270   : > { %3234 = vmatpush3.bf16.msra.mxu1 %v1839_v35  ;;  %3235 = vmatprep.mubr.msk.bf16.mxu1 %vm3513_vm0, %v3512_v1 }
 0x271   : > { %3245 = vmatprep.subr.bf16.mxu1 %v3512_v1 }
 0x288   : > { %1584 = vmax.xlane.f32.xlu0 %v1583_v41 }
 0x28c   : > { %1581 = vmax.xlane.f32.xlu1 %v1580_v44  ;;  %1587 = vmax.xlane.f32.xlu0 %v1586_v45 }
 0x290   : > { %1593 = vmax.xlane.f32.xlu0 %v1592_v47 }
 0x294   : > { %1596 = vmax.xlane.f32.xlu0 %v1595_v49 }
 0x29d   : > { %982 = vrot.lane.b32.xlu1 %v3738_v28, %s4261_s27  ;;  %s658_s27 = scalar_lea.vmem %s4232_s20, %s4262_s30 }
 0x2aa   : > { %988 = vrot.lane.b32.xlu0 %v3738_v28, %s3524_s25 }
 0x2c1   : > { %1590 = vmax.xlane.f32.xlu1 %v1589_v51 }
 0x2d0   : > { %v3902_v53 = vpop.xlane.xlu1 %1566 }
 0x2d1   : > { %v1635_v55 = vsub.f32 %v3821_v36, %v3902_v53 }
 0x2d2   : > { %985 = vrot.lane.b32.xlu1 %v3738_v28, %s3523_s0  ;;  %s3525_s0 = smov 8  }
 0x2d3   : > { %v1648_v56 = vmul.f32 1.442695, %v1635_v55 }
 0x2d4   : > { %v3908_v57 = vpop.xlane.xlu0 %1569 }
 0x2d5   : > { %v1636_v24 = vsub.f32 %v3826_v42, %v3908_v57  ;;  %3407 = vpow2.f32 %v1648_v56  ;;  %v994_v42 = vpack.c.bf16 %v3845_v8, %v3845_v8 }
 0x2d7   : > { %v1650_v58 = vmul.f32 1.442695, %v1636_v24  ;;  %v1885_v6 = vsel %vm1745_vm3, %v994_v42, 0 }
 0x2d8   : > { %v3912_v59 = vpop.xlane.xlu0 %1572 }
 0x2d9   : > { %v1637_v61 = vsub.f32 %v3831_v48, %v3912_v59  ;;  %3409 = vpow2.f32 %v1650_v58 }
 0x2db   : > { %v1652_v62 = vmul.f32 1.442695, %v1637_v61 }
 0x2dc   : > { %v3916_v63 = vpop.xlane.xlu1 %1575 }
 0x2dd   : > { %v1638_v28 = vsub.f32 %v3836_v54, %v3916_v63  ;;  %3411 = vpow2.f32 %v1652_v62 }
 0x2df   : > { %v1654_v36 = vmul.f32 1.442695, %v1638_v28  ;;  %v3408_v0 = vpop.eup %3407 }
 0x2e0   : > { %v3922_v2 = vpop.xlane.xlu0 %1578  ;;  %v1731_v48 = vpack.c.bf16 %v3408_v0, %v3408_v0  ;;  %v1685_v29 = vsel %vm1009_vm2, %v3408_v0, 0.0 }
 0x2e1   : > { %v1639_v3 = vsub.f32 %v3841_v60, %v3922_v2  ;;  %3413 = vpow2.f32 %v1654_v36  ;;  %v974_v60 = vpop.permute.xlu1 %973 }
 0x2e2   : > { %3230 = vmatmul.mubr.msk.bf16.vlgmr.msra.gmra.mrb[32].mxu0 %vm1009_vm2, %v1731_v48  ;;  %v997_v17 = vpack.c.bf16 %v974_v60, %v974_v60 }
 0x2e3   : > { %v1656_v4 = vmul.f32 1.442695, %v1639_v3  ;;  %v3410_v5 = vpop.eup %3409  ;;  %3240 = vmatpush3.bf16.msra.mxu0 %v1885_v6  ;;  %3241 = vmatprep.mubr.msk.bf16.mxu0 %vm3513_vm0, %v3512_v1  ;;  %v1682_v3 = vsel %vm1009_vm2, %v3859_v34, 0.0 }
 0x2e4   : > { %v971_v54 = vpop.permute.xlu0 %970  ;;  %v1688_v9 = vsel %vm1009_vm2, %v3410_v5, 0.0  ;;  %v1732_v8 = vpack.c.bf16 %v3410_v5, %v3410_v5  ;;  %3251 = vmatprep.subr.bf16.mxu0 %v3512_v1  ;;  %v2023_v22 = vsel %vm1745_vm3, %v997_v17, 0 }
 0x2e5   : > { %3415 = vpow2.f32 %v1656_v4  ;;  %1689 = vadd.xlane.f32.xlu0 %v1688_v9  ;;  %v996_v12 = vpack.c.bf16 %v971_v54, %v971_v54  ;;  %v977_v19 = vpop.permute.xlu1 %976 }
 0x2e6   : > { %3236 = vmatmul.mubr.msk.bf16.vlgmr.msra.gmra.mrb[32].mxu1 %vm1009_vm2, %v1732_v8  ;;  %v998_v23 = vpack.c.bf16 %v977_v19, %v977_v19 }
 0x2e7   : > { %v3412_v10 = vpop.eup %3411  ;;  %3246 = vmatpush3.bf16.msra.mxu1 %v1931_v11  ;;  %3247 = vmatprep.mubr.msk.bf16.mxu1 %vm3513_vm0, %v3512_v1  ;;  %v1977_v18 = vsel %vm1745_vm3, %v996_v12, 0 }
 0x2e8   : > { %v1691_v13 = vsel %vm1009_vm2, %v3412_v10, 0.0  ;;  %v1733_v15 = vpack.c.bf16 %v3412_v10, %v3412_v10  ;;  %3257 = vmatprep.subr.bf16.mxu1 %v3512_v1  ;;  %v2069_v27 = vsel %vm1745_vm3, %v998_v23, 0 }
 0x2e9   : > { %1692 = vadd.xlane.f32.xlu0 %v1691_v13  ;;  %v980_v31 = vpop.permute.xlu1 %979 }
 0x2ea   : > { %3242 = vmatmul.mubr.msk.bf16.vlgmr.msra.gmra.mrb[36].mxu0 %vm1009_vm2, %v1733_v15  ;;  %v999_v58 = vpack.c.bf16 %v980_v31, %v980_v31  ;;  %v1600_v31 = vsub.f32 -inf, %v3908_v57 }
 0x2eb   : > { %v3938_v16 = vpop.eup %3413  ;;  %3252 = vmatpush3.bf16.msra.mxu0 %v1977_v18  ;;  %3253 = vmatprep.mubr.msk.bf16.mxu0 %vm3513_vm0, %v3512_v1 }
 0x2ec   : > { %v1734_v20 = vpack.c.bf16 %v3938_v16, %v3938_v16  ;;  %3263 = vmatprep.subr.bf16.mxu0 %v3512_v1  ;;  %v2115_v28 = vsel %vm1745_vm3, %v999_v58, 0 }
 0x2ee   : > { %3248 = vmatmul.mubr.msk.bf16.vlgmr.msra.gmra.mrb[36].mxu1 %vm1009_vm2, %v1734_v20 }
 0x2ef   : > { %v3416_v21 = vpop.eup %3415  ;;  %3258 = vmatpush3.bf16.msra.mxu1 %v2023_v22  ;;  %3259 = vmatprep.mubr.msk.bf16.mxu1 %vm3513_vm0, %v3512_v1 }
 0x2f0   : > { %v1735_v25 = vpack.c.bf16 %v3416_v21, %v3416_v21  ;;  %3269 = vmatprep.subr.bf16.mxu1 %v3512_v1  ;;  %v1697_v30 = vsel %vm1009_vm2, %v3416_v21, 0.0 }
 0x2f2   : > { %3254 = vmatmul.mubr.msk.bf16.vlgmr.msra.gmra.mrb[40].mxu0 %vm1009_vm2, %v1735_v25  ;;  %v1694_v25 = vsel %vm1009_vm2, %v3938_v16, 0.0  ;;  %v1603_v16 = vsub.f32 -inf, %v3922_v2 }
 0x2f3   : > { %3264 = vmatpush3.bf16.msra.mxu0 %v2069_v27  ;;  %3265 = vmatprep.mubr.msk.bf16.mxu0 %vm3513_vm0, %v3512_v1 }
 0x2f4   : > { %3275 = vmatprep.subr.bf16.mxu0 %v3512_v1 }
 0x2f6   : > { %1686 = vadd.xlane.f32.xlu1 %v1685_v29  ;;  %v1599_v29 = vsub.f32 -inf, %v3902_v53  ;;  %v1602_v53 = vsub.f32 -inf, %v3916_v63 }
 0x2fa   : > { %1698 = vadd.xlane.f32.xlu1 %v1697_v30  ;;  %v1612_v30 = vmul.f32 1.442695, %v1599_v29 }
 0x315   : > { %v3959_v26 = vpop.xlane.xlu0 %1584 }
 0x316   : > { %v1641_v32 = vsub.f32 %v3869_v38, %v3959_v26 }
 0x318   : > { %v1660_v33 = vmul.f32 1.442695, %v1641_v32  ;;  %v1614_v32 = vmul.f32 1.442695, %v1600_v31 }
 0x319   : > { %v3963_v35 = vpop.xlane.xlu1 %1581  ;;  %v3965_v37 = vpop.xlane.xlu0 %1587 }
 0x31a   : > { %v1640_v41 = vsub.f32 %v3872_v39, %v3963_v35  ;;  %3417 = vpow2.f32 %v1660_v33  ;;  %v1642_v45 = vsub.f32 %v3875_v40, %v3965_v37  ;;  %v1601_v33 = vsub.f32 -inf, %v3912_v59 }
 0x31c   : > { %v1658_v44 = vmul.f32 1.442695, %v1640_v41  ;;  %v1662_v51 = vmul.f32 1.442695, %v1642_v45  ;;  %v1616_v41 = vmul.f32 1.442695, %v1601_v33 }
 0x31d   : > { %v3971_v47 = vpop.xlane.xlu0 %1593  ;;  %v983_v52 = vpop.permute.xlu1 %982  ;;  %v1620_v45 = vmul.f32 1.442695, %v1603_v16 }
 0x31e   : > { %v1644_v49 = vsub.f32 %v3880_v43, %v3971_v47  ;;  %3419 = vpow2.f32 %v1658_v44  ;;  %v1000_v55 = vpack.c.bf16 %v983_v52, %v983_v52 }
 0x320   : > { %v1666_v38 = vmul.f32 1.442695, %v1644_v49  ;;  %v2161_v40 = vsel %vm1745_vm3, %v1000_v55, 0 }
 0x321   : > { %v3996_v9 = vpop.xlane.xlu0 %1596 }
 0x322   : > { %3421 = vpow2.f32 %v1666_v38  ;;  %v1645_v34 = vsub.f32 %v3887_v46, %v3996_v9 }
 0x323   : > { %3423 = vpow2.f32 %v1662_v51 }
 0x324   : > { %v3418_v56 = vpop.eup %3417  ;;  %v1668_v11 = vmul.f32 1.442695, %v1645_v34 }
 0x325   : > { %v1703_v39 = vsel %vm1009_vm2, %v3418_v56, 0.0  ;;  %v1737_v24 = vpack.c.bf16 %v3418_v56, %v3418_v56  ;;  %v989_v46 = vpop.permute.xlu0 %988 }
 0x326   : > { %1704 = vadd.xlane.f32.xlu1 %v1703_v39  ;;  %v1002_v18 = vpack.c.bf16 %v989_v46, %v989_v46 }
 0x327   : > { %3266 = vmatmul.mubr.msk.bf16.vlgmr.msra.gmra.mrb[44].mxu0 %vm1009_vm2, %v1737_v24  ;;  %v1618_v24 = vmul.f32 1.442695, %v1602_v53 }
 0x328   : > { %v3420_v61 = vpop.eup %3419  ;;  %3276 = vmatpush3.bf16.msra.mxu0 %v2161_v40  ;;  %3277 = vmatprep.mubr.msk.bf16.mxu0 %vm3513_vm0, %v3512_v1  ;;  %v2253_v22 = vsel %vm1745_vm3, %v1002_v18, 0 }
 0x329   : > { %v1700_v43 = vsel %vm1009_vm2, %v3420_v61, 0.0  ;;  %v1736_v62 = vpack.c.bf16 %v3420_v61, %v3420_v61  ;;  %3287 = vmatprep.subr.bf16.mxu0 %v3512_v1 }
 0x32a   : > { %1701 = vadd.xlane.f32.xlu0 %v1700_v43 }
 0x32b   : > { %3260 = vmatmul.mubr.msk.bf16.vlgmr.msra.gmra.mrb[40].mxu1 %vm1009_vm2, %v1736_v62 }
 0x32c   : > { %v3422_v36 = vpop.eup %3421  ;;  %3270 = vmatpush3.bf16.msra.mxu1 %v2115_v28  ;;  %3271 = vmatprep.mubr.msk.bf16.mxu1 %vm3513_vm0, %v3512_v1 }
 0x32d   : > { %v1712_v0 = vsel %vm1009_vm2, %v3422_v36, 0.0  ;;  %3281 = vmatprep.subr.bf16.mxu1 %v3512_v1  ;;  %v3424_v42 = vpop.eup %3423  ;;  %v1740_v17 = vpack.c.bf16 %v3422_v36, %v3422_v36 }
 0x32e   : > { %1713 = vadd.xlane.f32.xlu1 %v1712_v0  ;;  %v1738_v48 = vpack.c.bf16 %v3424_v42, %v3424_v42  ;;  %v1706_v4 = vsel %vm1009_vm2, %v3424_v42, 0.0 }
 0x332   : > { %1683 = vadd.xlane.f32.xlu1 %v1682_v3 }
 0x333   : > { %3272 = vmatmul.mubr.msk.bf16.vlgmr.msra.gmra.mrb[44].mxu1 %vm1009_vm2, %v1738_v48 }
 0x334   : > { %3283 = vmatprep.mubr.msk.bf16.mxu1 %vm3513_vm0, %v3512_v1 }
 0x336   : > { %1707 = vadd.xlane.f32.xlu1 %v1706_v4 }
 0x342   : > { %v3994_v5 = vpop.f32.mrb[28].mxu1 }
 0x343   : > { %v3225_v6 = vpop.f32.mrb[29].mxu1 }
 0x344   : > { %v1786_v7 = vpop.f32.mrb[30].mxu1 }
 0x345   : > { %v3226_v54 = vpop.f32.mrb[31].mxu1 }
 0x34e   : > { %v4000_v8 = vpop.xlane.xlu1 %1590 }
 0x34f   : > { %v1643_v60 = vsub.f32 %v3898_v50, %v4000_v8 }
 0x351   : > { %v1664_v10 = vmul.f32 1.442695, %v1643_v60 }
 0x352   : > { %v986_v12 = vpop.permute.xlu1 %985 }
 0x353   : > { %v1001_v13 = vpack.c.bf16 %v986_v12, %v986_v12  ;;  %3425 = vpow2.f32 %v1664_v10 }
 0x354   : > { %3427 = vpow2.f32 %v1668_v11 }
 0x355   : > { %v2207_v15 = vsel %vm1745_vm3, %v1001_v13, 0  ;;  %3429 = vpow2.f32 %v1612_v30 }
 0x356   : > { %3282 = vmatpush3.bf16.msra.mxu1 %v2207_v15  ;;  %3431 = vpow2.f32 %v1614_v32 }
 0x357   : > { %3293 = vmatprep.subr.bf16.mxu1 %v3512_v1  ;;  %3433 = vpow2.f32 %v1616_v41 }
 0x358   : > { %3435 = vpow2.f32 %v1620_v45 }
 0x359   : > { %3284 = vmatmul.mubr.msk.bf16.vlgmr.msra.gmra.mrb[48].mxu1 %vm1009_vm2, %v1740_v17 }
 0x35a   : > { %3297 = vmatprep.mubr.msk.bf16.mxu1 %vm3513_vm0, %v3512_v1 }
 0x35d   : > { %v3426_v50 = vpop.eup %3425 }
 0x35e   : > { %v1709_v19 = vsel %vm1009_vm2, %v3426_v50, 0.0  ;;  %v1739_v20 = vpack.c.bf16 %v3426_v50, %v3426_v50  ;;  %v3428_v21 = vpop.eup %3427 }
 0x35f   : > { %1710 = vadd.xlane.f32.xlu0 %v1709_v19  ;;  %v1715_v23 = vsel %vm1009_vm2, %v3428_v21, 0.0  ;;  %v1741_v27 = vpack.c.bf16 %v3428_v21, %v3428_v21  ;;  %v3430_v44 = vpop.eup %3429 }
 0x360   : > { %3278 = vmatmul.mubr.msk.bf16.vlgmr.msra.gmra.mrb[48].mxu0 %vm1009_vm2, %v1739_v20  ;;  %v1671_v38 = vmul.f32 0.0, %v3430_v44  ;;  %v3432_v51 = vpop.eup %3431  ;;  %v1605_v44 = vsub.f32 -inf, %v3959_v26 }
 0x361   : > { %3288 = vmatpush3.bf16.msra.mxu0 %v2253_v22  ;;  %3289 = vmatprep.mubr.msk.bf16.mxu0 %vm3513_vm0, %v3512_v1  ;;  %v1672_v57 = vmul.f32 0.0, %v3432_v51  ;;  %v3434_v56 = vpop.eup %3433  ;;  %v1606_v51 = vsub.f32 -inf, %v3965_v37  ;;  %v3393_v37 = vld [vmem:[%s4220_s8 + $0x10] sm:$0xff]  }
 0x362   : > { %3301 = vmatprep.subr.bf16.mxu0 %v3512_v1  ;;  %v1673_v58 = vmul.f32 0.0, %v3434_v56  ;;  %v3436_v2 = vpop.eup %3435  ;;  %v1624_v45 = vmul.f32 1.442695, %v1605_v44 }
 0x363   : > { %1716 = vadd.xlane.f32.xlu0 %v1715_v23  ;;  %v1675_v0 = vmul.f32 0.0, %v3436_v2 }
 0x367   : > { %1695 = vadd.xlane.f32.xlu0 %v1694_v25 }
 0x368   : > { %3290 = vmatmul.mubr.msk.bf16.vlgmr.msra.gmra.mrb[52].mxu0 %vm1009_vm2, %v1741_v27 }
 0x369   : > { %3305 = vmatprep.mubr.msk.bf16.mxu0 %vm3513_vm0, %v3512_v1  ;;  %3302 = vmatpush3.bf16.msra.mxu0 %v3393_v37 }
 0x36a   : > { %3303 = vmatprep.subr.bf16.mxu0 %v3512_v1 }
 0x372   : > { %v1690_v52 = vpop.xlane.xlu0 %1689 }
 0x373   : > { %v1720_v39 = vadd.f32 %v1690_v52, %v1672_v57  ;;  %v1626_v52 = vmul.f32 1.442695, %v1606_v51 }
 0x376   : > { %v1693_v59 = vpop.xlane.xlu0 %1692 }
 0x377   : > { %v1721_v40 = vadd.f32 %v1693_v59, %v1673_v58 }
 0x383   : > { %v1687_v49 = vpop.xlane.xlu1 %1686 }
 0x384   : > { %v1719_v55 = vadd.f32 %v1687_v49, %v1671_v38  ;;  %v1604_v49 = vsub.f32 -inf, %v3963_v35 }
 0x386   : > { %3437 = vrcp.f32 %v1719_v55 }
 0x387   : > { %3439 = vrcp.f32 %v1720_v39  ;;  %v1699_v43 = vpop.xlane.xlu1 %1698 }
 0x388   : > { %3441 = vpow2.f32 %v1618_v24  ;;  %v1723_v48 = vadd.f32 %v1699_v43, %v1675_v0 }
 0x389   : > { %3443 = vrcp.f32 %v1721_v40 }
 0x38a   : > { %3445 = vrcp.f32 %v1723_v48 }
 0x38b   : > { %3447 = vpow2.f32 %v1624_v45 }
 0x390   : > { %v3438_v36 = vpop.eup %3437 }
 0x391   : > { %v3440_v54 = vpop.eup %3439 }
 0x392   : > { %v3442_v11 = vpop.eup %3441 }
 0x393   : > { %v3444_v17 = vpop.eup %3443  ;;  %v1674_v19 = vmul.f32 0.0, %v3442_v11 }
 0x394   : > { %v3446_v31 = vpop.eup %3445 }
 0x3b3   : > { %v1705_v55 = vpop.xlane.xlu1 %1704 }
 0x3b5   : > { %v1829_v61 = vpop.f32.mrb[32].mxu0 }
 0x3b6   : > { %v2296_v62 = vadd.f32 %v1829_v61, %v1671_v38  ;;  %v3231_v28 = vpop.f32.mrb[33].mxu0  ;;  %v1622_v38 = vmul.f32 1.442695, %v1604_v49 }
 0x3b7   : > { %v1832_v42 = vpop.f32.mrb[34].mxu0  ;;  %v1702_v53 = vpop.xlane.xlu0 %1701 }
 0x3b8   : > { %v2320_v63 = vmul.f32 %v3438_v36, %v2296_v62  ;;  %v3232_v3 = vpop.f32.mrb[35].mxu0  ;;  %3449 = vpow2.f32 %v1622_v38 }
 0x3b9   : > { %v1875_v4 = vpop.f32.mrb[32].mxu1  ;;  %3451 = vpow2.f32 %v1626_v52  ;;  %v3395_v3 = vld [vmem:[%s4220_s8 + $0x18] sm:$0xff]  }
 0x3ba   : > { %v2297_v6 = vadd.f32 %v1875_v4, %v1672_v57  ;;  %v3237_v7 = vpop.f32.mrb[33].mxu1  ;;  %v3448_v57 = vpop.eup %3447  ;;  %3304 = vmatpush3.bf16.msra.mxu0 %v3395_v3 }
 0x3bb   : > { %v1878_v34 = vpop.f32.mrb[34].mxu1  ;;  %v4036_v56 = vpop.xlane.xlu1 %1713  ;;  %v1677_v39 = vmul.f32 0.0, %v3448_v57  ;;  %3317 = vmatprep.subr.bf16.mxu0 %v3512_v1 }
 0x3bc   : > { %v4026_v60 = vmul.f32 %v3440_v54, %v2297_v6  ;;  %v3238_v10 = vpop.f32.mrb[35].mxu1  ;;  %v3396_v54 = vld [vmem:[%s4220_s8 + $0x8] sm:$0xff]  }
 0x3bd   : > { %v1921_v12 = vpop.f32.mrb[36].mxu0  ;;  %v1725_v26 = vadd.f32 %v1705_v55, %v1677_v39 }
 0x3be   : > { %v2298_v13 = vadd.f32 %v1921_v12, %v1673_v58  ;;  %v3243_v15 = vpop.f32.mrb[37].mxu0 }
 0x3bf   : > { %v1924_v46 = vpop.f32.mrb[38].mxu0  ;;  %v4042_v35 = vpop.xlane.xlu1 %1683  ;;  %3453 = vrcp.f32 %v1725_v26 }
 0x3c0   : > { %v4028_v18 = vmul.f32 %v3444_v17, %v2298_v13  ;;  %v3244_v50 = vpop.f32.mrb[39].mxu0 }
 0x3c1   : > { %v1967_v20 = vpop.f32.mrb[36].mxu1 }
 0x3c2   : > { %v4030_v21 = vadd.f32 %v1967_v20, %v1674_v19  ;;  %v3249_v22 = vpop.f32.mrb[37].mxu1  ;;  %v3450_v24 = vpop.eup %3449 }
 0x3c3   : > { %v1970_v23 = vpop.f32.mrb[38].mxu1  ;;  %v1676_v58 = vmul.f32 0.0, %v3450_v24  ;;  %v3452_v43 = vpop.eup %3451 }
 0x3c4   : > { %v3250_v25 = vpop.f32.mrb[39].mxu1  ;;  %v1708_v28 = vpop.xlane.xlu1 %1707  ;;  %v1678_v36 = vmul.f32 0.0, %v3452_v43 }
 0x3c5   : > { %v2013_v27 = vpop.f32.mrb[40].mxu0  ;;  %v1724_v2 = vadd.f32 %v1702_v53, %v1676_v58 }
 0x3c6   : > { %v2300_v29 = vadd.f32 %v2013_v27, %v1675_v0  ;;  %v3255_v30 = vpop.f32.mrb[41].mxu0  ;;  %v3394_v0 = vld [vmem:[%s4220_s8] sm:$0xff]   ;;  %v1726_v42 = vadd.f32 %v1708_v28, %v1678_v36 }
 0x3c7   : > { %v2016_v32 = vpop.f32.mrb[42].mxu0  ;;  %3455 = vrcp.f32 %v1724_v2  ;;  %3294 = vmatpush3.bf16.msra.mxu1 %v3394_v0  ;;  %v1608_v30 = vsub.f32 -inf, %v3971_v47 }
 0x3c8   : > { %v2324_v33 = vmul.f32 %v3446_v31, %v2300_v29  ;;  %v3256_v41 = vpop.f32.mrb[43].mxu0  ;;  %3295 = vmatprep.subr.bf16.mxu1 %v3512_v1 }
 0x3c9   : > { %v3454_v6 = vpop.eup %3453 }
 0x3ca   : > { %v3377_v16 = vpack.i.bf16 %v2324_v33, %v2320_v63 }
 0x3cb   : > { %3296 = vmatpush3.bf16.msra.mxu1 %v3396_v54 }
 0x3cc   : > { %3378 = vrot.lane.b32.xlu0 %v3377_v16, %s3525_s0  ;;  %3309 = vmatprep.subr.bf16.mxu1 %v3512_v1  ;;  %v1609_v16 = vsub.f32 -inf, %v3996_v9 }
 0x3ce   : > { %v1632_v45 = vmul.f32 1.442695, %v1609_v16 }
 0x3d1   : > { %v3456_v15 = vpop.eup %3455 }
 0x3ec   : > { %v4038_v59 = vpop.xlane.xlu0 %1710 }
 0x3f0   : > { %v4040_v40 = vpop.xlane.xlu0 %1716 }
 0x3f4   : > { %v1696_v61 = vpop.xlane.xlu0 %1695 }
 0x3f5   : > { %v1722_v62 = vadd.f32 %v1696_v61, %v1674_v19 }
 0x3f7   : > { %3457 = vrcp.f32 %v1722_v62 }
 0x3f8   : > { %3459 = vrcp.f32 %v1726_v42 }
 0x3fa   : > { %v2105_v63 = vpop.f32.mrb[44].mxu0 }
 0x3fb   : > { %v2302_v48 = vadd.f32 %v2105_v63, %v1677_v39  ;;  %v3267_v4 = vpop.f32.mrb[45].mxu0 }
 0x3fc   : > { %v2108_v7 = vpop.f32.mrb[46].mxu0 }
 0x3fd   : > { %v2326_v34 = vmul.f32 %v3454_v6, %v2302_v48  ;;  %v3268_v10 = vpop.f32.mrb[47].mxu0 }
 0x3fe   : > { %v2059_v11 = vpop.f32.mrb[40].mxu1 }
 0x3ff   : > { %v2301_v12 = vadd.f32 %v2059_v11, %v1676_v58  ;;  %2357 = vrot.lane.b32.xlu0 %v2326_v34, %s3526_s26  ;;  %v3261_v13 = vpop.f32.mrb[41].mxu1 }
 0x400   : > { %v2062_v17 = vpop.f32.mrb[42].mxu1 }
 0x401   : > { %v3458_v46 = vpop.eup %3457  ;;  %v2325_v50 = vmul.f32 %v3456_v15, %v2301_v12  ;;  %v3262_v19 = vpop.f32.mrb[43].mxu1 }
 0x402   : > { %v4062_v20 = vmul.f32 %v3458_v46, %v4030_v21  ;;  %v3460_v29 = vpop.eup %3459  ;;  %v1630_v21 = vmul.f32 1.442695, %v1608_v30  ;;  %v3397_v30 = vld [vmem:[%s4220_s8 + $0x20] sm:$0xff]  }
 0x403   : > { %v3382_v22 = vpack.i.bf16 %v2325_v50, %v4026_v60  ;;  %v1607_v60 = vsub.f32 -inf, %v4000_v8 }
 0x404   : > { %3461 = vpow2.f32 %v1630_v21 }
 0x405   : > { %3383 = vrot.lane.b32.xlu1 %v3382_v22, %s3527_s4  ;;  %v1628_v41 = vmul.f32 1.442695, %v1607_v60 }
 0x406   : > { %v2151_v23 = vpop.f32.mrb[44].mxu1 }
 0x407   : > { %v2303_v25 = vadd.f32 %v2151_v23, %v1678_v36  ;;  %v3273_v27 = vpop.f32.mrb[45].mxu1  ;;  %3463 = vpow2.f32 %v1628_v41 }
 0x408   : > { %v2154_v31 = vpop.f32.mrb[46].mxu1  ;;  %3465 = vpow2.f32 %v1632_v45 }
 0x409   : > { %v4067_v32 = vmul.f32 %v3460_v29, %v2303_v25  ;;  %2340 = vrot.lane.b32.xlu1 %v4028_v18, %s3526_s26  ;;  %v3274_v33 = vpop.f32.mrb[47].mxu1 }
 0x40e   : > { %v3462_v44 = vpop.eup %3461 }
 0x40f   : > { %v1680_v49 = vmul.f32 0.0, %v3462_v44 }
 0x411   : > { %v1728_v47 = vadd.f32 %v4036_v56, %v1680_v49  ;;  %v3464_v38 = vpop.eup %3463 }
 0x412   : > { %v1679_v51 = vmul.f32 0.0, %v3464_v38  ;;  %v3466_v52 = vpop.eup %3465 }
 0x413   : > { %3467 = vrcp.f32 %v1728_v47  ;;  %v1681_v39 = vmul.f32 0.0, %v3466_v52  ;;  %v3487_v47 = vld [vmem:[%s3682_s29] sm:$0xf] }
 0x414   : > { %v1727_v18 = vadd.f32 %v4038_v59, %v1679_v51  ;;  %v4114_v38 = vunpack.c.l.bf16 %v3487_v47 }
 0x415   : > { %v1729_v58 = vadd.f32 %v4040_v40, %v1681_v39  ;;  %v1598_v40 = vsub.f32 -inf, %v3847_v14 }
 0x416   : > { %3469 = vrcp.f32 %v1727_v18 }
 0x417   : > { %3471 = vrcp.f32 %v1729_v58  ;;  %v1610_v4 = vmul.f32 1.442695, %v1598_v40 }
 0x419   : > { %3473 = vpow2.f32 %v1610_v4 }
 0x41d   : > { %v3468_v57 = vpop.eup %3467 }
 0x420   : > { %v3470_v61 = vpop.eup %3469 }
 0x421   : > { %v3472_v42 = vpop.eup %3471 }
 0x423   : > { %v3474_v6 = vpop.eup %3473 }
 0x424   : > { %v1670_v7 = vmul.f32 0.0, %v3474_v6 }
 0x426   : > { %v1718_v54 = vadd.f32 %v4042_v35, %v1670_v7  ;;  %v2295_v11 = vadd.f32 %v3994_v5, %v1670_v7 }
 0x428   : > { %3475 = vrcp.f32 %v1718_v54 }
 0x42c   : > { %v2243_v55 = vpop.f32.mrb[48].mxu1 }
 0x42d   : > { %v2305_v53 = vadd.f32 %v2243_v55, %v1680_v49  ;;  %v3285_v8 = vpop.f32.mrb[49].mxu1  ;;  %v3018_v49 = vld [vmem:[%s4221_s9 + $0x1] ss:$0 sm:$0xff] }
 0x42e   : > { %v2246_v9 = vpop.f32.mrb[50].mxu1 }
 0x42f   : > { %v2329_v24 = vmul.f32 %v3468_v57, %v2305_v53  ;;  %v3286_v26 = vpop.f32.mrb[51].mxu1 }
 0x431   : > { %2368 = vrot.lane.b32.xlu0 %v2329_v24, %s3527_s4 }
 0x432   : > { %v3476_v10 = vpop.eup %3475 }
 0x433   : > { %v2197_v56 = vpop.f32.mrb[48].mxu0  ;;  %v2319_v17 = vmul.f32 %v3476_v10, %v2295_v11 }
 0x434   : > { %v2304_v37 = vadd.f32 %v2197_v56, %v1679_v51  ;;  %v3279_v2 = vpop.f32.mrb[49].mxu0 }
 0x435   : > { %v2200_v59 = vpop.f32.mrb[50].mxu0  ;;  %v3019_v2 = vld [vmem:[%s4221_s9 + $0x2] ss:$0 sm:$0xff] }
 0x436   : > { %v2328_v43 = vmul.f32 %v3470_v61, %v2304_v37  ;;  %v3280_v62 = vpop.f32.mrb[51].mxu0 }
 0x438   : > { %2364 = vrot.lane.b32.xlu1 %v2328_v43, %s3525_s0 }
 0x43b   : > { %v2289_v28 = vpop.f32.mrb[52].mxu0 }
 0x43c   : > { %v2306_v36 = vadd.f32 %v2289_v28, %v1681_v39  ;;  %v3291_v0 = vpop.f32.mrb[53].mxu0 }
 0x43d   : > { %v2292_v63 = vpop.f32.mrb[54].mxu0 }
 0x43e   : > { %v2330_v3 = vmul.f32 %v3472_v42, %v2306_v36  ;;  %v3292_v48 = vpop.f32.mrb[55].mxu0  ;;  %v3379_v34 = vpop.permute.xlu0 %3378 }
 0x43f   : > { %v3381_v12 = vunpack.i.h.bf16 %v3379_v34  ;;  %v3380_v13 = vunpack.i.l.bf16 %v3379_v34 }
 0x440   : > { %2372 = vrot.lane.b32.xlu1 %v2330_v3, %s3526_s26 }
 0x441   : > { %v2360_v14 = vsel %vm1009_vm2, %v4062_v20, %v3381_v12  ;;  %v2343_v19 = vsel %vm1009_vm2, %v2319_v17, %v3380_v13  ;;  %v3398_v20 = vld [vmem:[%s4220_s8 + $0x28] sm:$0xff]  }
 0x471   : > { %v2358_v22 = vpop.permute.xlu0 %2357 }
 0x477   : > { %v3384_v15 = vpop.permute.xlu1 %3383 }
 0x478   : > { %v3386_v46 = vunpack.i.h.bf16 %v3384_v15  ;;  %v3385_v50 = vunpack.i.l.bf16 %v3384_v15 }
 0x47a   : > { %v2361_v35 = vsel %vm2344_vm4, %v2360_v14, %v3386_v46  ;;  %v2345_v23 = vsel %vm2344_vm4, %v2343_v19, %v3385_v50 }
 0x47b   : > { %v2341_v25 = vpop.permute.xlu1 %2340  ;;  %v2362_v5 = vsel %vm2346_vm5, %v2361_v35, %v2358_v22 }
 0x47c   : > { %v2347_v27 = vsel %vm2346_vm5, %v2345_v23, %v2341_v25  ;;  %v2379_v29 = vpack.c.bf16 %v2362_v5, %v2362_v5 }
 0x47d   : > { %v2378_v31 = vpack.c.bf16 %v2347_v27, %v2347_v27 }
 0x47e   : > { %3306 = vmatmul.mubr.msk.bf16.vlgmr.msra.gmra.mrb[56].mxu0 %vm702_vm1, %v2379_v29 }
 0x47f   : > { %3298 = vmatmul.mubr.msk.bf16.vlgmr.msra.gmra.mrb[52].mxu1 %vm702_vm1, %v2378_v31  ;;  %3321 = vmatprep.mubr.msk.bf16.mxu0 %vm3513_vm0, %v3512_v1  ;;  %v3029_v31 = vld [vmem:[%s4222_s10] ss:$0 sm:$0xff] }
 0x480   : > { %3310 = vmatpush3.bf16.msra.mxu1 %v3397_v30  ;;  %3313 = vmatprep.mubr.msk.bf16.mxu1 %vm3513_vm0, %v3512_v1 }
 0x481   : > { %3311 = vmatprep.subr.bf16.mxu1 %v3512_v1 }
 0x484   : > { %3312 = vmatpush3.bf16.msra.mxu1 %v3398_v20  ;;  %v3030_v20 = vld [vmem:[%s4222_s10 + $0x1] ss:$0 sm:$0xff] }
 0x485   : > { %3325 = vmatprep.subr.bf16.mxu1 %v3512_v1 }
 0x4a3   : > { %v2369_v60 = vpop.permute.xlu0 %2368 }
 0x4aa   : > { %v2365_v33 = vpop.permute.xlu1 %2364 }
 0x4ab   : > { %v2375_v21 = vsel %vm1009_vm2, %v4067_v32, %v2365_v33  ;;  %v3017_v32 = vld [vmem:[%s4221_s9] ss:$0 sm:$0xff] }
 0x4ac   : > { %v2376_v16 = vsel %vm2344_vm4, %v2375_v21, %v2369_v60  ;;  %v3032_v60 = vld [vmem:[%s4223_s11] ss:$0 sm:$0xff] }
 0x4b2   : > { %v2373_v41 = vpop.permute.xlu1 %2372 }
 0x4b3   : > { %v2377_v44 = vsel %vm2346_vm5, %v2376_v16, %v2373_v41  ;;  %v3033_v41 = vld [vmem:[%s4223_s11 + $0x1] ss:$0 sm:$0xff] }
 0x4b4   : > { %v2380_v45 = vpack.c.bf16 %v2377_v44, %v2377_v44 }
 0x4b6   : > { %3314 = vmatmul.mubr.msk.bf16.vlgmr.msra.gmra.mrb[56].mxu1 %vm702_vm1, %v2380_v45 }
 0x4b7   : > { %3333 = vmatprep.mubr.msk.bf16.mxu1 %vm3513_vm0, %v3512_v1 }
 0x551   : > { %v2518_v51 = vpop.f32.mrb[56].mxu0 }
 0x552   : > { %v2519_v18 = vadd.f32 %v3018_v49, %v2518_v51  ;;  %v2463_v52 = vpop.f32.mrb[52].mxu1  ;;  %v3307_v55 = vpop.f32.mrb[57].mxu0  ;;  %v3031_v49 = vld [vmem:[%s4222_s10 + $0x2] ss:$0 sm:$0xff] }
 0x553   : > { %v2464_v53 = vadd.f32 %v3017_v32, %v2463_v52  ;;  %v3299_v8 = vpop.f32.mrb[53].mxu1  ;;  %v2521_v57 = vpop.f32.mrb[58].mxu0  ;;  %v3034_v32 = vld [vmem:[%s4223_s11 + $0x2] ss:$0 sm:$0xff] }
 0x554   : > { %v2466_v39 = vpop.f32.mrb[54].mxu1  ;;  %v3308_v9 = vpop.f32.mrb[59].mxu0  ;;  %v2580_v24 = vadd.f32 %v2519_v18, %v4114_v38 }
 0x555   : > { %v3300_v26 = vpop.f32.mrb[55].mxu1  ;;  %v2579_v58 = vadd.f32 %v2464_v53, %v4114_v38 }
 0x556   : > { %v2591_v56 = vsel %vm702_vm1, %v2580_v24, 0.0 }
 0x557   : > { %2592 = vadd.xlane.f32.xlu1 %v2591_v56  ;;  %v2588_v37 = vsel %vm702_vm1, %v2579_v58, 0.0 }
 0x558   : > { %2589 = vadd.xlane.f32.xlu0 %v2588_v37 }
 0x589   : > { %v2573_v61 = vpop.f32.mrb[56].mxu1 }
 0x58a   : > { %v2574_v59 = vadd.f32 %v3019_v2, %v2573_v61  ;;  %v3315_v43 = vpop.f32.mrb[57].mxu1  ;;  %v3399_v61 = vld [vmem:[%s4226_s14] sm:$0xff]  }
 0x58b   : > { %v2576_v62 = vpop.f32.mrb[58].mxu1  ;;  %3318 = vmatpush3.bf16.msra.mxu0 %v3399_v61  ;;  %v3402_v43 = vld [vmem:[%s4228_s16 + $0x8] sm:$0xff]  }
 0x58c   : > { %v3316_v28 = vpop.f32.mrb[59].mxu1  ;;  %v2581_v36 = vadd.f32 %v2574_v59, %v4114_v38  ;;  %v3400_v59 = vld [vmem:[%s4226_s14 + $0x8] sm:$0xff]   ;;  %3319 = vmatprep.subr.bf16.mxu0 %v3512_v1 }
 0x58e   : > { %v2594_v0 = vsel %vm702_vm1, %v2581_v36, 0.0 }
 0x58f   : > { %2595 = vadd.xlane.f32.xlu0 %v2594_v0  ;;  %3320 = vmatpush3.bf16.msra.mxu0 %v3400_v59 }
 0x5e4   : > { %v2593_v42 = vpop.xlane.xlu1 %2592 }
 0x5e5   : > { %v2599_v63 = vmul.f32 0.03125, %v2593_v42  ;;  %v2590_v3 = vpop.xlane.xlu0 %2589  ;;  %v3035_v42 = vld [vmem:[%s4224_s12] ss:$0 sm:$0xff] }
 0x5e6   : > { %v2598_v48 = vmul.f32 0.03125, %v2590_v3  ;;  %v3036_v3 = vld [vmem:[%s4225_s13] ss:$0 sm:$0xff] }
 0x5e7   : > { %v2602_v40 = vsub.f32 %v2580_v24, %v2599_v63 }
 0x5e8   : > { %v2601_v4 = vsub.f32 %v2579_v58, %v2598_v48 }
 0x5e9   : > { %v2605_v6 = vmul.f32 %v2602_v40, %v2602_v40 }
 0x5ea   : > { %v2604_v7 = vmul.f32 %v2601_v4, %v2601_v4 }
 0x5eb   : > { %v2610_v54 = vsel %vm702_vm1, %v2605_v6, 0.0  ;;  %v3403_v6 = vld [vmem:[%s4228_s16 + $0x10] sm:$0xff]  }
 0x5ec   : > { %2611 = vadd.xlane.f32.xlu1 %v2610_v54  ;;  %v2607_v34 = vsel %vm702_vm1, %v2604_v7, 0.0  ;;  %v3404_v7 = vld [vmem:[%s4228_s16 + $0x18] sm:$0xff]   ;;  %v3037_v54 = vld [vmem:[%s4227_s15] ss:$0 sm:$0xff] }
 0x5ed   : > { %2608 = vadd.xlane.f32.xlu0 %v2607_v34 }
 0x61c   : > { %v2596_v10 = vpop.xlane.xlu0 %2595 }
 0x61d   : > { %v2600_v11 = vmul.f32 0.03125, %v2596_v10 }
 0x61f   : > { %v2603_v12 = vsub.f32 %v2581_v36, %v2600_v11 }
 0x621   : > { %v2606_v13 = vmul.f32 %v2603_v12, %v2603_v12 }
 0x623   : > { %v2613_v15 = vsel %vm702_vm1, %v2606_v13, 0.0 }
 0x624   : > { %2614 = vadd.xlane.f32.xlu0 %v2613_v15 }
 0x679   : > { %v2612_v17 = vpop.xlane.xlu1 %2611 }
 0x67a   : > { %v2609_v46 = vpop.xlane.xlu0 %2608  ;;  %v2617_v50 = vmul.f32 0.03125, %v2612_v17 }
 0x67b   : > { %v2616_v14 = vmul.f32 0.03125, %v2609_v46 }
 0x67c   : > { %v2620_v19 = vadd.f32 1e-05, %v2617_v50 }
 0x67d   : > { %v2619_v22 = vadd.f32 1e-05, %v2616_v14 }
 0x67e   : > { %3477 = vrsqrt.f32 %v2620_v19 }
 0x67f   : > { %3479 = vrsqrt.f32 %v2619_v22 }
 0x688   : > { %v3478_v25 = vpop.eup %3477 }
 0x689   : > { %v3480_v5 = vpop.eup %3479  ;;  %v2626_v29 = vmul.f32 %v3478_v25, %v2602_v40 }
 0x68a   : > { %v2625_v30 = vmul.f32 %v3480_v5, %v2601_v4 }
 0x68b   : > { %v2647_v21 = vmul.f32 %v3030_v20, %v2626_v29 }
 0x68c   : > { %v2646_v33 = vmul.f32 %v3029_v31, %v2625_v30 }
 0x68d   : > { %v2668_v44 = vadd.f32 %v3033_v41, %v2647_v21 }
 0x68e   : > { %v2667_v16 = vadd.f32 %v3032_v60, %v2646_v33  ;;  %v3047_v60 = vld [vmem:[%s4230_s18] ss:$0 sm:$0xff] }
 0x68f   : > { %v2671_v52 = vsel %vm702_vm1, %v2668_v44, 0.0 }
 0x690   : > { %v2670_v18 = vsel %vm702_vm1, %v2667_v16, 0.0  ;;  %v3048_v16 = vld [vmem:[%s4231_s19] ss:$0 sm:$0xff] }
 0x691   : > { %v2672_v53 = vadd.f32 %v2671_v52, %v2670_v18 }
 0x6b1   : > { %v2615_v35 = vpop.xlane.xlu0 %2614 }
 0x6b2   : > { %v2618_v23 = vmul.f32 0.03125, %v2615_v35 }
 0x6b4   : > { %v2621_v27 = vadd.f32 1e-05, %v2618_v23 }
 0x6b6   : > { %3481 = vrsqrt.f32 %v2621_v27 }
 0x6c0   : > { %v3482_v45 = vpop.eup %3481 }
 0x6c1   : > { %v2627_v47 = vmul.f32 %v3482_v45, %v2603_v12 }
 0x6c3   : > { %v2648_v51 = vmul.f32 %v3031_v49, %v2627_v47 }
 0x6c5   : > { %v2669_v55 = vadd.f32 %v3034_v32, %v2648_v51 }
 0x6c7   : > { %v2673_v8 = vsel %vm702_vm1, %v2669_v55, 0.0 }
 0x6c8   : > { %v2674_v57 = vadd.f32 %v2673_v8, %v2672_v53 }
 0x6ca   : > { %v2675_v39 = vmul.f32 0.33333334, %v2674_v57 }
 0x6cc   : > { %v2676_v9 = vadd.f32 %v2675_v39, %v4114_v38  ;;  %v3401_v38 = vld [vmem:[%s4228_s16] sm:$0xff]  }
 0x6cd   : > { %3326 = vmatpush3.bf16.msra.mxu1 %v3401_v38 }
 0x6ce   : > { %v2679_v24 = vsel %vm702_vm1, %v2676_v9, 0.0  ;;  %3327 = vmatprep.subr.bf16.mxu1 %v3512_v1 }
 0x6cf   : > { %2680 = vadd.xlane.f32.xlu1 %v2679_v24 }
 0x6d1   : > { %3328 = vmatpush3.bf16.msra.mxu1 %v3402_v43 }
 0x6d2   : > { %3329 = vmatprep.subr.bf16.mxu1 %v3512_v1 }
 0x6d5   : > { %3330 = vmatpush3.bf16.msra.mxu1 %v3403_v6 }
 0x6d6   : > { %3331 = vmatprep.subr.bf16.mxu1 %v3512_v1  ;;  %v3041_v1 = vld [vmem:[%s4229_s17] ss:$0 sm:$0xff] }
 0x6d9   : > { %3332 = vmatpush3.bf16.msra.mxu1 %v3404_v7 }
 0x75c   : > { %v2681_v26 = vpop.xlane.xlu1 %2680 }
 0x75d   : > { %v2682_v58 = vmul.f32 0.03125, %v2681_v26 }
 0x75f   : > { %v2683_v56 = vsub.f32 %v2676_v9, %v2682_v58 }
 0x761   : > { %v2684_v37 = vmul.f32 %v2683_v56, %v2683_v56 }
 0x763   : > { %v2685_v2 = vsel %vm702_vm1, %v2684_v37, 0.0 }
 0x764   : > { %2686 = vadd.xlane.f32.xlu0 %v2685_v2 }
 0x7f1   : > { %v2687_v62 = vpop.xlane.xlu0 %2686 }
 0x7f2   : > { %v2688_v28 = vmul.f32 0.03125, %v2687_v62 }
 0x7f4   : > { %v2689_v36 = vadd.f32 1e-05, %v2688_v28 }
 0x7f6   : > { %3483 = vrsqrt.f32 %v2689_v36 }
 0x800   : > { %v3484_v0 = vpop.eup %3483 }
 0x801   : > { %v2691_v63 = vmul.f32 %v3484_v0, %v2683_v56 }
 0x803   : > { %v2698_v48 = vmul.f32 %v3035_v42, %v2691_v63 }
 0x805   : > { %v2705_v40 = vadd.f32 %v3036_v3, %v2698_v48 }
 0x807   : > { %v2706_v4 = vpack.c.bf16 %v2705_v40, %v2705_v40 }
 0x809   : > { %3322 = vmatmul.mubr.msk.bf16.vlgmr.msra.gmra.mrb[60].mxu0 %vm702_vm1, %v2706_v4 }
 0x8dc   : > { %v2767_v34 = vpop.f32.mrb[60].mxu0 }
 0x8dd   : > { %v2768_v10 = vadd.f32 %v3037_v54, %v2767_v34  ;;  %v3323_v11 = vpop.f32.mrb[61].mxu0 }
 0x8de   : > { %v2770_v12 = vpop.f32.mrb[62].mxu0 }
 0x8df   : > { %v2773_v13 = vmax.f32 %v2768_v10, 0.0  ;;  %v3324_v15 = vpop.f32.mrb[63].mxu0 }
 0x8e1   : > { %v2774_v17 = vpack.c.bf16 %v2773_v13, %v2773_v13 }
 0x8e3   : > { %3334 = vmatmul.mubr.msk.bf16.vlgmr.msra.gmra.mrb[60].mxu1 %vm2814_vm6, %v2774_v17 }
 0x9b6   : > { %v2852_v46 = vpop.f32.mrb[60].mxu1 }
 0x9b7   : > { %v2853_v50 = vadd.f32 %v3041_v1, %v2852_v46  ;;  %v3335_v14 = vpop.f32.mrb[61].mxu1 }
 0x9b8   : > { %v2855_v19 = vpop.f32.mrb[62].mxu1 }
 0x9b9   : > { %v3336_v22 = vpop.f32.mrb[63].mxu1  ;;  %v2858_v35 = vadd.f32 %v2853_v50, %v2705_v40 }
 0x9bb   : > { %v2861_v23 = vsel %vm702_vm1, %v2858_v35, 0.0 }
 0x9bc   : > { %2862 = vadd.xlane.f32.xlu1 %v2861_v23 }
 0xa49   : > { %v2863_v25 = vpop.xlane.xlu1 %2862 }
 0xa4a   : > { %v2864_v5 = vmul.f32 0.03125, %v2863_v25 }
 0xa4c   : > { %v2865_v27 = vsub.f32 %v2858_v35, %v2864_v5 }
 0xa4e   : > { %v2866_v29 = vmul.f32 %v2865_v27, %v2865_v27 }
 0xa50   : > { %v2867_v30 = vsel %vm702_vm1, %v2866_v29, 0.0 }
 0xa51   : > { %2868 = vadd.xlane.f32.xlu0 %v2867_v30 }
 0xade   : > { %v2869_v31 = vpop.xlane.xlu0 %2868 }
 0xadf   : > { %v2870_v20 = vmul.f32 0.03125, %v2869_v31 }
 0xae1   : > { %v2871_v33 = vadd.f32 1e-05, %v2870_v20 }
 0xae3   : > { %3485 = vrsqrt.f32 %v2871_v33 }
 0xaed   : > { %v3486_v21 = vpop.eup %3485 }
 0xaee   : > { %v2873_v41 = vmul.f32 %v3486_v21, %v2865_v27 }
 0xaf0   : > { %v2880_v44 = vmul.f32 %v3047_v60, %v2873_v41 }
 0xaf2   : > { %v2887_v45 = vadd.f32 %v3048_v16, %v2880_v44 }
 0xaf4   : > { %v2888_v49 = vpack.c.bf16 %v2887_v45, %v2887_v45 }
 0xaf6   : > { %2890 = vst.msk [vmem:[%s658_s27] sm:$0xf] %vm2889_vm7, %v2888_v49 }
 0xaf7 PF: > { %s30_s23 = sadd.s32 1, %s3510_s23   ;;  %s4263_s1 = smov %s3506_s22 }
 0xaf8   : > { %p27_p5 = scmp.ge.s32.totalorder %s30_s23, 4   ;;  %s4264_s22 = smov %s4266_s24 }
 0xafa   :  { %29 = sbr.rel (!%p27_p5) target bundleno = 6 (0x6), region = 134 }

// kernel: multilevel_encoder_forward.9
= control target key start
LH: loop header
LB: loop body
LE: loop exit
PB: predicated region body
PF: predicated region fallthrough
CT: control target
= control target key end

     0   :  { %s3597_s0 = inlined_call_operand.vmem [shape: bf16[2,8,32], index: 0, kind: input, shape index: {}]   ;;  %s3598_s1 = inlined_call_operand.vmem [shape: bf16[2,8,32], index: 1, kind: input, shape index: {}]   ;;  %s3599_s2 = inlined_call_operand.vmem [shape: bf16[2,8,32], index: 2, kind: input, shape index: {}]   ;;  %s3600_s3 = inlined_call_operand.vmem [shape: bf16[32,32], index: 3, kind: input, shape index: {}]   ;;  %s3601_s4 = inlined_call_operand.vmem [shape: f32[1,32], index: 4, kind: input, shape index: {}]   ;;  %s3602_s5 = inlined_call_operand.vmem [shape: bf16[32,32], index: 5, kind: input, shape index: {}]   ;;  %s3603_s6 = inlined_call_operand.vmem [shape: f32[1,32], index: 6, kind: input, shape index: {}]   ;;  %s3604_s7 = inlined_call_operand.vmem [shape: bf16[32,32], index: 7, kind: input, shape index: {}]   ;;  %s3605_s8 = inlined_call_operand.vmem [shape: f32[1,32], index: 8, kind: input, shape index: {}]   ;;  %s3606_s9 = inlined_call_operand.vmem [shape: bf16[32,32], index: 9, kind: input, shape index: {}]   ;;  %s3607_s10 = inlined_call_operand.vmem [shape: f32[1,32], index: 10, kind: input, shape index: {}]   ;;  %s3608_s11 = inlined_call_operand.vmem [shape: bf16[32,96], index: 11, kind: input, shape index: {}]   ;;  %s3609_s12 = inlined_call_operand.vmem [shape: bf16[32,96], index: 12, kind: input, shape index: {}]   ;;  %s3610_s13 = inlined_call_operand.vmem [shape: bf16[32,96], index: 13, kind: input, shape index: {}]   ;;  %s3611_s14 = inlined_call_operand.vmem [shape: f32[1,96], index: 14, kind: input, shape index: {}]   ;;  %s3612_s15 = inlined_call_operand.vmem [shape: bf16[96,32], index: 15, kind: input, shape index: {}]   ;;  %s3613_s16 = inlined_call_operand.vmem [shape: f32[1,32], index: 16, kind: input, shape index: {}]   ;;  %s3614_s17 = inlined_call_operand.hbm [shape: f32[2,8,32], index: 17, kind: output, shape index: {}]  }
   0x1   :  { %3627 = sst [smem:[#allocation10_spill]] %s3597_s0 }
   0x2   :  { %3628 = sst [smem:[#allocation11_spill]] %s3598_s1 }
   0x3   :  { %22 = vsyncpa [#allocation3], 0 }
   0x4   :  { %24 = vsyncpa [#allocation3 + $0x1], 0  ;;  %s3133_s24 = smov 0   ;;  %s3135_s25 = smov 0  }
   0x5   :  { %s3137_s26 = smov 0   ;;  %s3139_s27 = smov 0  }
   0x6 LB: > { %3629 = sst [smem:[#allocation5_spill]] %s3020_s24  ;;  %s3154_s28 = sadd.s32 4294967295, %s3032_s27   ;;  %s3032_s27 = sphi %s3139_s27, %s3645_s27   ;;  %s3028_s26 = sphi %s3137_s26, %s3647_s26   ;;  %s3024_s25 = sphi %s3135_s25, %s3649_s25   ;;  %s3020_s24 = sphi %s3133_s24, %s3648_s24  }
   0x7   : > { %3630 = sst [smem:[#allocation6_spill]] %s3028_s26  ;;  %s2495_s29 = sadd.s32 4294967294, %s3032_s27  }
   0x8   : > { %s3158_s0 = sadd.s32 1, %s3032_s27   ;;  %s409_s30 = sadd.s32 1, %s3028_s26 }
   0x9   : > { %3631 = sst [smem:[#allocation7_spill]] %s3158_s0  ;;  %s406_s18 = ssub.s32 %s3032_s27, %s3158_s0 }
   0xa   : > { %p419_p0 = scmp.ne.s32.totalorder %s3028_s26, %s3024_s25  ;;  %p407_p1 = scmp.eq.s32.totalorder %s406_s18, 0 }
   0xb   : > { %p420_p2 = scmp.eq.s32.totalorder %s3154_s28, 1  ;;  %p425_p3 = scmp.ne.s32.totalorder %s3024_s25, %s3020_s24 }
   0xc   : > { %p426_p4 = scmp.eq.s32.totalorder %s2495_s29, 1  ;;  %p2498_p7 = scmp.ge.s32.totalorder %s3032_s27, 1 }
   0xd   : > { %s3169_s19 = scalar_select %p407_p1, %s3028_s26, %s409_s30  }
   0xe   : > { %p3171_p5 = por %p420_p2, %p419_p0  ;;  %p3175_p6 = por %p426_p4, %p425_p3 }
   0xf   : > { %3632 = sst [smem:[#allocation8_spill]] %s3169_s19  ;;  %p507_p8 = scmp.lt.s32.totalorder %s3032_s27, 3 }
  0x10   : > { %s3634_s20 = scalar_select %p3175_p6, 1, 0 }
  0x11   : > { %p508_p9 = pnand %p2498_p7, %p507_p8 }
  0x12   : > { %3635 = sst [smem:[#allocation9_spill]] %s3634_s20  ;;  %v2892_v0 = vld [vmem:[%s3600_s3] sm:$0xff] (!%p508_p9)   ;;  %v3034_v1 = vmov (!%p508_p9), 0.0   ;;  %v2893_v2 = vld [vmem:[%s3600_s3 + $0x8] sm:$0xff] (!%p508_p9)   ;;  %vm3035_vm0 = vmmov (!%p508_p9), 0   ;;  %p566_p10 = scmp.lt.s32.totalorder (!%p508_p9), %s3154_s28, 1 }
  0x13   : > { %511 = sbr.rel (%p508_p9) target bundleno = 2832 (0xb10), region = 88  ;;  %2645 = vmatprep.subr.bf16.mxu0 (!%p508_p9), %v3034_v1  ;;  %2669 = vmatprep.subr.bf16.mxu1 (!%p508_p9), %v3034_v1  ;;  %vm617_vm1 = vcmask (!%p508_p9), 261120   ;;  %v2894_v3 = vld [vmem:[%s3602_s5] sm:$0xff] (!%p508_p9)   ;;  %s3636_s19 = sld [smem:[#allocation11_spill]] (!%p508_p9)  ;;  %v2895_v5 = vld [vmem:[%s3602_s5 + $0x8] sm:$0xff] (!%p508_p9)   ;;  %vm822_vm2 = vcmask (!%p508_p9), 64512  }
  0x14   : > { %2646 = vmatpush3.bf16.msra.mxu0 (!%p508_p9), %v2892_v0  ;;  %2649 = vmatprep.mubr.msk.bf16.mxu0 (!%p508_p9), %vm3035_vm0, %v3034_v1  ;;  %s3637_s22 = sld [smem:[#allocation10_spill]] (!%p508_p9)  ;;  %v2896_v7 = vld [vmem:[%s3604_s7] sm:$0xff] (!%p508_p9)   ;;  %v2897_v8 = vld [vmem:[%s3604_s7 + $0x8] sm:$0xff] (!%p508_p9)   ;;  %s3625_s21 = smov (!%p508_p9), 120   ;;  %vm1070_vm3 = vcmask (!%p508_p9), 1043456   ;;  %vm1277_vm4 = vcmask (!%p508_p9), 130048  }
  0x15   : > { %2647 = vmatprep.subr.bf16.mxu0 (!%p508_p9), %v3034_v1  ;;  %2671 = vmatprep.mubr.msk.bf16.mxu1 (!%p508_p9), %vm3035_vm0, %v3034_v1  ;;  %v3244_v9 = vld [vmem:[%s3601_s4] ss:$0 sm:$0xff] (!%p508_p9)  ;;  %s3038_s20 = smov (!%p508_p9), 112   ;;  %s3622_s29 = smov (!%p508_p9), 16   ;;  %vm1279_vm5 = vcmask (!%p508_p9), 195584   ;;  %vm2348_vm7 = vcmask (!%p508_p9), 785408  }
  0x16   : > { %v3251_v15 = vld [vmem:[%s3603_s6] ss:$0 sm:$0xff] (!%p508_p9)  ;;  %s3639_s23 = smov (!%p508_p9), 104   ;;  %s563_s0 = sand.u32 (!%p508_p9), 1, %s3024_s25  }
  0x17   : > { %v3267_v24 = vld [vmem:[%s3605_s8] ss:$0 sm:$0xff] (!%p508_p9) }
  0x18   : > { %2648 = vmatpush3.bf16.msra.mxu0 (!%p508_p9), %v2893_v2 }
  0x19   : > { %2653 = vmatprep.subr.bf16.mxu0 (!%p508_p9), %v3034_v1 }
  0x1a   : > { %s567_s30 = scalar_select %p566_p10, %s3154_s28, 1 }
  0x1c   : > { %s3196_s18 = sshll.u32 %s567_s30, 2  ;;  %s3620_s30 = smov 24  }
  0x1d   : > { %s3205_s26 = scalar_lea.vmem %s3636_s19, %s3196_s18  ;;  %s3220_s24 = scalar_lea.vmem %s3637_s22, %s3196_s18 }
  0x1e   : > { %v3209_v4 = vld [vmem:[%s3205_s26] sm:$0xf]  ;;  %s3623_s19 = smov 104   ;;  %s3621_s22 = smov 8  }
  0x1f   : > { %2650 = vmatmul.mubr.msk.bf16.vlgmr.msra.gmra.mrb[0].mxu0 %vm617_vm1, %v3209_v4  ;;  %v579_v6 = vld [vmem:[%s3220_s24] sm:$0xf] }
  0x20   : > { %2654 = vmatpush3.bf16.msra.mxu0 %v2894_v3  ;;  %2657 = vmatprep.mubr.msk.bf16.mxu0 %vm3035_vm0, %v3034_v1 }
  0x21   : > { %2655 = vmatprep.subr.bf16.mxu0 %v3034_v1 }
  0x24   : > { %2656 = vmatpush3.bf16.msra.mxu0 %v2895_v5 }
  0x25   : > { %2661 = vmatprep.subr.bf16.mxu0 %v3034_v1 }
  0x27   : > { %2658 = vmatmul.mubr.msk.bf16.vlgmr.msra.gmra.mrb[4].mxu0 %vm617_vm1, %v579_v6 }
  0x28   : > { %2665 = vmatprep.mubr.msk.bf16.mxu0 %vm3035_vm0, %v3034_v1  ;;  %2662 = vmatpush3.bf16.msra.mxu0 %v2896_v7 }
  0x29   : > { %2663 = vmatprep.subr.bf16.mxu0 %v3034_v1 }
  0x2c   : > { %2664 = vmatpush3.bf16.msra.mxu0 %v2897_v8 }
  0x2d   : > { %2675 = vmatprep.subr.bf16.mxu0 %v3034_v1 }
  0x2f   : > { %2666 = vmatmul.mubr.msk.bf16.vlgmr.msra.gmra.mrb[8].mxu0 %vm617_vm1, %v579_v6 }
  0x30   : > { %2677 = vmatprep.mubr.msk.bf16.mxu0 %vm3035_vm0, %v3034_v1 }
  0xf2   : > { %v655_v10 = vpop.f32.mrb[0].mxu0 }
  0xf3   : > { %v656_v11 = vadd.f32 %v3244_v9, %v655_v10  ;;  %v2651_v12 = vpop.f32.mrb[1].mxu0 }
  0xf4   : > { %v658_v13 = vpop.f32.mrb[2].mxu0 }
  0xf5   : > { %781 = vrot.lane.b32.xlu1 %v656_v11, %s3625_s21  ;;  %v2652_v14 = vpop.f32.mrb[3].mxu0  ;;  %v790_v23 = vpack.c.bf16 %v656_v11, %v656_v11 }
  0xfa   : > { %v716_v16 = vpop.f32.mrb[4].mxu0 }
  0xfb   : > { %v717_v17 = vadd.f32 %v3251_v15, %v716_v16  ;;  %v2659_v18 = vpop.f32.mrb[5].mxu0 }
  0xfc   : > { %v719_v19 = vpop.f32.mrb[6].mxu0 }
  0xfd   : > { %801 = vrot.lane.b32.xlu1 %v717_v17, %s3623_s19  ;;  %795 = vrot.lane.b32.xlu0 %v717_v17, %s3625_s21  ;;  %v2660_v20 = vpop.f32.mrb[7].mxu0  ;;  %v804_v21 = vpack.c.bf16 %v717_v17, %v717_v17 }
  0xff   : > { %v827_v22 = vsel %vm822_vm2, %v804_v21, 0 }
 0x100   : > { %2670 = vmatpush3.bf16.xpose.msra.mxu1 %v827_v22 }
 0x101   : > { %787 = vrot.lane.b32.xlu1 %v656_v11, %s3623_s19  ;;  %798 = vrot.lane.b32.xlu0 %v717_v17, %s3038_s20 }
 0x102   : > { %2681 = vmatprep.subr.bf16.mxu1 %v3034_v1  ;;  %v774_v25 = vpop.f32.mrb[8].mxu0 }
 0x103   : > { %v3270_v26 = vadd.f32 %v3267_v24, %v774_v25  ;;  %v2667_v27 = vpop.f32.mrb[9].mxu0 }
 0x104   : > { %v777_v28 = vpop.f32.mrb[10].mxu0 }
 0x105   : > { %784 = vrot.lane.b32.xlu0 %v656_v11, %s3038_s20  ;;  %v2668_v29 = vpop.f32.mrb[11].mxu0  ;;  %809 = vrot.lane.b32.xlu1 %v3270_v26, %s3625_s21  ;;  %v818_v40 = vpack.c.bf16 %v3270_v26, %v3270_v26  ;;  %s2570_s21 = sshll.u32 %s3154_s28, 7  ;;  %s3042_s28 = smov [#allocation2]  }
 0x107   : > { %2672 = vmatmul.mubr.msk.bf16.vlgmr.msra.gmra.mrb[0].mxu1 %vm822_vm2, %v790_v23  ;;  %v1072_v44 = vsel %vm1070_vm3, %v818_v40, 0 }
 0x108   : > { %2683 = vmatprep.mubr.msk.bf16.mxu1 %vm3035_vm0, %v3034_v1 }
 0x167   : > { %v782_v30 = vpop.permute.xlu1 %781 }
 0x168   : > { %v791_v39 = vpack.c.bf16 %v782_v30, %v782_v30 }
 0x16f   : > { %v796_v31 = vpop.permute.xlu0 %795  ;;  %v802_v34 = vpop.permute.xlu1 %801 }
 0x170   : > { %v805_v32 = vpack.c.bf16 %v796_v31, %v796_v31  ;;  %v807_v37 = vpack.c.bf16 %v802_v34, %v802_v34 }
 0x172   : > { %v873_v33 = vsel %vm822_vm2, %v805_v32, 0  ;;  %v965_v42 = vsel %vm822_vm2, %v807_v37, 0 }
 0x173   : > { %2676 = vmatpush3.bf16.xpose.msra.mxu0 %v873_v33  ;;  %v799_v35 = vpop.permute.xlu0 %798  ;;  %v788_v45 = vpop.permute.xlu1 %787 }
 0x174   : > { %v806_v36 = vpack.c.bf16 %v799_v35, %v799_v35  ;;  %2687 = vmatprep.subr.bf16.mxu0 %v3034_v1  ;;  %v793_v46 = vpack.c.bf16 %v788_v45, %v788_v45 }
 0x176   : > { %v919_v38 = vsel %vm822_vm2, %v806_v36, 0 }
 0x177   : > { %2682 = vmatpush3.bf16.xpose.msra.mxu1 %v919_v38  ;;  %v785_v41 = vpop.permute.xlu0 %784  ;;  %v810_v52 = vpop.permute.xlu1 %809 }
 0x178   : > { %2693 = vmatprep.subr.bf16.mxu1 %v3034_v1  ;;  %v792_v43 = vpack.c.bf16 %v785_v41, %v785_v41  ;;  %v819_v53 = vpack.c.bf16 %v810_v52, %v810_v52 }
 0x17a   : > { %2678 = vmatmul.mubr.msk.bf16.vlgmr.msra.gmra.mrb[12].mxu0 %vm822_vm2, %v791_v39  ;;  %v1118_v54 = vsel %vm1070_vm3, %v819_v53, 0 }
 0x17b   : > { %2688 = vmatpush3.bf16.xpose.msra.mxu0 %v965_v42  ;;  %2689 = vmatprep.mubr.msk.bf16.mxu0 %vm3035_vm0, %v3034_v1 }
 0x17c   : > { %2699 = vmatprep.subr.bf16.mxu0 %v3034_v1 }
 0x17e   : > { %2684 = vmatmul.mubr.msk.bf16.vlgmr.msra.gmra.mrb[4].mxu1 %vm822_vm2, %v792_v43 }
 0x17f   : > { %2694 = vmatpush3.bf16.msra.mxu1 %v1072_v44  ;;  %2695 = vmatprep.mubr.msk.bf16.mxu1 %vm3035_vm0, %v3034_v1 }
 0x180   : > { %2705 = vmatprep.subr.bf16.mxu1 %v3034_v1 }
 0x182   : > { %2690 = vmatmul.mubr.msk.bf16.vlgmr.msra.gmra.mrb[16].mxu0 %vm822_vm2, %v793_v46 }
 0x183   : > { %2701 = vmatprep.mubr.msk.bf16.mxu0 %vm3035_vm0, %v3034_v1  ;;  %2700 = vmatpush3.bf16.msra.mxu0 %v1118_v54 }
 0x184   : > { %2711 = vmatprep.subr.bf16.mxu0 %v3034_v1 }
 0x1da   : > { %v863_v47 = vpop.f32.mrb[0].mxu1 }
 0x1db   : > { %v2673_v48 = vpop.f32.mrb[1].mxu1  ;;  %v1007_v49 = vsel %vm822_vm2, %v863_v47, -inf }
 0x1dc   : > { %1008 = vmax.xlane.f32.xlu0 %v1007_v49  ;;  %v866_v50 = vpop.f32.mrb[2].mxu1 }
 0x1dd   : > { %v2674_v51 = vpop.f32.mrb[3].mxu1 }
 0x24d   : > { %v909_v55 = vpop.f32.mrb[12].mxu0 }
 0x24e   : > { %v2679_v56 = vpop.f32.mrb[13].mxu0  ;;  %v1010_v57 = vsel %vm822_vm2, %v909_v55, -inf }
 0x24f   : > { %1011 = vmax.xlane.f32.xlu1 %v1010_v57  ;;  %v912_v58 = vpop.f32.mrb[14].mxu0 }
 0x250   : > { %v2680_v59 = vpop.f32.mrb[15].mxu0 }
 0x251   : > { %v955_v60 = vpop.f32.mrb[4].mxu1 }
 0x252   : > { %v2685_v61 = vpop.f32.mrb[5].mxu1  ;;  %v1013_v62 = vsel %vm822_vm2, %v955_v60, -inf }
 0x253   : > { %1014 = vmax.xlane.f32.xlu0 %v1013_v62  ;;  %v958_v63 = vpop.f32.mrb[6].mxu1  ;;  %v2898_v62 = vld [vmem:[%s3606_s9] sm:$0xff]  }
 0x254   : > { %v2686_v0 = vpop.f32.mrb[7].mxu1 }
 0x255   : > { %v1001_v2 = vpop.f32.mrb[16].mxu0  ;;  %v2899_v0 = vld [vmem:[%s3606_s9 + $0x8] sm:$0xff]  }
 0x256   : > { %v2691_v3 = vpop.f32.mrb[17].mxu0  ;;  %v1016_v5 = vsel %vm822_vm2, %v1001_v2, -inf }
 0x257   : > { %1017 = vmax.xlane.f32.xlu0 %v1016_v5  ;;  %v1004_v6 = vpop.f32.mrb[18].mxu0 }
 0x258   : > { %v2692_v7 = vpop.f32.mrb[19].mxu0 }
 0x260   : > { %815 = vrot.lane.b32.xlu1 %v3270_v26, %s3623_s19 }
 0x269   : > { %v3301_v8 = vpop.xlane.xlu0 %1008 }
 0x26a   : > { %v1031_v10 = vsub.f32 %v863_v47, %v3301_v8 }
 0x26c   : > { %v1035_v11 = vmul.f32 1.442695, %v1031_v10 }
 0x26d   : > { %812 = vrot.lane.b32.xlu0 %v3270_v26, %s3038_s20 }
 0x26e   : > { %2920 = vpow2.f32 %v1035_v11 }
 0x278   : > { %v2921_v12 = vpop.eup %2920 }
 0x279   : > { %v1063_v13 = vpack.c.bf16 %v2921_v12, %v2921_v12  ;;  %v1047_v35 = vsel %vm822_vm2, %v2921_v12, 0.0  ;;  %v2900_v12 = vld [vmem:[%s3600_s3] sm:$0xff]  }
 0x27b   : > { %2696 = vmatmul.mubr.msk.bf16.vlgmr.msra.gmra.mrb[8].mxu1 %vm822_vm2, %v1063_v13 }
 0x27c   : > { %2707 = vmatprep.mubr.msk.bf16.mxu1 %vm3035_vm0, %v3034_v1 }
 0x2dc   : > { %v1012_v14 = vpop.xlane.xlu1 %1011 }
 0x2dd   : > { %v1032_v16 = vsub.f32 %v909_v55, %v1012_v14  ;;  %v1020_v45 = vsub.f32 -inf, %v1012_v14 }
 0x2df   : > { %v1037_v17 = vmul.f32 1.442695, %v1032_v16  ;;  %v1025_v46 = vmul.f32 1.442695, %v1020_v45 }
 0x2e0   : > { %v1015_v18 = vpop.xlane.xlu0 %1014  ;;  %v816_v25 = vpop.permute.xlu1 %815 }
 0x2e1   : > { %v1033_v19 = vsub.f32 %v955_v60, %v1015_v18  ;;  %2922 = vpow2.f32 %v1037_v17  ;;  %v821_v28 = vpack.c.bf16 %v816_v25, %v816_v25  ;;  %v1021_v47 = vsub.f32 -inf, %v1015_v18  ;;  %v2901_v17 = vld [vmem:[%s3600_s3 + $0x8] sm:$0xff]  }
 0x2e3   : > { %v1039_v20 = vmul.f32 1.442695, %v1033_v19  ;;  %v1210_v33 = vsel %vm1070_vm3, %v821_v28, 0  ;;  %v1027_v48 = vmul.f32 1.442695, %v1021_v47  ;;  %v2903_v47 = vld [vmem:[%s3604_s7] sm:$0xff]  }
 0x2e4   : > { %v1018_v21 = vpop.xlane.xlu0 %1017 }
 0x2e5   : > { %v1034_v22 = vsub.f32 %v1001_v2, %v1018_v21  ;;  %2924 = vpow2.f32 %v1039_v20  ;;  %v1022_v49 = vsub.f32 -inf, %v1018_v21 }
 0x2e7   : > { %v1041_v23 = vmul.f32 1.442695, %v1034_v22  ;;  %v1029_v50 = vmul.f32 1.442695, %v1022_v49  ;;  %v2905_v49 = vld [vmem:[%s3604_s7 + $0x8] sm:$0xff]  }
 0x2e8   : > { %v813_v26 = vpop.permute.xlu0 %812 }
 0x2e9   : > { %v820_v27 = vpack.c.bf16 %v813_v26, %v813_v26  ;;  %2926 = vpow2.f32 %v1041_v23 }
 0x2ea   : > { %2928 = vpow2.f32 %v1025_v46  ;;  %v2902_v46 = vld [vmem:[%s3602_s5] sm:$0xff]  }
 0x2eb   : > { %v1164_v29 = vsel %vm1070_vm3, %v820_v27, 0  ;;  %v2923_v30 = vpop.eup %2922  ;;  %2930 = vpow2.f32 %v1027_v48  ;;  %v2904_v48 = vld [vmem:[%s3602_s5 + $0x8] sm:$0xff]  }
 0x2ec   : > { %2706 = vmatpush3.bf16.msra.mxu1 %v1164_v29  ;;  %v1050_v31 = vsel %vm822_vm2, %v2923_v30, 0.0  ;;  %v1064_v32 = vpack.c.bf16 %v2923_v30, %v2923_v30  ;;  %2932 = vpow2.f32 %v1029_v50  ;;  %v1019_v30 = vsub.f32 -inf, %v3301_v8  ;;  %v3384_v50 = vld [vmem:[%s3607_s10] ss:$0 sm:$0xff] }
 0x2ed   : > { %2717 = vmatprep.subr.bf16.mxu1 %v3034_v1  ;;  %1051 = vadd.xlane.f32.xlu1 %v1050_v31 }
 0x2ee   : > { %2702 = vmatmul.mubr.msk.bf16.vlgmr.msra.gmra.mrb[20].mxu0 %vm822_vm2, %v1064_v32  ;;  %v1023_v31 = vmul.f32 1.442695, %v1019_v30 }
 0x2ef   : > { %v2925_v34 = vpop.eup %2924  ;;  %2712 = vmatpush3.bf16.msra.mxu0 %v1210_v33  ;;  %2713 = vmatprep.mubr.msk.bf16.mxu0 %vm3035_vm0, %v3034_v1 }
 0x2f0   : > { %v1053_v36 = vsel %vm822_vm2, %v2925_v34, 0.0  ;;  %v1065_v37 = vpack.c.bf16 %v2925_v34, %v2925_v34  ;;  %2725 = vmatprep.subr.bf16.mxu0 %v3034_v1 }
 0x2f1   : > { %1048 = vadd.xlane.f32.xlu1 %v1047_v35  ;;  %1054 = vadd.xlane.f32.xlu0 %v1053_v36 }
 0x2f2   : > { %2708 = vmatmul.mubr.msk.bf16.vlgmr.msra.gmra.mrb[12].mxu1 %vm822_vm2, %v1065_v37 }
 0x2f3   : > { %v2927_v38 = vpop.eup %2926  ;;  %2721 = vmatprep.mubr.msk.bf16.mxu1 %vm3035_vm0, %v3034_v1  ;;  %2718 = vmatpush3.bf16.msra.mxu1 %v2898_v62 }
 0x2f4   : > { %v1056_v39 = vsel %vm822_vm2, %v2927_v38, 0.0  ;;  %v1066_v40 = vpack.c.bf16 %v2927_v38, %v2927_v38  ;;  %v2929_v51 = vpop.eup %2928  ;;  %2719 = vmatprep.subr.bf16.mxu1 %v3034_v1 }
 0x2f5   : > { %1057 = vadd.xlane.f32.xlu0 %v1056_v39  ;;  %v1044_v53 = vmul.f32 0.0, %v2929_v51  ;;  %v2931_v54 = vpop.eup %2930 }
 0x2f6   : > { %2714 = vmatmul.mubr.msk.bf16.vlgmr.msra.gmra.mrb[24].mxu0 %vm822_vm2, %v1066_v40  ;;  %v1045_v57 = vmul.f32 0.0, %v2931_v54  ;;  %v2933_v58 = vpop.eup %2932 }
 0x2f7   : > { %2729 = vmatprep.mubr.msk.bf16.mxu0 %vm3035_vm0, %v3034_v1  ;;  %v1046_v61 = vmul.f32 0.0, %v2933_v58  ;;  %2720 = vmatpush3.bf16.msra.mxu1 %v2899_v0 }
 0x2f8   : > { %2733 = vmatprep.subr.bf16.mxu1 %v3034_v1  ;;  %2726 = vmatpush3.bf16.msra.mxu0 %v2900_v12 }
 0x2f9   : > { %2727 = vmatprep.subr.bf16.mxu0 %v3034_v1 }
 0x2fc   : > { %2728 = vmatpush3.bf16.msra.mxu0 %v2901_v17 }
 0x2fd   : > { %2741 = vmatprep.subr.bf16.mxu0 %v3034_v1 }
 0x34e   : > { %v3326_v41 = vpop.f32.mrb[8].mxu1 }
 0x34f   : > { %v2697_v42 = vpop.f32.mrb[9].mxu1 }
 0x350   : > { %v1111_v43 = vpop.f32.mrb[10].mxu1 }
 0x351   : > { %v2698_v44 = vpop.f32.mrb[11].mxu1 }
 0x37a   : > { %v1052_v52 = vpop.xlane.xlu1 %1051 }
 0x37b   : > { %v1060_v56 = vadd.f32 %v1052_v52, %v1044_v53  ;;  %v581_v52 = vunpack.c.l.bf16 %v3209_v4 }
 0x37d   : > { %2934 = vrcp.f32 %v1060_v56 }
 0x37e   : > { %v1055_v55 = vpop.xlane.xlu0 %1054  ;;  %v1049_v33 = vpop.xlane.xlu1 %1048 }
 0x37f   : > { %v1061_v59 = vadd.f32 %v1055_v55, %v1045_v57 }
 0x381   : > { %2936 = vrcp.f32 %v1061_v59 }
 0x382   : > { %v1058_v60 = vpop.xlane.xlu0 %1057 }
 0x383   : > { %v1062_v63 = vadd.f32 %v1058_v60, %v1046_v61 }
 0x385   : > { %2938 = vrcp.f32 %v1062_v63 }
 0x386   : > { %2940 = vpow2.f32 %v1023_v31 }
 0x387   : > { %v2935_v6 = vpop.eup %2934 }
 0x38b   : > { %v2937_v18 = vpop.eup %2936 }
 0x38f   : > { %v2939_v26 = vpop.eup %2938 }
 0x390   : > { %v2941_v32 = vpop.eup %2940 }
 0x391   : > { %v1043_v34 = vmul.f32 0.0, %v2941_v32 }
 0x393   : > { %v1059_v35 = vadd.f32 %v1049_v33, %v1043_v34  ;;  %v1252_v37 = vadd.f32 %v3326_v41, %v1043_v34 }
 0x395   : > { %2942 = vrcp.f32 %v1059_v35 }
 0x39f   : > { %v2943_v36 = vpop.eup %2942 }
 0x3a0   : > { %v1260_v40 = vmul.f32 %v2943_v36, %v1252_v37 }
 0x3c1   : > { %v1154_v2 = vpop.f32.mrb[20].mxu0 }
 0x3c2   : > { %v1253_v3 = vadd.f32 %v1154_v2, %v1044_v53  ;;  %v2703_v5 = vpop.f32.mrb[21].mxu0 }
 0x3c3   : > { %v1157_v7 = vpop.f32.mrb[22].mxu0 }
 0x3c4   : > { %v1261_v10 = vmul.f32 %v2935_v6, %v1253_v3  ;;  %v2704_v11 = vpop.f32.mrb[23].mxu0 }
 0x3c5   : > { %v1200_v13 = vpop.f32.mrb[12].mxu1 }
 0x3c6   : > { %v1254_v14 = vadd.f32 %v1200_v13, %v1045_v57  ;;  %v2709_v16 = vpop.f32.mrb[13].mxu1  ;;  %1265 = vrot.lane.b32.xlu0 %v1261_v10, %s3621_s22  ;;  %s2974_s22 = sshll.u32 %s3042_s28, 4  ;;  %s2975_s22 = int_to_ptr.vmem [resolvable:$false] %s2974_s22 }
 0x3c7   : > { %v1203_v19 = vpop.f32.mrb[14].mxu1 }
 0x3c8   : > { %v1262_v20 = vmul.f32 %v2937_v18, %v1254_v14  ;;  %v2710_v21 = vpop.f32.mrb[15].mxu1 }
 0x3c9   : > { %v1246_v22 = vpop.f32.mrb[24].mxu0 }
 0x3ca   : > { %v1255_v23 = vadd.f32 %v1246_v22, %v1046_v61  ;;  %1269 = vrot.lane.b32.xlu1 %v1262_v20, %s3622_s29  ;;  %v2715_v25 = vpop.f32.mrb[25].mxu0  ;;  %s3638_s29 = smov 120  }
 0x3cb   : > { %v1249_v27 = vpop.f32.mrb[26].mxu0 }
 0x3cc   : > { %v1263_v28 = vmul.f32 %v2939_v26, %v1255_v23  ;;  %v2716_v29 = vpop.f32.mrb[27].mxu0 }
 0x3ce   : > { %1273 = vrot.lane.b32.xlu1 %v1263_v28, %s3620_s30  ;;  %s577_s30 = scalar_lea.vmem %s3599_s2, %s3196_s18  ;;  %s3640_s18 = smov 16  }
 0x3cf   : > { %v3359_v41 = vld [vmem:[%s577_s30] sm:$0xf]  ;;  %s3641_s30 = smov 8  }
 0x3d0   : > { %2730 = vmatmul.mubr.msk.bf16.vlgmr.msra.gmra.mrb[28].mxu0 %vm617_vm1, %v3359_v41 }
 0x3d1   : > { %2742 = vmatpush3.bf16.msra.mxu0 %v2903_v47  ;;  %2745 = vmatprep.mubr.msk.bf16.mxu0 %vm3035_vm0, %v3034_v1 }
 0x3d2   : > { %2743 = vmatprep.subr.bf16.mxu0 %v3034_v1 }
 0x3d5   : > { %2744 = vmatpush3.bf16.msra.mxu0 %v2905_v49 }
 0x3d6   : > { %2755 = vmatprep.subr.bf16.mxu0 %v3034_v1 }
 0x438   : > { %v1266_v38 = vpop.permute.xlu0 %1265 }
 0x439   : > { %v1276_v42 = vsel %vm822_vm2, %v1260_v40, %v1266_v38 }
 0x43c   : > { %v1270_v39 = vpop.permute.xlu1 %1269 }
 0x43d   : > { %v1278_v8 = vsel %vm1277_vm4, %v1276_v42, %v1270_v39 }
 0x440   : > { %v1274_v43 = vpop.permute.xlu1 %1273 }
 0x441   : > { %v1280_v44 = vsel %vm1279_vm5, %v1278_v8, %v1274_v43 }
 0x442   : > { %v1281_v45 = vpack.c.bf16 %v1280_v44, %v1280_v44 }
 0x444   : > { %2722 = vmatmul.mubr.msk.bf16.vlgmr.msra.gmra.mrb[16].mxu1 %vm617_vm1, %v1281_v45 }
 0x445   : > { %2737 = vmatprep.mubr.msk.bf16.mxu1 %vm3035_vm0, %v3034_v1  ;;  %2734 = vmatpush3.bf16.msra.mxu1 %v2902_v46 }
 0x446   : > { %2735 = vmatprep.subr.bf16.mxu1 %v3034_v1 }
 0x449   : > { %2736 = vmatpush3.bf16.msra.mxu1 %v2904_v48 }
 0x44a   : > { %2749 = vmatprep.subr.bf16.mxu1 %v3034_v1 }
 0x4a3   : > { %v1420_v60 = vpop.f32.mrb[28].mxu0 }
 0x4a4   : > { %v2731_v4 = vpop.f32.mrb[29].mxu0  ;;  %v1421_v10 = vadd.f32 %v3244_v9, %v1420_v60 }
 0x4a5   : > { %v1423_v61 = vpop.f32.mrb[30].mxu0 }
 0x4a6   : > { %v2732_v62 = vpop.f32.mrb[31].mxu0 }
 0x517   : > { %v1342_v51 = vpop.f32.mrb[16].mxu1 }
 0x518   : > { %v1343_v53 = vadd.f32 %v3384_v50, %v1342_v51  ;;  %v2723_v54 = vpop.f32.mrb[17].mxu1 }
 0x519   : > { %v1345_v55 = vpop.f32.mrb[18].mxu1 }
 0x51a   : > { %v1348_v56 = vmul.f32 0.2, %v1343_v53  ;;  %v2724_v57 = vpop.f32.mrb[19].mxu1 }
 0x51c   : > { %v1349_v58 = vadd.f32 %v1348_v56, %v581_v52 }
 0x51e   : > { %v1426_v59 = vpack.c.bf16 %v1349_v58, %v1349_v58 }
 0x520   : > { %2738 = vmatmul.mubr.msk.bf16.vlgmr.msra.gmra.mrb[20].mxu1 %vm617_vm1, %v1426_v59  ;;  %2746 = vmatmul.mubr.msk.bf16.vlgmr.msra.gmra.mrb[32].mxu0 %vm617_vm1, %v1426_v59 }
 0x521   : > { %2751 = vmatprep.mubr.msk.bf16.mxu1 %vm3035_vm0, %v3034_v1  ;;  %2757 = vmatprep.mubr.msk.bf16.mxu0 %vm3035_vm0, %v3034_v1 }
 0x5f3   : > { %v1482_v63 = vpop.f32.mrb[20].mxu1  ;;  %v1540_v0 = vpop.f32.mrb[32].mxu0 }
 0x5f4   : > { %v1483_v2 = vadd.f32 %v3251_v15, %v1482_v63  ;;  %v2739_v3 = vpop.f32.mrb[21].mxu1  ;;  %v2747_v5 = vpop.f32.mrb[33].mxu0  ;;  %v1556_v15 = vpack.c.bf16 %v1421_v10, %v1421_v10  ;;  %v3405_v9 = vadd.f32 %v3267_v24, %v1540_v0 }
 0x5f5   : > { %v1485_v6 = vpop.f32.mrb[22].mxu1  ;;  %v1543_v7 = vpop.f32.mrb[34].mxu0 }
 0x5f6   : > { %1564 = vrot.lane.b32.xlu1 %v1483_v2, %s3038_s20  ;;  %1561 = vrot.lane.b32.xlu0 %v1483_v2, %s3638_s29  ;;  %v2740_v11 = vpop.f32.mrb[23].mxu1  ;;  %v2748_v12 = vpop.f32.mrb[35].mxu0  ;;  %v1570_v13 = vpack.c.bf16 %v1483_v2, %v1483_v2  ;;  %v1584_v26 = vpack.c.bf16 %v3405_v9, %v3405_v9 }
 0x5f8   : > { %v1592_v14 = vsel %vm822_vm2, %v1570_v13, 0  ;;  %v1836_v31 = vsel %vm1070_vm3, %v1584_v26, 0 }
 0x5f9   : > { %2750 = vmatpush3.bf16.xpose.msra.mxu1 %v1592_v14 }
 0x5fa   : > { %1567 = vrot.lane.b32.xlu1 %v1483_v2, %s3639_s23  ;;  %1547 = vrot.lane.b32.xlu0 %v1421_v10, %s3638_s29 }
 0x5fb   : > { %2761 = vmatprep.subr.bf16.mxu1 %v3034_v1 }
 0x5fe   : > { %1553 = vrot.lane.b32.xlu1 %v1421_v10, %s3639_s23  ;;  %1550 = vrot.lane.b32.xlu0 %v1421_v10, %s3038_s20 }
 0x600   : > { %2752 = vmatmul.mubr.msk.bf16.vlgmr.msra.gmra.mrb[24].mxu1 %vm822_vm2, %v1556_v15 }
 0x601   : > { %2763 = vmatprep.mubr.msk.bf16.mxu1 %vm3035_vm0, %v3034_v1 }
 0x602   : > { %1575 = vrot.lane.b32.xlu1 %v3405_v9, %s3638_s29 }
 0x668   : > { %v1565_v16 = vpop.permute.xlu1 %1564  ;;  %v1562_v17 = vpop.permute.xlu0 %1561 }
 0x669   : > { %v1572_v18 = vpack.c.bf16 %v1565_v16, %v1565_v16  ;;  %v1571_v19 = vpack.c.bf16 %v1562_v17, %v1562_v17 }
 0x66b   : > { %v1684_v20 = vsel %vm822_vm2, %v1572_v18, 0  ;;  %v1638_v21 = vsel %vm822_vm2, %v1571_v19, 0 }
 0x66c   : > { %v1568_v22 = vpop.permute.xlu1 %1567  ;;  %2756 = vmatpush3.bf16.xpose.msra.mxu0 %v1638_v21  ;;  %v1548_v24 = vpop.permute.xlu0 %1547  ;;  %2762 = vmatpush3.bf16.xpose.msra.mxu1 %v1684_v20 }
 0x66d   : > { %2767 = vmatprep.subr.bf16.mxu0 %v3034_v1  ;;  %2773 = vmatprep.subr.bf16.mxu1 %v3034_v1  ;;  %v1573_v23 = vpack.c.bf16 %v1568_v22, %v1568_v22  ;;  %v1557_v25 = vpack.c.bf16 %v1548_v24, %v1548_v24 }
 0x66f   : > { %v1730_v30 = vsel %vm822_vm2, %v1573_v23, 0 }
 0x670   : > { %v1554_v27 = vpop.permute.xlu1 %1553  ;;  %v1551_v28 = vpop.permute.xlu0 %1550 }
 0x671   : > { %v1558_v29 = vpack.c.bf16 %v1551_v28, %v1551_v28  ;;  %v1559_v34 = vpack.c.bf16 %v1554_v27, %v1554_v27 }
 0x673   : > { %2758 = vmatmul.mubr.msk.bf16.vlgmr.msra.gmra.mrb[36].mxu0 %vm822_vm2, %v1557_v25  ;;  %2764 = vmatmul.mubr.msk.bf16.vlgmr.msra.gmra.mrb[28].mxu1 %vm822_vm2, %v1558_v29 }
 0x674   : > { %2768 = vmatpush3.bf16.xpose.msra.mxu0 %v1730_v30  ;;  %v1576_v32 = vpop.permute.xlu1 %1575  ;;  %2774 = vmatpush3.bf16.msra.mxu1 %v1836_v31 }
 0x675   : > { %2769 = vmatprep.mubr.msk.bf16.mxu0 %vm3035_vm0, %v3034_v1  ;;  %2779 = vmatprep.subr.bf16.mxu0 %v3034_v1  ;;  %v1585_v33 = vpack.c.bf16 %v1576_v32, %v1576_v32 }
 0x676   : > { %2775 = vmatprep.mubr.msk.bf16.mxu1 %vm3035_vm0, %v3034_v1  ;;  %2785 = vmatprep.subr.bf16.mxu1 %v3034_v1 }
 0x677   : > { %v1882_v35 = vsel %vm1070_vm3, %v1585_v33, 0 }
 0x67b   : > { %2770 = vmatmul.mubr.msk.bf16.vlgmr.msra.gmra.mrb[40].mxu0 %vm822_vm2, %v1559_v34 }
 0x67c   : > { %2780 = vmatpush3.bf16.msra.mxu0 %v1882_v35  ;;  %2781 = vmatprep.mubr.msk.bf16.mxu0 %vm3035_vm0, %v3034_v1 }
 0x67d   : > { %2791 = vmatprep.subr.bf16.mxu0 %v3034_v1 }
 0x6d3   : > { %v1628_v36 = vpop.f32.mrb[24].mxu1 }
 0x6d4   : > { %v2753_v37 = vpop.f32.mrb[25].mxu1  ;;  %v1772_v38 = vsel %vm822_vm2, %v1628_v36, -inf }
 0x6d5   : > { %1773 = vmax.xlane.f32.xlu0 %v1772_v38  ;;  %v1631_v39 = vpop.f32.mrb[26].mxu1 }
 0x6d6   : > { %v2754_v40 = vpop.f32.mrb[27].mxu1 }
 0x746   : > { %v1674_v42 = vpop.f32.mrb[36].mxu0  ;;  %v1720_v8 = vpop.f32.mrb[28].mxu1 }
 0x747   : > { %v2759_v43 = vpop.f32.mrb[37].mxu0  ;;  %v2765_v44 = vpop.f32.mrb[29].mxu1  ;;  %v1778_v45 = vsel %vm822_vm2, %v1720_v8, -inf  ;;  %v1775_v46 = vsel %vm822_vm2, %v1674_v42, -inf }
 0x748   : > { %1779 = vmax.xlane.f32.xlu0 %v1778_v45  ;;  %v1723_v47 = vpop.f32.mrb[30].mxu1  ;;  %1776 = vmax.xlane.f32.xlu1 %v1775_v46  ;;  %v1677_v48 = vpop.f32.mrb[38].mxu0  ;;  %v2906_v45 = vld [vmem:[%s3606_s9] sm:$0xff]  }
 0x749   : > { %v2760_v49 = vpop.f32.mrb[39].mxu0  ;;  %v2766_v51 = vpop.f32.mrb[31].mxu1  ;;  %v2907_v46 = vld [vmem:[%s3609_s12] sm:$0xff]  }
 0x74a   : > { %v2909_v51 = vld [vmem:[%s3609_s12 + $0x8] sm:$0xff]  }
 0x74e   : > { %v1766_v52 = vpop.f32.mrb[40].mxu0 }
 0x74f   : > { %v2771_v53 = vpop.f32.mrb[41].mxu0  ;;  %v1781_v54 = vsel %vm822_vm2, %v1766_v52, -inf }
 0x750   : > { %1782 = vmax.xlane.f32.xlu0 %v1781_v54  ;;  %v1769_v55 = vpop.f32.mrb[42].mxu0  ;;  %v2908_v54 = vld [vmem:[%s3606_s9 + $0x8] sm:$0xff]  }
 0x751   : > { %v2772_v56 = vpop.f32.mrb[43].mxu0 }
 0x759   : > { %1581 = vrot.lane.b32.xlu1 %v3405_v9, %s3639_s23 }
 0x762   : > { %v3439_v57 = vpop.xlane.xlu0 %1773 }
 0x763   : > { %v1796_v58 = vsub.f32 %v1628_v36, %v3439_v57 }
 0x765   : > { %v1800_v59 = vmul.f32 1.442695, %v1796_v58 }
 0x766   : > { %1578 = vrot.lane.b32.xlu0 %v3405_v9, %s3038_s20 }
 0x767   : > { %2944 = vpow2.f32 %v1800_v59 }
 0x771   : > { %v2945_v60 = vpop.eup %2944 }
 0x772   : > { %v1828_v4 = vpack.c.bf16 %v2945_v60, %v2945_v60  ;;  %v1812_v21 = vsel %vm822_vm2, %v2945_v60, 0.0 }
 0x774   : > { %2776 = vmatmul.mubr.msk.bf16.vlgmr.msra.gmra.mrb[32].mxu1 %vm822_vm2, %v1828_v4 }
 0x775   : > { %2787 = vmatprep.mubr.msk.bf16.mxu1 %vm3035_vm0, %v3034_v1 }
 0x7d5   : > { %v1780_v61 = vpop.xlane.xlu0 %1779  ;;  %v1777_v62 = vpop.xlane.xlu1 %1776 }
 0x7d6   : > { %v1798_v63 = vsub.f32 %v1720_v8, %v1780_v61  ;;  %v1797_v0 = vsub.f32 %v1674_v42, %v1777_v62  ;;  %v1786_v29 = vsub.f32 -inf, %v1780_v61  ;;  %v1785_v30 = vsub.f32 -inf, %v1777_v62 }
 0x7d8   : > { %v1804_v2 = vmul.f32 1.442695, %v1798_v63  ;;  %v1802_v3 = vmul.f32 1.442695, %v1797_v0  ;;  %v1792_v31 = vmul.f32 1.442695, %v1786_v29 }
 0x7d9   : > { %v1582_v12 = vpop.permute.xlu1 %1581  ;;  %v1790_v32 = vmul.f32 1.442695, %v1785_v30  ;;  %v2911_v0 = vld [vmem:[%s3610_s13] sm:$0xff]  }
 0x7da   : > { %2946 = vpow2.f32 %v1804_v2  ;;  %v1587_v15 = vpack.c.bf16 %v1582_v12, %v1582_v12  ;;  %v2910_v30 = vld [vmem:[%s3608_s11] sm:$0xff]  }
 0x7db   : > { %2948 = vpow2.f32 %v1802_v3 }
 0x7dc   : > { %v1974_v20 = vsel %vm1070_vm3, %v1587_v15, 0 }
 0x7dd   : > { %v1783_v5 = vpop.xlane.xlu0 %1782 }
 0x7de   : > { %v1799_v6 = vsub.f32 %v1766_v52, %v1783_v5  ;;  %v1787_v33 = vsub.f32 -inf, %v1783_v5  ;;  %v2968_v5 = vld [vmem:[%s3205_s26] sm:$0xf]  ;;  %s3642_s26 = smov 24  }
 0x7e0   : > { %v1806_v7 = vmul.f32 1.442695, %v1799_v6  ;;  %v1794_v34 = vmul.f32 1.442695, %v1787_v33  ;;  %v2913_v6 = vld [vmem:[%s3610_s13 + $0x8] sm:$0xff]  }
 0x7e1   : > { %v1579_v10 = vpop.permute.xlu0 %1578  ;;  %v2969_v33 = vld [vmem:[%s3220_s24] sm:$0xf] }
 0x7e2   : > { %v1586_v11 = vpack.c.bf16 %v1579_v10, %v1579_v10  ;;  %2950 = vpow2.f32 %v1806_v7 }
 0x7e3   : > { %2952 = vpow2.f32 %v1792_v31 }
 0x7e4   : > { %v1928_v13 = vsel %vm1070_vm3, %v1586_v11, 0  ;;  %v2947_v14 = vpop.eup %2946  ;;  %2954 = vpow2.f32 %v1790_v32  ;;  %v2914_v32 = vld [vmem:[%s3612_s15] sm:$0xff]  }
 0x7e5   : > { %2786 = vmatpush3.bf16.msra.mxu1 %v1928_v13  ;;  %v1818_v9 = vsel %vm822_vm2, %v2947_v14, 0.0  ;;  %v1830_v16 = vpack.c.bf16 %v2947_v14, %v2947_v14  ;;  %v2949_v17 = vpop.eup %2948  ;;  %2956 = vpow2.f32 %v1794_v34 }
 0x7e6   : > { %2797 = vmatprep.subr.bf16.mxu1 %v3034_v1  ;;  %1819 = vadd.xlane.f32.xlu0 %v1818_v9  ;;  %v1815_v18 = vsel %vm822_vm2, %v2949_v17, 0.0  ;;  %v1829_v19 = vpack.c.bf16 %v2949_v17, %v2949_v17  ;;  %v1784_v9 = vsub.f32 -inf, %v3439_v57 }
 0x7e7   : > { %1816 = vadd.xlane.f32.xlu1 %v1815_v18 }
 0x7e8   : > { %2788 = vmatmul.mubr.msk.bf16.vlgmr.msra.gmra.mrb[36].mxu1 %vm822_vm2, %v1830_v16  ;;  %2782 = vmatmul.mubr.msk.bf16.vlgmr.msra.gmra.mrb[44].mxu0 %vm822_vm2, %v1829_v19  ;;  %v1788_v16 = vmul.f32 1.442695, %v1784_v9 }
 0x7e9   : > { %2801 = vmatprep.mubr.msk.bf16.mxu1 %vm3035_vm0, %v3034_v1  ;;  %2792 = vmatpush3.bf16.msra.mxu0 %v1974_v20 }
 0x7ea   : > { %2793 = vmatprep.mubr.msk.bf16.mxu0 %vm3035_vm0, %v3034_v1  ;;  %2805 = vmatprep.subr.bf16.mxu0 %v3034_v1 }
 0x7eb   : > { %1813 = vadd.xlane.f32.xlu1 %v1812_v21  ;;  %2798 = vmatpush3.bf16.msra.mxu1 %v2906_v45  ;;  %v2918_v45 = vld [vmem:[%s3612_s15 + $0x20] sm:$0xff]  }
 0x7ec   : > { %v2951_v22 = vpop.eup %2950  ;;  %2799 = vmatprep.subr.bf16.mxu1 %v3034_v1 }
 0x7ed   : > { %v1821_v24 = vsel %vm822_vm2, %v2951_v22, 0.0  ;;  %v1831_v23 = vpack.c.bf16 %v2951_v22, %v2951_v22  ;;  %v2953_v35 = vpop.eup %2952 }
 0x7ee   : > { %1822 = vadd.xlane.f32.xlu0 %v1821_v24  ;;  %v2955_v36 = vpop.eup %2954  ;;  %v1810_v38 = vmul.f32 0.0, %v2953_v35  ;;  %v2915_v35 = vld [vmem:[%s3612_s15 + $0x8] sm:$0xff]  }
 0x7ef   : > { %v1809_v40 = vmul.f32 0.0, %v2955_v36  ;;  %v2957_v43 = vpop.eup %2956  ;;  %2800 = vmatpush3.bf16.msra.mxu1 %v2908_v54 }
 0x7f0   : > { %2794 = vmatmul.mubr.msk.bf16.vlgmr.msra.gmra.mrb[48].mxu0 %vm822_vm2, %v1831_v23  ;;  %v1811_v47 = vmul.f32 0.0, %v2957_v43  ;;  %2813 = vmatprep.subr.bf16.mxu1 %v3034_v1 }
 0x7f1   : > { %2809 = vmatprep.mubr.msk.bf16.mxu0 %vm3035_vm0, %v3034_v1  ;;  %2806 = vmatpush3.bf16.msra.mxu0 %v2907_v46  ;;  %v2919_v46 = vld [vmem:[%s3612_s15 + $0x28] sm:$0xff]  }
 0x7f2   : > { %2807 = vmatprep.subr.bf16.mxu0 %v3034_v1 }
 0x7f5   : > { %2808 = vmatpush3.bf16.msra.mxu0 %v2909_v51 }
 0x7f6   : > { %2821 = vmatprep.subr.bf16.mxu0 %v3034_v1 }
 0x7f8   : > { %2810 = vmatmul.mubr.msk.bf16.vlgmr.msra.gmra.mrb[52].mxu0 %vm617_vm1, %v2968_v5  ;;  %v583_v5 = vunpack.c.l.bf16 %v3359_v41 }
 0x7f9   : > { %2822 = vmatpush3.bf16.msra.mxu0 %v2911_v0  ;;  %2825 = vmatprep.mubr.msk.bf16.mxu0 %vm3035_vm0, %v3034_v1 }
 0x7fa   : > { %2823 = vmatprep.subr.bf16.mxu0 %v3034_v1 }
 0x7fd   : > { %2824 = vmatpush3.bf16.msra.mxu0 %v2913_v6 }
 0x800   : > { %2826 = vmatmul.mubr.msk.bf16.vlgmr.msra.gmra.mrb[56].mxu0 %vm617_vm1, %v3359_v41 }
 0x847   : > { %v3464_v25 = vpop.f32.mrb[32].mxu1 }
 0x848   : > { %v2777_v26 = vpop.f32.mrb[33].mxu1 }
 0x849   : > { %v1875_v27 = vpop.f32.mrb[34].mxu1 }
 0x84a   : > { %v2778_v28 = vpop.f32.mrb[35].mxu1 }
 0x873   : > { %v1820_v37 = vpop.xlane.xlu0 %1819 }
 0x874   : > { %v1817_v39 = vpop.xlane.xlu1 %1816  ;;  %v1826_v42 = vadd.f32 %v1820_v37, %v1810_v38 }
 0x875   : > { %v1825_v8 = vadd.f32 %v1817_v39, %v1809_v40  ;;  %v2916_v39 = vld [vmem:[%s3612_s15 + $0x10] sm:$0xff]  }
 0x876   : > { %2958 = vrcp.f32 %v1826_v42  ;;  %v2917_v42 = vld [vmem:[%s3612_s15 + $0x18] sm:$0xff]  }
 0x877   : > { %2960 = vrcp.f32 %v1825_v8 }
 0x878   : > { %v1814_v18 = vpop.xlane.xlu1 %1813 }
 0x87b   : > { %v1823_v44 = vpop.xlane.xlu0 %1822 }
 0x87c   : > { %v1827_v48 = vadd.f32 %v1823_v44, %v1811_v47 }
 0x87e   : > { %2962 = vrcp.f32 %v1827_v48 }
 0x87f   : > { %2964 = vpow2.f32 %v1788_v16 }
 0x880   : > { %v2959_v55 = vpop.eup %2958 }
 0x881   : > { %v2961_v62 = vpop.eup %2960 }
 0x888   : > { %v2963_v12 = vpop.eup %2962 }
 0x889   : > { %v2965_v17 = vpop.eup %2964 }
 0x88a   : > { %v1808_v19 = vmul.f32 0.0, %v2965_v17 }
 0x88c   : > { %v1824_v20 = vadd.f32 %v1814_v18, %v1808_v19  ;;  %v2016_v22 = vadd.f32 %v3464_v25, %v1808_v19  ;;  %v2912_v25 = vld [vmem:[%s3608_s11 + $0x8] sm:$0xff]  }
 0x88e   : > { %2966 = vrcp.f32 %v1824_v20 }
 0x898   : > { %v2967_v21 = vpop.eup %2966 }
 0x899   : > { %v2024_v23 = vmul.f32 %v2967_v21, %v2016_v22 }
 0x8bb   : > { %v1964_v49 = vpop.f32.mrb[36].mxu1  ;;  %v1918_v56 = vpop.f32.mrb[44].mxu0 }
 0x8bc   : > { %v2018_v52 = vadd.f32 %v1964_v49, %v1810_v38  ;;  %v2789_v53 = vpop.f32.mrb[37].mxu1  ;;  %v2017_v59 = vadd.f32 %v1918_v56, %v1809_v40  ;;  %v2783_v60 = vpop.f32.mrb[45].mxu0 }
 0x8bd   : > { %v1967_v58 = vpop.f32.mrb[38].mxu1  ;;  %v1921_v63 = vpop.f32.mrb[46].mxu0 }
 0x8be   : > { %v2026_v4 = vmul.f32 %v2959_v55, %v2018_v52  ;;  %v2790_v61 = vpop.f32.mrb[39].mxu1  ;;  %v2025_v2 = vmul.f32 %v2961_v62, %v2017_v59  ;;  %v2784_v3 = vpop.f32.mrb[47].mxu0  ;;  %v2560_v55 = vld [vmem:[%s3611_s14] ss:$0 sm:$0xff] }
 0x8bf   : > { %v2561_v63 = vld [vmem:[%s3613_s16] ss:$0 sm:$0xff] }
 0x8c0   : > { %2033 = vrot.lane.b32.xlu1 %v2026_v4, %s3640_s18  ;;  %2029 = vrot.lane.b32.xlu0 %v2025_v2, %s3641_s30  ;;  %s3554_s18 = scalar_lea.hbm %s3614_s17, %s2570_s21  ;;  %s2399_s30 = scalar_lea.sflag [#allocation3], %s563_s0 }
 0x8c3   : > { %v2010_v7 = vpop.f32.mrb[48].mxu0 }
 0x8c4   : > { %v2019_v10 = vadd.f32 %v2010_v7, %v1811_v47  ;;  %v2795_v11 = vpop.f32.mrb[49].mxu0 }
 0x8c5   : > { %v2013_v13 = vpop.f32.mrb[50].mxu0 }
 0x8c6   : > { %v2027_v14 = vmul.f32 %v2963_v12, %v2019_v10  ;;  %v2796_v15 = vpop.f32.mrb[51].mxu0 }
 0x8c8   : > { %2037 = vrot.lane.b32.xlu1 %v2027_v14, %s3642_s26  ;;  %s2499_s26 = sshll.u32 %s563_s0, 3 }
 0x8c9   : > { %s565_s19 = scalar_lea.vmem [#allocation2], %s2499_s26  ;;  %s2976_s26 = scalar_lea.vmem %s2975_s22, 256 }
 0x8ca   : > { %s2412_s29 = sshll.u32 %s565_s19, 4  ;;  %s3556_s29 = int_to_ptr.vmem [resolvable:$true] %s2412_s29 }
 0x8cb   : > { %v2166_v34 = vpop.f32.mrb[52].mxu0  ;;  %s2970_s24 = scalar_lea.vmem %s3556_s29, 128  ;;  %p2977_p0 = scmp.lt.s32.totalorder %s3556_s29, %s2975_s22 }
 0x8cc   : > { %v2811_v36 = vpop.f32.mrb[53].mxu0  ;;  %p2971_p11 = scmp.ne.s32.totalorder %s3556_s29, %s2970_s24  ;;  %p2978_p1 = scmp.lt.s32.totalorder %s2976_s26, %s2970_s24 }
 0x8cd   : > { %v2169_v37 = vpop.f32.mrb[54].mxu0 }
 0x8ce   : > { %v2812_v38 = vpop.f32.mrb[55].mxu0  ;;  %p2972_p12 = pnand %p2971_p11, %p3171_p5  ;;  %p2979_p2 = por %p2978_p1, %p2977_p0 }
 0x8d0   : > { %p2973_p13 = pneg %p2972_p12 }
 0x8d2   : > { %p2980_p3 = pnand %p2979_p2, %p2973_p13 }
 0x8d3   : > { %v2274_v40 = vpop.f32.mrb[56].mxu0 }
 0x8d4   : > { %v2827_v8 = vpop.f32.mrb[57].mxu0 }
 0x8d5   : > { %v2277_v43 = vpop.f32.mrb[58].mxu0 }
 0x8d6   : > { %v2828_v44 = vpop.f32.mrb[59].mxu0 }
 0x932   : > { %v2030_v24 = vpop.permute.xlu0 %2029  ;;  %v2034_v26 = vpop.permute.xlu1 %2033 }
 0x933   : > { %v2040_v27 = vsel %vm822_vm2, %v2024_v23, %v2030_v24 }
 0x934   : > { %v2041_v28 = vsel %vm1277_vm4, %v2040_v27, %v2034_v26 }
 0x93a   : > { %v2038_v29 = vpop.permute.xlu1 %2037 }
 0x93b   : > { %v2042_v57 = vsel %vm1279_vm5, %v2041_v28, %v2038_v29 }
 0x93c   : > { %v2043_v31 = vpack.c.bf16 %v2042_v57, %v2042_v57 }
 0x93e   : > { %2802 = vmatmul.mubr.msk.bf16.vlgmr.msra.gmra.mrb[40].mxu1 %vm617_vm1, %v2043_v31 }
 0x93f   : > { %2814 = vmatpush3.bf16.msra.mxu1 %v2910_v30  ;;  %2817 = vmatprep.mubr.msk.bf16.mxu1 %vm3035_vm0, %v3034_v1 }
 0x940   : > { %2815 = vmatprep.subr.bf16.mxu1 %v3034_v1 }
 0x943   : > { %2816 = vmatpush3.bf16.msra.mxu1 %v2912_v25 }
 0x944   : > { %2829 = vmatprep.subr.bf16.mxu1 %v3034_v1 }
 0x946   : > { %2818 = vmatmul.mubr.msk.bf16.vlgmr.msra.gmra.mrb[44].mxu1 %vm617_vm1, %v2969_v33 }
 0x947   : > { %2830 = vmatpush3.bf16.msra.mxu1 %v2914_v32  ;;  %2841 = vmatprep.mubr.msk.bf16.mxu1 %vm3035_vm0, %v3034_v1 }
 0x948   : > { %2831 = vmatprep.subr.bf16.mxu1 %v3034_v1 }
 0x94b   : > { %2832 = vmatpush3.bf16.msra.mxu1 %v2915_v35 }
 0x94c   : > { %2833 = vmatprep.subr.bf16.mxu1 %v3034_v1 }
 0x94f   : > { %2834 = vmatpush3.bf16.msra.mxu1 %v2916_v39 }
 0x950   : > { %2835 = vmatprep.subr.bf16.mxu1 %v3034_v1 }
 0x953   : > { %2836 = vmatpush3.bf16.msra.mxu1 %v2917_v42 }
 0x954   : > { %2837 = vmatprep.subr.bf16.mxu1 %v3034_v1 }
 0x957   : > { %2838 = vmatpush3.bf16.msra.mxu1 %v2918_v45 }
 0x958   : > { %2839 = vmatprep.subr.bf16.mxu1 %v3034_v1 }
 0x95b   : > { %2840 = vmatpush3.bf16.msra.mxu1 %v2919_v46 }
 0xa11   : > { %v2104_v47 = vpop.f32.mrb[40].mxu1 }
 0xa12   : > { %v2803_v48 = vpop.f32.mrb[41].mxu1  ;;  %v2105_v62 = vadd.f32 %v3384_v50, %v2104_v47 }
 0xa13   : > { %v2107_v49 = vpop.f32.mrb[42].mxu1 }
 0xa14   : > { %v2804_v51 = vpop.f32.mrb[43].mxu1  ;;  %v2110_v6 = vmul.f32 0.2, %v2105_v62 }
 0xa16   : > { %v2111_v50 = vadd.f32 %v2110_v6, %v583_v5 }
 0xa19   : > { %v2218_v52 = vpop.f32.mrb[44].mxu1 }
 0xa1a   : > { %v2219_v53 = vadd.f32 %v2218_v52, %v2166_v34  ;;  %v2819_v54 = vpop.f32.mrb[45].mxu1 }
 0xa1b   : > { %v2221_v56 = vpop.f32.mrb[46].mxu1 }
 0xa1c   : > { %v2280_v58 = vadd.f32 %v2274_v40, %v2219_v53  ;;  %v2820_v1 = vpop.f32.mrb[47].mxu1 }
 0xa1e   : > { %v2288_v59 = vadd.f32 %v2560_v55, %v2280_v58 }
 0xa20   : > { %vm2289_vm6 = vcmp.ge.f32.partialorder %v2288_v59, 0.0  ;;  %v2290_v60 = vmul.f32 0.01, %v2288_v59 }
 0xa22   : > { %v2291_v4 = vsel %vm2289_vm6, %v2288_v59, %v2290_v60 }
 0xa23   : > { %v2292_v61 = vpack.c.bf16 %v2291_v4, %v2291_v4 }
 0xa25   : > { %2842 = vmatmul.mubr.msk.bf16.vlgmr.msra.gmra.mrb[48].mxu1 %vm2348_vm7, %v2292_v61 }
 0xaf8   : > { %v2386_v0 = vpop.f32.mrb[48].mxu1 }
 0xaf9   : > { %v2387_v2 = vadd.f32 %v2561_v63, %v2386_v0  ;;  %v2843_v3 = vpop.f32.mrb[49].mxu1 }
 0xafa   : > { %v2389_v7 = vpop.f32.mrb[50].mxu1 }
 0xafb   : > { %vm2392_vm8 = vcmp.ge.f32.partialorder %v2387_v2, 0.0  ;;  %v2393_v10 = vmul.f32 0.01, %v2387_v2  ;;  %v2844_v11 = vpop.f32.mrb[51].mxu1 }
 0xafd   : > { %v2394_v12 = vsel %vm2392_vm8, %v2387_v2, %v2393_v10 }
 0xafe   : > { %v2395_v13 = vmul.f32 0.2, %v2394_v12 }
 0xb00   : > { %v2396_v14 = vadd.f32 %v2395_v13, %v2111_v50 }
 0xb02   : > { %2397 = vst.msk [vmem:[%s565_s19] sm:$0xff] %vm617_vm1, %v2396_v14 }
 0xb03   : > { %2983 = shalt.err (!%p2980_p3)
}
 0xb04   : > { %s2984_s0 = scalar_lea.hbm %s3554_s18, 128  ;;  %s2988_s23 = scalar_lea.hbm %s3614_s17, 256 }
 0xb05   : > { %p2985_p4 = scmp.ne.s32.totalorder %s3554_s18, %s2984_s0  ;;  %p2989_p9 = scmp.lt.u32.totalorder %s3554_s18, %s3614_s17 }
 0xb06   : > { %p2990_p10 = scmp.lt.u32.totalorder %s2988_s23, %s2984_s0  ;;  %p2992_p12 = scmp.lt.u32.totalorder %s2984_s0, %s3554_s18 }
 0xb07   : > { %p2986_p7 = pnand %p2985_p4, %p3171_p5 }
 0xb08   : > { %p2991_p11 = por %p2990_p10, %p2989_p9 }
 0xb09   : > { %p2987_p8 = pneg %p2986_p7 }
 0xb0a   : > { %p2993_p13 = por %p2992_p12, %p2991_p11 }
 0xb0c   : > { %p2994_p0 = pnand %p2993_p13, %p2987_p8 }
 0xb0e   : > { %2997 = shalt.err (!%p2994_p0)
}
 0xb0f   : > { %2845 = dma.vmem_to_hbm [thread:$0]  (%p3171_p5), %s3556_s29, 128, %s3554_s18, %s2399_s30  }
 0xb10 PF: > { %s3643_s24 = sld [smem:[#allocation5_spill]]  ;;  %p2851_p1 = scmp.ge.s32.totalorder %s3032_s27, 2 }
 0xb12   : > { %p2848_p2 = pnand %p2851_p1, %p3175_p6 }
 0xb16   : > { %s2424_s26 = sand.u32 1, %s3643_s24  }
 0xb17   : > { %s2425_s21 = scalar_lea.sflag [#allocation3], %s2424_s26 }
 0xb18   : > { %3015 = dma.done.wait (!%p2848_p2), %s2425_s21, 128  }
 0xb19   : > { %3017 = vsyncadd (!%p2848_p2), %s2425_s21, 4294967168  ;;  %s3645_s27 = sld [smem:[#allocation7_spill]]  ;;  %s3646_s0 = sld [smem:[#allocation6_spill]] }
 0xb1a   : > { %s3647_s26 = sld [smem:[#allocation8_spill]]  ;;  %s3648_s24 = smov %s3024_s25 }
 0xb1f   : > { %p27_p3 = scmp.ge.s32.totalorder %s3645_s27, 4   ;;  %s3649_s25 = smov %s3646_s0 }
 0xb21   :  { %29 = sbr.rel (!%p27_p3) target bundleno = 6 (0x6), region = 129 }
 0xb28   :  { %2430 = vsyncpa [#allocation3], 1 }
 0xb29   :  { %2432 = vsyncpa [#allocation3 + $0x1], 1 }

</bundles_post_ra>
